<compile_context>
chip_gen: v7x
topology: tpu7x:2x2x1
jax: 0.10.0
libtpu: 0.0.40
codegen_flags: <defaults>
</compile_context>

<pallas_src>
import jax
import jax.numpy as jnp
from jax import lax
from jax.experimental import pallas as pl
from jax.experimental.pallas import tpu as pltpu

_LANES = 128
_SUBLANES = 8
_BLOCK_ROWS = 8192                 # 8192 x 128 f32 = 4 MiB/tile, 8 MiB double-buffered
_PALLAS_MIN_ELEMS = 256 * 1024     # below this, fused XLA square+reduce wins


def _sublane_multiple(dtype):
    """Rows of a (rows, 128) view must be a multiple of this for the dtype."""
    itemsize = jnp.dtype(dtype).itemsize
    return _SUBLANES * max(1, 4 // itemsize)   # f32 -> 8, bf16 -> 16, int8/fp8 -> 32


def _make_ssq_kernel(num_blocks, block_rows, last_valid_rows):
    """Kernel: acc(8,128) += sublane-group fold of x*x over the current tile.

    `num_blocks`, `block_rows`, `last_valid_rows` are static Python ints; when
    the last tile is partial (grid does not divide the rows) the out-of-bounds
    rows are masked in-kernel instead of being zero-padded in HBM.
    """
    need_mask = last_valid_rows != block_rows

    def kernel(x_ref, acc_ref):
        i = pl.program_id(0)

        @pl.when(i == 0)
        def _():
            acc_ref[...] = jnp.zeros_like(acc_ref)

        x = x_ref[...].astype(jnp.float32)       # per-tile upcast in VMEM
        if need_mask:
            row_ids = lax.broadcasted_iota(jnp.int32, x.shape, 0)
            valid = jnp.where(i == num_blocks - 1, last_valid_rows, block_rows)
            x = jnp.where(row_ids < valid, x, 0.0)
        sq = x * x
        # (block_rows, 128) -> (block_rows//8, 8, 128) -> fold groups -> (8, 128)
        acc_ref[...] += jnp.sum(sq.reshape(-1, _SUBLANES, _LANES), axis=0)

    return kernel


def _pallas_sum_of_squares_2d(x2d):
    """Sum of squares of a lane-aligned (rows, 128) array via one pallas_call."""
    rows = x2d.shape[0]
    block_rows = min(_BLOCK_ROWS, rows)
    num_blocks = -(-rows // block_rows)
    last_valid_rows = rows - (num_blocks - 1) * block_rows
    n = x2d.size

    partial = pl.pallas_call(
        _make_ssq_kernel(num_blocks, block_rows, last_valid_rows),
        out_shape=jax.ShapeDtypeStruct((_SUBLANES, _LANES), jnp.float32),
        grid_spec=pltpu.PrefetchScalarGridSpec(
            num_scalar_prefetch=0,
            grid=(num_blocks,),
            in_specs=[pl.BlockSpec((block_rows, _LANES), lambda i: (i, 0))],
            out_specs=pl.BlockSpec((_SUBLANES, _LANES), lambda i: (0, 0)),
        ),
        compiler_params=pltpu.CompilerParams(
            dimension_semantics=("arbitrary",),
        ),
        cost_estimate=pl.CostEstimate(
            flops=2 * n,
            transcendentals=0,
            bytes_accessed=n * x2d.dtype.itemsize + _SUBLANES * _LANES * 4,
        ),
    )(x2d)
    # Final tiny cross-lane reduction (8*128 elements) stays in plain JAX.
    return jnp.sum(partial)


def _pallas_weight_ssq(w):
    """Sum of squares of one (arbitrarily shaped) weight, streamed in place."""
    flat = w.reshape(-1)                       # metadata-only under jit
    n = flat.shape[0]
    min_chunk = _sublane_multiple(w.dtype) * _LANES
    padded = -(-n // min_chunk) * min_chunk
    if padded != n:
        # At most one mini-tile of zeros (< 4 KiB) -- negligible vs. the weight.
        flat = jnp.pad(flat, (0, padded - n))
    x2d = flat.reshape(padded // _LANES, _LANES)
    return _pallas_sum_of_squares_2d(x2d)


_pallas_weight_ssq_jit = jax.jit(_pallas_weight_ssq)


def _sum_of_squares(w):
    """Dispatcher: Pallas streaming reduction for large weights, XLA for tiny."""
    if w.size >= _PALLAS_MIN_ELEMS:
        return _pallas_weight_ssq_jit(w)
    # Small-problem fast path: XLA fuses square+reduce into one pass.
    return jnp.sum(w.astype(jnp.float32) ** 2)


def _named_parameters(model):
    if hasattr(model, "named_parameters"):
        return list(model.named_parameters())
    if hasattr(model, "items"):
        return list(model.items())
    return list(model)


def loss_with_l2_regularization(criterion, model, weight_decay=1e-5, flag=False):
    """JAX/Pallas equivalent of the PyTorch module's forward.

    criterion: scalar loss value (already computed elsewhere)
    model:     dict {name: array} or object exposing .named_parameters()
    """
    regularizations = []
    for k, v in _named_parameters(model):
        if "conv" in k and "weight" in k:
            penality = weight_decay * (_sum_of_squares(v) / 2.0)
            regularizations.append(penality)
            if flag:
                # TODO(synk): like the PyTorch print, this only shows values when
                # called eagerly; under jax.jit it would print tracers.
                print("{} : {}".format(k, penality))
    if not regularizations:
        return criterion + jnp.float32(0.0)
    loss = criterion + sum(regularizations)
    return loss


if __name__ == "__main__":
    key = jax.random.PRNGKey(0)
    k1, k2, k3, k4, k5, kc, kb = jax.random.split(key, 7)

    # Synthetic "model" parameters (DICNN-like conv stack, PyTorch OIHW layout;
    # L2 is layout-independent).  The tiny conv weights take the XLA fast path;
    # "conv_big.weight" (1.31M elems) exercises the Pallas streaming path with a
    # multi-tile grid and a masked partial last tile.
    named_params = {
        "conv1.weight":   jax.random.normal(k1, (8, 5, 3, 3), dtype=jnp.float32) * 0.1,
        "conv1.bias":     jnp.zeros((8,), dtype=jnp.float32),
        "conv2.weight":   jax.random.normal(k2, (8, 8, 3, 3), dtype=jnp.float32) * 0.1,
        "conv2.bias":     jnp.zeros((8,), dtype=jnp.float32),
        "conv3.weight":   jax.random.normal(k3, (4, 8, 3, 3), dtype=jnp.float32) * 0.1,
        "conv3.bias":     jnp.zeros((4,), dtype=jnp.float32),
        # non-conv parameter: must be ignored by the regularizer
        "fc.weight":      jax.random.normal(k4, (16, 16), dtype=jnp.float32),
        "conv_big.weight": jax.random.normal(k5, (160, 128, 8, 8), dtype=jnp.float32) * 0.05,
    }
    criterion = jnp.abs(jax.random.normal(kc, (), dtype=jnp.float32))  # scalar loss

    weight_decay = 1e-5
    loss = loss_with_l2_regularization(criterion, named_params,
                                       weight_decay=weight_decay, flag=False)
    loss = jax.block_until_ready(loss)

    # Pure-JAX reference check.
    ref = criterion
    for k, v in named_params.items():
        if "conv" in k and "weight" in k:
            ref = ref + weight_decay * (jnp.sum(v.astype(jnp.float32) ** 2) / 2.0)
    assert jnp.allclose(loss, ref, rtol=1e-5, atol=1e-5), (loss, ref)

    # Standalone check of the Pallas reducer on an uneven size (pad + masked tail).
    big = jax.random.normal(kb, (2_500_000,), dtype=jnp.float32) * 0.1
    got = jax.block_until_ready(_pallas_weight_ssq_jit(big))
    want = jnp.sum(big.astype(jnp.float32) ** 2)
    assert jnp.allclose(got, want, rtol=1e-4, atol=1e-4), (got, want)

    print("KERNEL_OK")
</pallas_src>

<mosaic_0001>
module attributes {stable_mosaic.version = 11 : i64} {
  func.func @kernel(%arg0: i32, %arg1: memref<8192x128xf32, #tpu.memory_space<vmem>>, %arg2: memref<8x128xf32, #tpu.memory_space<vmem>>) attributes {dimension_semantics = [#tpu.dimension_semantics<arbitrary>], iteration_bounds = array<i64: 2>, scalar_prefetch = 0 : i64, scratch_operands = 0 : i64, tpu.core_type = #tpu.core_type<tc>, window_params = [{transform_indices = @transform_0, window_bounds = array<i64: 8192, 128>}, {pipeline_mode = #tpu.pipeline_mode<synchronous>, transform_indices = @transform_1, window_bounds = array<i64: 8, 128>}]} {
    %c0_i32 = arith.constant 0 : i32
    %0 = arith.cmpi eq, %arg0, %c0_i32 : i32
    %1 = arith.extui %0 : i1 to i32
    %c0_i32_0 = arith.constant 0 : i32
    %2 = arith.cmpi ne, %1, %c0_i32_0 : i32
    scf.if %2 {
      %cst_7 = arith.constant 0.000000e+00 : f32
      %17 = vector.broadcast %cst_7 : f32 to vector<8x128xf32>
      %c0_8 = arith.constant 0 : index
      %c0_9 = arith.constant 0 : index
      %18 = vector.load %arg2[%c0_8, %c0_9] : memref<8x128xf32, #tpu.memory_space<vmem>>, vector<8x128xf32>
      tpu.vector_store %arg2[%c0_8, %c0_9], %17 {strides = array<i32>} : memref<8x128xf32, #tpu.memory_space<vmem>>, vector<8x128xf32>,
    } else {
    }
    %c0 = arith.constant 0 : index
    %c0_1 = arith.constant 0 : index
    %3 = vector.load %arg1[%c0, %c0_1] : memref<8192x128xf32, #tpu.memory_space<vmem>>, vector<8192x128xf32>
    %4 = tpu.iota {dimensions = array<i32: 0>} : vector<8192x128xi32>
    %c1_i32 = arith.constant 1 : i32
    %5 = arith.cmpi eq, %arg0, %c1_i32 : i32
    %c2048_i32 = arith.constant 2048 : i32
    %c8192_i32 = arith.constant 8192 : i32
    %6 = arith.select %5, %c2048_i32, %c8192_i32 : i32
    %7 = vector.broadcast %6 : i32 to vector<8192x128xi32>
    %8 = arith.cmpi slt, %4, %7 : vector<8192x128xi32>
    %cst = arith.constant 0.000000e+00 : f32
    %9 = vector.broadcast %cst : f32 to vector<8192x128xf32>
    %10 = arith.select %8, %3, %9 : vector<8192x128xi1>, vector<8192x128xf32>
    %11 = arith.mulf %10, %10 : vector<8192x128xf32>
    %c0_2 = arith.constant 0 : index
    %c0_3 = arith.constant 0 : index
    %12 = vector.load %arg2[%c0_2, %c0_3] : memref<8x128xf32, #tpu.memory_space<vmem>>, vector<8x128xf32>
    %13 = vector.shape_cast %11 : vector<8192x128xf32> to vector<1024x8x128xf32>
    %cst_4 = arith.constant dense<0.000000e+00> : vector<8x128xf32>
    %14 = vector.multi_reduction <add>, %13, %cst_4 [0] : vector<1024x8x128xf32> to vector<8x128xf32>
    %15 = arith.addf %12, %14 : vector<8x128xf32>
    %c0_5 = arith.constant 0 : index
    %c0_6 = arith.constant 0 : index
    %16 = vector.load %arg2[%c0_5, %c0_6] : memref<8x128xf32, #tpu.memory_space<vmem>>, vector<8x128xf32>
    tpu.vector_store %arg2[%c0_5, %c0_6], %15 {strides = array<i32>} : memref<8x128xf32, #tpu.memory_space<vmem>>, vector<8x128xf32>,
    return
  }
  func.func @transform_0(%arg0: i32) -> (i32, i32) {
    %c0_i32 = arith.constant 0 : i32
    %c0_i32_0 = arith.constant 0 : i32
    return %arg0, %c0_i32 : i32, i32
  }
  func.func @transform_1(%arg0: i32) -> (i32, i32) {
    %c0_i32 = arith.constant 0 : i32
    %c0_i32_0 = arith.constant 0 : i32
    %c0_i32_1 = arith.constant 0 : i32
    return %c0_i32, %c0_i32_0 : i32, i32
  }
}

</mosaic_0001>

<bundles_post_ra>
// kernel: _pallas_weight_ssq.1
= control target key start
LH: loop header
LB: loop body
LE: loop exit
PB: predicated region body
PF: predicated region fallthrough
CT: control target
= control target key end

     0   :  { %s6344_s6 = smov 0   ;;  %s9445_s0 = inlined_call_operand.vmem [shape: f32[10240,128], index: 0, kind: input, shape index: {}]   ;;  %s9446_s1 = inlined_call_operand.vmem [shape: f32[8,128], index: 1, kind: output, shape index: {}]  }
   0x1 LB: > { %s6307_s7 = sadd.s32 4294967295, %s6331_s6   ;;  %p6310_p0 = scmp.ge.s32.totalorder %s6331_s6, 1  ;;  %s6331_s6 = sphi %s6344_s6, %s11_s6  }
   0x2   : > { %p91_p1 = scmp.lt.s32.totalorder %s6331_s6, 3 }
   0x4   : > { %p92_p2 = pnand %p6310_p0, %p91_p1 }
   0x5   : > { %s6311_s8 = sshll.u32 (!%p92_p2), %s6307_s7, 10  ;;  %p6313_p4 = scmp.ne.s32.totalorder (!%p92_p2), %s6307_s7, 0 }
   0x6   : > { %95 = sbr.rel (%p92_p2) target bundleno = 2079 (0x81f), region = 24  ;;  %p115_p3 = scmp.lt.s32.totalorder (!%p92_p2), %s6311_s8, 1279 }
   0xd   : > { %s9448_s8 = smov (!%p115_p3, %s6311_s8), 1279  ;;  %127 = sbr.rel (%p6313_p4) target bundleno = 20 (0x14), region = 28 }
   0xe   : > { %s6312_s9 = sshll.u32 %s9448_s8, 3  ;;  %v6333_v0 = vmov (!%p6313_p4), 0.0  }
   0xf   : > { %s6355_s12 = scalar_lea.vmem %s9445_s0, %s6312_s9  ;;  %128 = vst [vmem:[%s9446_s1] sm:$0xff] (!%p6313_p4), %v6333_v0 }
  0x14 PF: > { %v1153_v1 = vlaneseq  ;;  %p2178_p5 = scmp.eq.s32.totalorder %s6307_s7, 1  ;;  %v129_v6 = vld [vmem:[%s6355_s12] sm:$0xff]  ;;  %v130_v7 = vld [vmem:[%s6355_s12 + $0x8] sm:$0xff]  ;;  %v131_v9 = vld [vmem:[%s6355_s12 + $0x10] sm:$0xff] }
  0x15   : > { %v132_v13 = vld [vmem:[%s6355_s12 + $0x18] sm:$0xff]  ;;  %v133_v16 = vld [vmem:[%s6355_s12 + $0x20] sm:$0xff]  ;;  %v134_v21 = vld [vmem:[%s6355_s12 + $0x28] sm:$0xff] }
  0x16   : > { %v6360_v2 = vshrl.u32 %v1153_v1, 7  ;;  %s2179_s15 = scalar_select %p2178_p5, 2048, 8192  ;;  %v135_v25 = vld [vmem:[%s6355_s12 + $0x30] sm:$0xff]  ;;  %v136_v30 = vld [vmem:[%s6355_s12 + $0x38] sm:$0xff]  ;;  %v137_v35 = vld [vmem:[%s6355_s12 + $0x40] sm:$0xff] }
  0x17   : > { %v138_v40 = vld [vmem:[%s6355_s12 + $0x48] sm:$0xff]  ;;  %v139_v45 = vld [vmem:[%s6355_s12 + $0x50] sm:$0xff]  ;;  %v140_v50 = vld [vmem:[%s6355_s12 + $0x58] sm:$0xff] }
  0x18   : > { %v1155_v3 = vadd.s32 8, %v6360_v2  ;;  %v6363_v4 = vstv %s2179_s15  ;;  %v1156_v5 = vadd.s32 16, %v6360_v2  ;;  %v1157_v8 = vadd.s32 24, %v6360_v2  ;;  %v141_v55 = vld [vmem:[%s6355_s12 + $0x60] sm:$0xff]  ;;  %v142_v60 = vld [vmem:[%s6355_s12 + $0x68] sm:$0xff]  ;;  %v143_v1 = vld [vmem:[%s6355_s12 + $0x70] sm:$0xff] }
  0x19   : > { %vm2181_vm0 = vcmp.lt.s32.totalorder %v6360_v2, %v6363_v4  ;;  %v1158_v10 = vadd.s32 32, %v6360_v2  ;;  %v1159_v14 = vadd.s32 40, %v6360_v2  ;;  %v1160_v17 = vadd.s32 48, %v6360_v2 }
  0x1a   : > { %vm2182_vm1 = vcmp.lt.s32.totalorder %v1155_v3, %v6363_v4  ;;  %vm2183_vm2 = vcmp.lt.s32.totalorder %v1156_v5, %v6363_v4  ;;  %v3205_v11 = vsel %vm2181_vm0, %v129_v6, 0.0  ;;  %vm2184_vm3 = vcmp.lt.s32.totalorder %v1157_v8, %v6363_v4  ;;  %v144_v8 = vld [vmem:[%s6355_s12 + $0x78] sm:$0xff] }
  0x1b   : > { %v3206_v12 = vsel %vm2182_vm1, %v130_v7, 0.0  ;;  %v3207_v15 = vsel %vm2183_vm2, %v131_v9, 0.0  ;;  %vm2185_vm4 = vcmp.lt.s32.totalorder %v1158_v10, %v6363_v4  ;;  %v4229_v18 = vmul.f32 %v3205_v11, %v3205_v11 }
  0x1c   : > { %v4230_v19 = vmul.f32 %v3206_v12, %v3206_v12  ;;  %v3208_v20 = vsel %vm2184_vm3, %v132_v13, 0.0  ;;  %v1161_v22 = vadd.s32 56, %v6360_v2  ;;  %vm2186_vm5 = vcmp.lt.s32.totalorder %v1159_v14, %v6363_v4  ;;  %v145_v13 = vld [vmem:[%s6355_s12 + $0x80] sm:$0xff] }
  0x1d   : > { %v4231_v23 = vmul.f32 %v3207_v15, %v3207_v15  ;;  %v3209_v24 = vsel %vm2185_vm4, %v133_v16, 0.0  ;;  %v1162_v26 = vadd.s32 64, %v6360_v2  ;;  %vm2187_vm6 = vcmp.lt.s32.totalorder %v1160_v17, %v6363_v4 }
  0x1e   : > { %v4232_v27 = vmul.f32 %v3208_v20, %v3208_v20  ;;  %v5254_v28 = vadd.f32 %v4230_v19, %v4229_v18  ;;  %v3210_v29 = vsel %vm2186_vm5, %v134_v21, 0.0  ;;  %v1163_v31 = vadd.s32 72, %v6360_v2  ;;  %v146_v18 = vld [vmem:[%s6355_s12 + $0x88] sm:$0xff] }
  0x1f   : > { %vm2188_vm7 = vcmp.lt.s32.totalorder %v1161_v22, %v6363_v4  ;;  %v4233_v32 = vmul.f32 %v3209_v24, %v3209_v24  ;;  %v3211_v34 = vsel %vm2187_vm6, %v135_v25, 0.0  ;;  %v1164_v36 = vadd.s32 80, %v6360_v2 }
  0x20   : > { %v5255_v33 = vadd.f32 %v5254_v28, %v4231_v23  ;;  %vm2189_vm8 = vcmp.lt.s32.totalorder %v1162_v26, %v6363_v4  ;;  %v4234_v37 = vmul.f32 %v3210_v29, %v3210_v29  ;;  %v3212_v39 = vsel %vm2188_vm7, %v136_v30, 0.0  ;;  %v147_v23 = vld [vmem:[%s6355_s12 + $0x90] sm:$0xff]  ;;  %v148_v28 = vld [vmem:[%s6355_s12 + $0x98] sm:$0xff] }
  0x21   : > { %v1165_v41 = vadd.s32 88, %v6360_v2  ;;  %vm2190_vm9 = vcmp.lt.s32.totalorder %v1163_v31, %v6363_v4  ;;  %v4235_v42 = vmul.f32 %v3211_v34, %v3211_v34  ;;  %v3213_v44 = vsel %vm2189_vm8, %v137_v35, 0.0 }
  0x22   : > { %v5256_v38 = vadd.f32 %v5255_v33, %v4232_v27  ;;  %v1166_v46 = vadd.s32 96, %v6360_v2  ;;  %vm2191_vm10 = vcmp.lt.s32.totalorder %v1164_v36, %v6363_v4  ;;  %v4236_v47 = vmul.f32 %v3212_v39, %v3212_v39  ;;  %v149_v33 = vld [vmem:[%s6355_s12 + $0xa0] sm:$0xff] }
  0x23   : > { %v3214_v49 = vsel %vm2190_vm9, %v138_v40, 0.0  ;;  %v1167_v51 = vadd.s32 104, %v6360_v2  ;;  %vm2192_vm11 = vcmp.lt.s32.totalorder %v1165_v41, %v6363_v4  ;;  %v4237_v52 = vmul.f32 %v3213_v44, %v3213_v44 }
  0x24   : > { %v5257_v43 = vadd.f32 %v5256_v38, %v4233_v32  ;;  %v3215_v54 = vsel %vm2191_vm10, %v139_v45, 0.0  ;;  %v1168_v56 = vadd.s32 112, %v6360_v2  ;;  %vm2193_vm12 = vcmp.lt.s32.totalorder %v1166_v46, %v6363_v4  ;;  %v150_v38 = vld [vmem:[%s6355_s12 + $0xa8] sm:$0xff] }
  0x25   : > { %v4238_v57 = vmul.f32 %v3214_v49, %v3214_v49  ;;  %v3216_v59 = vsel %vm2192_vm11, %v140_v50, 0.0  ;;  %v1169_v61 = vadd.s32 120, %v6360_v2  ;;  %vm2194_vm13 = vcmp.lt.s32.totalorder %v1167_v51, %v6363_v4 }
  0x26   : > { %v5258_v48 = vadd.f32 %v5257_v43, %v4234_v37  ;;  %v4239_v62 = vmul.f32 %v3215_v54, %v3215_v54  ;;  %v3217_v0 = vsel %vm2193_vm12, %v141_v55, 0.0  ;;  %v1170_v3 = vadd.s32 128, %v6360_v2  ;;  %v151_v43 = vld [vmem:[%s6355_s12 + $0xb0] sm:$0xff] }
  0x27   : > { %vm2195_vm14 = vcmp.lt.s32.totalorder %v1168_v56, %v6363_v4  ;;  %v4240_v5 = vmul.f32 %v3216_v59, %v3216_v59  ;;  %v3218_v7 = vsel %vm2194_vm13, %v142_v60, 0.0  ;;  %v1171_v9 = vadd.s32 136, %v6360_v2 }
  0x28   : > { %v5259_v53 = vadd.f32 %v5258_v48, %v4235_v42  ;;  %vm2196_vm15 = vcmp.lt.s32.totalorder %v1169_v61, %v6363_v4  ;;  %v4241_v10 = vmul.f32 %v3217_v0, %v3217_v0  ;;  %v3219_v12 = vsel %vm2195_vm14, %v143_v1, 0.0  ;;  %v152_v48 = vld [vmem:[%s6355_s12 + $0xb8] sm:$0xff] }
  0x29   : > { %v1172_v14 = vadd.s32 144, %v6360_v2  ;;  %vm2197_vm0 = vcmp.lt.s32.totalorder %v1170_v3, %v6363_v4  ;;  %v4242_v15 = vmul.f32 %v3218_v7, %v3218_v7  ;;  %v3220_v17 = vsel %vm2196_vm15, %v144_v8, 0.0 }
  0x2a   : > { %v5260_v58 = vadd.f32 %v5259_v53, %v4236_v47  ;;  %v1173_v19 = vadd.s32 152, %v6360_v2  ;;  %vm2198_vm1 = vcmp.lt.s32.totalorder %v1171_v9, %v6363_v4  ;;  %v4243_v20 = vmul.f32 %v3219_v12, %v3219_v12  ;;  %v153_v53 = vld [vmem:[%s6355_s12 + $0xc0] sm:$0xff] }
  0x2b   : > { %v3221_v22 = vsel %vm2197_vm0, %v145_v13, 0.0  ;;  %v1174_v24 = vadd.s32 160, %v6360_v2  ;;  %vm2199_vm2 = vcmp.lt.s32.totalorder %v1172_v14, %v6363_v4  ;;  %v4244_v25 = vmul.f32 %v3220_v17, %v3220_v17 }
  0x2c   : > { %v5261_v63 = vadd.f32 %v5260_v58, %v4237_v52  ;;  %v3222_v27 = vsel %vm2198_vm1, %v146_v18, 0.0  ;;  %v1175_v29 = vadd.s32 168, %v6360_v2  ;;  %vm2200_vm3 = vcmp.lt.s32.totalorder %v1173_v19, %v6363_v4  ;;  %v154_v58 = vld [vmem:[%s6355_s12 + $0xc8] sm:$0xff] }
  0x2d   : > { %v4245_v30 = vmul.f32 %v3221_v22, %v3221_v22  ;;  %v3223_v32 = vsel %vm2199_vm2, %v147_v23, 0.0  ;;  %v1176_v34 = vadd.s32 176, %v6360_v2  ;;  %vm2201_vm4 = vcmp.lt.s32.totalorder %v1174_v24, %v6363_v4 }
  0x2e   : > { %v5262_v6 = vadd.f32 %v5261_v63, %v4238_v57  ;;  %v4246_v35 = vmul.f32 %v3222_v27, %v3222_v27  ;;  %v3224_v37 = vsel %vm2200_vm3, %v148_v28, 0.0  ;;  %v1177_v39 = vadd.s32 184, %v6360_v2  ;;  %v155_v63 = vld [vmem:[%s6355_s12 + $0xd0] sm:$0xff] }
  0x2f   : > { %vm2202_vm5 = vcmp.lt.s32.totalorder %v1175_v29, %v6363_v4  ;;  %v4247_v40 = vmul.f32 %v3223_v32, %v3223_v32  ;;  %v3225_v42 = vsel %vm2201_vm4, %v149_v33, 0.0  ;;  %v1178_v44 = vadd.s32 192, %v6360_v2 }
  0x30   : > { %v5263_v11 = vadd.f32 %v5262_v6, %v4239_v62  ;;  %vm2203_vm6 = vcmp.lt.s32.totalorder %v1176_v34, %v6363_v4  ;;  %v4248_v45 = vmul.f32 %v3224_v37, %v3224_v37  ;;  %v3226_v47 = vsel %vm2202_vm5, %v150_v38, 0.0  ;;  %v156_v6 = vld [vmem:[%s6355_s12 + $0xd8] sm:$0xff] }
  0x31   : > { %v1179_v49 = vadd.s32 200, %v6360_v2  ;;  %vm2204_vm7 = vcmp.lt.s32.totalorder %v1177_v39, %v6363_v4  ;;  %v4249_v50 = vmul.f32 %v3225_v42, %v3225_v42  ;;  %v3227_v52 = vsel %vm2203_vm6, %v151_v43, 0.0 }
  0x32   : > { %v5264_v16 = vadd.f32 %v5263_v11, %v4240_v5  ;;  %v1180_v54 = vadd.s32 208, %v6360_v2  ;;  %vm2205_vm8 = vcmp.lt.s32.totalorder %v1178_v44, %v6363_v4  ;;  %v4250_v55 = vmul.f32 %v3226_v47, %v3226_v47  ;;  %v157_v11 = vld [vmem:[%s6355_s12 + $0xe0] sm:$0xff] }
  0x33   : > { %v3228_v57 = vsel %vm2204_vm7, %v152_v48, 0.0  ;;  %v1181_v59 = vadd.s32 216, %v6360_v2  ;;  %vm2206_vm9 = vcmp.lt.s32.totalorder %v1179_v49, %v6363_v4  ;;  %v4251_v60 = vmul.f32 %v3227_v52, %v3227_v52 }
  0x34   : > { %v5265_v21 = vadd.f32 %v5264_v16, %v4241_v10  ;;  %v3229_v62 = vsel %vm2205_vm8, %v153_v53, 0.0  ;;  %v1182_v0 = vadd.s32 224, %v6360_v2  ;;  %vm2207_vm10 = vcmp.lt.s32.totalorder %v1180_v54, %v6363_v4  ;;  %v158_v16 = vld [vmem:[%s6355_s12 + $0xe8] sm:$0xff] }
  0x35   : > { %v4252_v1 = vmul.f32 %v3228_v57, %v3228_v57  ;;  %v3230_v5 = vsel %vm2206_vm9, %v154_v58, 0.0  ;;  %v1183_v7 = vadd.s32 232, %v6360_v2  ;;  %vm2208_vm11 = vcmp.lt.s32.totalorder %v1181_v59, %v6363_v4 }
  0x36   : > { %v5266_v26 = vadd.f32 %v5265_v21, %v4242_v15  ;;  %v4253_v8 = vmul.f32 %v3229_v62, %v3229_v62  ;;  %v3231_v10 = vsel %vm2207_vm10, %v155_v63, 0.0  ;;  %v1184_v12 = vadd.s32 240, %v6360_v2  ;;  %v159_v21 = vld [vmem:[%s6355_s12 + $0xf0] sm:$0xff] }
  0x37   : > { %vm2209_vm12 = vcmp.lt.s32.totalorder %v1182_v0, %v6363_v4  ;;  %v4254_v13 = vmul.f32 %v3230_v5, %v3230_v5  ;;  %v3232_v15 = vsel %vm2208_vm11, %v156_v6, 0.0  ;;  %v1185_v17 = vadd.s32 248, %v6360_v2 }
  0x38   : > { %v5267_v31 = vadd.f32 %v5266_v26, %v4243_v20  ;;  %vm2210_vm13 = vcmp.lt.s32.totalorder %v1183_v7, %v6363_v4  ;;  %v4255_v18 = vmul.f32 %v3231_v10, %v3231_v10  ;;  %v3233_v20 = vsel %vm2209_vm12, %v157_v11, 0.0  ;;  %v160_v26 = vld [vmem:[%s6355_s12 + $0xf8] sm:$0xff] }
  0x39   : > { %v1186_v22 = vadd.s32 256, %v6360_v2  ;;  %vm2211_vm14 = vcmp.lt.s32.totalorder %v1184_v12, %v6363_v4  ;;  %v4256_v23 = vmul.f32 %v3232_v15, %v3232_v15  ;;  %v1187_v27 = vadd.s32 264, %v6360_v2 }
  0x3a   : > { %v5268_v36 = vadd.f32 %v5267_v31, %v4244_v25  ;;  %v3234_v25 = vsel %vm2210_vm13, %v158_v16, 0.0  ;;  %vm2212_vm15 = vcmp.lt.s32.totalorder %v1185_v17, %v6363_v4  ;;  %v4257_v28 = vmul.f32 %v3233_v20, %v3233_v20  ;;  %v161_v31 = vld [vmem:[%s6355_s12 + $0x100] sm:$0xff] }
  0x3b   : > { %v1188_v32 = vadd.s32 272, %v6360_v2  ;;  %vm2213_vm0 = vcmp.lt.s32.totalorder %v1186_v22, %v6363_v4  ;;  %v4258_v33 = vmul.f32 %v3234_v25, %v3234_v25  ;;  %v1189_v37 = vadd.s32 280, %v6360_v2 }
  0x3c   : > { %v5269_v41 = vadd.f32 %v5268_v36, %v4245_v30  ;;  %v3235_v30 = vsel %vm2211_vm14, %v159_v21, 0.0  ;;  %v162_v36 = vld [vmem:[%s6355_s12 + $0x108] sm:$0xff]  ;;  %vm2214_vm1 = vcmp.lt.s32.totalorder %v1187_v27, %v6363_v4  ;;  %v1190_v42 = vadd.s32 288, %v6360_v2 }
  0x3d   : > { %v4259_v38 = vmul.f32 %v3235_v30, %v3235_v30  ;;  %vm2215_vm2 = vcmp.lt.s32.totalorder %v1188_v32, %v6363_v4  ;;  %v1191_v47 = vadd.s32 296, %v6360_v2  ;;  %vm2216_vm3 = vcmp.lt.s32.totalorder %v1189_v37, %v6363_v4 }
  0x3e   : > { %v5270_v46 = vadd.f32 %v5269_v41, %v4246_v35  ;;  %v3236_v35 = vsel %vm2212_vm15, %v160_v26, 0.0  ;;  %v163_v41 = vld [vmem:[%s6355_s12 + $0x110] sm:$0xff]  ;;  %v1192_v52 = vadd.s32 304, %v6360_v2  ;;  %vm2217_vm4 = vcmp.lt.s32.totalorder %v1190_v42, %v6363_v4 }
  0x3f   : > { %v4260_v43 = vmul.f32 %v3236_v35, %v3236_v35  ;;  %v1193_v57 = vadd.s32 312, %v6360_v2  ;;  %vm2218_vm5 = vcmp.lt.s32.totalorder %v1191_v47, %v6363_v4  ;;  %v1194_v62 = vadd.s32 320, %v6360_v2 }
  0x40   : > { %v5271_v51 = vadd.f32 %v5270_v46, %v4247_v40  ;;  %v3237_v40 = vsel %vm2213_vm0, %v161_v31, 0.0  ;;  %v164_v46 = vld [vmem:[%s6355_s12 + $0x118] sm:$0xff]  ;;  %vm2219_vm6 = vcmp.lt.s32.totalorder %v1192_v52, %v6363_v4  ;;  %v1195_v5 = vadd.s32 328, %v6360_v2 }
  0x41   : > { %v4261_v48 = vmul.f32 %v3237_v40, %v3237_v40  ;;  %vm2220_vm7 = vcmp.lt.s32.totalorder %v1193_v57, %v6363_v4  ;;  %v1196_v10 = vadd.s32 336, %v6360_v2  ;;  %vm2221_vm8 = vcmp.lt.s32.totalorder %v1194_v62, %v6363_v4 }
  0x42   : > { %v5272_v56 = vadd.f32 %v5271_v51, %v4248_v45  ;;  %v3238_v45 = vsel %vm2214_vm1, %v162_v36, 0.0  ;;  %v165_v51 = vld [vmem:[%s6355_s12 + $0x120] sm:$0xff]  ;;  %v1197_v15 = vadd.s32 344, %v6360_v2  ;;  %vm2222_vm9 = vcmp.lt.s32.totalorder %v1195_v5, %v6363_v4 }
  0x43   : > { %v4262_v53 = vmul.f32 %v3238_v45, %v3238_v45  ;;  %v1198_v20 = vadd.s32 352, %v6360_v2  ;;  %vm2223_vm10 = vcmp.lt.s32.totalorder %v1196_v10, %v6363_v4  ;;  %v1199_v25 = vadd.s32 360, %v6360_v2 }
  0x44   : > { %v5273_v61 = vadd.f32 %v5272_v56, %v4249_v50  ;;  %v3239_v50 = vsel %vm2215_vm2, %v163_v41, 0.0  ;;  %v166_v56 = vld [vmem:[%s6355_s12 + $0x128] sm:$0xff]  ;;  %vm2224_vm11 = vcmp.lt.s32.totalorder %v1197_v15, %v6363_v4  ;;  %v1200_v30 = vadd.s32 368, %v6360_v2 }
  0x45   : > { %v4263_v58 = vmul.f32 %v3239_v50, %v3239_v50  ;;  %vm2225_vm12 = vcmp.lt.s32.totalorder %v1198_v20, %v6363_v4  ;;  %v1201_v35 = vadd.s32 376, %v6360_v2  ;;  %vm2226_vm13 = vcmp.lt.s32.totalorder %v1199_v25, %v6363_v4 }
  0x46   : > { %v5274_v3 = vadd.f32 %v5273_v61, %v4250_v55  ;;  %v3240_v55 = vsel %vm2216_vm3, %v164_v46, 0.0  ;;  %v167_v61 = vld [vmem:[%s6355_s12 + $0x130] sm:$0xff]  ;;  %v1202_v40 = vadd.s32 384, %v6360_v2  ;;  %vm2227_vm14 = vcmp.lt.s32.totalorder %v1200_v30, %v6363_v4 }
  0x47   : > { %v4264_v63 = vmul.f32 %v3240_v55, %v3240_v55  ;;  %v1203_v45 = vadd.s32 392, %v6360_v2  ;;  %vm2228_vm15 = vcmp.lt.s32.totalorder %v1201_v35, %v6363_v4  ;;  %v1204_v50 = vadd.s32 400, %v6360_v2 }
  0x48   : > { %v5275_v9 = vadd.f32 %v5274_v3, %v4251_v60  ;;  %v3241_v60 = vsel %vm2217_vm4, %v165_v51, 0.0  ;;  %v168_v3 = vld [vmem:[%s6355_s12 + $0x138] sm:$0xff]  ;;  %vm2229_vm0 = vcmp.lt.s32.totalorder %v1202_v40, %v6363_v4  ;;  %v1205_v55 = vadd.s32 408, %v6360_v2 }
  0x49   : > { %v4265_v6 = vmul.f32 %v3241_v60, %v3241_v60  ;;  %vm2230_vm1 = vcmp.lt.s32.totalorder %v1203_v45, %v6363_v4  ;;  %v1206_v60 = vadd.s32 416, %v6360_v2  ;;  %vm2231_vm2 = vcmp.lt.s32.totalorder %v1204_v50, %v6363_v4 }
  0x4a   : > { %v5276_v14 = vadd.f32 %v5275_v9, %v4252_v1  ;;  %v3242_v1 = vsel %vm2218_vm5, %v166_v56, 0.0  ;;  %v169_v9 = vld [vmem:[%s6355_s12 + $0x140] sm:$0xff]  ;;  %vm2232_vm3 = vcmp.lt.s32.totalorder %v1205_v55, %v6363_v4 }
  0x4b   : > { %v4266_v11 = vmul.f32 %v3242_v1, %v3242_v1  ;;  %v1207_v1 = vadd.s32 424, %v6360_v2  ;;  %vm2233_vm4 = vcmp.lt.s32.totalorder %v1206_v60, %v6363_v4 }
  0x4c   : > { %v5277_v19 = vadd.f32 %v5276_v14, %v4253_v8  ;;  %v3243_v8 = vsel %vm2219_vm6, %v167_v61, 0.0  ;;  %v170_v14 = vld [vmem:[%s6355_s12 + $0x148] sm:$0xff] }
  0x4d   : > { %v4267_v16 = vmul.f32 %v3243_v8, %v3243_v8  ;;  %v1208_v8 = vadd.s32 432, %v6360_v2  ;;  %vm2234_vm5 = vcmp.lt.s32.totalorder %v1207_v1, %v6363_v4 }
  0x4e   : > { %v5278_v24 = vadd.f32 %v5277_v19, %v4254_v13  ;;  %v3244_v13 = vsel %vm2220_vm7, %v168_v3, 0.0  ;;  %v171_v19 = vld [vmem:[%s6355_s12 + $0x150] sm:$0xff] }
  0x4f   : > { %v4268_v21 = vmul.f32 %v3244_v13, %v3244_v13  ;;  %v1209_v13 = vadd.s32 440, %v6360_v2  ;;  %vm2235_vm6 = vcmp.lt.s32.totalorder %v1208_v8, %v6363_v4 }
  0x50   : > { %v5279_v29 = vadd.f32 %v5278_v24, %v4255_v18  ;;  %v3245_v18 = vsel %vm2221_vm8, %v169_v9, 0.0  ;;  %v172_v24 = vld [vmem:[%s6355_s12 + $0x158] sm:$0xff] }
  0x51   : > { %v4269_v26 = vmul.f32 %v3245_v18, %v3245_v18  ;;  %v1210_v18 = vadd.s32 448, %v6360_v2  ;;  %vm2236_vm7 = vcmp.lt.s32.totalorder %v1209_v13, %v6363_v4 }
  0x52   : > { %v5280_v34 = vadd.f32 %v5279_v29, %v4256_v23  ;;  %v3246_v23 = vsel %vm2222_vm9, %v170_v14, 0.0  ;;  %v173_v29 = vld [vmem:[%s6355_s12 + $0x160] sm:$0xff] }
  0x53   : > { %v4270_v31 = vmul.f32 %v3246_v23, %v3246_v23  ;;  %v1211_v23 = vadd.s32 456, %v6360_v2  ;;  %vm2237_vm8 = vcmp.lt.s32.totalorder %v1210_v18, %v6363_v4 }
  0x54   : > { %v5281_v39 = vadd.f32 %v5280_v34, %v4257_v28  ;;  %v3247_v28 = vsel %vm2223_vm10, %v171_v19, 0.0  ;;  %v174_v34 = vld [vmem:[%s6355_s12 + $0x168] sm:$0xff] }
  0x55   : > { %v4271_v36 = vmul.f32 %v3247_v28, %v3247_v28  ;;  %v1212_v28 = vadd.s32 464, %v6360_v2  ;;  %vm2238_vm9 = vcmp.lt.s32.totalorder %v1211_v23, %v6363_v4 }
  0x56   : > { %v5282_v44 = vadd.f32 %v5281_v39, %v4258_v33  ;;  %v3248_v33 = vsel %vm2224_vm11, %v172_v24, 0.0  ;;  %v175_v39 = vld [vmem:[%s6355_s12 + $0x170] sm:$0xff] }
  0x57   : > { %v4272_v41 = vmul.f32 %v3248_v33, %v3248_v33  ;;  %v1213_v33 = vadd.s32 472, %v6360_v2  ;;  %vm2239_vm10 = vcmp.lt.s32.totalorder %v1212_v28, %v6363_v4 }
  0x58   : > { %v5283_v49 = vadd.f32 %v5282_v44, %v4259_v38  ;;  %v3249_v38 = vsel %vm2225_vm12, %v173_v29, 0.0  ;;  %v176_v44 = vld [vmem:[%s6355_s12 + $0x178] sm:$0xff] }
  0x59   : > { %v4273_v46 = vmul.f32 %v3249_v38, %v3249_v38  ;;  %v1214_v38 = vadd.s32 480, %v6360_v2  ;;  %vm2240_vm11 = vcmp.lt.s32.totalorder %v1213_v33, %v6363_v4 }
  0x5a   : > { %v5284_v54 = vadd.f32 %v5283_v49, %v4260_v43  ;;  %v3250_v43 = vsel %vm2226_vm13, %v174_v34, 0.0  ;;  %v177_v49 = vld [vmem:[%s6355_s12 + $0x180] sm:$0xff] }
  0x5b   : > { %v4274_v51 = vmul.f32 %v3250_v43, %v3250_v43  ;;  %v1215_v43 = vadd.s32 488, %v6360_v2  ;;  %vm2241_vm12 = vcmp.lt.s32.totalorder %v1214_v38, %v6363_v4 }
  0x5c   : > { %v5285_v59 = vadd.f32 %v5284_v54, %v4261_v48  ;;  %v3251_v48 = vsel %vm2227_vm14, %v175_v39, 0.0  ;;  %v178_v54 = vld [vmem:[%s6355_s12 + $0x188] sm:$0xff] }
  0x5d   : > { %v4275_v56 = vmul.f32 %v3251_v48, %v3251_v48  ;;  %v1216_v48 = vadd.s32 496, %v6360_v2  ;;  %vm2242_vm13 = vcmp.lt.s32.totalorder %v1215_v43, %v6363_v4 }
  0x5e   : > { %v5286_v0 = vadd.f32 %v5285_v59, %v4262_v53  ;;  %v3252_v53 = vsel %vm2228_vm15, %v176_v44, 0.0  ;;  %v179_v59 = vld [vmem:[%s6355_s12 + $0x190] sm:$0xff] }
  0x5f   : > { %v4276_v61 = vmul.f32 %v3252_v53, %v3252_v53  ;;  %v1217_v53 = vadd.s32 504, %v6360_v2  ;;  %vm2243_vm14 = vcmp.lt.s32.totalorder %v1216_v48, %v6363_v4 }
  0x60   : > { %v5287_v7 = vadd.f32 %v5286_v0, %v4263_v58  ;;  %v3253_v58 = vsel %vm2229_vm0, %v177_v49, 0.0  ;;  %v180_v0 = vld [vmem:[%s6355_s12 + $0x198] sm:$0xff] }
  0x61   : > { %v4277_v3 = vmul.f32 %v3253_v58, %v3253_v58  ;;  %v1218_v58 = vadd.s32 512, %v6360_v2  ;;  %vm2244_vm15 = vcmp.lt.s32.totalorder %v1217_v53, %v6363_v4 }
  0x62   : > { %v5288_v12 = vadd.f32 %v5287_v7, %v4264_v63  ;;  %v3254_v63 = vsel %vm2230_vm1, %v178_v54, 0.0  ;;  %v181_v7 = vld [vmem:[%s6355_s12 + $0x1a0] sm:$0xff] }
  0x63   : > { %v4278_v9 = vmul.f32 %v3254_v63, %v3254_v63  ;;  %v1219_v63 = vadd.s32 520, %v6360_v2  ;;  %vm2245_vm0 = vcmp.lt.s32.totalorder %v1218_v58, %v6363_v4 }
  0x64   : > { %v5289_v17 = vadd.f32 %v5288_v12, %v4265_v6  ;;  %v3255_v6 = vsel %vm2231_vm2, %v179_v59, 0.0  ;;  %v182_v12 = vld [vmem:[%s6355_s12 + $0x1a8] sm:$0xff] }
  0x65   : > { %v4279_v14 = vmul.f32 %v3255_v6, %v3255_v6  ;;  %v1220_v6 = vadd.s32 528, %v6360_v2  ;;  %vm2246_vm1 = vcmp.lt.s32.totalorder %v1219_v63, %v6363_v4 }
  0x66   : > { %v5290_v22 = vadd.f32 %v5289_v17, %v4266_v11  ;;  %v3256_v11 = vsel %vm2232_vm3, %v180_v0, 0.0  ;;  %v183_v17 = vld [vmem:[%s6355_s12 + $0x1b0] sm:$0xff] }
  0x67   : > { %v4280_v19 = vmul.f32 %v3256_v11, %v3256_v11  ;;  %v1221_v11 = vadd.s32 536, %v6360_v2  ;;  %vm2247_vm2 = vcmp.lt.s32.totalorder %v1220_v6, %v6363_v4 }
  0x68   : > { %v5291_v27 = vadd.f32 %v5290_v22, %v4267_v16  ;;  %v3257_v16 = vsel %vm2233_vm4, %v181_v7, 0.0  ;;  %v184_v22 = vld [vmem:[%s6355_s12 + $0x1b8] sm:$0xff] }
  0x69   : > { %v4281_v24 = vmul.f32 %v3257_v16, %v3257_v16  ;;  %v1222_v16 = vadd.s32 544, %v6360_v2  ;;  %vm2248_vm3 = vcmp.lt.s32.totalorder %v1221_v11, %v6363_v4 }
  0x6a   : > { %v5292_v32 = vadd.f32 %v5291_v27, %v4268_v21  ;;  %v3258_v21 = vsel %vm2234_vm5, %v182_v12, 0.0  ;;  %v185_v27 = vld [vmem:[%s6355_s12 + $0x1c0] sm:$0xff] }
  0x6b   : > { %v4282_v29 = vmul.f32 %v3258_v21, %v3258_v21  ;;  %v1223_v21 = vadd.s32 552, %v6360_v2  ;;  %vm2249_vm4 = vcmp.lt.s32.totalorder %v1222_v16, %v6363_v4 }
  0x6c   : > { %v5293_v37 = vadd.f32 %v5292_v32, %v4269_v26  ;;  %v3259_v26 = vsel %vm2235_vm6, %v183_v17, 0.0  ;;  %v186_v32 = vld [vmem:[%s6355_s12 + $0x1c8] sm:$0xff] }
  0x6d   : > { %v4283_v34 = vmul.f32 %v3259_v26, %v3259_v26  ;;  %v1224_v26 = vadd.s32 560, %v6360_v2  ;;  %vm2250_vm5 = vcmp.lt.s32.totalorder %v1223_v21, %v6363_v4 }
  0x6e   : > { %v5294_v42 = vadd.f32 %v5293_v37, %v4270_v31  ;;  %v3260_v31 = vsel %vm2236_vm7, %v184_v22, 0.0  ;;  %v187_v37 = vld [vmem:[%s6355_s12 + $0x1d0] sm:$0xff] }
  0x6f   : > { %v4284_v39 = vmul.f32 %v3260_v31, %v3260_v31  ;;  %v1225_v31 = vadd.s32 568, %v6360_v2  ;;  %vm2251_vm6 = vcmp.lt.s32.totalorder %v1224_v26, %v6363_v4 }
  0x70   : > { %v5295_v47 = vadd.f32 %v5294_v42, %v4271_v36  ;;  %v3261_v36 = vsel %vm2237_vm8, %v185_v27, 0.0  ;;  %v188_v42 = vld [vmem:[%s6355_s12 + $0x1d8] sm:$0xff] }
  0x71   : > { %v4285_v44 = vmul.f32 %v3261_v36, %v3261_v36  ;;  %v1226_v36 = vadd.s32 576, %v6360_v2  ;;  %vm2252_vm7 = vcmp.lt.s32.totalorder %v1225_v31, %v6363_v4 }
  0x72   : > { %v5296_v52 = vadd.f32 %v5295_v47, %v4272_v41  ;;  %v3262_v41 = vsel %vm2238_vm9, %v186_v32, 0.0  ;;  %v189_v47 = vld [vmem:[%s6355_s12 + $0x1e0] sm:$0xff] }
  0x73   : > { %v4286_v49 = vmul.f32 %v3262_v41, %v3262_v41  ;;  %v1227_v41 = vadd.s32 584, %v6360_v2  ;;  %vm2253_vm8 = vcmp.lt.s32.totalorder %v1226_v36, %v6363_v4 }
  0x74   : > { %v5297_v57 = vadd.f32 %v5296_v52, %v4273_v46  ;;  %v3263_v46 = vsel %vm2239_vm10, %v187_v37, 0.0  ;;  %v190_v52 = vld [vmem:[%s6355_s12 + $0x1e8] sm:$0xff] }
  0x75   : > { %v4287_v54 = vmul.f32 %v3263_v46, %v3263_v46  ;;  %v1228_v46 = vadd.s32 592, %v6360_v2  ;;  %vm2254_vm9 = vcmp.lt.s32.totalorder %v1227_v41, %v6363_v4 }
  0x76   : > { %v5298_v62 = vadd.f32 %v5297_v57, %v4274_v51  ;;  %v3264_v51 = vsel %vm2240_vm11, %v188_v42, 0.0  ;;  %v191_v57 = vld [vmem:[%s6355_s12 + $0x1f0] sm:$0xff] }
  0x77   : > { %v4288_v59 = vmul.f32 %v3264_v51, %v3264_v51  ;;  %v1229_v51 = vadd.s32 600, %v6360_v2  ;;  %vm2255_vm10 = vcmp.lt.s32.totalorder %v1228_v46, %v6363_v4 }
  0x78   : > { %v5299_v5 = vadd.f32 %v5298_v62, %v4275_v56  ;;  %v3265_v56 = vsel %vm2241_vm12, %v189_v47, 0.0  ;;  %v192_v62 = vld [vmem:[%s6355_s12 + $0x1f8] sm:$0xff] }
  0x79   : > { %v4289_v0 = vmul.f32 %v3265_v56, %v3265_v56  ;;  %v1230_v56 = vadd.s32 608, %v6360_v2  ;;  %vm2256_vm11 = vcmp.lt.s32.totalorder %v1229_v51, %v6363_v4 }
  0x7a   : > { %v5300_v10 = vadd.f32 %v5299_v5, %v4276_v61  ;;  %v3266_v61 = vsel %vm2242_vm13, %v190_v52, 0.0  ;;  %v193_v5 = vld [vmem:[%s6355_s12 + $0x200] sm:$0xff] }
  0x7b   : > { %v4290_v7 = vmul.f32 %v3266_v61, %v3266_v61  ;;  %v1231_v61 = vadd.s32 616, %v6360_v2  ;;  %vm2257_vm12 = vcmp.lt.s32.totalorder %v1230_v56, %v6363_v4 }
  0x7c   : > { %v5301_v15 = vadd.f32 %v5300_v10, %v4277_v3  ;;  %v3267_v3 = vsel %vm2243_vm14, %v191_v57, 0.0  ;;  %v194_v10 = vld [vmem:[%s6355_s12 + $0x208] sm:$0xff] }
  0x7d   : > { %v4291_v12 = vmul.f32 %v3267_v3, %v3267_v3  ;;  %v1232_v3 = vadd.s32 624, %v6360_v2  ;;  %vm2258_vm13 = vcmp.lt.s32.totalorder %v1231_v61, %v6363_v4 }
  0x7e   : > { %v5302_v20 = vadd.f32 %v5301_v15, %v4278_v9  ;;  %v3268_v9 = vsel %vm2244_vm15, %v192_v62, 0.0  ;;  %v195_v15 = vld [vmem:[%s6355_s12 + $0x210] sm:$0xff] }
  0x7f   : > { %v4292_v17 = vmul.f32 %v3268_v9, %v3268_v9  ;;  %v1233_v9 = vadd.s32 632, %v6360_v2  ;;  %vm2259_vm14 = vcmp.lt.s32.totalorder %v1232_v3, %v6363_v4 }
  0x80   : > { %v5303_v25 = vadd.f32 %v5302_v20, %v4279_v14  ;;  %v3269_v14 = vsel %vm2245_vm0, %v193_v5, 0.0  ;;  %v196_v20 = vld [vmem:[%s6355_s12 + $0x218] sm:$0xff] }
  0x81   : > { %v4293_v22 = vmul.f32 %v3269_v14, %v3269_v14  ;;  %v1234_v14 = vadd.s32 640, %v6360_v2  ;;  %vm2260_vm15 = vcmp.lt.s32.totalorder %v1233_v9, %v6363_v4 }
  0x82   : > { %v5304_v30 = vadd.f32 %v5303_v25, %v4280_v19  ;;  %v3270_v19 = vsel %vm2246_vm1, %v194_v10, 0.0  ;;  %v197_v25 = vld [vmem:[%s6355_s12 + $0x220] sm:$0xff] }
  0x83   : > { %v4294_v27 = vmul.f32 %v3270_v19, %v3270_v19  ;;  %v1235_v19 = vadd.s32 648, %v6360_v2  ;;  %vm2261_vm0 = vcmp.lt.s32.totalorder %v1234_v14, %v6363_v4 }
  0x84   : > { %v5305_v35 = vadd.f32 %v5304_v30, %v4281_v24  ;;  %v3271_v24 = vsel %vm2247_vm2, %v195_v15, 0.0  ;;  %v198_v30 = vld [vmem:[%s6355_s12 + $0x228] sm:$0xff] }
  0x85   : > { %v4295_v32 = vmul.f32 %v3271_v24, %v3271_v24  ;;  %v1236_v24 = vadd.s32 656, %v6360_v2  ;;  %vm2262_vm1 = vcmp.lt.s32.totalorder %v1235_v19, %v6363_v4 }
  0x86   : > { %v5306_v40 = vadd.f32 %v5305_v35, %v4282_v29  ;;  %v3272_v29 = vsel %vm2248_vm3, %v196_v20, 0.0  ;;  %v199_v35 = vld [vmem:[%s6355_s12 + $0x230] sm:$0xff] }
  0x87   : > { %v4296_v37 = vmul.f32 %v3272_v29, %v3272_v29  ;;  %v1237_v29 = vadd.s32 664, %v6360_v2  ;;  %vm2263_vm2 = vcmp.lt.s32.totalorder %v1236_v24, %v6363_v4 }
  0x88   : > { %v5307_v45 = vadd.f32 %v5306_v40, %v4283_v34  ;;  %v3273_v34 = vsel %vm2249_vm4, %v197_v25, 0.0  ;;  %v200_v40 = vld [vmem:[%s6355_s12 + $0x238] sm:$0xff] }
  0x89   : > { %v4297_v42 = vmul.f32 %v3273_v34, %v3273_v34  ;;  %v1238_v34 = vadd.s32 672, %v6360_v2  ;;  %vm2264_vm3 = vcmp.lt.s32.totalorder %v1237_v29, %v6363_v4 }
  0x8a   : > { %v5308_v50 = vadd.f32 %v5307_v45, %v4284_v39  ;;  %v3274_v39 = vsel %vm2250_vm5, %v198_v30, 0.0  ;;  %v201_v45 = vld [vmem:[%s6355_s12 + $0x240] sm:$0xff] }
  0x8b   : > { %v4298_v47 = vmul.f32 %v3274_v39, %v3274_v39  ;;  %v1239_v39 = vadd.s32 680, %v6360_v2  ;;  %vm2265_vm4 = vcmp.lt.s32.totalorder %v1238_v34, %v6363_v4 }
  0x8c   : > { %v5309_v55 = vadd.f32 %v5308_v50, %v4285_v44  ;;  %v3275_v44 = vsel %vm2251_vm6, %v199_v35, 0.0  ;;  %v202_v50 = vld [vmem:[%s6355_s12 + $0x248] sm:$0xff] }
  0x8d   : > { %v4299_v52 = vmul.f32 %v3275_v44, %v3275_v44  ;;  %v1240_v44 = vadd.s32 688, %v6360_v2  ;;  %vm2266_vm5 = vcmp.lt.s32.totalorder %v1239_v39, %v6363_v4 }
  0x8e   : > { %v5310_v60 = vadd.f32 %v5309_v55, %v4286_v49  ;;  %v3276_v49 = vsel %vm2252_vm7, %v200_v40, 0.0  ;;  %v203_v55 = vld [vmem:[%s6355_s12 + $0x250] sm:$0xff] }
  0x8f   : > { %v4300_v57 = vmul.f32 %v3276_v49, %v3276_v49  ;;  %v1241_v49 = vadd.s32 696, %v6360_v2  ;;  %vm2267_vm6 = vcmp.lt.s32.totalorder %v1240_v44, %v6363_v4 }
  0x90   : > { %v5311_v1 = vadd.f32 %v5310_v60, %v4287_v54  ;;  %v3277_v54 = vsel %vm2253_vm8, %v201_v45, 0.0  ;;  %v204_v60 = vld [vmem:[%s6355_s12 + $0x258] sm:$0xff] }
  0x91   : > { %v4301_v62 = vmul.f32 %v3277_v54, %v3277_v54  ;;  %v1242_v54 = vadd.s32 704, %v6360_v2  ;;  %vm2268_vm7 = vcmp.lt.s32.totalorder %v1241_v49, %v6363_v4 }
  0x92   : > { %v5312_v8 = vadd.f32 %v5311_v1, %v4288_v59  ;;  %v3278_v59 = vsel %vm2254_vm9, %v202_v50, 0.0  ;;  %v205_v1 = vld [vmem:[%s6355_s12 + $0x260] sm:$0xff] }
  0x93   : > { %v4302_v5 = vmul.f32 %v3278_v59, %v3278_v59  ;;  %v1243_v59 = vadd.s32 712, %v6360_v2  ;;  %vm2269_vm8 = vcmp.lt.s32.totalorder %v1242_v54, %v6363_v4 }
  0x94   : > { %v5313_v13 = vadd.f32 %v5312_v8, %v4289_v0  ;;  %v3279_v0 = vsel %vm2255_vm10, %v203_v55, 0.0  ;;  %v206_v8 = vld [vmem:[%s6355_s12 + $0x268] sm:$0xff] }
  0x95   : > { %v4303_v10 = vmul.f32 %v3279_v0, %v3279_v0  ;;  %v1244_v0 = vadd.s32 720, %v6360_v2  ;;  %vm2270_vm9 = vcmp.lt.s32.totalorder %v1243_v59, %v6363_v4 }
  0x96   : > { %v5314_v18 = vadd.f32 %v5313_v13, %v4290_v7  ;;  %v3280_v7 = vsel %vm2256_vm11, %v204_v60, 0.0  ;;  %v207_v13 = vld [vmem:[%s6355_s12 + $0x270] sm:$0xff] }
  0x97   : > { %v4304_v15 = vmul.f32 %v3280_v7, %v3280_v7  ;;  %v1245_v7 = vadd.s32 728, %v6360_v2  ;;  %vm2271_vm10 = vcmp.lt.s32.totalorder %v1244_v0, %v6363_v4 }
  0x98   : > { %v5315_v23 = vadd.f32 %v5314_v18, %v4291_v12  ;;  %v3281_v12 = vsel %vm2257_vm12, %v205_v1, 0.0  ;;  %v208_v18 = vld [vmem:[%s6355_s12 + $0x278] sm:$0xff] }
  0x99   : > { %v4305_v20 = vmul.f32 %v3281_v12, %v3281_v12  ;;  %v1246_v12 = vadd.s32 736, %v6360_v2  ;;  %vm2272_vm11 = vcmp.lt.s32.totalorder %v1245_v7, %v6363_v4 }
  0x9a   : > { %v5316_v28 = vadd.f32 %v5315_v23, %v4292_v17  ;;  %v3282_v17 = vsel %vm2258_vm13, %v206_v8, 0.0  ;;  %v209_v23 = vld [vmem:[%s6355_s12 + $0x280] sm:$0xff] }
  0x9b   : > { %v4306_v25 = vmul.f32 %v3282_v17, %v3282_v17  ;;  %v1247_v17 = vadd.s32 744, %v6360_v2  ;;  %vm2273_vm12 = vcmp.lt.s32.totalorder %v1246_v12, %v6363_v4 }
  0x9c   : > { %v5317_v33 = vadd.f32 %v5316_v28, %v4293_v22  ;;  %v3283_v22 = vsel %vm2259_vm14, %v207_v13, 0.0  ;;  %v210_v28 = vld [vmem:[%s6355_s12 + $0x288] sm:$0xff] }
  0x9d   : > { %v4307_v30 = vmul.f32 %v3283_v22, %v3283_v22  ;;  %v1248_v22 = vadd.s32 752, %v6360_v2  ;;  %vm2274_vm13 = vcmp.lt.s32.totalorder %v1247_v17, %v6363_v4 }
  0x9e   : > { %v5318_v38 = vadd.f32 %v5317_v33, %v4294_v27  ;;  %v3284_v27 = vsel %vm2260_vm15, %v208_v18, 0.0  ;;  %v211_v33 = vld [vmem:[%s6355_s12 + $0x290] sm:$0xff] }
  0x9f   : > { %v4308_v35 = vmul.f32 %v3284_v27, %v3284_v27  ;;  %v1249_v27 = vadd.s32 760, %v6360_v2  ;;  %vm2275_vm14 = vcmp.lt.s32.totalorder %v1248_v22, %v6363_v4 }
  0xa0   : > { %v5319_v43 = vadd.f32 %v5318_v38, %v4295_v32  ;;  %v3285_v32 = vsel %vm2261_vm0, %v209_v23, 0.0  ;;  %v212_v38 = vld [vmem:[%s6355_s12 + $0x298] sm:$0xff] }
  0xa1   : > { %v4309_v40 = vmul.f32 %v3285_v32, %v3285_v32  ;;  %v1250_v32 = vadd.s32 768, %v6360_v2  ;;  %vm2276_vm15 = vcmp.lt.s32.totalorder %v1249_v27, %v6363_v4 }
  0xa2   : > { %v5320_v48 = vadd.f32 %v5319_v43, %v4296_v37  ;;  %v3286_v37 = vsel %vm2262_vm1, %v210_v28, 0.0  ;;  %v213_v43 = vld [vmem:[%s6355_s12 + $0x2a0] sm:$0xff] }
  0xa3   : > { %v4310_v45 = vmul.f32 %v3286_v37, %v3286_v37  ;;  %v1251_v37 = vadd.s32 776, %v6360_v2  ;;  %vm2277_vm0 = vcmp.lt.s32.totalorder %v1250_v32, %v6363_v4 }
  0xa4   : > { %v5321_v53 = vadd.f32 %v5320_v48, %v4297_v42  ;;  %v3287_v42 = vsel %vm2263_vm2, %v211_v33, 0.0  ;;  %v214_v48 = vld [vmem:[%s6355_s12 + $0x2a8] sm:$0xff] }
  0xa5   : > { %v4311_v50 = vmul.f32 %v3287_v42, %v3287_v42  ;;  %v1252_v42 = vadd.s32 784, %v6360_v2  ;;  %vm2278_vm1 = vcmp.lt.s32.totalorder %v1251_v37, %v6363_v4 }
  0xa6   : > { %v5322_v58 = vadd.f32 %v5321_v53, %v4298_v47  ;;  %v3288_v47 = vsel %vm2264_vm3, %v212_v38, 0.0  ;;  %v215_v53 = vld [vmem:[%s6355_s12 + $0x2b0] sm:$0xff] }
  0xa7   : > { %v4312_v55 = vmul.f32 %v3288_v47, %v3288_v47  ;;  %v1253_v47 = vadd.s32 792, %v6360_v2  ;;  %vm2279_vm2 = vcmp.lt.s32.totalorder %v1252_v42, %v6363_v4 }
  0xa8   : > { %v5323_v63 = vadd.f32 %v5322_v58, %v4299_v52  ;;  %v3289_v52 = vsel %vm2265_vm4, %v213_v43, 0.0  ;;  %v216_v58 = vld [vmem:[%s6355_s12 + $0x2b8] sm:$0xff] }
  0xa9   : > { %v4313_v60 = vmul.f32 %v3289_v52, %v3289_v52  ;;  %v1254_v52 = vadd.s32 800, %v6360_v2  ;;  %vm2280_vm3 = vcmp.lt.s32.totalorder %v1253_v47, %v6363_v4 }
  0xaa   : > { %v5324_v6 = vadd.f32 %v5323_v63, %v4300_v57  ;;  %v3290_v57 = vsel %vm2266_vm5, %v214_v48, 0.0  ;;  %v217_v63 = vld [vmem:[%s6355_s12 + $0x2c0] sm:$0xff] }
  0xab   : > { %v4314_v1 = vmul.f32 %v3290_v57, %v3290_v57  ;;  %v1255_v57 = vadd.s32 808, %v6360_v2  ;;  %vm2281_vm4 = vcmp.lt.s32.totalorder %v1254_v52, %v6363_v4 }
  0xac   : > { %v5325_v11 = vadd.f32 %v5324_v6, %v4301_v62  ;;  %v3291_v62 = vsel %vm2267_vm6, %v215_v53, 0.0  ;;  %v218_v6 = vld [vmem:[%s6355_s12 + $0x2c8] sm:$0xff] }
  0xad   : > { %v4315_v8 = vmul.f32 %v3291_v62, %v3291_v62  ;;  %v1256_v62 = vadd.s32 816, %v6360_v2  ;;  %vm2282_vm5 = vcmp.lt.s32.totalorder %v1255_v57, %v6363_v4 }
  0xae   : > { %v5326_v16 = vadd.f32 %v5325_v11, %v4302_v5  ;;  %v3292_v5 = vsel %vm2268_vm7, %v216_v58, 0.0  ;;  %v219_v11 = vld [vmem:[%s6355_s12 + $0x2d0] sm:$0xff] }
  0xaf   : > { %v4316_v13 = vmul.f32 %v3292_v5, %v3292_v5  ;;  %v1257_v5 = vadd.s32 824, %v6360_v2  ;;  %vm2283_vm6 = vcmp.lt.s32.totalorder %v1256_v62, %v6363_v4 }
  0xb0   : > { %v5327_v21 = vadd.f32 %v5326_v16, %v4303_v10  ;;  %v3293_v10 = vsel %vm2269_vm8, %v217_v63, 0.0  ;;  %v220_v16 = vld [vmem:[%s6355_s12 + $0x2d8] sm:$0xff] }
  0xb1   : > { %v4317_v18 = vmul.f32 %v3293_v10, %v3293_v10  ;;  %v1258_v10 = vadd.s32 832, %v6360_v2  ;;  %vm2284_vm7 = vcmp.lt.s32.totalorder %v1257_v5, %v6363_v4 }
  0xb2   : > { %v5328_v26 = vadd.f32 %v5327_v21, %v4304_v15  ;;  %v3294_v15 = vsel %vm2270_vm9, %v218_v6, 0.0  ;;  %v221_v21 = vld [vmem:[%s6355_s12 + $0x2e0] sm:$0xff] }
  0xb3   : > { %v4318_v23 = vmul.f32 %v3294_v15, %v3294_v15  ;;  %v1259_v15 = vadd.s32 840, %v6360_v2  ;;  %vm2285_vm8 = vcmp.lt.s32.totalorder %v1258_v10, %v6363_v4 }
  0xb4   : > { %v5329_v31 = vadd.f32 %v5328_v26, %v4305_v20  ;;  %v3295_v20 = vsel %vm2271_vm10, %v219_v11, 0.0  ;;  %v222_v26 = vld [vmem:[%s6355_s12 + $0x2e8] sm:$0xff] }
  0xb5   : > { %v4319_v28 = vmul.f32 %v3295_v20, %v3295_v20  ;;  %v1260_v20 = vadd.s32 848, %v6360_v2  ;;  %vm2286_vm9 = vcmp.lt.s32.totalorder %v1259_v15, %v6363_v4 }
  0xb6   : > { %v5330_v36 = vadd.f32 %v5329_v31, %v4306_v25  ;;  %v3296_v25 = vsel %vm2272_vm11, %v220_v16, 0.0  ;;  %v223_v31 = vld [vmem:[%s6355_s12 + $0x2f0] sm:$0xff] }
  0xb7   : > { %v4320_v33 = vmul.f32 %v3296_v25, %v3296_v25  ;;  %v1261_v25 = vadd.s32 856, %v6360_v2  ;;  %vm2287_vm10 = vcmp.lt.s32.totalorder %v1260_v20, %v6363_v4 }
  0xb8   : > { %v5331_v41 = vadd.f32 %v5330_v36, %v4307_v30  ;;  %v3297_v30 = vsel %vm2273_vm12, %v221_v21, 0.0  ;;  %v224_v36 = vld [vmem:[%s6355_s12 + $0x2f8] sm:$0xff] }
  0xb9   : > { %v4321_v38 = vmul.f32 %v3297_v30, %v3297_v30  ;;  %v1262_v30 = vadd.s32 864, %v6360_v2  ;;  %vm2288_vm11 = vcmp.lt.s32.totalorder %v1261_v25, %v6363_v4 }
  0xba   : > { %v5332_v46 = vadd.f32 %v5331_v41, %v4308_v35  ;;  %v3298_v35 = vsel %vm2274_vm13, %v222_v26, 0.0  ;;  %v225_v41 = vld [vmem:[%s6355_s12 + $0x300] sm:$0xff] }
  0xbb   : > { %v4322_v43 = vmul.f32 %v3298_v35, %v3298_v35  ;;  %v1263_v35 = vadd.s32 872, %v6360_v2  ;;  %vm2289_vm12 = vcmp.lt.s32.totalorder %v1262_v30, %v6363_v4 }
  0xbc   : > { %v5333_v51 = vadd.f32 %v5332_v46, %v4309_v40  ;;  %v3299_v40 = vsel %vm2275_vm14, %v223_v31, 0.0  ;;  %v226_v46 = vld [vmem:[%s6355_s12 + $0x308] sm:$0xff] }
  0xbd   : > { %v4323_v48 = vmul.f32 %v3299_v40, %v3299_v40  ;;  %v1264_v40 = vadd.s32 880, %v6360_v2  ;;  %vm2290_vm13 = vcmp.lt.s32.totalorder %v1263_v35, %v6363_v4 }
  0xbe   : > { %v5334_v56 = vadd.f32 %v5333_v51, %v4310_v45  ;;  %v3300_v45 = vsel %vm2276_vm15, %v224_v36, 0.0  ;;  %v227_v51 = vld [vmem:[%s6355_s12 + $0x310] sm:$0xff] }
  0xbf   : > { %v4324_v53 = vmul.f32 %v3300_v45, %v3300_v45  ;;  %v1265_v45 = vadd.s32 888, %v6360_v2  ;;  %vm2291_vm14 = vcmp.lt.s32.totalorder %v1264_v40, %v6363_v4 }
  0xc0   : > { %v5335_v61 = vadd.f32 %v5334_v56, %v4311_v50  ;;  %v3301_v50 = vsel %vm2277_vm0, %v225_v41, 0.0  ;;  %v228_v56 = vld [vmem:[%s6355_s12 + $0x318] sm:$0xff] }
  0xc1   : > { %v4325_v58 = vmul.f32 %v3301_v50, %v3301_v50  ;;  %v1266_v50 = vadd.s32 896, %v6360_v2  ;;  %vm2292_vm15 = vcmp.lt.s32.totalorder %v1265_v45, %v6363_v4 }
  0xc2   : > { %v5336_v3 = vadd.f32 %v5335_v61, %v4312_v55  ;;  %v3302_v55 = vsel %vm2278_vm1, %v226_v46, 0.0  ;;  %v229_v61 = vld [vmem:[%s6355_s12 + $0x320] sm:$0xff] }
  0xc3   : > { %v4326_v63 = vmul.f32 %v3302_v55, %v3302_v55  ;;  %v1267_v55 = vadd.s32 904, %v6360_v2  ;;  %vm2293_vm0 = vcmp.lt.s32.totalorder %v1266_v50, %v6363_v4 }
  0xc4   : > { %v5337_v9 = vadd.f32 %v5336_v3, %v4313_v60  ;;  %v3303_v60 = vsel %vm2279_vm2, %v227_v51, 0.0  ;;  %v230_v3 = vld [vmem:[%s6355_s12 + $0x328] sm:$0xff] }
  0xc5   : > { %v4327_v6 = vmul.f32 %v3303_v60, %v3303_v60  ;;  %v1268_v60 = vadd.s32 912, %v6360_v2  ;;  %vm2294_vm1 = vcmp.lt.s32.totalorder %v1267_v55, %v6363_v4 }
  0xc6   : > { %v5338_v14 = vadd.f32 %v5337_v9, %v4314_v1  ;;  %v3304_v1 = vsel %vm2280_vm3, %v228_v56, 0.0  ;;  %v231_v9 = vld [vmem:[%s6355_s12 + $0x330] sm:$0xff] }
  0xc7   : > { %v4328_v11 = vmul.f32 %v3304_v1, %v3304_v1  ;;  %v1269_v1 = vadd.s32 920, %v6360_v2  ;;  %vm2295_vm2 = vcmp.lt.s32.totalorder %v1268_v60, %v6363_v4 }
  0xc8   : > { %v5339_v19 = vadd.f32 %v5338_v14, %v4315_v8  ;;  %v3305_v8 = vsel %vm2281_vm4, %v229_v61, 0.0  ;;  %v232_v14 = vld [vmem:[%s6355_s12 + $0x338] sm:$0xff] }
  0xc9   : > { %v4329_v16 = vmul.f32 %v3305_v8, %v3305_v8  ;;  %v1270_v8 = vadd.s32 928, %v6360_v2  ;;  %vm2296_vm3 = vcmp.lt.s32.totalorder %v1269_v1, %v6363_v4 }
  0xca   : > { %v5340_v24 = vadd.f32 %v5339_v19, %v4316_v13  ;;  %v3306_v13 = vsel %vm2282_vm5, %v230_v3, 0.0  ;;  %v233_v19 = vld [vmem:[%s6355_s12 + $0x340] sm:$0xff] }
  0xcb   : > { %v4330_v21 = vmul.f32 %v3306_v13, %v3306_v13  ;;  %v1271_v13 = vadd.s32 936, %v6360_v2  ;;  %vm2297_vm4 = vcmp.lt.s32.totalorder %v1270_v8, %v6363_v4 }
  0xcc   : > { %v5341_v29 = vadd.f32 %v5340_v24, %v4317_v18  ;;  %v3307_v18 = vsel %vm2283_vm6, %v231_v9, 0.0  ;;  %v234_v24 = vld [vmem:[%s6355_s12 + $0x348] sm:$0xff] }
  0xcd   : > { %v4331_v26 = vmul.f32 %v3307_v18, %v3307_v18  ;;  %v1272_v18 = vadd.s32 944, %v6360_v2  ;;  %vm2298_vm5 = vcmp.lt.s32.totalorder %v1271_v13, %v6363_v4 }
  0xce   : > { %v5342_v34 = vadd.f32 %v5341_v29, %v4318_v23  ;;  %v3308_v23 = vsel %vm2284_vm7, %v232_v14, 0.0  ;;  %v235_v29 = vld [vmem:[%s6355_s12 + $0x350] sm:$0xff] }
  0xcf   : > { %v4332_v31 = vmul.f32 %v3308_v23, %v3308_v23  ;;  %v1273_v23 = vadd.s32 952, %v6360_v2  ;;  %vm2299_vm6 = vcmp.lt.s32.totalorder %v1272_v18, %v6363_v4 }
  0xd0   : > { %v5343_v39 = vadd.f32 %v5342_v34, %v4319_v28  ;;  %v3309_v28 = vsel %vm2285_vm8, %v233_v19, 0.0  ;;  %v236_v34 = vld [vmem:[%s6355_s12 + $0x358] sm:$0xff] }
  0xd1   : > { %v4333_v36 = vmul.f32 %v3309_v28, %v3309_v28  ;;  %v1274_v28 = vadd.s32 960, %v6360_v2  ;;  %vm2300_vm7 = vcmp.lt.s32.totalorder %v1273_v23, %v6363_v4 }
  0xd2   : > { %v5344_v44 = vadd.f32 %v5343_v39, %v4320_v33  ;;  %v3310_v33 = vsel %vm2286_vm9, %v234_v24, 0.0  ;;  %v237_v39 = vld [vmem:[%s6355_s12 + $0x360] sm:$0xff] }
  0xd3   : > { %v4334_v41 = vmul.f32 %v3310_v33, %v3310_v33  ;;  %v1275_v33 = vadd.s32 968, %v6360_v2  ;;  %vm2301_vm8 = vcmp.lt.s32.totalorder %v1274_v28, %v6363_v4 }
  0xd4   : > { %v5345_v49 = vadd.f32 %v5344_v44, %v4321_v38  ;;  %v3311_v38 = vsel %vm2287_vm10, %v235_v29, 0.0  ;;  %v238_v44 = vld [vmem:[%s6355_s12 + $0x368] sm:$0xff] }
  0xd5   : > { %v4335_v46 = vmul.f32 %v3311_v38, %v3311_v38  ;;  %v1276_v38 = vadd.s32 976, %v6360_v2  ;;  %vm2302_vm9 = vcmp.lt.s32.totalorder %v1275_v33, %v6363_v4 }
  0xd6   : > { %v5346_v54 = vadd.f32 %v5345_v49, %v4322_v43  ;;  %v3312_v43 = vsel %vm2288_vm11, %v236_v34, 0.0  ;;  %v239_v49 = vld [vmem:[%s6355_s12 + $0x370] sm:$0xff] }
  0xd7   : > { %v4336_v51 = vmul.f32 %v3312_v43, %v3312_v43  ;;  %v1277_v43 = vadd.s32 984, %v6360_v2  ;;  %vm2303_vm10 = vcmp.lt.s32.totalorder %v1276_v38, %v6363_v4 }
  0xd8   : > { %v5347_v59 = vadd.f32 %v5346_v54, %v4323_v48  ;;  %v3313_v48 = vsel %vm2289_vm12, %v237_v39, 0.0  ;;  %v240_v54 = vld [vmem:[%s6355_s12 + $0x378] sm:$0xff] }
  0xd9   : > { %v4337_v56 = vmul.f32 %v3313_v48, %v3313_v48  ;;  %v1278_v48 = vadd.s32 992, %v6360_v2  ;;  %vm2304_vm11 = vcmp.lt.s32.totalorder %v1277_v43, %v6363_v4 }
  0xda   : > { %v5348_v0 = vadd.f32 %v5347_v59, %v4324_v53  ;;  %v3314_v53 = vsel %vm2290_vm13, %v238_v44, 0.0  ;;  %v241_v59 = vld [vmem:[%s6355_s12 + $0x380] sm:$0xff] }
  0xdb   : > { %v4338_v61 = vmul.f32 %v3314_v53, %v3314_v53  ;;  %v1279_v53 = vadd.s32 1000, %v6360_v2  ;;  %vm2305_vm12 = vcmp.lt.s32.totalorder %v1278_v48, %v6363_v4 }
  0xdc   : > { %v5349_v7 = vadd.f32 %v5348_v0, %v4325_v58  ;;  %v3315_v58 = vsel %vm2291_vm14, %v239_v49, 0.0  ;;  %v242_v0 = vld [vmem:[%s6355_s12 + $0x388] sm:$0xff] }
  0xdd   : > { %v4339_v3 = vmul.f32 %v3315_v58, %v3315_v58  ;;  %v1280_v58 = vadd.s32 1008, %v6360_v2  ;;  %vm2306_vm13 = vcmp.lt.s32.totalorder %v1279_v53, %v6363_v4 }
  0xde   : > { %v5350_v12 = vadd.f32 %v5349_v7, %v4326_v63  ;;  %v3316_v63 = vsel %vm2292_vm15, %v240_v54, 0.0  ;;  %v243_v7 = vld [vmem:[%s6355_s12 + $0x390] sm:$0xff] }
  0xdf   : > { %v4340_v9 = vmul.f32 %v3316_v63, %v3316_v63  ;;  %v1281_v63 = vadd.s32 1016, %v6360_v2  ;;  %vm2307_vm14 = vcmp.lt.s32.totalorder %v1280_v58, %v6363_v4 }
  0xe0   : > { %v5351_v17 = vadd.f32 %v5350_v12, %v4327_v6  ;;  %v3317_v6 = vsel %vm2293_vm0, %v241_v59, 0.0  ;;  %v244_v12 = vld [vmem:[%s6355_s12 + $0x398] sm:$0xff] }
  0xe1   : > { %v4341_v14 = vmul.f32 %v3317_v6, %v3317_v6  ;;  %v1282_v6 = vadd.s32 1024, %v6360_v2  ;;  %vm2308_vm15 = vcmp.lt.s32.totalorder %v1281_v63, %v6363_v4 }
  0xe2   : > { %v5352_v22 = vadd.f32 %v5351_v17, %v4328_v11  ;;  %v3318_v11 = vsel %vm2294_vm1, %v242_v0, 0.0  ;;  %v245_v17 = vld [vmem:[%s6355_s12 + $0x3a0] sm:$0xff] }
  0xe3   : > { %v4342_v19 = vmul.f32 %v3318_v11, %v3318_v11  ;;  %v1283_v11 = vadd.s32 1032, %v6360_v2  ;;  %vm2309_vm0 = vcmp.lt.s32.totalorder %v1282_v6, %v6363_v4 }
  0xe4   : > { %v5353_v27 = vadd.f32 %v5352_v22, %v4329_v16  ;;  %v3319_v16 = vsel %vm2295_vm2, %v243_v7, 0.0  ;;  %v246_v22 = vld [vmem:[%s6355_s12 + $0x3a8] sm:$0xff] }
  0xe5   : > { %v4343_v24 = vmul.f32 %v3319_v16, %v3319_v16  ;;  %v1284_v16 = vadd.s32 1040, %v6360_v2  ;;  %vm2310_vm1 = vcmp.lt.s32.totalorder %v1283_v11, %v6363_v4 }
  0xe6   : > { %v5354_v32 = vadd.f32 %v5353_v27, %v4330_v21  ;;  %v3320_v21 = vsel %vm2296_vm3, %v244_v12, 0.0  ;;  %v247_v27 = vld [vmem:[%s6355_s12 + $0x3b0] sm:$0xff] }
  0xe7   : > { %v4344_v29 = vmul.f32 %v3320_v21, %v3320_v21  ;;  %v1285_v21 = vadd.s32 1048, %v6360_v2  ;;  %vm2311_vm2 = vcmp.lt.s32.totalorder %v1284_v16, %v6363_v4 }
  0xe8   : > { %v5355_v37 = vadd.f32 %v5354_v32, %v4331_v26  ;;  %v3321_v26 = vsel %vm2297_vm4, %v245_v17, 0.0  ;;  %v248_v32 = vld [vmem:[%s6355_s12 + $0x3b8] sm:$0xff] }
  0xe9   : > { %v4345_v34 = vmul.f32 %v3321_v26, %v3321_v26  ;;  %v1286_v26 = vadd.s32 1056, %v6360_v2  ;;  %vm2312_vm3 = vcmp.lt.s32.totalorder %v1285_v21, %v6363_v4 }
  0xea   : > { %v5356_v42 = vadd.f32 %v5355_v37, %v4332_v31  ;;  %v3322_v31 = vsel %vm2298_vm5, %v246_v22, 0.0  ;;  %v249_v37 = vld [vmem:[%s6355_s12 + $0x3c0] sm:$0xff] }
  0xeb   : > { %v4346_v39 = vmul.f32 %v3322_v31, %v3322_v31  ;;  %v1287_v31 = vadd.s32 1064, %v6360_v2  ;;  %vm2313_vm4 = vcmp.lt.s32.totalorder %v1286_v26, %v6363_v4 }
  0xec   : > { %v5357_v47 = vadd.f32 %v5356_v42, %v4333_v36  ;;  %v3323_v36 = vsel %vm2299_vm6, %v247_v27, 0.0  ;;  %v250_v42 = vld [vmem:[%s6355_s12 + $0x3c8] sm:$0xff] }
  0xed   : > { %v4347_v44 = vmul.f32 %v3323_v36, %v3323_v36  ;;  %v1288_v36 = vadd.s32 1072, %v6360_v2  ;;  %vm2314_vm5 = vcmp.lt.s32.totalorder %v1287_v31, %v6363_v4 }
  0xee   : > { %v5358_v52 = vadd.f32 %v5357_v47, %v4334_v41  ;;  %v3324_v41 = vsel %vm2300_vm7, %v248_v32, 0.0  ;;  %v251_v47 = vld [vmem:[%s6355_s12 + $0x3d0] sm:$0xff] }
  0xef   : > { %v4348_v49 = vmul.f32 %v3324_v41, %v3324_v41  ;;  %v1289_v41 = vadd.s32 1080, %v6360_v2  ;;  %vm2315_vm6 = vcmp.lt.s32.totalorder %v1288_v36, %v6363_v4 }
  0xf0   : > { %v5359_v57 = vadd.f32 %v5358_v52, %v4335_v46  ;;  %v3325_v46 = vsel %vm2301_vm8, %v249_v37, 0.0  ;;  %v252_v52 = vld [vmem:[%s6355_s12 + $0x3d8] sm:$0xff] }
  0xf1   : > { %v4349_v54 = vmul.f32 %v3325_v46, %v3325_v46  ;;  %v1290_v46 = vadd.s32 1088, %v6360_v2  ;;  %vm2316_vm7 = vcmp.lt.s32.totalorder %v1289_v41, %v6363_v4 }
  0xf2   : > { %v5360_v62 = vadd.f32 %v5359_v57, %v4336_v51  ;;  %v3326_v51 = vsel %vm2302_vm9, %v250_v42, 0.0  ;;  %v253_v57 = vld [vmem:[%s6355_s12 + $0x3e0] sm:$0xff] }
  0xf3   : > { %v4350_v59 = vmul.f32 %v3326_v51, %v3326_v51  ;;  %v1291_v51 = vadd.s32 1096, %v6360_v2  ;;  %vm2317_vm8 = vcmp.lt.s32.totalorder %v1290_v46, %v6363_v4 }
  0xf4   : > { %v5361_v5 = vadd.f32 %v5360_v62, %v4337_v56  ;;  %v3327_v56 = vsel %vm2303_vm10, %v251_v47, 0.0  ;;  %v254_v62 = vld [vmem:[%s6355_s12 + $0x3e8] sm:$0xff] }
  0xf5   : > { %v4351_v0 = vmul.f32 %v3327_v56, %v3327_v56  ;;  %v1292_v56 = vadd.s32 1104, %v6360_v2  ;;  %vm2318_vm9 = vcmp.lt.s32.totalorder %v1291_v51, %v6363_v4 }
  0xf6   : > { %v5362_v10 = vadd.f32 %v5361_v5, %v4338_v61  ;;  %v3328_v61 = vsel %vm2304_vm11, %v252_v52, 0.0  ;;  %v255_v5 = vld [vmem:[%s6355_s12 + $0x3f0] sm:$0xff] }
  0xf7   : > { %v4352_v7 = vmul.f32 %v3328_v61, %v3328_v61  ;;  %v1293_v61 = vadd.s32 1112, %v6360_v2  ;;  %vm2319_vm10 = vcmp.lt.s32.totalorder %v1292_v56, %v6363_v4 }
  0xf8   : > { %v5363_v15 = vadd.f32 %v5362_v10, %v4339_v3  ;;  %v3329_v3 = vsel %vm2305_vm12, %v253_v57, 0.0  ;;  %v256_v10 = vld [vmem:[%s6355_s12 + $0x3f8] sm:$0xff] }
  0xf9   : > { %v4353_v12 = vmul.f32 %v3329_v3, %v3329_v3  ;;  %v1294_v3 = vadd.s32 1120, %v6360_v2  ;;  %vm2320_vm11 = vcmp.lt.s32.totalorder %v1293_v61, %v6363_v4 }
  0xfa   : > { %v5364_v20 = vadd.f32 %v5363_v15, %v4340_v9  ;;  %v3330_v9 = vsel %vm2306_vm13, %v254_v62, 0.0  ;;  %v257_v15 = vld [vmem:[%s6355_s12 + $0x400] sm:$0xff] }
  0xfb   : > { %v4354_v17 = vmul.f32 %v3330_v9, %v3330_v9  ;;  %v1295_v9 = vadd.s32 1128, %v6360_v2  ;;  %vm2321_vm12 = vcmp.lt.s32.totalorder %v1294_v3, %v6363_v4 }
  0xfc   : > { %v5365_v25 = vadd.f32 %v5364_v20, %v4341_v14  ;;  %v3331_v14 = vsel %vm2307_vm14, %v255_v5, 0.0  ;;  %v258_v20 = vld [vmem:[%s6355_s12 + $0x408] sm:$0xff] }
  0xfd   : > { %v4355_v22 = vmul.f32 %v3331_v14, %v3331_v14  ;;  %v1296_v14 = vadd.s32 1136, %v6360_v2  ;;  %vm2322_vm13 = vcmp.lt.s32.totalorder %v1295_v9, %v6363_v4 }
  0xfe   : > { %v5366_v30 = vadd.f32 %v5365_v25, %v4342_v19  ;;  %v3332_v19 = vsel %vm2308_vm15, %v256_v10, 0.0  ;;  %v259_v25 = vld [vmem:[%s6355_s12 + $0x410] sm:$0xff] }
  0xff   : > { %v4356_v27 = vmul.f32 %v3332_v19, %v3332_v19  ;;  %v1297_v19 = vadd.s32 1144, %v6360_v2  ;;  %vm2323_vm14 = vcmp.lt.s32.totalorder %v1296_v14, %v6363_v4 }
 0x100   : > { %v5367_v35 = vadd.f32 %v5366_v30, %v4343_v24  ;;  %v3333_v24 = vsel %vm2309_vm0, %v257_v15, 0.0  ;;  %v260_v30 = vld [vmem:[%s6355_s12 + $0x418] sm:$0xff] }
 0x101   : > { %v4357_v32 = vmul.f32 %v3333_v24, %v3333_v24  ;;  %v1298_v24 = vadd.s32 1152, %v6360_v2  ;;  %vm2324_vm15 = vcmp.lt.s32.totalorder %v1297_v19, %v6363_v4 }
 0x102   : > { %v5368_v40 = vadd.f32 %v5367_v35, %v4344_v29  ;;  %v3334_v29 = vsel %vm2310_vm1, %v258_v20, 0.0  ;;  %v261_v35 = vld [vmem:[%s6355_s12 + $0x420] sm:$0xff] }
 0x103   : > { %v4358_v37 = vmul.f32 %v3334_v29, %v3334_v29  ;;  %v1299_v29 = vadd.s32 1160, %v6360_v2  ;;  %vm2325_vm0 = vcmp.lt.s32.totalorder %v1298_v24, %v6363_v4 }
 0x104   : > { %v5369_v45 = vadd.f32 %v5368_v40, %v4345_v34  ;;  %v3335_v34 = vsel %vm2311_vm2, %v259_v25, 0.0  ;;  %v262_v40 = vld [vmem:[%s6355_s12 + $0x428] sm:$0xff] }
 0x105   : > { %v4359_v42 = vmul.f32 %v3335_v34, %v3335_v34  ;;  %v1300_v34 = vadd.s32 1168, %v6360_v2  ;;  %vm2326_vm1 = vcmp.lt.s32.totalorder %v1299_v29, %v6363_v4 }
 0x106   : > { %v5370_v50 = vadd.f32 %v5369_v45, %v4346_v39  ;;  %v3336_v39 = vsel %vm2312_vm3, %v260_v30, 0.0  ;;  %v263_v45 = vld [vmem:[%s6355_s12 + $0x430] sm:$0xff] }
 0x107   : > { %v4360_v47 = vmul.f32 %v3336_v39, %v3336_v39  ;;  %v1301_v39 = vadd.s32 1176, %v6360_v2  ;;  %vm2327_vm2 = vcmp.lt.s32.totalorder %v1300_v34, %v6363_v4 }
 0x108   : > { %v5371_v55 = vadd.f32 %v5370_v50, %v4347_v44  ;;  %v3337_v44 = vsel %vm2313_vm4, %v261_v35, 0.0  ;;  %v264_v50 = vld [vmem:[%s6355_s12 + $0x438] sm:$0xff] }
 0x109   : > { %v4361_v52 = vmul.f32 %v3337_v44, %v3337_v44  ;;  %v1302_v44 = vadd.s32 1184, %v6360_v2  ;;  %vm2328_vm3 = vcmp.lt.s32.totalorder %v1301_v39, %v6363_v4 }
 0x10a   : > { %v5372_v60 = vadd.f32 %v5371_v55, %v4348_v49  ;;  %v3338_v49 = vsel %vm2314_vm5, %v262_v40, 0.0  ;;  %v265_v55 = vld [vmem:[%s6355_s12 + $0x440] sm:$0xff] }
 0x10b   : > { %v4362_v57 = vmul.f32 %v3338_v49, %v3338_v49  ;;  %v1303_v49 = vadd.s32 1192, %v6360_v2  ;;  %vm2329_vm4 = vcmp.lt.s32.totalorder %v1302_v44, %v6363_v4 }
 0x10c   : > { %v5373_v1 = vadd.f32 %v5372_v60, %v4349_v54  ;;  %v3339_v54 = vsel %vm2315_vm6, %v263_v45, 0.0  ;;  %v266_v60 = vld [vmem:[%s6355_s12 + $0x448] sm:$0xff] }
 0x10d   : > { %v4363_v62 = vmul.f32 %v3339_v54, %v3339_v54  ;;  %v1304_v54 = vadd.s32 1200, %v6360_v2  ;;  %vm2330_vm5 = vcmp.lt.s32.totalorder %v1303_v49, %v6363_v4 }
 0x10e   : > { %v5374_v8 = vadd.f32 %v5373_v1, %v4350_v59  ;;  %v3340_v59 = vsel %vm2316_vm7, %v264_v50, 0.0  ;;  %v267_v1 = vld [vmem:[%s6355_s12 + $0x450] sm:$0xff] }
 0x10f   : > { %v4364_v5 = vmul.f32 %v3340_v59, %v3340_v59  ;;  %v1305_v59 = vadd.s32 1208, %v6360_v2  ;;  %vm2331_vm6 = vcmp.lt.s32.totalorder %v1304_v54, %v6363_v4 }
 0x110   : > { %v5375_v13 = vadd.f32 %v5374_v8, %v4351_v0  ;;  %v3341_v0 = vsel %vm2317_vm8, %v265_v55, 0.0  ;;  %v268_v8 = vld [vmem:[%s6355_s12 + $0x458] sm:$0xff] }
 0x111   : > { %v4365_v10 = vmul.f32 %v3341_v0, %v3341_v0  ;;  %v1306_v0 = vadd.s32 1216, %v6360_v2  ;;  %vm2332_vm7 = vcmp.lt.s32.totalorder %v1305_v59, %v6363_v4 }
 0x112   : > { %v5376_v18 = vadd.f32 %v5375_v13, %v4352_v7  ;;  %v3342_v7 = vsel %vm2318_vm9, %v266_v60, 0.0  ;;  %v269_v13 = vld [vmem:[%s6355_s12 + $0x460] sm:$0xff] }
 0x113   : > { %v4366_v15 = vmul.f32 %v3342_v7, %v3342_v7  ;;  %v1307_v7 = vadd.s32 1224, %v6360_v2  ;;  %vm2333_vm8 = vcmp.lt.s32.totalorder %v1306_v0, %v6363_v4 }
 0x114   : > { %v5377_v23 = vadd.f32 %v5376_v18, %v4353_v12  ;;  %v3343_v12 = vsel %vm2319_vm10, %v267_v1, 0.0  ;;  %v270_v18 = vld [vmem:[%s6355_s12 + $0x468] sm:$0xff] }
 0x115   : > { %v4367_v20 = vmul.f32 %v3343_v12, %v3343_v12  ;;  %v1308_v12 = vadd.s32 1232, %v6360_v2  ;;  %vm2334_vm9 = vcmp.lt.s32.totalorder %v1307_v7, %v6363_v4 }
 0x116   : > { %v5378_v28 = vadd.f32 %v5377_v23, %v4354_v17  ;;  %v3344_v17 = vsel %vm2320_vm11, %v268_v8, 0.0  ;;  %v271_v23 = vld [vmem:[%s6355_s12 + $0x470] sm:$0xff] }
 0x117   : > { %v4368_v25 = vmul.f32 %v3344_v17, %v3344_v17  ;;  %v1309_v17 = vadd.s32 1240, %v6360_v2  ;;  %vm2335_vm10 = vcmp.lt.s32.totalorder %v1308_v12, %v6363_v4 }
 0x118   : > { %v5379_v33 = vadd.f32 %v5378_v28, %v4355_v22  ;;  %v3345_v22 = vsel %vm2321_vm12, %v269_v13, 0.0  ;;  %v272_v28 = vld [vmem:[%s6355_s12 + $0x478] sm:$0xff] }
 0x119   : > { %v4369_v30 = vmul.f32 %v3345_v22, %v3345_v22  ;;  %v1310_v22 = vadd.s32 1248, %v6360_v2  ;;  %vm2336_vm11 = vcmp.lt.s32.totalorder %v1309_v17, %v6363_v4 }
 0x11a   : > { %v5380_v38 = vadd.f32 %v5379_v33, %v4356_v27  ;;  %v3346_v27 = vsel %vm2322_vm13, %v270_v18, 0.0  ;;  %v273_v33 = vld [vmem:[%s6355_s12 + $0x480] sm:$0xff] }
 0x11b   : > { %v4370_v35 = vmul.f32 %v3346_v27, %v3346_v27  ;;  %v1311_v27 = vadd.s32 1256, %v6360_v2  ;;  %vm2337_vm12 = vcmp.lt.s32.totalorder %v1310_v22, %v6363_v4 }
 0x11c   : > { %v5381_v43 = vadd.f32 %v5380_v38, %v4357_v32  ;;  %v3347_v32 = vsel %vm2323_vm14, %v271_v23, 0.0  ;;  %v274_v38 = vld [vmem:[%s6355_s12 + $0x488] sm:$0xff] }
 0x11d   : > { %v4371_v40 = vmul.f32 %v3347_v32, %v3347_v32  ;;  %v1312_v32 = vadd.s32 1264, %v6360_v2  ;;  %vm2338_vm13 = vcmp.lt.s32.totalorder %v1311_v27, %v6363_v4 }
 0x11e   : > { %v5382_v48 = vadd.f32 %v5381_v43, %v4358_v37  ;;  %v3348_v37 = vsel %vm2324_vm15, %v272_v28, 0.0  ;;  %v275_v43 = vld [vmem:[%s6355_s12 + $0x490] sm:$0xff] }
 0x11f   : > { %v4372_v45 = vmul.f32 %v3348_v37, %v3348_v37  ;;  %v1313_v37 = vadd.s32 1272, %v6360_v2  ;;  %vm2339_vm14 = vcmp.lt.s32.totalorder %v1312_v32, %v6363_v4 }
 0x120   : > { %v5383_v53 = vadd.f32 %v5382_v48, %v4359_v42  ;;  %v3349_v42 = vsel %vm2325_vm0, %v273_v33, 0.0  ;;  %v276_v48 = vld [vmem:[%s6355_s12 + $0x498] sm:$0xff] }
 0x121   : > { %v4373_v50 = vmul.f32 %v3349_v42, %v3349_v42  ;;  %v1314_v42 = vadd.s32 1280, %v6360_v2  ;;  %vm2340_vm15 = vcmp.lt.s32.totalorder %v1313_v37, %v6363_v4 }
 0x122   : > { %v5384_v58 = vadd.f32 %v5383_v53, %v4360_v47  ;;  %v3350_v47 = vsel %vm2326_vm1, %v274_v38, 0.0  ;;  %v277_v53 = vld [vmem:[%s6355_s12 + $0x4a0] sm:$0xff] }
 0x123   : > { %v4374_v55 = vmul.f32 %v3350_v47, %v3350_v47  ;;  %v1315_v47 = vadd.s32 1288, %v6360_v2  ;;  %vm2341_vm0 = vcmp.lt.s32.totalorder %v1314_v42, %v6363_v4 }
 0x124   : > { %v5385_v63 = vadd.f32 %v5384_v58, %v4361_v52  ;;  %v3351_v52 = vsel %vm2327_vm2, %v275_v43, 0.0  ;;  %v278_v58 = vld [vmem:[%s6355_s12 + $0x4a8] sm:$0xff] }
 0x125   : > { %v4375_v60 = vmul.f32 %v3351_v52, %v3351_v52  ;;  %v1316_v52 = vadd.s32 1296, %v6360_v2  ;;  %vm2342_vm1 = vcmp.lt.s32.totalorder %v1315_v47, %v6363_v4 }
 0x126   : > { %v5386_v6 = vadd.f32 %v5385_v63, %v4362_v57  ;;  %v3352_v57 = vsel %vm2328_vm3, %v276_v48, 0.0  ;;  %v279_v63 = vld [vmem:[%s6355_s12 + $0x4b0] sm:$0xff] }
 0x127   : > { %v4376_v1 = vmul.f32 %v3352_v57, %v3352_v57  ;;  %v1317_v57 = vadd.s32 1304, %v6360_v2  ;;  %vm2343_vm2 = vcmp.lt.s32.totalorder %v1316_v52, %v6363_v4 }
 0x128   : > { %v5387_v11 = vadd.f32 %v5386_v6, %v4363_v62  ;;  %v3353_v62 = vsel %vm2329_vm4, %v277_v53, 0.0  ;;  %v280_v6 = vld [vmem:[%s6355_s12 + $0x4b8] sm:$0xff] }
 0x129   : > { %v4377_v8 = vmul.f32 %v3353_v62, %v3353_v62  ;;  %v1318_v62 = vadd.s32 1312, %v6360_v2  ;;  %vm2344_vm3 = vcmp.lt.s32.totalorder %v1317_v57, %v6363_v4 }
 0x12a   : > { %v5388_v16 = vadd.f32 %v5387_v11, %v4364_v5  ;;  %v3354_v5 = vsel %vm2330_vm5, %v278_v58, 0.0  ;;  %v281_v11 = vld [vmem:[%s6355_s12 + $0x4c0] sm:$0xff] }
 0x12b   : > { %v4378_v13 = vmul.f32 %v3354_v5, %v3354_v5  ;;  %v1319_v5 = vadd.s32 1320, %v6360_v2  ;;  %vm2345_vm4 = vcmp.lt.s32.totalorder %v1318_v62, %v6363_v4 }
 0x12c   : > { %v5389_v21 = vadd.f32 %v5388_v16, %v4365_v10  ;;  %v3355_v10 = vsel %vm2331_vm6, %v279_v63, 0.0  ;;  %v282_v16 = vld [vmem:[%s6355_s12 + $0x4c8] sm:$0xff] }
 0x12d   : > { %v4379_v18 = vmul.f32 %v3355_v10, %v3355_v10  ;;  %v1320_v10 = vadd.s32 1328, %v6360_v2  ;;  %vm2346_vm5 = vcmp.lt.s32.totalorder %v1319_v5, %v6363_v4 }
 0x12e   : > { %v5390_v26 = vadd.f32 %v5389_v21, %v4366_v15  ;;  %v3356_v15 = vsel %vm2332_vm7, %v280_v6, 0.0  ;;  %v283_v21 = vld [vmem:[%s6355_s12 + $0x4d0] sm:$0xff] }
 0x12f   : > { %v4380_v23 = vmul.f32 %v3356_v15, %v3356_v15  ;;  %v1321_v15 = vadd.s32 1336, %v6360_v2  ;;  %vm2347_vm6 = vcmp.lt.s32.totalorder %v1320_v10, %v6363_v4 }
 0x130   : > { %v5391_v31 = vadd.f32 %v5390_v26, %v4367_v20  ;;  %v3357_v20 = vsel %vm2333_vm8, %v281_v11, 0.0  ;;  %v284_v26 = vld [vmem:[%s6355_s12 + $0x4d8] sm:$0xff] }
 0x131   : > { %v4381_v28 = vmul.f32 %v3357_v20, %v3357_v20  ;;  %v1322_v20 = vadd.s32 1344, %v6360_v2  ;;  %vm2348_vm7 = vcmp.lt.s32.totalorder %v1321_v15, %v6363_v4 }
 0x132   : > { %v5392_v36 = vadd.f32 %v5391_v31, %v4368_v25  ;;  %v3358_v25 = vsel %vm2334_vm9, %v282_v16, 0.0  ;;  %v285_v31 = vld [vmem:[%s6355_s12 + $0x4e0] sm:$0xff] }
 0x133   : > { %v4382_v33 = vmul.f32 %v3358_v25, %v3358_v25  ;;  %v1323_v25 = vadd.s32 1352, %v6360_v2  ;;  %vm2349_vm8 = vcmp.lt.s32.totalorder %v1322_v20, %v6363_v4 }
 0x134   : > { %v5393_v41 = vadd.f32 %v5392_v36, %v4369_v30  ;;  %v3359_v30 = vsel %vm2335_vm10, %v283_v21, 0.0  ;;  %v286_v36 = vld [vmem:[%s6355_s12 + $0x4e8] sm:$0xff] }
 0x135   : > { %v4383_v38 = vmul.f32 %v3359_v30, %v3359_v30  ;;  %v1324_v30 = vadd.s32 1360, %v6360_v2  ;;  %vm2350_vm9 = vcmp.lt.s32.totalorder %v1323_v25, %v6363_v4 }
 0x136   : > { %v5394_v46 = vadd.f32 %v5393_v41, %v4370_v35  ;;  %v3360_v35 = vsel %vm2336_vm11, %v284_v26, 0.0  ;;  %v287_v41 = vld [vmem:[%s6355_s12 + $0x4f0] sm:$0xff] }
 0x137   : > { %v4384_v43 = vmul.f32 %v3360_v35, %v3360_v35  ;;  %v1325_v35 = vadd.s32 1368, %v6360_v2  ;;  %vm2351_vm10 = vcmp.lt.s32.totalorder %v1324_v30, %v6363_v4 }
 0x138   : > { %v5395_v51 = vadd.f32 %v5394_v46, %v4371_v40  ;;  %v3361_v40 = vsel %vm2337_vm12, %v285_v31, 0.0  ;;  %v288_v46 = vld [vmem:[%s6355_s12 + $0x4f8] sm:$0xff] }
 0x139   : > { %v4385_v48 = vmul.f32 %v3361_v40, %v3361_v40  ;;  %v1326_v40 = vadd.s32 1376, %v6360_v2  ;;  %vm2352_vm11 = vcmp.lt.s32.totalorder %v1325_v35, %v6363_v4 }
 0x13a   : > { %v5396_v56 = vadd.f32 %v5395_v51, %v4372_v45  ;;  %v3362_v45 = vsel %vm2338_vm13, %v286_v36, 0.0  ;;  %v289_v51 = vld [vmem:[%s6355_s12 + $0x500] sm:$0xff] }
 0x13b   : > { %v4386_v53 = vmul.f32 %v3362_v45, %v3362_v45  ;;  %v1327_v45 = vadd.s32 1384, %v6360_v2  ;;  %vm2353_vm12 = vcmp.lt.s32.totalorder %v1326_v40, %v6363_v4 }
 0x13c   : > { %v5397_v61 = vadd.f32 %v5396_v56, %v4373_v50  ;;  %v3363_v50 = vsel %vm2339_vm14, %v287_v41, 0.0  ;;  %v290_v56 = vld [vmem:[%s6355_s12 + $0x508] sm:$0xff] }
 0x13d   : > { %v4387_v58 = vmul.f32 %v3363_v50, %v3363_v50  ;;  %v1328_v50 = vadd.s32 1392, %v6360_v2  ;;  %vm2354_vm13 = vcmp.lt.s32.totalorder %v1327_v45, %v6363_v4 }
 0x13e   : > { %v5398_v3 = vadd.f32 %v5397_v61, %v4374_v55  ;;  %v3364_v55 = vsel %vm2340_vm15, %v288_v46, 0.0  ;;  %v291_v61 = vld [vmem:[%s6355_s12 + $0x510] sm:$0xff] }
 0x13f   : > { %v4388_v63 = vmul.f32 %v3364_v55, %v3364_v55  ;;  %v1329_v55 = vadd.s32 1400, %v6360_v2  ;;  %vm2355_vm14 = vcmp.lt.s32.totalorder %v1328_v50, %v6363_v4 }
 0x140   : > { %v5399_v9 = vadd.f32 %v5398_v3, %v4375_v60  ;;  %v3365_v60 = vsel %vm2341_vm0, %v289_v51, 0.0  ;;  %v292_v3 = vld [vmem:[%s6355_s12 + $0x518] sm:$0xff] }
 0x141   : > { %v4389_v6 = vmul.f32 %v3365_v60, %v3365_v60  ;;  %v1330_v60 = vadd.s32 1408, %v6360_v2  ;;  %vm2356_vm15 = vcmp.lt.s32.totalorder %v1329_v55, %v6363_v4 }
 0x142   : > { %v5400_v14 = vadd.f32 %v5399_v9, %v4376_v1  ;;  %v3366_v1 = vsel %vm2342_vm1, %v290_v56, 0.0  ;;  %v293_v9 = vld [vmem:[%s6355_s12 + $0x520] sm:$0xff] }
 0x143   : > { %v4390_v11 = vmul.f32 %v3366_v1, %v3366_v1  ;;  %v1331_v1 = vadd.s32 1416, %v6360_v2  ;;  %vm2357_vm0 = vcmp.lt.s32.totalorder %v1330_v60, %v6363_v4 }
 0x144   : > { %v5401_v19 = vadd.f32 %v5400_v14, %v4377_v8  ;;  %v3367_v8 = vsel %vm2343_vm2, %v291_v61, 0.0  ;;  %v294_v14 = vld [vmem:[%s6355_s12 + $0x528] sm:$0xff] }
 0x145   : > { %v4391_v16 = vmul.f32 %v3367_v8, %v3367_v8  ;;  %v1332_v8 = vadd.s32 1424, %v6360_v2  ;;  %vm2358_vm1 = vcmp.lt.s32.totalorder %v1331_v1, %v6363_v4 }
 0x146   : > { %v5402_v24 = vadd.f32 %v5401_v19, %v4378_v13  ;;  %v3368_v13 = vsel %vm2344_vm3, %v292_v3, 0.0  ;;  %v295_v19 = vld [vmem:[%s6355_s12 + $0x530] sm:$0xff] }
 0x147   : > { %v4392_v21 = vmul.f32 %v3368_v13, %v3368_v13  ;;  %v1333_v13 = vadd.s32 1432, %v6360_v2  ;;  %vm2359_vm2 = vcmp.lt.s32.totalorder %v1332_v8, %v6363_v4 }
 0x148   : > { %v5403_v29 = vadd.f32 %v5402_v24, %v4379_v18  ;;  %v3369_v18 = vsel %vm2345_vm4, %v293_v9, 0.0  ;;  %v296_v24 = vld [vmem:[%s6355_s12 + $0x538] sm:$0xff] }
 0x149   : > { %v4393_v26 = vmul.f32 %v3369_v18, %v3369_v18  ;;  %v1334_v18 = vadd.s32 1440, %v6360_v2  ;;  %vm2360_vm3 = vcmp.lt.s32.totalorder %v1333_v13, %v6363_v4 }
 0x14a   : > { %v5404_v34 = vadd.f32 %v5403_v29, %v4380_v23  ;;  %v3370_v23 = vsel %vm2346_vm5, %v294_v14, 0.0  ;;  %v297_v29 = vld [vmem:[%s6355_s12 + $0x540] sm:$0xff] }
 0x14b   : > { %v4394_v31 = vmul.f32 %v3370_v23, %v3370_v23  ;;  %v1335_v23 = vadd.s32 1448, %v6360_v2  ;;  %vm2361_vm4 = vcmp.lt.s32.totalorder %v1334_v18, %v6363_v4 }
 0x14c   : > { %v5405_v39 = vadd.f32 %v5404_v34, %v4381_v28  ;;  %v3371_v28 = vsel %vm2347_vm6, %v295_v19, 0.0  ;;  %v298_v34 = vld [vmem:[%s6355_s12 + $0x548] sm:$0xff] }
 0x14d   : > { %v4395_v36 = vmul.f32 %v3371_v28, %v3371_v28  ;;  %v1336_v28 = vadd.s32 1456, %v6360_v2  ;;  %vm2362_vm5 = vcmp.lt.s32.totalorder %v1335_v23, %v6363_v4 }
 0x14e   : > { %v5406_v44 = vadd.f32 %v5405_v39, %v4382_v33  ;;  %v3372_v33 = vsel %vm2348_vm7, %v296_v24, 0.0  ;;  %v299_v39 = vld [vmem:[%s6355_s12 + $0x550] sm:$0xff] }
 0x14f   : > { %v4396_v41 = vmul.f32 %v3372_v33, %v3372_v33  ;;  %v1337_v33 = vadd.s32 1464, %v6360_v2  ;;  %vm2363_vm6 = vcmp.lt.s32.totalorder %v1336_v28, %v6363_v4 }
 0x150   : > { %v5407_v49 = vadd.f32 %v5406_v44, %v4383_v38  ;;  %v3373_v38 = vsel %vm2349_vm8, %v297_v29, 0.0  ;;  %v300_v44 = vld [vmem:[%s6355_s12 + $0x558] sm:$0xff] }
 0x151   : > { %v4397_v46 = vmul.f32 %v3373_v38, %v3373_v38  ;;  %v1338_v38 = vadd.s32 1472, %v6360_v2  ;;  %vm2364_vm7 = vcmp.lt.s32.totalorder %v1337_v33, %v6363_v4 }
 0x152   : > { %v5408_v54 = vadd.f32 %v5407_v49, %v4384_v43  ;;  %v3374_v43 = vsel %vm2350_vm9, %v298_v34, 0.0  ;;  %v301_v49 = vld [vmem:[%s6355_s12 + $0x560] sm:$0xff] }
 0x153   : > { %v4398_v51 = vmul.f32 %v3374_v43, %v3374_v43  ;;  %v1339_v43 = vadd.s32 1480, %v6360_v2  ;;  %vm2365_vm8 = vcmp.lt.s32.totalorder %v1338_v38, %v6363_v4 }
 0x154   : > { %v5409_v59 = vadd.f32 %v5408_v54, %v4385_v48  ;;  %v3375_v48 = vsel %vm2351_vm10, %v299_v39, 0.0  ;;  %v302_v54 = vld [vmem:[%s6355_s12 + $0x568] sm:$0xff] }
 0x155   : > { %v4399_v56 = vmul.f32 %v3375_v48, %v3375_v48  ;;  %v1340_v48 = vadd.s32 1488, %v6360_v2  ;;  %vm2366_vm9 = vcmp.lt.s32.totalorder %v1339_v43, %v6363_v4 }
 0x156   : > { %v5410_v0 = vadd.f32 %v5409_v59, %v4386_v53  ;;  %v3376_v53 = vsel %vm2352_vm11, %v300_v44, 0.0  ;;  %v303_v59 = vld [vmem:[%s6355_s12 + $0x570] sm:$0xff] }
 0x157   : > { %v4400_v61 = vmul.f32 %v3376_v53, %v3376_v53  ;;  %v1341_v53 = vadd.s32 1496, %v6360_v2  ;;  %vm2367_vm10 = vcmp.lt.s32.totalorder %v1340_v48, %v6363_v4 }
 0x158   : > { %v5411_v7 = vadd.f32 %v5410_v0, %v4387_v58  ;;  %v3377_v58 = vsel %vm2353_vm12, %v301_v49, 0.0  ;;  %v304_v0 = vld [vmem:[%s6355_s12 + $0x578] sm:$0xff] }
 0x159   : > { %v4401_v3 = vmul.f32 %v3377_v58, %v3377_v58  ;;  %v1342_v58 = vadd.s32 1504, %v6360_v2  ;;  %vm2368_vm11 = vcmp.lt.s32.totalorder %v1341_v53, %v6363_v4 }
 0x15a   : > { %v5412_v12 = vadd.f32 %v5411_v7, %v4388_v63  ;;  %v3378_v63 = vsel %vm2354_vm13, %v302_v54, 0.0  ;;  %v305_v7 = vld [vmem:[%s6355_s12 + $0x580] sm:$0xff] }
 0x15b   : > { %v4402_v9 = vmul.f32 %v3378_v63, %v3378_v63  ;;  %v1343_v63 = vadd.s32 1512, %v6360_v2  ;;  %vm2369_vm12 = vcmp.lt.s32.totalorder %v1342_v58, %v6363_v4 }
 0x15c   : > { %v5413_v17 = vadd.f32 %v5412_v12, %v4389_v6  ;;  %v3379_v6 = vsel %vm2355_vm14, %v303_v59, 0.0  ;;  %v306_v12 = vld [vmem:[%s6355_s12 + $0x588] sm:$0xff] }
 0x15d   : > { %v4403_v14 = vmul.f32 %v3379_v6, %v3379_v6  ;;  %v1344_v6 = vadd.s32 1520, %v6360_v2  ;;  %vm2370_vm13 = vcmp.lt.s32.totalorder %v1343_v63, %v6363_v4 }
 0x15e   : > { %v5414_v22 = vadd.f32 %v5413_v17, %v4390_v11  ;;  %v3380_v11 = vsel %vm2356_vm15, %v304_v0, 0.0  ;;  %v307_v17 = vld [vmem:[%s6355_s12 + $0x590] sm:$0xff] }
 0x15f   : > { %v4404_v19 = vmul.f32 %v3380_v11, %v3380_v11  ;;  %v1345_v11 = vadd.s32 1528, %v6360_v2  ;;  %vm2371_vm14 = vcmp.lt.s32.totalorder %v1344_v6, %v6363_v4 }
 0x160   : > { %v5415_v27 = vadd.f32 %v5414_v22, %v4391_v16  ;;  %v3381_v16 = vsel %vm2357_vm0, %v305_v7, 0.0  ;;  %v308_v22 = vld [vmem:[%s6355_s12 + $0x598] sm:$0xff] }
 0x161   : > { %v4405_v24 = vmul.f32 %v3381_v16, %v3381_v16  ;;  %v1346_v16 = vadd.s32 1536, %v6360_v2  ;;  %vm2372_vm15 = vcmp.lt.s32.totalorder %v1345_v11, %v6363_v4 }
 0x162   : > { %v5416_v32 = vadd.f32 %v5415_v27, %v4392_v21  ;;  %v3382_v21 = vsel %vm2358_vm1, %v306_v12, 0.0  ;;  %v309_v27 = vld [vmem:[%s6355_s12 + $0x5a0] sm:$0xff] }
 0x163   : > { %v4406_v29 = vmul.f32 %v3382_v21, %v3382_v21  ;;  %v1347_v21 = vadd.s32 1544, %v6360_v2  ;;  %vm2373_vm0 = vcmp.lt.s32.totalorder %v1346_v16, %v6363_v4 }
 0x164   : > { %v5417_v37 = vadd.f32 %v5416_v32, %v4393_v26  ;;  %v3383_v26 = vsel %vm2359_vm2, %v307_v17, 0.0  ;;  %v310_v32 = vld [vmem:[%s6355_s12 + $0x5a8] sm:$0xff] }
 0x165   : > { %v4407_v34 = vmul.f32 %v3383_v26, %v3383_v26  ;;  %v1348_v26 = vadd.s32 1552, %v6360_v2  ;;  %vm2374_vm1 = vcmp.lt.s32.totalorder %v1347_v21, %v6363_v4 }
 0x166   : > { %v5418_v42 = vadd.f32 %v5417_v37, %v4394_v31  ;;  %v3384_v31 = vsel %vm2360_vm3, %v308_v22, 0.0  ;;  %v311_v37 = vld [vmem:[%s6355_s12 + $0x5b0] sm:$0xff] }
 0x167   : > { %v4408_v39 = vmul.f32 %v3384_v31, %v3384_v31  ;;  %v1349_v31 = vadd.s32 1560, %v6360_v2  ;;  %vm2375_vm2 = vcmp.lt.s32.totalorder %v1348_v26, %v6363_v4 }
 0x168   : > { %v5419_v47 = vadd.f32 %v5418_v42, %v4395_v36  ;;  %v3385_v36 = vsel %vm2361_vm4, %v309_v27, 0.0  ;;  %v312_v42 = vld [vmem:[%s6355_s12 + $0x5b8] sm:$0xff] }
 0x169   : > { %v4409_v44 = vmul.f32 %v3385_v36, %v3385_v36  ;;  %v1350_v36 = vadd.s32 1568, %v6360_v2  ;;  %vm2376_vm3 = vcmp.lt.s32.totalorder %v1349_v31, %v6363_v4 }
 0x16a   : > { %v5420_v52 = vadd.f32 %v5419_v47, %v4396_v41  ;;  %v3386_v41 = vsel %vm2362_vm5, %v310_v32, 0.0  ;;  %v313_v47 = vld [vmem:[%s6355_s12 + $0x5c0] sm:$0xff] }
 0x16b   : > { %v4410_v49 = vmul.f32 %v3386_v41, %v3386_v41  ;;  %v1351_v41 = vadd.s32 1576, %v6360_v2  ;;  %vm2377_vm4 = vcmp.lt.s32.totalorder %v1350_v36, %v6363_v4 }
 0x16c   : > { %v5421_v57 = vadd.f32 %v5420_v52, %v4397_v46  ;;  %v3387_v46 = vsel %vm2363_vm6, %v311_v37, 0.0  ;;  %v314_v52 = vld [vmem:[%s6355_s12 + $0x5c8] sm:$0xff] }
 0x16d   : > { %v4411_v54 = vmul.f32 %v3387_v46, %v3387_v46  ;;  %v1352_v46 = vadd.s32 1584, %v6360_v2  ;;  %vm2378_vm5 = vcmp.lt.s32.totalorder %v1351_v41, %v6363_v4 }
 0x16e   : > { %v5422_v62 = vadd.f32 %v5421_v57, %v4398_v51  ;;  %v3388_v51 = vsel %vm2364_vm7, %v312_v42, 0.0  ;;  %v315_v57 = vld [vmem:[%s6355_s12 + $0x5d0] sm:$0xff] }
 0x16f   : > { %v4412_v59 = vmul.f32 %v3388_v51, %v3388_v51  ;;  %v1353_v51 = vadd.s32 1592, %v6360_v2  ;;  %vm2379_vm6 = vcmp.lt.s32.totalorder %v1352_v46, %v6363_v4 }
 0x170   : > { %v5423_v5 = vadd.f32 %v5422_v62, %v4399_v56  ;;  %v3389_v56 = vsel %vm2365_vm8, %v313_v47, 0.0  ;;  %v316_v62 = vld [vmem:[%s6355_s12 + $0x5d8] sm:$0xff] }
 0x171   : > { %v4413_v0 = vmul.f32 %v3389_v56, %v3389_v56  ;;  %v1354_v56 = vadd.s32 1600, %v6360_v2  ;;  %vm2380_vm7 = vcmp.lt.s32.totalorder %v1353_v51, %v6363_v4 }
 0x172   : > { %v5424_v10 = vadd.f32 %v5423_v5, %v4400_v61  ;;  %v3390_v61 = vsel %vm2366_vm9, %v314_v52, 0.0  ;;  %v317_v5 = vld [vmem:[%s6355_s12 + $0x5e0] sm:$0xff] }
 0x173   : > { %v4414_v7 = vmul.f32 %v3390_v61, %v3390_v61  ;;  %v1355_v61 = vadd.s32 1608, %v6360_v2  ;;  %vm2381_vm8 = vcmp.lt.s32.totalorder %v1354_v56, %v6363_v4 }
 0x174   : > { %v5425_v15 = vadd.f32 %v5424_v10, %v4401_v3  ;;  %v3391_v3 = vsel %vm2367_vm10, %v315_v57, 0.0  ;;  %v318_v10 = vld [vmem:[%s6355_s12 + $0x5e8] sm:$0xff] }
 0x175   : > { %v4415_v12 = vmul.f32 %v3391_v3, %v3391_v3  ;;  %v1356_v3 = vadd.s32 1616, %v6360_v2  ;;  %vm2382_vm9 = vcmp.lt.s32.totalorder %v1355_v61, %v6363_v4 }
 0x176   : > { %v5426_v20 = vadd.f32 %v5425_v15, %v4402_v9  ;;  %v3392_v9 = vsel %vm2368_vm11, %v316_v62, 0.0  ;;  %v319_v15 = vld [vmem:[%s6355_s12 + $0x5f0] sm:$0xff] }
 0x177   : > { %v4416_v17 = vmul.f32 %v3392_v9, %v3392_v9  ;;  %v1357_v9 = vadd.s32 1624, %v6360_v2  ;;  %vm2383_vm10 = vcmp.lt.s32.totalorder %v1356_v3, %v6363_v4 }
 0x178   : > { %v5427_v25 = vadd.f32 %v5426_v20, %v4403_v14  ;;  %v3393_v14 = vsel %vm2369_vm12, %v317_v5, 0.0  ;;  %v320_v20 = vld [vmem:[%s6355_s12 + $0x5f8] sm:$0xff] }
 0x179   : > { %v4417_v22 = vmul.f32 %v3393_v14, %v3393_v14  ;;  %v1358_v14 = vadd.s32 1632, %v6360_v2  ;;  %vm2384_vm11 = vcmp.lt.s32.totalorder %v1357_v9, %v6363_v4 }
 0x17a   : > { %v5428_v30 = vadd.f32 %v5427_v25, %v4404_v19  ;;  %v3394_v19 = vsel %vm2370_vm13, %v318_v10, 0.0  ;;  %v321_v25 = vld [vmem:[%s6355_s12 + $0x600] sm:$0xff] }
 0x17b   : > { %v4418_v27 = vmul.f32 %v3394_v19, %v3394_v19  ;;  %v1359_v19 = vadd.s32 1640, %v6360_v2  ;;  %vm2385_vm12 = vcmp.lt.s32.totalorder %v1358_v14, %v6363_v4 }
 0x17c   : > { %v5429_v35 = vadd.f32 %v5428_v30, %v4405_v24  ;;  %v3395_v24 = vsel %vm2371_vm14, %v319_v15, 0.0  ;;  %v322_v30 = vld [vmem:[%s6355_s12 + $0x608] sm:$0xff] }
 0x17d   : > { %v4419_v32 = vmul.f32 %v3395_v24, %v3395_v24  ;;  %v1360_v24 = vadd.s32 1648, %v6360_v2  ;;  %vm2386_vm13 = vcmp.lt.s32.totalorder %v1359_v19, %v6363_v4 }
 0x17e   : > { %v5430_v40 = vadd.f32 %v5429_v35, %v4406_v29  ;;  %v3396_v29 = vsel %vm2372_vm15, %v320_v20, 0.0  ;;  %v323_v35 = vld [vmem:[%s6355_s12 + $0x610] sm:$0xff] }
 0x17f   : > { %v4420_v37 = vmul.f32 %v3396_v29, %v3396_v29  ;;  %v1361_v29 = vadd.s32 1656, %v6360_v2  ;;  %vm2387_vm14 = vcmp.lt.s32.totalorder %v1360_v24, %v6363_v4 }
 0x180   : > { %v5431_v45 = vadd.f32 %v5430_v40, %v4407_v34  ;;  %v3397_v34 = vsel %vm2373_vm0, %v321_v25, 0.0  ;;  %v324_v40 = vld [vmem:[%s6355_s12 + $0x618] sm:$0xff] }
 0x181   : > { %v4421_v42 = vmul.f32 %v3397_v34, %v3397_v34  ;;  %v1362_v34 = vadd.s32 1664, %v6360_v2  ;;  %vm2388_vm15 = vcmp.lt.s32.totalorder %v1361_v29, %v6363_v4 }
 0x182   : > { %v5432_v50 = vadd.f32 %v5431_v45, %v4408_v39  ;;  %v3398_v39 = vsel %vm2374_vm1, %v322_v30, 0.0  ;;  %v325_v45 = vld [vmem:[%s6355_s12 + $0x620] sm:$0xff] }
 0x183   : > { %v4422_v47 = vmul.f32 %v3398_v39, %v3398_v39  ;;  %v1363_v39 = vadd.s32 1672, %v6360_v2  ;;  %vm2389_vm0 = vcmp.lt.s32.totalorder %v1362_v34, %v6363_v4 }
 0x184   : > { %v5433_v55 = vadd.f32 %v5432_v50, %v4409_v44  ;;  %v3399_v44 = vsel %vm2375_vm2, %v323_v35, 0.0  ;;  %v326_v50 = vld [vmem:[%s6355_s12 + $0x628] sm:$0xff] }
 0x185   : > { %v4423_v52 = vmul.f32 %v3399_v44, %v3399_v44  ;;  %v1364_v44 = vadd.s32 1680, %v6360_v2  ;;  %vm2390_vm1 = vcmp.lt.s32.totalorder %v1363_v39, %v6363_v4 }
 0x186   : > { %v5434_v60 = vadd.f32 %v5433_v55, %v4410_v49  ;;  %v3400_v49 = vsel %vm2376_vm3, %v324_v40, 0.0  ;;  %v327_v55 = vld [vmem:[%s6355_s12 + $0x630] sm:$0xff] }
 0x187   : > { %v4424_v57 = vmul.f32 %v3400_v49, %v3400_v49  ;;  %v1365_v49 = vadd.s32 1688, %v6360_v2  ;;  %vm2391_vm2 = vcmp.lt.s32.totalorder %v1364_v44, %v6363_v4 }
 0x188   : > { %v5435_v1 = vadd.f32 %v5434_v60, %v4411_v54  ;;  %v3401_v54 = vsel %vm2377_vm4, %v325_v45, 0.0  ;;  %v328_v60 = vld [vmem:[%s6355_s12 + $0x638] sm:$0xff] }
 0x189   : > { %v4425_v62 = vmul.f32 %v3401_v54, %v3401_v54  ;;  %v1366_v54 = vadd.s32 1696, %v6360_v2  ;;  %vm2392_vm3 = vcmp.lt.s32.totalorder %v1365_v49, %v6363_v4 }
 0x18a   : > { %v5436_v8 = vadd.f32 %v5435_v1, %v4412_v59  ;;  %v3402_v59 = vsel %vm2378_vm5, %v326_v50, 0.0  ;;  %v329_v1 = vld [vmem:[%s6355_s12 + $0x640] sm:$0xff] }
 0x18b   : > { %v4426_v5 = vmul.f32 %v3402_v59, %v3402_v59  ;;  %v1367_v59 = vadd.s32 1704, %v6360_v2  ;;  %vm2393_vm4 = vcmp.lt.s32.totalorder %v1366_v54, %v6363_v4 }
 0x18c   : > { %v5437_v13 = vadd.f32 %v5436_v8, %v4413_v0  ;;  %v3403_v0 = vsel %vm2379_vm6, %v327_v55, 0.0  ;;  %v330_v8 = vld [vmem:[%s6355_s12 + $0x648] sm:$0xff] }
 0x18d   : > { %v4427_v10 = vmul.f32 %v3403_v0, %v3403_v0  ;;  %v1368_v0 = vadd.s32 1712, %v6360_v2  ;;  %vm2394_vm5 = vcmp.lt.s32.totalorder %v1367_v59, %v6363_v4 }
 0x18e   : > { %v5438_v18 = vadd.f32 %v5437_v13, %v4414_v7  ;;  %v3404_v7 = vsel %vm2380_vm7, %v328_v60, 0.0  ;;  %v331_v13 = vld [vmem:[%s6355_s12 + $0x650] sm:$0xff] }
 0x18f   : > { %v4428_v15 = vmul.f32 %v3404_v7, %v3404_v7  ;;  %v1369_v7 = vadd.s32 1720, %v6360_v2  ;;  %vm2395_vm6 = vcmp.lt.s32.totalorder %v1368_v0, %v6363_v4 }
 0x190   : > { %v5439_v23 = vadd.f32 %v5438_v18, %v4415_v12  ;;  %v3405_v12 = vsel %vm2381_vm8, %v329_v1, 0.0  ;;  %v332_v18 = vld [vmem:[%s6355_s12 + $0x658] sm:$0xff] }
 0x191   : > { %v4429_v20 = vmul.f32 %v3405_v12, %v3405_v12  ;;  %v1370_v12 = vadd.s32 1728, %v6360_v2  ;;  %vm2396_vm7 = vcmp.lt.s32.totalorder %v1369_v7, %v6363_v4 }
 0x192   : > { %v5440_v28 = vadd.f32 %v5439_v23, %v4416_v17  ;;  %v3406_v17 = vsel %vm2382_vm9, %v330_v8, 0.0  ;;  %v333_v23 = vld [vmem:[%s6355_s12 + $0x660] sm:$0xff] }
 0x193   : > { %v4430_v25 = vmul.f32 %v3406_v17, %v3406_v17  ;;  %v1371_v17 = vadd.s32 1736, %v6360_v2  ;;  %vm2397_vm8 = vcmp.lt.s32.totalorder %v1370_v12, %v6363_v4 }
 0x194   : > { %v5441_v33 = vadd.f32 %v5440_v28, %v4417_v22  ;;  %v3407_v22 = vsel %vm2383_vm10, %v331_v13, 0.0  ;;  %v334_v28 = vld [vmem:[%s6355_s12 + $0x668] sm:$0xff] }
 0x195   : > { %v4431_v30 = vmul.f32 %v3407_v22, %v3407_v22  ;;  %v1372_v22 = vadd.s32 1744, %v6360_v2  ;;  %vm2398_vm9 = vcmp.lt.s32.totalorder %v1371_v17, %v6363_v4 }
 0x196   : > { %v5442_v38 = vadd.f32 %v5441_v33, %v4418_v27  ;;  %v3408_v27 = vsel %vm2384_vm11, %v332_v18, 0.0  ;;  %v335_v33 = vld [vmem:[%s6355_s12 + $0x670] sm:$0xff] }
 0x197   : > { %v4432_v35 = vmul.f32 %v3408_v27, %v3408_v27  ;;  %v1373_v27 = vadd.s32 1752, %v6360_v2  ;;  %vm2399_vm10 = vcmp.lt.s32.totalorder %v1372_v22, %v6363_v4 }
 0x198   : > { %v5443_v43 = vadd.f32 %v5442_v38, %v4419_v32  ;;  %v3409_v32 = vsel %vm2385_vm12, %v333_v23, 0.0  ;;  %v336_v38 = vld [vmem:[%s6355_s12 + $0x678] sm:$0xff] }
 0x199   : > { %v4433_v40 = vmul.f32 %v3409_v32, %v3409_v32  ;;  %v1374_v32 = vadd.s32 1760, %v6360_v2  ;;  %vm2400_vm11 = vcmp.lt.s32.totalorder %v1373_v27, %v6363_v4 }
 0x19a   : > { %v5444_v48 = vadd.f32 %v5443_v43, %v4420_v37  ;;  %v3410_v37 = vsel %vm2386_vm13, %v334_v28, 0.0  ;;  %v337_v43 = vld [vmem:[%s6355_s12 + $0x680] sm:$0xff] }
 0x19b   : > { %v4434_v45 = vmul.f32 %v3410_v37, %v3410_v37  ;;  %v1375_v37 = vadd.s32 1768, %v6360_v2  ;;  %vm2401_vm12 = vcmp.lt.s32.totalorder %v1374_v32, %v6363_v4 }
 0x19c   : > { %v5445_v53 = vadd.f32 %v5444_v48, %v4421_v42  ;;  %v3411_v42 = vsel %vm2387_vm14, %v335_v33, 0.0  ;;  %v338_v48 = vld [vmem:[%s6355_s12 + $0x688] sm:$0xff] }
 0x19d   : > { %v4435_v50 = vmul.f32 %v3411_v42, %v3411_v42  ;;  %v1376_v42 = vadd.s32 1776, %v6360_v2  ;;  %vm2402_vm13 = vcmp.lt.s32.totalorder %v1375_v37, %v6363_v4 }
 0x19e   : > { %v5446_v58 = vadd.f32 %v5445_v53, %v4422_v47  ;;  %v3412_v47 = vsel %vm2388_vm15, %v336_v38, 0.0  ;;  %v339_v53 = vld [vmem:[%s6355_s12 + $0x690] sm:$0xff] }
 0x19f   : > { %v4436_v55 = vmul.f32 %v3412_v47, %v3412_v47  ;;  %v1377_v47 = vadd.s32 1784, %v6360_v2  ;;  %vm2403_vm14 = vcmp.lt.s32.totalorder %v1376_v42, %v6363_v4 }
 0x1a0   : > { %v5447_v63 = vadd.f32 %v5446_v58, %v4423_v52  ;;  %v3413_v52 = vsel %vm2389_vm0, %v337_v43, 0.0  ;;  %v340_v58 = vld [vmem:[%s6355_s12 + $0x698] sm:$0xff] }
 0x1a1   : > { %v4437_v60 = vmul.f32 %v3413_v52, %v3413_v52  ;;  %v1378_v52 = vadd.s32 1792, %v6360_v2  ;;  %vm2404_vm15 = vcmp.lt.s32.totalorder %v1377_v47, %v6363_v4 }
 0x1a2   : > { %v5448_v6 = vadd.f32 %v5447_v63, %v4424_v57  ;;  %v3414_v57 = vsel %vm2390_vm1, %v338_v48, 0.0  ;;  %v341_v63 = vld [vmem:[%s6355_s12 + $0x6a0] sm:$0xff] }
 0x1a3   : > { %v4438_v1 = vmul.f32 %v3414_v57, %v3414_v57  ;;  %v1379_v57 = vadd.s32 1800, %v6360_v2  ;;  %vm2405_vm0 = vcmp.lt.s32.totalorder %v1378_v52, %v6363_v4 }
 0x1a4   : > { %v5449_v11 = vadd.f32 %v5448_v6, %v4425_v62  ;;  %v3415_v62 = vsel %vm2391_vm2, %v339_v53, 0.0  ;;  %v342_v6 = vld [vmem:[%s6355_s12 + $0x6a8] sm:$0xff] }
 0x1a5   : > { %v4439_v8 = vmul.f32 %v3415_v62, %v3415_v62  ;;  %v1380_v62 = vadd.s32 1808, %v6360_v2  ;;  %vm2406_vm1 = vcmp.lt.s32.totalorder %v1379_v57, %v6363_v4 }
 0x1a6   : > { %v5450_v16 = vadd.f32 %v5449_v11, %v4426_v5  ;;  %v3416_v5 = vsel %vm2392_vm3, %v340_v58, 0.0  ;;  %v343_v11 = vld [vmem:[%s6355_s12 + $0x6b0] sm:$0xff] }
 0x1a7   : > { %v4440_v13 = vmul.f32 %v3416_v5, %v3416_v5  ;;  %v1381_v5 = vadd.s32 1816, %v6360_v2  ;;  %vm2407_vm2 = vcmp.lt.s32.totalorder %v1380_v62, %v6363_v4 }
 0x1a8   : > { %v5451_v21 = vadd.f32 %v5450_v16, %v4427_v10  ;;  %v3417_v10 = vsel %vm2393_vm4, %v341_v63, 0.0  ;;  %v344_v16 = vld [vmem:[%s6355_s12 + $0x6b8] sm:$0xff] }
 0x1a9   : > { %v4441_v18 = vmul.f32 %v3417_v10, %v3417_v10  ;;  %v1382_v10 = vadd.s32 1824, %v6360_v2  ;;  %vm2408_vm3 = vcmp.lt.s32.totalorder %v1381_v5, %v6363_v4 }
 0x1aa   : > { %v5452_v26 = vadd.f32 %v5451_v21, %v4428_v15  ;;  %v3418_v15 = vsel %vm2394_vm5, %v342_v6, 0.0  ;;  %v345_v21 = vld [vmem:[%s6355_s12 + $0x6c0] sm:$0xff] }
 0x1ab   : > { %v4442_v23 = vmul.f32 %v3418_v15, %v3418_v15  ;;  %v1383_v15 = vadd.s32 1832, %v6360_v2  ;;  %vm2409_vm4 = vcmp.lt.s32.totalorder %v1382_v10, %v6363_v4 }
 0x1ac   : > { %v5453_v31 = vadd.f32 %v5452_v26, %v4429_v20  ;;  %v3419_v20 = vsel %vm2395_vm6, %v343_v11, 0.0  ;;  %v346_v26 = vld [vmem:[%s6355_s12 + $0x6c8] sm:$0xff] }
 0x1ad   : > { %v4443_v28 = vmul.f32 %v3419_v20, %v3419_v20  ;;  %v1384_v20 = vadd.s32 1840, %v6360_v2  ;;  %vm2410_vm5 = vcmp.lt.s32.totalorder %v1383_v15, %v6363_v4 }
 0x1ae   : > { %v5454_v36 = vadd.f32 %v5453_v31, %v4430_v25  ;;  %v3420_v25 = vsel %vm2396_vm7, %v344_v16, 0.0  ;;  %v347_v31 = vld [vmem:[%s6355_s12 + $0x6d0] sm:$0xff] }
 0x1af   : > { %v4444_v33 = vmul.f32 %v3420_v25, %v3420_v25  ;;  %v1385_v25 = vadd.s32 1848, %v6360_v2  ;;  %vm2411_vm6 = vcmp.lt.s32.totalorder %v1384_v20, %v6363_v4 }
 0x1b0   : > { %v5455_v41 = vadd.f32 %v5454_v36, %v4431_v30  ;;  %v3421_v30 = vsel %vm2397_vm8, %v345_v21, 0.0  ;;  %v348_v36 = vld [vmem:[%s6355_s12 + $0x6d8] sm:$0xff] }
 0x1b1   : > { %v4445_v38 = vmul.f32 %v3421_v30, %v3421_v30  ;;  %v1386_v30 = vadd.s32 1856, %v6360_v2  ;;  %vm2412_vm7 = vcmp.lt.s32.totalorder %v1385_v25, %v6363_v4 }
 0x1b2   : > { %v5456_v46 = vadd.f32 %v5455_v41, %v4432_v35  ;;  %v3422_v35 = vsel %vm2398_vm9, %v346_v26, 0.0  ;;  %v349_v41 = vld [vmem:[%s6355_s12 + $0x6e0] sm:$0xff] }
 0x1b3   : > { %v4446_v43 = vmul.f32 %v3422_v35, %v3422_v35  ;;  %v1387_v35 = vadd.s32 1864, %v6360_v2  ;;  %vm2413_vm8 = vcmp.lt.s32.totalorder %v1386_v30, %v6363_v4 }
 0x1b4   : > { %v5457_v51 = vadd.f32 %v5456_v46, %v4433_v40  ;;  %v3423_v40 = vsel %vm2399_vm10, %v347_v31, 0.0  ;;  %v350_v46 = vld [vmem:[%s6355_s12 + $0x6e8] sm:$0xff] }
 0x1b5   : > { %v4447_v48 = vmul.f32 %v3423_v40, %v3423_v40  ;;  %v1388_v40 = vadd.s32 1872, %v6360_v2  ;;  %vm2414_vm9 = vcmp.lt.s32.totalorder %v1387_v35, %v6363_v4 }
 0x1b6   : > { %v5458_v56 = vadd.f32 %v5457_v51, %v4434_v45  ;;  %v3424_v45 = vsel %vm2400_vm11, %v348_v36, 0.0  ;;  %v351_v51 = vld [vmem:[%s6355_s12 + $0x6f0] sm:$0xff] }
 0x1b7   : > { %v4448_v53 = vmul.f32 %v3424_v45, %v3424_v45  ;;  %v1389_v45 = vadd.s32 1880, %v6360_v2  ;;  %vm2415_vm10 = vcmp.lt.s32.totalorder %v1388_v40, %v6363_v4 }
 0x1b8   : > { %v5459_v61 = vadd.f32 %v5458_v56, %v4435_v50  ;;  %v3425_v50 = vsel %vm2401_vm12, %v349_v41, 0.0  ;;  %v352_v56 = vld [vmem:[%s6355_s12 + $0x6f8] sm:$0xff] }
 0x1b9   : > { %v4449_v58 = vmul.f32 %v3425_v50, %v3425_v50  ;;  %v1390_v50 = vadd.s32 1888, %v6360_v2  ;;  %vm2416_vm11 = vcmp.lt.s32.totalorder %v1389_v45, %v6363_v4 }
 0x1ba   : > { %v5460_v3 = vadd.f32 %v5459_v61, %v4436_v55  ;;  %v3426_v55 = vsel %vm2402_vm13, %v350_v46, 0.0  ;;  %v353_v61 = vld [vmem:[%s6355_s12 + $0x700] sm:$0xff] }
 0x1bb   : > { %v4450_v63 = vmul.f32 %v3426_v55, %v3426_v55  ;;  %v1391_v55 = vadd.s32 1896, %v6360_v2  ;;  %vm2417_vm12 = vcmp.lt.s32.totalorder %v1390_v50, %v6363_v4 }
 0x1bc   : > { %v5461_v9 = vadd.f32 %v5460_v3, %v4437_v60  ;;  %v3427_v60 = vsel %vm2403_vm14, %v351_v51, 0.0  ;;  %v354_v3 = vld [vmem:[%s6355_s12 + $0x708] sm:$0xff] }
 0x1bd   : > { %v4451_v6 = vmul.f32 %v3427_v60, %v3427_v60  ;;  %v1392_v60 = vadd.s32 1904, %v6360_v2  ;;  %vm2418_vm13 = vcmp.lt.s32.totalorder %v1391_v55, %v6363_v4 }
 0x1be   : > { %v5462_v14 = vadd.f32 %v5461_v9, %v4438_v1  ;;  %v3428_v1 = vsel %vm2404_vm15, %v352_v56, 0.0  ;;  %v355_v9 = vld [vmem:[%s6355_s12 + $0x710] sm:$0xff] }
 0x1bf   : > { %v4452_v11 = vmul.f32 %v3428_v1, %v3428_v1  ;;  %v1393_v1 = vadd.s32 1912, %v6360_v2  ;;  %vm2419_vm14 = vcmp.lt.s32.totalorder %v1392_v60, %v6363_v4 }
 0x1c0   : > { %v5463_v19 = vadd.f32 %v5462_v14, %v4439_v8  ;;  %v3429_v8 = vsel %vm2405_vm0, %v353_v61, 0.0  ;;  %v356_v14 = vld [vmem:[%s6355_s12 + $0x718] sm:$0xff] }
 0x1c1   : > { %v4453_v16 = vmul.f32 %v3429_v8, %v3429_v8  ;;  %v1394_v8 = vadd.s32 1920, %v6360_v2  ;;  %vm2420_vm15 = vcmp.lt.s32.totalorder %v1393_v1, %v6363_v4 }
 0x1c2   : > { %v5464_v24 = vadd.f32 %v5463_v19, %v4440_v13  ;;  %v3430_v13 = vsel %vm2406_vm1, %v354_v3, 0.0  ;;  %v357_v19 = vld [vmem:[%s6355_s12 + $0x720] sm:$0xff] }
 0x1c3   : > { %v4454_v21 = vmul.f32 %v3430_v13, %v3430_v13  ;;  %v1395_v13 = vadd.s32 1928, %v6360_v2  ;;  %vm2421_vm0 = vcmp.lt.s32.totalorder %v1394_v8, %v6363_v4 }
 0x1c4   : > { %v5465_v29 = vadd.f32 %v5464_v24, %v4441_v18  ;;  %v3431_v18 = vsel %vm2407_vm2, %v355_v9, 0.0  ;;  %v358_v24 = vld [vmem:[%s6355_s12 + $0x728] sm:$0xff] }
 0x1c5   : > { %v4455_v26 = vmul.f32 %v3431_v18, %v3431_v18  ;;  %v1396_v18 = vadd.s32 1936, %v6360_v2  ;;  %vm2422_vm1 = vcmp.lt.s32.totalorder %v1395_v13, %v6363_v4 }
 0x1c6   : > { %v5466_v34 = vadd.f32 %v5465_v29, %v4442_v23  ;;  %v3432_v23 = vsel %vm2408_vm3, %v356_v14, 0.0  ;;  %v359_v29 = vld [vmem:[%s6355_s12 + $0x730] sm:$0xff] }
 0x1c7   : > { %v4456_v31 = vmul.f32 %v3432_v23, %v3432_v23  ;;  %v1397_v23 = vadd.s32 1944, %v6360_v2  ;;  %vm2423_vm2 = vcmp.lt.s32.totalorder %v1396_v18, %v6363_v4 }
 0x1c8   : > { %v5467_v39 = vadd.f32 %v5466_v34, %v4443_v28  ;;  %v3433_v28 = vsel %vm2409_vm4, %v357_v19, 0.0  ;;  %v360_v34 = vld [vmem:[%s6355_s12 + $0x738] sm:$0xff] }
 0x1c9   : > { %v4457_v36 = vmul.f32 %v3433_v28, %v3433_v28  ;;  %v1398_v28 = vadd.s32 1952, %v6360_v2  ;;  %vm2424_vm3 = vcmp.lt.s32.totalorder %v1397_v23, %v6363_v4 }
 0x1ca   : > { %v5468_v44 = vadd.f32 %v5467_v39, %v4444_v33  ;;  %v3434_v33 = vsel %vm2410_vm5, %v358_v24, 0.0  ;;  %v361_v39 = vld [vmem:[%s6355_s12 + $0x740] sm:$0xff] }
 0x1cb   : > { %v4458_v41 = vmul.f32 %v3434_v33, %v3434_v33  ;;  %v1399_v33 = vadd.s32 1960, %v6360_v2  ;;  %vm2425_vm4 = vcmp.lt.s32.totalorder %v1398_v28, %v6363_v4 }
 0x1cc   : > { %v5469_v49 = vadd.f32 %v5468_v44, %v4445_v38  ;;  %v3435_v38 = vsel %vm2411_vm6, %v359_v29, 0.0  ;;  %v362_v44 = vld [vmem:[%s6355_s12 + $0x748] sm:$0xff] }
 0x1cd   : > { %v4459_v46 = vmul.f32 %v3435_v38, %v3435_v38  ;;  %v1400_v38 = vadd.s32 1968, %v6360_v2  ;;  %vm2426_vm5 = vcmp.lt.s32.totalorder %v1399_v33, %v6363_v4 }
 0x1ce   : > { %v5470_v54 = vadd.f32 %v5469_v49, %v4446_v43  ;;  %v3436_v43 = vsel %vm2412_vm7, %v360_v34, 0.0  ;;  %v363_v49 = vld [vmem:[%s6355_s12 + $0x750] sm:$0xff] }
 0x1cf   : > { %v4460_v51 = vmul.f32 %v3436_v43, %v3436_v43  ;;  %v1401_v43 = vadd.s32 1976, %v6360_v2  ;;  %vm2427_vm6 = vcmp.lt.s32.totalorder %v1400_v38, %v6363_v4 }
 0x1d0   : > { %v5471_v59 = vadd.f32 %v5470_v54, %v4447_v48  ;;  %v3437_v48 = vsel %vm2413_vm8, %v361_v39, 0.0  ;;  %v364_v54 = vld [vmem:[%s6355_s12 + $0x758] sm:$0xff] }
 0x1d1   : > { %v4461_v56 = vmul.f32 %v3437_v48, %v3437_v48  ;;  %v1402_v48 = vadd.s32 1984, %v6360_v2  ;;  %vm2428_vm7 = vcmp.lt.s32.totalorder %v1401_v43, %v6363_v4 }
 0x1d2   : > { %v5472_v0 = vadd.f32 %v5471_v59, %v4448_v53  ;;  %v3438_v53 = vsel %vm2414_vm9, %v362_v44, 0.0  ;;  %v365_v59 = vld [vmem:[%s6355_s12 + $0x760] sm:$0xff] }
 0x1d3   : > { %v4462_v61 = vmul.f32 %v3438_v53, %v3438_v53  ;;  %v1403_v53 = vadd.s32 1992, %v6360_v2  ;;  %vm2429_vm8 = vcmp.lt.s32.totalorder %v1402_v48, %v6363_v4 }
 0x1d4   : > { %v5473_v7 = vadd.f32 %v5472_v0, %v4449_v58  ;;  %v3439_v58 = vsel %vm2415_vm10, %v363_v49, 0.0  ;;  %v366_v0 = vld [vmem:[%s6355_s12 + $0x768] sm:$0xff] }
 0x1d5   : > { %v4463_v3 = vmul.f32 %v3439_v58, %v3439_v58  ;;  %v1404_v58 = vadd.s32 2000, %v6360_v2  ;;  %vm2430_vm9 = vcmp.lt.s32.totalorder %v1403_v53, %v6363_v4 }
 0x1d6   : > { %v5474_v12 = vadd.f32 %v5473_v7, %v4450_v63  ;;  %v3440_v63 = vsel %vm2416_vm11, %v364_v54, 0.0  ;;  %v367_v7 = vld [vmem:[%s6355_s12 + $0x770] sm:$0xff] }
 0x1d7   : > { %v4464_v9 = vmul.f32 %v3440_v63, %v3440_v63  ;;  %v1405_v63 = vadd.s32 2008, %v6360_v2  ;;  %vm2431_vm10 = vcmp.lt.s32.totalorder %v1404_v58, %v6363_v4 }
 0x1d8   : > { %v5475_v17 = vadd.f32 %v5474_v12, %v4451_v6  ;;  %v3441_v6 = vsel %vm2417_vm12, %v365_v59, 0.0  ;;  %v368_v12 = vld [vmem:[%s6355_s12 + $0x778] sm:$0xff] }
 0x1d9   : > { %v4465_v14 = vmul.f32 %v3441_v6, %v3441_v6  ;;  %v1406_v6 = vadd.s32 2016, %v6360_v2  ;;  %vm2432_vm11 = vcmp.lt.s32.totalorder %v1405_v63, %v6363_v4 }
 0x1da   : > { %v5476_v22 = vadd.f32 %v5475_v17, %v4452_v11  ;;  %v3442_v11 = vsel %vm2418_vm13, %v366_v0, 0.0  ;;  %v369_v17 = vld [vmem:[%s6355_s12 + $0x780] sm:$0xff] }
 0x1db   : > { %v4466_v19 = vmul.f32 %v3442_v11, %v3442_v11  ;;  %v1407_v11 = vadd.s32 2024, %v6360_v2  ;;  %vm2433_vm12 = vcmp.lt.s32.totalorder %v1406_v6, %v6363_v4 }
 0x1dc   : > { %v5477_v27 = vadd.f32 %v5476_v22, %v4453_v16  ;;  %v3443_v16 = vsel %vm2419_vm14, %v367_v7, 0.0  ;;  %v370_v22 = vld [vmem:[%s6355_s12 + $0x788] sm:$0xff] }
 0x1dd   : > { %v4467_v24 = vmul.f32 %v3443_v16, %v3443_v16  ;;  %v1408_v16 = vadd.s32 2032, %v6360_v2  ;;  %vm2434_vm13 = vcmp.lt.s32.totalorder %v1407_v11, %v6363_v4 }
 0x1de   : > { %v5478_v32 = vadd.f32 %v5477_v27, %v4454_v21  ;;  %v3444_v21 = vsel %vm2420_vm15, %v368_v12, 0.0  ;;  %v371_v27 = vld [vmem:[%s6355_s12 + $0x790] sm:$0xff] }
 0x1df   : > { %v4468_v29 = vmul.f32 %v3444_v21, %v3444_v21  ;;  %v1409_v21 = vadd.s32 2040, %v6360_v2  ;;  %vm2435_vm14 = vcmp.lt.s32.totalorder %v1408_v16, %v6363_v4 }
 0x1e0   : > { %v5479_v37 = vadd.f32 %v5478_v32, %v4455_v26  ;;  %v3445_v26 = vsel %vm2421_vm0, %v369_v17, 0.0  ;;  %v372_v32 = vld [vmem:[%s6355_s12 + $0x798] sm:$0xff] }
 0x1e1   : > { %v4469_v34 = vmul.f32 %v3445_v26, %v3445_v26  ;;  %v1410_v26 = vadd.s32 2048, %v6360_v2  ;;  %vm2436_vm15 = vcmp.lt.s32.totalorder %v1409_v21, %v6363_v4 }
 0x1e2   : > { %v5480_v42 = vadd.f32 %v5479_v37, %v4456_v31  ;;  %v3446_v31 = vsel %vm2422_vm1, %v370_v22, 0.0  ;;  %v373_v37 = vld [vmem:[%s6355_s12 + $0x7a0] sm:$0xff] }
 0x1e3   : > { %v4470_v39 = vmul.f32 %v3446_v31, %v3446_v31  ;;  %v1411_v31 = vadd.s32 2056, %v6360_v2  ;;  %vm2437_vm0 = vcmp.lt.s32.totalorder %v1410_v26, %v6363_v4 }
 0x1e4   : > { %v5481_v47 = vadd.f32 %v5480_v42, %v4457_v36  ;;  %v3447_v36 = vsel %vm2423_vm2, %v371_v27, 0.0  ;;  %v374_v42 = vld [vmem:[%s6355_s12 + $0x7a8] sm:$0xff] }
 0x1e5   : > { %v4471_v44 = vmul.f32 %v3447_v36, %v3447_v36  ;;  %v1412_v36 = vadd.s32 2064, %v6360_v2  ;;  %vm2438_vm1 = vcmp.lt.s32.totalorder %v1411_v31, %v6363_v4 }
 0x1e6   : > { %v5482_v52 = vadd.f32 %v5481_v47, %v4458_v41  ;;  %v3448_v41 = vsel %vm2424_vm3, %v372_v32, 0.0  ;;  %v375_v47 = vld [vmem:[%s6355_s12 + $0x7b0] sm:$0xff] }
 0x1e7   : > { %v4472_v49 = vmul.f32 %v3448_v41, %v3448_v41  ;;  %v1413_v41 = vadd.s32 2072, %v6360_v2  ;;  %vm2439_vm2 = vcmp.lt.s32.totalorder %v1412_v36, %v6363_v4 }
 0x1e8   : > { %v5483_v57 = vadd.f32 %v5482_v52, %v4459_v46  ;;  %v3449_v46 = vsel %vm2425_vm4, %v373_v37, 0.0  ;;  %v376_v52 = vld [vmem:[%s6355_s12 + $0x7b8] sm:$0xff] }
 0x1e9   : > { %v4473_v54 = vmul.f32 %v3449_v46, %v3449_v46  ;;  %v1414_v46 = vadd.s32 2080, %v6360_v2  ;;  %vm2440_vm3 = vcmp.lt.s32.totalorder %v1413_v41, %v6363_v4 }
 0x1ea   : > { %v5484_v62 = vadd.f32 %v5483_v57, %v4460_v51  ;;  %v3450_v51 = vsel %vm2426_vm5, %v374_v42, 0.0  ;;  %v377_v57 = vld [vmem:[%s6355_s12 + $0x7c0] sm:$0xff] }
 0x1eb   : > { %v4474_v59 = vmul.f32 %v3450_v51, %v3450_v51  ;;  %v1415_v51 = vadd.s32 2088, %v6360_v2  ;;  %vm2441_vm4 = vcmp.lt.s32.totalorder %v1414_v46, %v6363_v4 }
 0x1ec   : > { %v5485_v5 = vadd.f32 %v5484_v62, %v4461_v56  ;;  %v3451_v56 = vsel %vm2427_vm6, %v375_v47, 0.0  ;;  %v378_v62 = vld [vmem:[%s6355_s12 + $0x7c8] sm:$0xff] }
 0x1ed   : > { %v4475_v0 = vmul.f32 %v3451_v56, %v3451_v56  ;;  %v1416_v56 = vadd.s32 2096, %v6360_v2  ;;  %vm2442_vm5 = vcmp.lt.s32.totalorder %v1415_v51, %v6363_v4 }
 0x1ee   : > { %v5486_v10 = vadd.f32 %v5485_v5, %v4462_v61  ;;  %v3452_v61 = vsel %vm2428_vm7, %v376_v52, 0.0  ;;  %v379_v5 = vld [vmem:[%s6355_s12 + $0x7d0] sm:$0xff] }
 0x1ef   : > { %v4476_v7 = vmul.f32 %v3452_v61, %v3452_v61  ;;  %v1417_v61 = vadd.s32 2104, %v6360_v2  ;;  %vm2443_vm6 = vcmp.lt.s32.totalorder %v1416_v56, %v6363_v4 }
 0x1f0   : > { %v5487_v15 = vadd.f32 %v5486_v10, %v4463_v3  ;;  %v3453_v3 = vsel %vm2429_vm8, %v377_v57, 0.0  ;;  %v380_v10 = vld [vmem:[%s6355_s12 + $0x7d8] sm:$0xff] }
 0x1f1   : > { %v4477_v12 = vmul.f32 %v3453_v3, %v3453_v3  ;;  %v1418_v3 = vadd.s32 2112, %v6360_v2  ;;  %vm2444_vm7 = vcmp.lt.s32.totalorder %v1417_v61, %v6363_v4 }
 0x1f2   : > { %v5488_v20 = vadd.f32 %v5487_v15, %v4464_v9  ;;  %v3454_v9 = vsel %vm2430_vm9, %v378_v62, 0.0  ;;  %v381_v15 = vld [vmem:[%s6355_s12 + $0x7e0] sm:$0xff] }
 0x1f3   : > { %v4478_v17 = vmul.f32 %v3454_v9, %v3454_v9  ;;  %v1419_v9 = vadd.s32 2120, %v6360_v2  ;;  %vm2445_vm8 = vcmp.lt.s32.totalorder %v1418_v3, %v6363_v4 }
 0x1f4   : > { %v5489_v25 = vadd.f32 %v5488_v20, %v4465_v14  ;;  %v3455_v14 = vsel %vm2431_vm10, %v379_v5, 0.0  ;;  %v382_v20 = vld [vmem:[%s6355_s12 + $0x7e8] sm:$0xff] }
 0x1f5   : > { %v4479_v22 = vmul.f32 %v3455_v14, %v3455_v14  ;;  %v1420_v14 = vadd.s32 2128, %v6360_v2  ;;  %vm2446_vm9 = vcmp.lt.s32.totalorder %v1419_v9, %v6363_v4 }
 0x1f6   : > { %v5490_v30 = vadd.f32 %v5489_v25, %v4466_v19  ;;  %v3456_v19 = vsel %vm2432_vm11, %v380_v10, 0.0  ;;  %v383_v25 = vld [vmem:[%s6355_s12 + $0x7f0] sm:$0xff] }
 0x1f7   : > { %v4480_v27 = vmul.f32 %v3456_v19, %v3456_v19  ;;  %v1421_v19 = vadd.s32 2136, %v6360_v2  ;;  %vm2447_vm10 = vcmp.lt.s32.totalorder %v1420_v14, %v6363_v4 }
 0x1f8   : > { %v5491_v35 = vadd.f32 %v5490_v30, %v4467_v24  ;;  %v3457_v24 = vsel %vm2433_vm12, %v381_v15, 0.0  ;;  %v384_v30 = vld [vmem:[%s6355_s12 + $0x7f8] sm:$0xff] }
 0x1f9   : > { %v4481_v32 = vmul.f32 %v3457_v24, %v3457_v24  ;;  %v1422_v24 = vadd.s32 2144, %v6360_v2  ;;  %vm2448_vm11 = vcmp.lt.s32.totalorder %v1421_v19, %v6363_v4 }
 0x1fa   : > { %v5492_v40 = vadd.f32 %v5491_v35, %v4468_v29  ;;  %v3458_v29 = vsel %vm2434_vm13, %v382_v20, 0.0  ;;  %v385_v35 = vld [vmem:[%s6355_s12 + $0x800] sm:$0xff] }
 0x1fb   : > { %v4482_v37 = vmul.f32 %v3458_v29, %v3458_v29  ;;  %v1423_v29 = vadd.s32 2152, %v6360_v2  ;;  %vm2449_vm12 = vcmp.lt.s32.totalorder %v1422_v24, %v6363_v4 }
 0x1fc   : > { %v5493_v45 = vadd.f32 %v5492_v40, %v4469_v34  ;;  %v3459_v34 = vsel %vm2435_vm14, %v383_v25, 0.0  ;;  %v386_v40 = vld [vmem:[%s6355_s12 + $0x808] sm:$0xff] }
 0x1fd   : > { %v4483_v42 = vmul.f32 %v3459_v34, %v3459_v34  ;;  %v1424_v34 = vadd.s32 2160, %v6360_v2  ;;  %vm2450_vm13 = vcmp.lt.s32.totalorder %v1423_v29, %v6363_v4 }
 0x1fe   : > { %v5494_v50 = vadd.f32 %v5493_v45, %v4470_v39  ;;  %v3460_v39 = vsel %vm2436_vm15, %v384_v30, 0.0  ;;  %v387_v45 = vld [vmem:[%s6355_s12 + $0x810] sm:$0xff] }
 0x1ff   : > { %v4484_v47 = vmul.f32 %v3460_v39, %v3460_v39  ;;  %v1425_v39 = vadd.s32 2168, %v6360_v2  ;;  %vm2451_vm14 = vcmp.lt.s32.totalorder %v1424_v34, %v6363_v4 }
 0x200   : > { %v5495_v55 = vadd.f32 %v5494_v50, %v4471_v44  ;;  %v3461_v44 = vsel %vm2437_vm0, %v385_v35, 0.0  ;;  %v388_v50 = vld [vmem:[%s6355_s12 + $0x818] sm:$0xff] }
 0x201   : > { %v4485_v52 = vmul.f32 %v3461_v44, %v3461_v44  ;;  %v1426_v44 = vadd.s32 2176, %v6360_v2  ;;  %vm2452_vm15 = vcmp.lt.s32.totalorder %v1425_v39, %v6363_v4 }
 0x202   : > { %v5496_v60 = vadd.f32 %v5495_v55, %v4472_v49  ;;  %v3462_v49 = vsel %vm2438_vm1, %v386_v40, 0.0  ;;  %v389_v55 = vld [vmem:[%s6355_s12 + $0x820] sm:$0xff] }
 0x203   : > { %v4486_v57 = vmul.f32 %v3462_v49, %v3462_v49  ;;  %v1427_v49 = vadd.s32 2184, %v6360_v2  ;;  %vm2453_vm0 = vcmp.lt.s32.totalorder %v1426_v44, %v6363_v4 }
 0x204   : > { %v5497_v1 = vadd.f32 %v5496_v60, %v4473_v54  ;;  %v3463_v54 = vsel %vm2439_vm2, %v387_v45, 0.0  ;;  %v390_v60 = vld [vmem:[%s6355_s12 + $0x828] sm:$0xff] }
 0x205   : > { %v4487_v62 = vmul.f32 %v3463_v54, %v3463_v54  ;;  %v1428_v54 = vadd.s32 2192, %v6360_v2  ;;  %vm2454_vm1 = vcmp.lt.s32.totalorder %v1427_v49, %v6363_v4 }
 0x206   : > { %v5498_v8 = vadd.f32 %v5497_v1, %v4474_v59  ;;  %v3464_v59 = vsel %vm2440_vm3, %v388_v50, 0.0  ;;  %v391_v1 = vld [vmem:[%s6355_s12 + $0x830] sm:$0xff] }
 0x207   : > { %v4488_v5 = vmul.f32 %v3464_v59, %v3464_v59  ;;  %v1429_v59 = vadd.s32 2200, %v6360_v2  ;;  %vm2455_vm2 = vcmp.lt.s32.totalorder %v1428_v54, %v6363_v4 }
 0x208   : > { %v5499_v13 = vadd.f32 %v5498_v8, %v4475_v0  ;;  %v3465_v0 = vsel %vm2441_vm4, %v389_v55, 0.0  ;;  %v392_v8 = vld [vmem:[%s6355_s12 + $0x838] sm:$0xff] }
 0x209   : > { %v4489_v10 = vmul.f32 %v3465_v0, %v3465_v0  ;;  %v1430_v0 = vadd.s32 2208, %v6360_v2  ;;  %vm2456_vm3 = vcmp.lt.s32.totalorder %v1429_v59, %v6363_v4 }
 0x20a   : > { %v5500_v18 = vadd.f32 %v5499_v13, %v4476_v7  ;;  %v3466_v7 = vsel %vm2442_vm5, %v390_v60, 0.0  ;;  %v393_v13 = vld [vmem:[%s6355_s12 + $0x840] sm:$0xff] }
 0x20b   : > { %v4490_v15 = vmul.f32 %v3466_v7, %v3466_v7  ;;  %v1431_v7 = vadd.s32 2216, %v6360_v2  ;;  %vm2457_vm4 = vcmp.lt.s32.totalorder %v1430_v0, %v6363_v4 }
 0x20c   : > { %v5501_v23 = vadd.f32 %v5500_v18, %v4477_v12  ;;  %v3467_v12 = vsel %vm2443_vm6, %v391_v1, 0.0  ;;  %v394_v18 = vld [vmem:[%s6355_s12 + $0x848] sm:$0xff] }
 0x20d   : > { %v4491_v20 = vmul.f32 %v3467_v12, %v3467_v12  ;;  %v1432_v12 = vadd.s32 2224, %v6360_v2  ;;  %vm2458_vm5 = vcmp.lt.s32.totalorder %v1431_v7, %v6363_v4 }
 0x20e   : > { %v5502_v28 = vadd.f32 %v5501_v23, %v4478_v17  ;;  %v3468_v17 = vsel %vm2444_vm7, %v392_v8, 0.0  ;;  %v395_v23 = vld [vmem:[%s6355_s12 + $0x850] sm:$0xff] }
 0x20f   : > { %v4492_v25 = vmul.f32 %v3468_v17, %v3468_v17  ;;  %v1433_v17 = vadd.s32 2232, %v6360_v2  ;;  %vm2459_vm6 = vcmp.lt.s32.totalorder %v1432_v12, %v6363_v4 }
 0x210   : > { %v5503_v33 = vadd.f32 %v5502_v28, %v4479_v22  ;;  %v3469_v22 = vsel %vm2445_vm8, %v393_v13, 0.0  ;;  %v396_v28 = vld [vmem:[%s6355_s12 + $0x858] sm:$0xff] }
 0x211   : > { %v4493_v30 = vmul.f32 %v3469_v22, %v3469_v22  ;;  %v1434_v22 = vadd.s32 2240, %v6360_v2  ;;  %vm2460_vm7 = vcmp.lt.s32.totalorder %v1433_v17, %v6363_v4 }
 0x212   : > { %v5504_v38 = vadd.f32 %v5503_v33, %v4480_v27  ;;  %v3470_v27 = vsel %vm2446_vm9, %v394_v18, 0.0  ;;  %v397_v33 = vld [vmem:[%s6355_s12 + $0x860] sm:$0xff] }
 0x213   : > { %v4494_v35 = vmul.f32 %v3470_v27, %v3470_v27  ;;  %v1435_v27 = vadd.s32 2248, %v6360_v2  ;;  %vm2461_vm8 = vcmp.lt.s32.totalorder %v1434_v22, %v6363_v4 }
 0x214   : > { %v5505_v43 = vadd.f32 %v5504_v38, %v4481_v32  ;;  %v3471_v32 = vsel %vm2447_vm10, %v395_v23, 0.0  ;;  %v398_v38 = vld [vmem:[%s6355_s12 + $0x868] sm:$0xff] }
 0x215   : > { %v4495_v40 = vmul.f32 %v3471_v32, %v3471_v32  ;;  %v1436_v32 = vadd.s32 2256, %v6360_v2  ;;  %vm2462_vm9 = vcmp.lt.s32.totalorder %v1435_v27, %v6363_v4 }
 0x216   : > { %v5506_v48 = vadd.f32 %v5505_v43, %v4482_v37  ;;  %v3472_v37 = vsel %vm2448_vm11, %v396_v28, 0.0  ;;  %v399_v43 = vld [vmem:[%s6355_s12 + $0x870] sm:$0xff] }
 0x217   : > { %v4496_v45 = vmul.f32 %v3472_v37, %v3472_v37  ;;  %v1437_v37 = vadd.s32 2264, %v6360_v2  ;;  %vm2463_vm10 = vcmp.lt.s32.totalorder %v1436_v32, %v6363_v4 }
 0x218   : > { %v5507_v53 = vadd.f32 %v5506_v48, %v4483_v42  ;;  %v3473_v42 = vsel %vm2449_vm12, %v397_v33, 0.0  ;;  %v400_v48 = vld [vmem:[%s6355_s12 + $0x878] sm:$0xff] }
 0x219   : > { %v4497_v50 = vmul.f32 %v3473_v42, %v3473_v42  ;;  %v1438_v42 = vadd.s32 2272, %v6360_v2  ;;  %vm2464_vm11 = vcmp.lt.s32.totalorder %v1437_v37, %v6363_v4 }
 0x21a   : > { %v5508_v58 = vadd.f32 %v5507_v53, %v4484_v47  ;;  %v3474_v47 = vsel %vm2450_vm13, %v398_v38, 0.0  ;;  %v401_v53 = vld [vmem:[%s6355_s12 + $0x880] sm:$0xff] }
 0x21b   : > { %v4498_v55 = vmul.f32 %v3474_v47, %v3474_v47  ;;  %v1439_v47 = vadd.s32 2280, %v6360_v2  ;;  %vm2465_vm12 = vcmp.lt.s32.totalorder %v1438_v42, %v6363_v4 }
 0x21c   : > { %v5509_v63 = vadd.f32 %v5508_v58, %v4485_v52  ;;  %v3475_v52 = vsel %vm2451_vm14, %v399_v43, 0.0  ;;  %v402_v58 = vld [vmem:[%s6355_s12 + $0x888] sm:$0xff] }
 0x21d   : > { %v4499_v60 = vmul.f32 %v3475_v52, %v3475_v52  ;;  %v1440_v52 = vadd.s32 2288, %v6360_v2  ;;  %vm2466_vm13 = vcmp.lt.s32.totalorder %v1439_v47, %v6363_v4 }
 0x21e   : > { %v5510_v6 = vadd.f32 %v5509_v63, %v4486_v57  ;;  %v3476_v57 = vsel %vm2452_vm15, %v400_v48, 0.0  ;;  %v403_v63 = vld [vmem:[%s6355_s12 + $0x890] sm:$0xff] }
 0x21f   : > { %v4500_v1 = vmul.f32 %v3476_v57, %v3476_v57  ;;  %v1441_v57 = vadd.s32 2296, %v6360_v2  ;;  %vm2467_vm14 = vcmp.lt.s32.totalorder %v1440_v52, %v6363_v4 }
 0x220   : > { %v5511_v11 = vadd.f32 %v5510_v6, %v4487_v62  ;;  %v3477_v62 = vsel %vm2453_vm0, %v401_v53, 0.0  ;;  %v404_v6 = vld [vmem:[%s6355_s12 + $0x898] sm:$0xff] }
 0x221   : > { %v4501_v8 = vmul.f32 %v3477_v62, %v3477_v62  ;;  %v1442_v62 = vadd.s32 2304, %v6360_v2  ;;  %vm2468_vm15 = vcmp.lt.s32.totalorder %v1441_v57, %v6363_v4 }
 0x222   : > { %v5512_v16 = vadd.f32 %v5511_v11, %v4488_v5  ;;  %v3478_v5 = vsel %vm2454_vm1, %v402_v58, 0.0  ;;  %v405_v11 = vld [vmem:[%s6355_s12 + $0x8a0] sm:$0xff] }
 0x223   : > { %v4502_v13 = vmul.f32 %v3478_v5, %v3478_v5  ;;  %v1443_v5 = vadd.s32 2312, %v6360_v2  ;;  %vm2469_vm0 = vcmp.lt.s32.totalorder %v1442_v62, %v6363_v4 }
 0x224   : > { %v5513_v21 = vadd.f32 %v5512_v16, %v4489_v10  ;;  %v3479_v10 = vsel %vm2455_vm2, %v403_v63, 0.0  ;;  %v406_v16 = vld [vmem:[%s6355_s12 + $0x8a8] sm:$0xff] }
 0x225   : > { %v4503_v18 = vmul.f32 %v3479_v10, %v3479_v10  ;;  %v1444_v10 = vadd.s32 2320, %v6360_v2  ;;  %vm2470_vm1 = vcmp.lt.s32.totalorder %v1443_v5, %v6363_v4 }
 0x226   : > { %v5514_v26 = vadd.f32 %v5513_v21, %v4490_v15  ;;  %v3480_v15 = vsel %vm2456_vm3, %v404_v6, 0.0  ;;  %v407_v21 = vld [vmem:[%s6355_s12 + $0x8b0] sm:$0xff] }
 0x227   : > { %v4504_v23 = vmul.f32 %v3480_v15, %v3480_v15  ;;  %v1445_v15 = vadd.s32 2328, %v6360_v2  ;;  %vm2471_vm2 = vcmp.lt.s32.totalorder %v1444_v10, %v6363_v4 }
 0x228   : > { %v5515_v31 = vadd.f32 %v5514_v26, %v4491_v20  ;;  %v3481_v20 = vsel %vm2457_vm4, %v405_v11, 0.0  ;;  %v408_v26 = vld [vmem:[%s6355_s12 + $0x8b8] sm:$0xff] }
 0x229   : > { %v4505_v28 = vmul.f32 %v3481_v20, %v3481_v20  ;;  %v1446_v20 = vadd.s32 2336, %v6360_v2  ;;  %vm2472_vm3 = vcmp.lt.s32.totalorder %v1445_v15, %v6363_v4 }
 0x22a   : > { %v5516_v36 = vadd.f32 %v5515_v31, %v4492_v25  ;;  %v3482_v25 = vsel %vm2458_vm5, %v406_v16, 0.0  ;;  %v409_v31 = vld [vmem:[%s6355_s12 + $0x8c0] sm:$0xff] }
 0x22b   : > { %v4506_v33 = vmul.f32 %v3482_v25, %v3482_v25  ;;  %v1447_v25 = vadd.s32 2344, %v6360_v2  ;;  %vm2473_vm4 = vcmp.lt.s32.totalorder %v1446_v20, %v6363_v4 }
 0x22c   : > { %v5517_v41 = vadd.f32 %v5516_v36, %v4493_v30  ;;  %v3483_v30 = vsel %vm2459_vm6, %v407_v21, 0.0  ;;  %v410_v36 = vld [vmem:[%s6355_s12 + $0x8c8] sm:$0xff] }
 0x22d   : > { %v4507_v38 = vmul.f32 %v3483_v30, %v3483_v30  ;;  %v1448_v30 = vadd.s32 2352, %v6360_v2  ;;  %vm2474_vm5 = vcmp.lt.s32.totalorder %v1447_v25, %v6363_v4 }
 0x22e   : > { %v5518_v46 = vadd.f32 %v5517_v41, %v4494_v35  ;;  %v3484_v35 = vsel %vm2460_vm7, %v408_v26, 0.0  ;;  %v411_v41 = vld [vmem:[%s6355_s12 + $0x8d0] sm:$0xff] }
 0x22f   : > { %v4508_v43 = vmul.f32 %v3484_v35, %v3484_v35  ;;  %v1449_v35 = vadd.s32 2360, %v6360_v2  ;;  %vm2475_vm6 = vcmp.lt.s32.totalorder %v1448_v30, %v6363_v4 }
 0x230   : > { %v5519_v51 = vadd.f32 %v5518_v46, %v4495_v40  ;;  %v3485_v40 = vsel %vm2461_vm8, %v409_v31, 0.0  ;;  %v412_v46 = vld [vmem:[%s6355_s12 + $0x8d8] sm:$0xff] }
 0x231   : > { %v4509_v48 = vmul.f32 %v3485_v40, %v3485_v40  ;;  %v1450_v40 = vadd.s32 2368, %v6360_v2  ;;  %vm2476_vm7 = vcmp.lt.s32.totalorder %v1449_v35, %v6363_v4 }
 0x232   : > { %v5520_v56 = vadd.f32 %v5519_v51, %v4496_v45  ;;  %v3486_v45 = vsel %vm2462_vm9, %v410_v36, 0.0  ;;  %v413_v51 = vld [vmem:[%s6355_s12 + $0x8e0] sm:$0xff] }
 0x233   : > { %v4510_v53 = vmul.f32 %v3486_v45, %v3486_v45  ;;  %v1451_v45 = vadd.s32 2376, %v6360_v2  ;;  %vm2477_vm8 = vcmp.lt.s32.totalorder %v1450_v40, %v6363_v4 }
 0x234   : > { %v5521_v61 = vadd.f32 %v5520_v56, %v4497_v50  ;;  %v3487_v50 = vsel %vm2463_vm10, %v411_v41, 0.0  ;;  %v414_v56 = vld [vmem:[%s6355_s12 + $0x8e8] sm:$0xff] }
 0x235   : > { %v4511_v58 = vmul.f32 %v3487_v50, %v3487_v50  ;;  %v1452_v50 = vadd.s32 2384, %v6360_v2  ;;  %vm2478_vm9 = vcmp.lt.s32.totalorder %v1451_v45, %v6363_v4 }
 0x236   : > { %v5522_v3 = vadd.f32 %v5521_v61, %v4498_v55  ;;  %v3488_v55 = vsel %vm2464_vm11, %v412_v46, 0.0  ;;  %v415_v61 = vld [vmem:[%s6355_s12 + $0x8f0] sm:$0xff] }
 0x237   : > { %v4512_v63 = vmul.f32 %v3488_v55, %v3488_v55  ;;  %v1453_v55 = vadd.s32 2392, %v6360_v2  ;;  %vm2479_vm10 = vcmp.lt.s32.totalorder %v1452_v50, %v6363_v4 }
 0x238   : > { %v5523_v9 = vadd.f32 %v5522_v3, %v4499_v60  ;;  %v3489_v60 = vsel %vm2465_vm12, %v413_v51, 0.0  ;;  %v416_v3 = vld [vmem:[%s6355_s12 + $0x8f8] sm:$0xff] }
 0x239   : > { %v4513_v6 = vmul.f32 %v3489_v60, %v3489_v60  ;;  %v1454_v60 = vadd.s32 2400, %v6360_v2  ;;  %vm2480_vm11 = vcmp.lt.s32.totalorder %v1453_v55, %v6363_v4 }
 0x23a   : > { %v5524_v14 = vadd.f32 %v5523_v9, %v4500_v1  ;;  %v3490_v1 = vsel %vm2466_vm13, %v414_v56, 0.0  ;;  %v417_v9 = vld [vmem:[%s6355_s12 + $0x900] sm:$0xff] }
 0x23b   : > { %v4514_v11 = vmul.f32 %v3490_v1, %v3490_v1  ;;  %v1455_v1 = vadd.s32 2408, %v6360_v2  ;;  %vm2481_vm12 = vcmp.lt.s32.totalorder %v1454_v60, %v6363_v4 }
 0x23c   : > { %v5525_v19 = vadd.f32 %v5524_v14, %v4501_v8  ;;  %v3491_v8 = vsel %vm2467_vm14, %v415_v61, 0.0  ;;  %v418_v14 = vld [vmem:[%s6355_s12 + $0x908] sm:$0xff] }
 0x23d   : > { %v4515_v16 = vmul.f32 %v3491_v8, %v3491_v8  ;;  %v1456_v8 = vadd.s32 2416, %v6360_v2  ;;  %vm2482_vm13 = vcmp.lt.s32.totalorder %v1455_v1, %v6363_v4 }
 0x23e   : > { %v5526_v24 = vadd.f32 %v5525_v19, %v4502_v13  ;;  %v3492_v13 = vsel %vm2468_vm15, %v416_v3, 0.0  ;;  %v419_v19 = vld [vmem:[%s6355_s12 + $0x910] sm:$0xff] }
 0x23f   : > { %v4516_v21 = vmul.f32 %v3492_v13, %v3492_v13  ;;  %v1457_v13 = vadd.s32 2424, %v6360_v2  ;;  %vm2483_vm14 = vcmp.lt.s32.totalorder %v1456_v8, %v6363_v4 }
 0x240   : > { %v5527_v29 = vadd.f32 %v5526_v24, %v4503_v18  ;;  %v3493_v18 = vsel %vm2469_vm0, %v417_v9, 0.0  ;;  %v420_v24 = vld [vmem:[%s6355_s12 + $0x918] sm:$0xff] }
 0x241   : > { %v4517_v26 = vmul.f32 %v3493_v18, %v3493_v18  ;;  %v1458_v18 = vadd.s32 2432, %v6360_v2  ;;  %vm2484_vm15 = vcmp.lt.s32.totalorder %v1457_v13, %v6363_v4 }
 0x242   : > { %v5528_v34 = vadd.f32 %v5527_v29, %v4504_v23  ;;  %v3494_v23 = vsel %vm2470_vm1, %v418_v14, 0.0  ;;  %v421_v29 = vld [vmem:[%s6355_s12 + $0x920] sm:$0xff] }
 0x243   : > { %v4518_v31 = vmul.f32 %v3494_v23, %v3494_v23  ;;  %v1459_v23 = vadd.s32 2440, %v6360_v2  ;;  %vm2485_vm0 = vcmp.lt.s32.totalorder %v1458_v18, %v6363_v4 }
 0x244   : > { %v5529_v39 = vadd.f32 %v5528_v34, %v4505_v28  ;;  %v3495_v28 = vsel %vm2471_vm2, %v419_v19, 0.0  ;;  %v422_v34 = vld [vmem:[%s6355_s12 + $0x928] sm:$0xff] }
 0x245   : > { %v4519_v36 = vmul.f32 %v3495_v28, %v3495_v28  ;;  %v1460_v28 = vadd.s32 2448, %v6360_v2  ;;  %vm2486_vm1 = vcmp.lt.s32.totalorder %v1459_v23, %v6363_v4 }
 0x246   : > { %v5530_v44 = vadd.f32 %v5529_v39, %v4506_v33  ;;  %v3496_v33 = vsel %vm2472_vm3, %v420_v24, 0.0  ;;  %v423_v39 = vld [vmem:[%s6355_s12 + $0x930] sm:$0xff] }
 0x247   : > { %v4520_v41 = vmul.f32 %v3496_v33, %v3496_v33  ;;  %v1461_v33 = vadd.s32 2456, %v6360_v2  ;;  %vm2487_vm2 = vcmp.lt.s32.totalorder %v1460_v28, %v6363_v4 }
 0x248   : > { %v5531_v49 = vadd.f32 %v5530_v44, %v4507_v38  ;;  %v3497_v38 = vsel %vm2473_vm4, %v421_v29, 0.0  ;;  %v424_v44 = vld [vmem:[%s6355_s12 + $0x938] sm:$0xff] }
 0x249   : > { %v4521_v46 = vmul.f32 %v3497_v38, %v3497_v38  ;;  %v1462_v38 = vadd.s32 2464, %v6360_v2  ;;  %vm2488_vm3 = vcmp.lt.s32.totalorder %v1461_v33, %v6363_v4 }
 0x24a   : > { %v5532_v54 = vadd.f32 %v5531_v49, %v4508_v43  ;;  %v3498_v43 = vsel %vm2474_vm5, %v422_v34, 0.0  ;;  %v425_v49 = vld [vmem:[%s6355_s12 + $0x940] sm:$0xff] }
 0x24b   : > { %v4522_v51 = vmul.f32 %v3498_v43, %v3498_v43  ;;  %v1463_v43 = vadd.s32 2472, %v6360_v2  ;;  %vm2489_vm4 = vcmp.lt.s32.totalorder %v1462_v38, %v6363_v4 }
 0x24c   : > { %v5533_v59 = vadd.f32 %v5532_v54, %v4509_v48  ;;  %v3499_v48 = vsel %vm2475_vm6, %v423_v39, 0.0  ;;  %v426_v54 = vld [vmem:[%s6355_s12 + $0x948] sm:$0xff] }
 0x24d   : > { %v4523_v56 = vmul.f32 %v3499_v48, %v3499_v48  ;;  %v1464_v48 = vadd.s32 2480, %v6360_v2  ;;  %vm2490_vm5 = vcmp.lt.s32.totalorder %v1463_v43, %v6363_v4 }
 0x24e   : > { %v5534_v0 = vadd.f32 %v5533_v59, %v4510_v53  ;;  %v3500_v53 = vsel %vm2476_vm7, %v424_v44, 0.0  ;;  %v427_v59 = vld [vmem:[%s6355_s12 + $0x950] sm:$0xff] }
 0x24f   : > { %v4524_v61 = vmul.f32 %v3500_v53, %v3500_v53  ;;  %v1465_v53 = vadd.s32 2488, %v6360_v2  ;;  %vm2491_vm6 = vcmp.lt.s32.totalorder %v1464_v48, %v6363_v4 }
 0x250   : > { %v5535_v7 = vadd.f32 %v5534_v0, %v4511_v58  ;;  %v3501_v58 = vsel %vm2477_vm8, %v425_v49, 0.0  ;;  %v428_v0 = vld [vmem:[%s6355_s12 + $0x958] sm:$0xff] }
 0x251   : > { %v4525_v3 = vmul.f32 %v3501_v58, %v3501_v58  ;;  %v1466_v58 = vadd.s32 2496, %v6360_v2  ;;  %vm2492_vm7 = vcmp.lt.s32.totalorder %v1465_v53, %v6363_v4 }
 0x252   : > { %v5536_v12 = vadd.f32 %v5535_v7, %v4512_v63  ;;  %v3502_v63 = vsel %vm2478_vm9, %v426_v54, 0.0  ;;  %v429_v7 = vld [vmem:[%s6355_s12 + $0x960] sm:$0xff] }
 0x253   : > { %v4526_v9 = vmul.f32 %v3502_v63, %v3502_v63  ;;  %v1467_v63 = vadd.s32 2504, %v6360_v2  ;;  %vm2493_vm8 = vcmp.lt.s32.totalorder %v1466_v58, %v6363_v4 }
 0x254   : > { %v5537_v17 = vadd.f32 %v5536_v12, %v4513_v6  ;;  %v3503_v6 = vsel %vm2479_vm10, %v427_v59, 0.0  ;;  %v430_v12 = vld [vmem:[%s6355_s12 + $0x968] sm:$0xff] }
 0x255   : > { %v4527_v14 = vmul.f32 %v3503_v6, %v3503_v6  ;;  %v1468_v6 = vadd.s32 2512, %v6360_v2  ;;  %vm2494_vm9 = vcmp.lt.s32.totalorder %v1467_v63, %v6363_v4 }
 0x256   : > { %v5538_v22 = vadd.f32 %v5537_v17, %v4514_v11  ;;  %v3504_v11 = vsel %vm2480_vm11, %v428_v0, 0.0  ;;  %v431_v17 = vld [vmem:[%s6355_s12 + $0x970] sm:$0xff] }
 0x257   : > { %v4528_v19 = vmul.f32 %v3504_v11, %v3504_v11  ;;  %v1469_v11 = vadd.s32 2520, %v6360_v2  ;;  %vm2495_vm10 = vcmp.lt.s32.totalorder %v1468_v6, %v6363_v4 }
 0x258   : > { %v5539_v27 = vadd.f32 %v5538_v22, %v4515_v16  ;;  %v3505_v16 = vsel %vm2481_vm12, %v429_v7, 0.0  ;;  %v432_v22 = vld [vmem:[%s6355_s12 + $0x978] sm:$0xff] }
 0x259   : > { %v4529_v24 = vmul.f32 %v3505_v16, %v3505_v16  ;;  %v1470_v16 = vadd.s32 2528, %v6360_v2  ;;  %vm2496_vm11 = vcmp.lt.s32.totalorder %v1469_v11, %v6363_v4 }
 0x25a   : > { %v5540_v32 = vadd.f32 %v5539_v27, %v4516_v21  ;;  %v3506_v21 = vsel %vm2482_vm13, %v430_v12, 0.0  ;;  %v433_v27 = vld [vmem:[%s6355_s12 + $0x980] sm:$0xff] }
 0x25b   : > { %v4530_v29 = vmul.f32 %v3506_v21, %v3506_v21  ;;  %v1471_v21 = vadd.s32 2536, %v6360_v2  ;;  %vm2497_vm12 = vcmp.lt.s32.totalorder %v1470_v16, %v6363_v4 }
 0x25c   : > { %v5541_v37 = vadd.f32 %v5540_v32, %v4517_v26  ;;  %v3507_v26 = vsel %vm2483_vm14, %v431_v17, 0.0  ;;  %v434_v32 = vld [vmem:[%s6355_s12 + $0x988] sm:$0xff] }
 0x25d   : > { %v4531_v34 = vmul.f32 %v3507_v26, %v3507_v26  ;;  %v1472_v26 = vadd.s32 2544, %v6360_v2  ;;  %vm2498_vm13 = vcmp.lt.s32.totalorder %v1471_v21, %v6363_v4 }
 0x25e   : > { %v5542_v42 = vadd.f32 %v5541_v37, %v4518_v31  ;;  %v3508_v31 = vsel %vm2484_vm15, %v432_v22, 0.0  ;;  %v435_v37 = vld [vmem:[%s6355_s12 + $0x990] sm:$0xff] }
 0x25f   : > { %v4532_v39 = vmul.f32 %v3508_v31, %v3508_v31  ;;  %v1473_v31 = vadd.s32 2552, %v6360_v2  ;;  %vm2499_vm14 = vcmp.lt.s32.totalorder %v1472_v26, %v6363_v4 }
 0x260   : > { %v5543_v47 = vadd.f32 %v5542_v42, %v4519_v36  ;;  %v3509_v36 = vsel %vm2485_vm0, %v433_v27, 0.0  ;;  %v436_v42 = vld [vmem:[%s6355_s12 + $0x998] sm:$0xff] }
 0x261   : > { %v4533_v44 = vmul.f32 %v3509_v36, %v3509_v36  ;;  %v1474_v36 = vadd.s32 2560, %v6360_v2  ;;  %vm2500_vm15 = vcmp.lt.s32.totalorder %v1473_v31, %v6363_v4 }
 0x262   : > { %v5544_v52 = vadd.f32 %v5543_v47, %v4520_v41  ;;  %v3510_v41 = vsel %vm2486_vm1, %v434_v32, 0.0  ;;  %v437_v47 = vld [vmem:[%s6355_s12 + $0x9a0] sm:$0xff] }
 0x263   : > { %v4534_v49 = vmul.f32 %v3510_v41, %v3510_v41  ;;  %v1475_v41 = vadd.s32 2568, %v6360_v2  ;;  %vm2501_vm0 = vcmp.lt.s32.totalorder %v1474_v36, %v6363_v4 }
 0x264   : > { %v5545_v57 = vadd.f32 %v5544_v52, %v4521_v46  ;;  %v3511_v46 = vsel %vm2487_vm2, %v435_v37, 0.0  ;;  %v438_v52 = vld [vmem:[%s6355_s12 + $0x9a8] sm:$0xff] }
 0x265   : > { %v4535_v54 = vmul.f32 %v3511_v46, %v3511_v46  ;;  %v1476_v46 = vadd.s32 2576, %v6360_v2  ;;  %vm2502_vm1 = vcmp.lt.s32.totalorder %v1475_v41, %v6363_v4 }
 0x266   : > { %v5546_v62 = vadd.f32 %v5545_v57, %v4522_v51  ;;  %v3512_v51 = vsel %vm2488_vm3, %v436_v42, 0.0  ;;  %v439_v57 = vld [vmem:[%s6355_s12 + $0x9b0] sm:$0xff] }
 0x267   : > { %v4536_v59 = vmul.f32 %v3512_v51, %v3512_v51  ;;  %v1477_v51 = vadd.s32 2584, %v6360_v2  ;;  %vm2503_vm2 = vcmp.lt.s32.totalorder %v1476_v46, %v6363_v4 }
 0x268   : > { %v5547_v5 = vadd.f32 %v5546_v62, %v4523_v56  ;;  %v3513_v56 = vsel %vm2489_vm4, %v437_v47, 0.0  ;;  %v440_v62 = vld [vmem:[%s6355_s12 + $0x9b8] sm:$0xff] }
 0x269   : > { %v4537_v0 = vmul.f32 %v3513_v56, %v3513_v56  ;;  %v1478_v56 = vadd.s32 2592, %v6360_v2  ;;  %vm2504_vm3 = vcmp.lt.s32.totalorder %v1477_v51, %v6363_v4 }
 0x26a   : > { %v5548_v10 = vadd.f32 %v5547_v5, %v4524_v61  ;;  %v3514_v61 = vsel %vm2490_vm5, %v438_v52, 0.0  ;;  %v441_v5 = vld [vmem:[%s6355_s12 + $0x9c0] sm:$0xff] }
 0x26b   : > { %v4538_v7 = vmul.f32 %v3514_v61, %v3514_v61  ;;  %v1479_v61 = vadd.s32 2600, %v6360_v2  ;;  %vm2505_vm4 = vcmp.lt.s32.totalorder %v1478_v56, %v6363_v4 }
 0x26c   : > { %v5549_v15 = vadd.f32 %v5548_v10, %v4525_v3  ;;  %v3515_v3 = vsel %vm2491_vm6, %v439_v57, 0.0  ;;  %v442_v10 = vld [vmem:[%s6355_s12 + $0x9c8] sm:$0xff] }
 0x26d   : > { %v4539_v12 = vmul.f32 %v3515_v3, %v3515_v3  ;;  %v1480_v3 = vadd.s32 2608, %v6360_v2  ;;  %vm2506_vm5 = vcmp.lt.s32.totalorder %v1479_v61, %v6363_v4 }
 0x26e   : > { %v5550_v20 = vadd.f32 %v5549_v15, %v4526_v9  ;;  %v3516_v9 = vsel %vm2492_vm7, %v440_v62, 0.0  ;;  %v443_v15 = vld [vmem:[%s6355_s12 + $0x9d0] sm:$0xff] }
 0x26f   : > { %v4540_v17 = vmul.f32 %v3516_v9, %v3516_v9  ;;  %v1481_v9 = vadd.s32 2616, %v6360_v2  ;;  %vm2507_vm6 = vcmp.lt.s32.totalorder %v1480_v3, %v6363_v4 }
 0x270   : > { %v5551_v25 = vadd.f32 %v5550_v20, %v4527_v14  ;;  %v3517_v14 = vsel %vm2493_vm8, %v441_v5, 0.0  ;;  %v444_v20 = vld [vmem:[%s6355_s12 + $0x9d8] sm:$0xff] }
 0x271   : > { %v4541_v22 = vmul.f32 %v3517_v14, %v3517_v14  ;;  %v1482_v14 = vadd.s32 2624, %v6360_v2  ;;  %vm2508_vm7 = vcmp.lt.s32.totalorder %v1481_v9, %v6363_v4 }
 0x272   : > { %v5552_v30 = vadd.f32 %v5551_v25, %v4528_v19  ;;  %v3518_v19 = vsel %vm2494_vm9, %v442_v10, 0.0  ;;  %v445_v25 = vld [vmem:[%s6355_s12 + $0x9e0] sm:$0xff] }
 0x273   : > { %v4542_v27 = vmul.f32 %v3518_v19, %v3518_v19  ;;  %v1483_v19 = vadd.s32 2632, %v6360_v2  ;;  %vm2509_vm8 = vcmp.lt.s32.totalorder %v1482_v14, %v6363_v4 }
 0x274   : > { %v5553_v35 = vadd.f32 %v5552_v30, %v4529_v24  ;;  %v3519_v24 = vsel %vm2495_vm10, %v443_v15, 0.0  ;;  %v446_v30 = vld [vmem:[%s6355_s12 + $0x9e8] sm:$0xff] }
 0x275   : > { %v4543_v32 = vmul.f32 %v3519_v24, %v3519_v24  ;;  %v1484_v24 = vadd.s32 2640, %v6360_v2  ;;  %vm2510_vm9 = vcmp.lt.s32.totalorder %v1483_v19, %v6363_v4 }
 0x276   : > { %v5554_v40 = vadd.f32 %v5553_v35, %v4530_v29  ;;  %v3520_v29 = vsel %vm2496_vm11, %v444_v20, 0.0  ;;  %v447_v35 = vld [vmem:[%s6355_s12 + $0x9f0] sm:$0xff] }
 0x277   : > { %v4544_v37 = vmul.f32 %v3520_v29, %v3520_v29  ;;  %v1485_v29 = vadd.s32 2648, %v6360_v2  ;;  %vm2511_vm10 = vcmp.lt.s32.totalorder %v1484_v24, %v6363_v4 }
 0x278   : > { %v5555_v45 = vadd.f32 %v5554_v40, %v4531_v34  ;;  %v3521_v34 = vsel %vm2497_vm12, %v445_v25, 0.0  ;;  %v448_v40 = vld [vmem:[%s6355_s12 + $0x9f8] sm:$0xff] }
 0x279   : > { %v4545_v42 = vmul.f32 %v3521_v34, %v3521_v34  ;;  %v1486_v34 = vadd.s32 2656, %v6360_v2  ;;  %vm2512_vm11 = vcmp.lt.s32.totalorder %v1485_v29, %v6363_v4 }
 0x27a   : > { %v5556_v50 = vadd.f32 %v5555_v45, %v4532_v39  ;;  %v3522_v39 = vsel %vm2498_vm13, %v446_v30, 0.0  ;;  %v449_v45 = vld [vmem:[%s6355_s12 + $0xa00] sm:$0xff] }
 0x27b   : > { %v4546_v47 = vmul.f32 %v3522_v39, %v3522_v39  ;;  %v1487_v39 = vadd.s32 2664, %v6360_v2  ;;  %vm2513_vm12 = vcmp.lt.s32.totalorder %v1486_v34, %v6363_v4 }
 0x27c   : > { %v5557_v55 = vadd.f32 %v5556_v50, %v4533_v44  ;;  %v3523_v44 = vsel %vm2499_vm14, %v447_v35, 0.0  ;;  %v450_v50 = vld [vmem:[%s6355_s12 + $0xa08] sm:$0xff] }
 0x27d   : > { %v4547_v52 = vmul.f32 %v3523_v44, %v3523_v44  ;;  %v1488_v44 = vadd.s32 2672, %v6360_v2  ;;  %vm2514_vm13 = vcmp.lt.s32.totalorder %v1487_v39, %v6363_v4 }
 0x27e   : > { %v5558_v60 = vadd.f32 %v5557_v55, %v4534_v49  ;;  %v3524_v49 = vsel %vm2500_vm15, %v448_v40, 0.0  ;;  %v451_v55 = vld [vmem:[%s6355_s12 + $0xa10] sm:$0xff] }
 0x27f   : > { %v4548_v57 = vmul.f32 %v3524_v49, %v3524_v49  ;;  %v1489_v49 = vadd.s32 2680, %v6360_v2  ;;  %vm2515_vm14 = vcmp.lt.s32.totalorder %v1488_v44, %v6363_v4 }
 0x280   : > { %v5559_v1 = vadd.f32 %v5558_v60, %v4535_v54  ;;  %v3525_v54 = vsel %vm2501_vm0, %v449_v45, 0.0  ;;  %v452_v60 = vld [vmem:[%s6355_s12 + $0xa18] sm:$0xff] }
 0x281   : > { %v4549_v62 = vmul.f32 %v3525_v54, %v3525_v54  ;;  %v1490_v54 = vadd.s32 2688, %v6360_v2  ;;  %vm2516_vm15 = vcmp.lt.s32.totalorder %v1489_v49, %v6363_v4 }
 0x282   : > { %v5560_v8 = vadd.f32 %v5559_v1, %v4536_v59  ;;  %v3526_v59 = vsel %vm2502_vm1, %v450_v50, 0.0  ;;  %v453_v1 = vld [vmem:[%s6355_s12 + $0xa20] sm:$0xff] }
 0x283   : > { %v4550_v5 = vmul.f32 %v3526_v59, %v3526_v59  ;;  %v1491_v59 = vadd.s32 2696, %v6360_v2  ;;  %vm2517_vm0 = vcmp.lt.s32.totalorder %v1490_v54, %v6363_v4 }
 0x284   : > { %v5561_v13 = vadd.f32 %v5560_v8, %v4537_v0  ;;  %v3527_v0 = vsel %vm2503_vm2, %v451_v55, 0.0  ;;  %v454_v8 = vld [vmem:[%s6355_s12 + $0xa28] sm:$0xff] }
 0x285   : > { %v4551_v10 = vmul.f32 %v3527_v0, %v3527_v0  ;;  %v1492_v0 = vadd.s32 2704, %v6360_v2  ;;  %vm2518_vm1 = vcmp.lt.s32.totalorder %v1491_v59, %v6363_v4 }
 0x286   : > { %v5562_v18 = vadd.f32 %v5561_v13, %v4538_v7  ;;  %v3528_v7 = vsel %vm2504_vm3, %v452_v60, 0.0  ;;  %v455_v13 = vld [vmem:[%s6355_s12 + $0xa30] sm:$0xff] }
 0x287   : > { %v4552_v15 = vmul.f32 %v3528_v7, %v3528_v7  ;;  %v1493_v7 = vadd.s32 2712, %v6360_v2  ;;  %vm2519_vm2 = vcmp.lt.s32.totalorder %v1492_v0, %v6363_v4 }
 0x288   : > { %v5563_v23 = vadd.f32 %v5562_v18, %v4539_v12  ;;  %v3529_v12 = vsel %vm2505_vm4, %v453_v1, 0.0  ;;  %v456_v18 = vld [vmem:[%s6355_s12 + $0xa38] sm:$0xff] }
 0x289   : > { %v4553_v20 = vmul.f32 %v3529_v12, %v3529_v12  ;;  %v1494_v12 = vadd.s32 2720, %v6360_v2  ;;  %vm2520_vm3 = vcmp.lt.s32.totalorder %v1493_v7, %v6363_v4 }
 0x28a   : > { %v5564_v28 = vadd.f32 %v5563_v23, %v4540_v17  ;;  %v3530_v17 = vsel %vm2506_vm5, %v454_v8, 0.0  ;;  %v457_v23 = vld [vmem:[%s6355_s12 + $0xa40] sm:$0xff] }
 0x28b   : > { %v4554_v25 = vmul.f32 %v3530_v17, %v3530_v17  ;;  %v1495_v17 = vadd.s32 2728, %v6360_v2  ;;  %vm2521_vm4 = vcmp.lt.s32.totalorder %v1494_v12, %v6363_v4 }
 0x28c   : > { %v5565_v33 = vadd.f32 %v5564_v28, %v4541_v22  ;;  %v3531_v22 = vsel %vm2507_vm6, %v455_v13, 0.0  ;;  %v458_v28 = vld [vmem:[%s6355_s12 + $0xa48] sm:$0xff] }
 0x28d   : > { %v4555_v30 = vmul.f32 %v3531_v22, %v3531_v22  ;;  %v1496_v22 = vadd.s32 2736, %v6360_v2  ;;  %vm2522_vm5 = vcmp.lt.s32.totalorder %v1495_v17, %v6363_v4 }
 0x28e   : > { %v5566_v38 = vadd.f32 %v5565_v33, %v4542_v27  ;;  %v3532_v27 = vsel %vm2508_vm7, %v456_v18, 0.0  ;;  %v459_v33 = vld [vmem:[%s6355_s12 + $0xa50] sm:$0xff] }
 0x28f   : > { %v4556_v35 = vmul.f32 %v3532_v27, %v3532_v27  ;;  %v1497_v27 = vadd.s32 2744, %v6360_v2  ;;  %vm2523_vm6 = vcmp.lt.s32.totalorder %v1496_v22, %v6363_v4 }
 0x290   : > { %v5567_v43 = vadd.f32 %v5566_v38, %v4543_v32  ;;  %v3533_v32 = vsel %vm2509_vm8, %v457_v23, 0.0  ;;  %v460_v38 = vld [vmem:[%s6355_s12 + $0xa58] sm:$0xff] }
 0x291   : > { %v4557_v40 = vmul.f32 %v3533_v32, %v3533_v32  ;;  %v1498_v32 = vadd.s32 2752, %v6360_v2  ;;  %vm2524_vm7 = vcmp.lt.s32.totalorder %v1497_v27, %v6363_v4 }
 0x292   : > { %v5568_v48 = vadd.f32 %v5567_v43, %v4544_v37  ;;  %v3534_v37 = vsel %vm2510_vm9, %v458_v28, 0.0  ;;  %v461_v43 = vld [vmem:[%s6355_s12 + $0xa60] sm:$0xff] }
 0x293   : > { %v4558_v45 = vmul.f32 %v3534_v37, %v3534_v37  ;;  %v1499_v37 = vadd.s32 2760, %v6360_v2  ;;  %vm2525_vm8 = vcmp.lt.s32.totalorder %v1498_v32, %v6363_v4 }
 0x294   : > { %v5569_v53 = vadd.f32 %v5568_v48, %v4545_v42  ;;  %v3535_v42 = vsel %vm2511_vm10, %v459_v33, 0.0  ;;  %v462_v48 = vld [vmem:[%s6355_s12 + $0xa68] sm:$0xff] }
 0x295   : > { %v4559_v50 = vmul.f32 %v3535_v42, %v3535_v42  ;;  %v1500_v42 = vadd.s32 2768, %v6360_v2  ;;  %vm2526_vm9 = vcmp.lt.s32.totalorder %v1499_v37, %v6363_v4 }
 0x296   : > { %v5570_v58 = vadd.f32 %v5569_v53, %v4546_v47  ;;  %v3536_v47 = vsel %vm2512_vm11, %v460_v38, 0.0  ;;  %v463_v53 = vld [vmem:[%s6355_s12 + $0xa70] sm:$0xff] }
 0x297   : > { %v4560_v55 = vmul.f32 %v3536_v47, %v3536_v47  ;;  %v1501_v47 = vadd.s32 2776, %v6360_v2  ;;  %vm2527_vm10 = vcmp.lt.s32.totalorder %v1500_v42, %v6363_v4 }
 0x298   : > { %v5571_v63 = vadd.f32 %v5570_v58, %v4547_v52  ;;  %v3537_v52 = vsel %vm2513_vm12, %v461_v43, 0.0  ;;  %v464_v58 = vld [vmem:[%s6355_s12 + $0xa78] sm:$0xff] }
 0x299   : > { %v4561_v60 = vmul.f32 %v3537_v52, %v3537_v52  ;;  %v1502_v52 = vadd.s32 2784, %v6360_v2  ;;  %vm2528_vm11 = vcmp.lt.s32.totalorder %v1501_v47, %v6363_v4 }
 0x29a   : > { %v5572_v6 = vadd.f32 %v5571_v63, %v4548_v57  ;;  %v3538_v57 = vsel %vm2514_vm13, %v462_v48, 0.0  ;;  %v465_v63 = vld [vmem:[%s6355_s12 + $0xa80] sm:$0xff] }
 0x29b   : > { %v4562_v1 = vmul.f32 %v3538_v57, %v3538_v57  ;;  %v1503_v57 = vadd.s32 2792, %v6360_v2  ;;  %vm2529_vm12 = vcmp.lt.s32.totalorder %v1502_v52, %v6363_v4 }
 0x29c   : > { %v5573_v11 = vadd.f32 %v5572_v6, %v4549_v62  ;;  %v3539_v62 = vsel %vm2515_vm14, %v463_v53, 0.0  ;;  %v466_v6 = vld [vmem:[%s6355_s12 + $0xa88] sm:$0xff] }
 0x29d   : > { %v4563_v8 = vmul.f32 %v3539_v62, %v3539_v62  ;;  %v1504_v62 = vadd.s32 2800, %v6360_v2  ;;  %vm2530_vm13 = vcmp.lt.s32.totalorder %v1503_v57, %v6363_v4 }
 0x29e   : > { %v5574_v16 = vadd.f32 %v5573_v11, %v4550_v5  ;;  %v3540_v5 = vsel %vm2516_vm15, %v464_v58, 0.0  ;;  %v467_v11 = vld [vmem:[%s6355_s12 + $0xa90] sm:$0xff] }
 0x29f   : > { %v4564_v13 = vmul.f32 %v3540_v5, %v3540_v5  ;;  %v1505_v5 = vadd.s32 2808, %v6360_v2  ;;  %vm2531_vm14 = vcmp.lt.s32.totalorder %v1504_v62, %v6363_v4 }
 0x2a0   : > { %v5575_v21 = vadd.f32 %v5574_v16, %v4551_v10  ;;  %v3541_v10 = vsel %vm2517_vm0, %v465_v63, 0.0  ;;  %v468_v16 = vld [vmem:[%s6355_s12 + $0xa98] sm:$0xff] }
 0x2a1   : > { %v4565_v18 = vmul.f32 %v3541_v10, %v3541_v10  ;;  %v1506_v10 = vadd.s32 2816, %v6360_v2  ;;  %vm2532_vm15 = vcmp.lt.s32.totalorder %v1505_v5, %v6363_v4 }
 0x2a2   : > { %v5576_v26 = vadd.f32 %v5575_v21, %v4552_v15  ;;  %v3542_v15 = vsel %vm2518_vm1, %v466_v6, 0.0  ;;  %v469_v21 = vld [vmem:[%s6355_s12 + $0xaa0] sm:$0xff] }
 0x2a3   : > { %v4566_v23 = vmul.f32 %v3542_v15, %v3542_v15  ;;  %v1507_v15 = vadd.s32 2824, %v6360_v2  ;;  %vm2533_vm0 = vcmp.lt.s32.totalorder %v1506_v10, %v6363_v4 }
 0x2a4   : > { %v5577_v31 = vadd.f32 %v5576_v26, %v4553_v20  ;;  %v3543_v20 = vsel %vm2519_vm2, %v467_v11, 0.0  ;;  %v470_v26 = vld [vmem:[%s6355_s12 + $0xaa8] sm:$0xff] }
 0x2a5   : > { %v4567_v28 = vmul.f32 %v3543_v20, %v3543_v20  ;;  %v1508_v20 = vadd.s32 2832, %v6360_v2  ;;  %vm2534_vm1 = vcmp.lt.s32.totalorder %v1507_v15, %v6363_v4 }
 0x2a6   : > { %v5578_v36 = vadd.f32 %v5577_v31, %v4554_v25  ;;  %v3544_v25 = vsel %vm2520_vm3, %v468_v16, 0.0  ;;  %v471_v31 = vld [vmem:[%s6355_s12 + $0xab0] sm:$0xff] }
 0x2a7   : > { %v4568_v33 = vmul.f32 %v3544_v25, %v3544_v25  ;;  %v1509_v25 = vadd.s32 2840, %v6360_v2  ;;  %vm2535_vm2 = vcmp.lt.s32.totalorder %v1508_v20, %v6363_v4 }
 0x2a8   : > { %v5579_v41 = vadd.f32 %v5578_v36, %v4555_v30  ;;  %v3545_v30 = vsel %vm2521_vm4, %v469_v21, 0.0  ;;  %v472_v36 = vld [vmem:[%s6355_s12 + $0xab8] sm:$0xff] }
 0x2a9   : > { %v4569_v38 = vmul.f32 %v3545_v30, %v3545_v30  ;;  %v1510_v30 = vadd.s32 2848, %v6360_v2  ;;  %vm2536_vm3 = vcmp.lt.s32.totalorder %v1509_v25, %v6363_v4 }
 0x2aa   : > { %v5580_v46 = vadd.f32 %v5579_v41, %v4556_v35  ;;  %v3546_v35 = vsel %vm2522_vm5, %v470_v26, 0.0  ;;  %v473_v41 = vld [vmem:[%s6355_s12 + $0xac0] sm:$0xff] }
 0x2ab   : > { %v4570_v43 = vmul.f32 %v3546_v35, %v3546_v35  ;;  %v1511_v35 = vadd.s32 2856, %v6360_v2  ;;  %vm2537_vm4 = vcmp.lt.s32.totalorder %v1510_v30, %v6363_v4 }
 0x2ac   : > { %v5581_v51 = vadd.f32 %v5580_v46, %v4557_v40  ;;  %v3547_v40 = vsel %vm2523_vm6, %v471_v31, 0.0  ;;  %v474_v46 = vld [vmem:[%s6355_s12 + $0xac8] sm:$0xff] }
 0x2ad   : > { %v4571_v48 = vmul.f32 %v3547_v40, %v3547_v40  ;;  %v1512_v40 = vadd.s32 2864, %v6360_v2  ;;  %vm2538_vm5 = vcmp.lt.s32.totalorder %v1511_v35, %v6363_v4 }
 0x2ae   : > { %v5582_v56 = vadd.f32 %v5581_v51, %v4558_v45  ;;  %v3548_v45 = vsel %vm2524_vm7, %v472_v36, 0.0  ;;  %v475_v51 = vld [vmem:[%s6355_s12 + $0xad0] sm:$0xff] }
 0x2af   : > { %v4572_v53 = vmul.f32 %v3548_v45, %v3548_v45  ;;  %v1513_v45 = vadd.s32 2872, %v6360_v2  ;;  %vm2539_vm6 = vcmp.lt.s32.totalorder %v1512_v40, %v6363_v4 }
 0x2b0   : > { %v5583_v61 = vadd.f32 %v5582_v56, %v4559_v50  ;;  %v3549_v50 = vsel %vm2525_vm8, %v473_v41, 0.0  ;;  %v476_v56 = vld [vmem:[%s6355_s12 + $0xad8] sm:$0xff] }
 0x2b1   : > { %v4573_v58 = vmul.f32 %v3549_v50, %v3549_v50  ;;  %v1514_v50 = vadd.s32 2880, %v6360_v2  ;;  %vm2540_vm7 = vcmp.lt.s32.totalorder %v1513_v45, %v6363_v4 }
 0x2b2   : > { %v5584_v3 = vadd.f32 %v5583_v61, %v4560_v55  ;;  %v3550_v55 = vsel %vm2526_vm9, %v474_v46, 0.0  ;;  %v477_v61 = vld [vmem:[%s6355_s12 + $0xae0] sm:$0xff] }
 0x2b3   : > { %v4574_v63 = vmul.f32 %v3550_v55, %v3550_v55  ;;  %v1515_v55 = vadd.s32 2888, %v6360_v2  ;;  %vm2541_vm8 = vcmp.lt.s32.totalorder %v1514_v50, %v6363_v4 }
 0x2b4   : > { %v5585_v9 = vadd.f32 %v5584_v3, %v4561_v60  ;;  %v3551_v60 = vsel %vm2527_vm10, %v475_v51, 0.0  ;;  %v478_v3 = vld [vmem:[%s6355_s12 + $0xae8] sm:$0xff] }
 0x2b5   : > { %v4575_v6 = vmul.f32 %v3551_v60, %v3551_v60  ;;  %v1516_v60 = vadd.s32 2896, %v6360_v2  ;;  %vm2542_vm9 = vcmp.lt.s32.totalorder %v1515_v55, %v6363_v4 }
 0x2b6   : > { %v5586_v14 = vadd.f32 %v5585_v9, %v4562_v1  ;;  %v3552_v1 = vsel %vm2528_vm11, %v476_v56, 0.0  ;;  %v479_v9 = vld [vmem:[%s6355_s12 + $0xaf0] sm:$0xff] }
 0x2b7   : > { %v4576_v11 = vmul.f32 %v3552_v1, %v3552_v1  ;;  %v1517_v1 = vadd.s32 2904, %v6360_v2  ;;  %vm2543_vm10 = vcmp.lt.s32.totalorder %v1516_v60, %v6363_v4 }
 0x2b8   : > { %v5587_v19 = vadd.f32 %v5586_v14, %v4563_v8  ;;  %v3553_v8 = vsel %vm2529_vm12, %v477_v61, 0.0  ;;  %v480_v14 = vld [vmem:[%s6355_s12 + $0xaf8] sm:$0xff] }
 0x2b9   : > { %v4577_v16 = vmul.f32 %v3553_v8, %v3553_v8  ;;  %v1518_v8 = vadd.s32 2912, %v6360_v2  ;;  %vm2544_vm11 = vcmp.lt.s32.totalorder %v1517_v1, %v6363_v4 }
 0x2ba   : > { %v5588_v24 = vadd.f32 %v5587_v19, %v4564_v13  ;;  %v3554_v13 = vsel %vm2530_vm13, %v478_v3, 0.0  ;;  %v481_v19 = vld [vmem:[%s6355_s12 + $0xb00] sm:$0xff] }
 0x2bb   : > { %v4578_v21 = vmul.f32 %v3554_v13, %v3554_v13  ;;  %v1519_v13 = vadd.s32 2920, %v6360_v2  ;;  %vm2545_vm12 = vcmp.lt.s32.totalorder %v1518_v8, %v6363_v4 }
 0x2bc   : > { %v5589_v29 = vadd.f32 %v5588_v24, %v4565_v18  ;;  %v3555_v18 = vsel %vm2531_vm14, %v479_v9, 0.0  ;;  %v482_v24 = vld [vmem:[%s6355_s12 + $0xb08] sm:$0xff] }
 0x2bd   : > { %v4579_v26 = vmul.f32 %v3555_v18, %v3555_v18  ;;  %v1520_v18 = vadd.s32 2928, %v6360_v2  ;;  %vm2546_vm13 = vcmp.lt.s32.totalorder %v1519_v13, %v6363_v4 }
 0x2be   : > { %v5590_v34 = vadd.f32 %v5589_v29, %v4566_v23  ;;  %v3556_v23 = vsel %vm2532_vm15, %v480_v14, 0.0  ;;  %v483_v29 = vld [vmem:[%s6355_s12 + $0xb10] sm:$0xff] }
 0x2bf   : > { %v4580_v31 = vmul.f32 %v3556_v23, %v3556_v23  ;;  %v1521_v23 = vadd.s32 2936, %v6360_v2  ;;  %vm2547_vm14 = vcmp.lt.s32.totalorder %v1520_v18, %v6363_v4 }
 0x2c0   : > { %v5591_v39 = vadd.f32 %v5590_v34, %v4567_v28  ;;  %v3557_v28 = vsel %vm2533_vm0, %v481_v19, 0.0  ;;  %v484_v34 = vld [vmem:[%s6355_s12 + $0xb18] sm:$0xff] }
 0x2c1   : > { %v4581_v36 = vmul.f32 %v3557_v28, %v3557_v28  ;;  %v1522_v28 = vadd.s32 2944, %v6360_v2  ;;  %vm2548_vm15 = vcmp.lt.s32.totalorder %v1521_v23, %v6363_v4 }
 0x2c2   : > { %v5592_v44 = vadd.f32 %v5591_v39, %v4568_v33  ;;  %v3558_v33 = vsel %vm2534_vm1, %v482_v24, 0.0  ;;  %v485_v39 = vld [vmem:[%s6355_s12 + $0xb20] sm:$0xff] }
 0x2c3   : > { %v4582_v41 = vmul.f32 %v3558_v33, %v3558_v33  ;;  %v1523_v33 = vadd.s32 2952, %v6360_v2  ;;  %vm2549_vm0 = vcmp.lt.s32.totalorder %v1522_v28, %v6363_v4 }
 0x2c4   : > { %v5593_v49 = vadd.f32 %v5592_v44, %v4569_v38  ;;  %v3559_v38 = vsel %vm2535_vm2, %v483_v29, 0.0  ;;  %v486_v44 = vld [vmem:[%s6355_s12 + $0xb28] sm:$0xff] }
 0x2c5   : > { %v4583_v46 = vmul.f32 %v3559_v38, %v3559_v38  ;;  %v1524_v38 = vadd.s32 2960, %v6360_v2  ;;  %vm2550_vm1 = vcmp.lt.s32.totalorder %v1523_v33, %v6363_v4 }
 0x2c6   : > { %v5594_v54 = vadd.f32 %v5593_v49, %v4570_v43  ;;  %v3560_v43 = vsel %vm2536_vm3, %v484_v34, 0.0  ;;  %v487_v49 = vld [vmem:[%s6355_s12 + $0xb30] sm:$0xff] }
 0x2c7   : > { %v4584_v51 = vmul.f32 %v3560_v43, %v3560_v43  ;;  %v1525_v43 = vadd.s32 2968, %v6360_v2  ;;  %vm2551_vm2 = vcmp.lt.s32.totalorder %v1524_v38, %v6363_v4 }
 0x2c8   : > { %v5595_v59 = vadd.f32 %v5594_v54, %v4571_v48  ;;  %v3561_v48 = vsel %vm2537_vm4, %v485_v39, 0.0  ;;  %v488_v54 = vld [vmem:[%s6355_s12 + $0xb38] sm:$0xff] }
 0x2c9   : > { %v4585_v56 = vmul.f32 %v3561_v48, %v3561_v48  ;;  %v1526_v48 = vadd.s32 2976, %v6360_v2  ;;  %vm2552_vm3 = vcmp.lt.s32.totalorder %v1525_v43, %v6363_v4 }
 0x2ca   : > { %v5596_v0 = vadd.f32 %v5595_v59, %v4572_v53  ;;  %v3562_v53 = vsel %vm2538_vm5, %v486_v44, 0.0  ;;  %v489_v59 = vld [vmem:[%s6355_s12 + $0xb40] sm:$0xff] }
 0x2cb   : > { %v4586_v61 = vmul.f32 %v3562_v53, %v3562_v53  ;;  %v1527_v53 = vadd.s32 2984, %v6360_v2  ;;  %vm2553_vm4 = vcmp.lt.s32.totalorder %v1526_v48, %v6363_v4 }
 0x2cc   : > { %v5597_v7 = vadd.f32 %v5596_v0, %v4573_v58  ;;  %v3563_v58 = vsel %vm2539_vm6, %v487_v49, 0.0  ;;  %v490_v0 = vld [vmem:[%s6355_s12 + $0xb48] sm:$0xff] }
 0x2cd   : > { %v4587_v3 = vmul.f32 %v3563_v58, %v3563_v58  ;;  %v1528_v58 = vadd.s32 2992, %v6360_v2  ;;  %vm2554_vm5 = vcmp.lt.s32.totalorder %v1527_v53, %v6363_v4 }
 0x2ce   : > { %v5598_v12 = vadd.f32 %v5597_v7, %v4574_v63  ;;  %v3564_v63 = vsel %vm2540_vm7, %v488_v54, 0.0  ;;  %v491_v7 = vld [vmem:[%s6355_s12 + $0xb50] sm:$0xff] }
 0x2cf   : > { %v4588_v9 = vmul.f32 %v3564_v63, %v3564_v63  ;;  %v1529_v63 = vadd.s32 3000, %v6360_v2  ;;  %vm2555_vm6 = vcmp.lt.s32.totalorder %v1528_v58, %v6363_v4 }
 0x2d0   : > { %v5599_v17 = vadd.f32 %v5598_v12, %v4575_v6  ;;  %v3565_v6 = vsel %vm2541_vm8, %v489_v59, 0.0  ;;  %v492_v12 = vld [vmem:[%s6355_s12 + $0xb58] sm:$0xff] }
 0x2d1   : > { %v4589_v14 = vmul.f32 %v3565_v6, %v3565_v6  ;;  %v1530_v6 = vadd.s32 3008, %v6360_v2  ;;  %vm2556_vm7 = vcmp.lt.s32.totalorder %v1529_v63, %v6363_v4 }
 0x2d2   : > { %v5600_v22 = vadd.f32 %v5599_v17, %v4576_v11  ;;  %v3566_v11 = vsel %vm2542_vm9, %v490_v0, 0.0  ;;  %v493_v17 = vld [vmem:[%s6355_s12 + $0xb60] sm:$0xff] }
 0x2d3   : > { %v4590_v19 = vmul.f32 %v3566_v11, %v3566_v11  ;;  %v1531_v11 = vadd.s32 3016, %v6360_v2  ;;  %vm2557_vm8 = vcmp.lt.s32.totalorder %v1530_v6, %v6363_v4 }
 0x2d4   : > { %v5601_v27 = vadd.f32 %v5600_v22, %v4577_v16  ;;  %v3567_v16 = vsel %vm2543_vm10, %v491_v7, 0.0  ;;  %v494_v22 = vld [vmem:[%s6355_s12 + $0xb68] sm:$0xff] }
 0x2d5   : > { %v4591_v24 = vmul.f32 %v3567_v16, %v3567_v16  ;;  %v1532_v16 = vadd.s32 3024, %v6360_v2  ;;  %vm2558_vm9 = vcmp.lt.s32.totalorder %v1531_v11, %v6363_v4 }
 0x2d6   : > { %v5602_v32 = vadd.f32 %v5601_v27, %v4578_v21  ;;  %v3568_v21 = vsel %vm2544_vm11, %v492_v12, 0.0  ;;  %v495_v27 = vld [vmem:[%s6355_s12 + $0xb70] sm:$0xff] }
 0x2d7   : > { %v4592_v29 = vmul.f32 %v3568_v21, %v3568_v21  ;;  %v1533_v21 = vadd.s32 3032, %v6360_v2  ;;  %vm2559_vm10 = vcmp.lt.s32.totalorder %v1532_v16, %v6363_v4 }
 0x2d8   : > { %v5603_v37 = vadd.f32 %v5602_v32, %v4579_v26  ;;  %v3569_v26 = vsel %vm2545_vm12, %v493_v17, 0.0  ;;  %v496_v32 = vld [vmem:[%s6355_s12 + $0xb78] sm:$0xff] }
 0x2d9   : > { %v4593_v34 = vmul.f32 %v3569_v26, %v3569_v26  ;;  %v1534_v26 = vadd.s32 3040, %v6360_v2  ;;  %vm2560_vm11 = vcmp.lt.s32.totalorder %v1533_v21, %v6363_v4 }
 0x2da   : > { %v5604_v42 = vadd.f32 %v5603_v37, %v4580_v31  ;;  %v3570_v31 = vsel %vm2546_vm13, %v494_v22, 0.0  ;;  %v497_v37 = vld [vmem:[%s6355_s12 + $0xb80] sm:$0xff] }
 0x2db   : > { %v4594_v39 = vmul.f32 %v3570_v31, %v3570_v31  ;;  %v1535_v31 = vadd.s32 3048, %v6360_v2  ;;  %vm2561_vm12 = vcmp.lt.s32.totalorder %v1534_v26, %v6363_v4 }
 0x2dc   : > { %v5605_v47 = vadd.f32 %v5604_v42, %v4581_v36  ;;  %v3571_v36 = vsel %vm2547_vm14, %v495_v27, 0.0  ;;  %v498_v42 = vld [vmem:[%s6355_s12 + $0xb88] sm:$0xff] }
 0x2dd   : > { %v4595_v44 = vmul.f32 %v3571_v36, %v3571_v36  ;;  %v1536_v36 = vadd.s32 3056, %v6360_v2  ;;  %vm2562_vm13 = vcmp.lt.s32.totalorder %v1535_v31, %v6363_v4 }
 0x2de   : > { %v5606_v52 = vadd.f32 %v5605_v47, %v4582_v41  ;;  %v3572_v41 = vsel %vm2548_vm15, %v496_v32, 0.0  ;;  %v499_v47 = vld [vmem:[%s6355_s12 + $0xb90] sm:$0xff] }
 0x2df   : > { %v4596_v49 = vmul.f32 %v3572_v41, %v3572_v41  ;;  %v1537_v41 = vadd.s32 3064, %v6360_v2  ;;  %vm2563_vm14 = vcmp.lt.s32.totalorder %v1536_v36, %v6363_v4 }
 0x2e0   : > { %v5607_v57 = vadd.f32 %v5606_v52, %v4583_v46  ;;  %v3573_v46 = vsel %vm2549_vm0, %v497_v37, 0.0  ;;  %v500_v52 = vld [vmem:[%s6355_s12 + $0xb98] sm:$0xff] }
 0x2e1   : > { %v4597_v54 = vmul.f32 %v3573_v46, %v3573_v46  ;;  %v1538_v46 = vadd.s32 3072, %v6360_v2  ;;  %vm2564_vm15 = vcmp.lt.s32.totalorder %v1537_v41, %v6363_v4 }
 0x2e2   : > { %v5608_v62 = vadd.f32 %v5607_v57, %v4584_v51  ;;  %v3574_v51 = vsel %vm2550_vm1, %v498_v42, 0.0  ;;  %v501_v57 = vld [vmem:[%s6355_s12 + $0xba0] sm:$0xff] }
 0x2e3   : > { %v4598_v59 = vmul.f32 %v3574_v51, %v3574_v51  ;;  %v1539_v51 = vadd.s32 3080, %v6360_v2  ;;  %vm2565_vm0 = vcmp.lt.s32.totalorder %v1538_v46, %v6363_v4 }
 0x2e4   : > { %v5609_v5 = vadd.f32 %v5608_v62, %v4585_v56  ;;  %v3575_v56 = vsel %vm2551_vm2, %v499_v47, 0.0  ;;  %v502_v62 = vld [vmem:[%s6355_s12 + $0xba8] sm:$0xff] }
 0x2e5   : > { %v4599_v0 = vmul.f32 %v3575_v56, %v3575_v56  ;;  %v1540_v56 = vadd.s32 3088, %v6360_v2  ;;  %vm2566_vm1 = vcmp.lt.s32.totalorder %v1539_v51, %v6363_v4 }
 0x2e6   : > { %v5610_v10 = vadd.f32 %v5609_v5, %v4586_v61  ;;  %v3576_v61 = vsel %vm2552_vm3, %v500_v52, 0.0  ;;  %v503_v5 = vld [vmem:[%s6355_s12 + $0xbb0] sm:$0xff] }
 0x2e7   : > { %v4600_v7 = vmul.f32 %v3576_v61, %v3576_v61  ;;  %v1541_v61 = vadd.s32 3096, %v6360_v2  ;;  %vm2567_vm2 = vcmp.lt.s32.totalorder %v1540_v56, %v6363_v4 }
 0x2e8   : > { %v5611_v15 = vadd.f32 %v5610_v10, %v4587_v3  ;;  %v3577_v3 = vsel %vm2553_vm4, %v501_v57, 0.0  ;;  %v504_v10 = vld [vmem:[%s6355_s12 + $0xbb8] sm:$0xff] }
 0x2e9   : > { %v4601_v12 = vmul.f32 %v3577_v3, %v3577_v3  ;;  %v1542_v3 = vadd.s32 3104, %v6360_v2  ;;  %vm2568_vm3 = vcmp.lt.s32.totalorder %v1541_v61, %v6363_v4 }
 0x2ea   : > { %v5612_v20 = vadd.f32 %v5611_v15, %v4588_v9  ;;  %v3578_v9 = vsel %vm2554_vm5, %v502_v62, 0.0  ;;  %v505_v15 = vld [vmem:[%s6355_s12 + $0xbc0] sm:$0xff] }
 0x2eb   : > { %v4602_v17 = vmul.f32 %v3578_v9, %v3578_v9  ;;  %v1543_v9 = vadd.s32 3112, %v6360_v2  ;;  %vm2569_vm4 = vcmp.lt.s32.totalorder %v1542_v3, %v6363_v4 }
 0x2ec   : > { %v5613_v25 = vadd.f32 %v5612_v20, %v4589_v14  ;;  %v3579_v14 = vsel %vm2555_vm6, %v503_v5, 0.0  ;;  %v506_v20 = vld [vmem:[%s6355_s12 + $0xbc8] sm:$0xff] }
 0x2ed   : > { %v4603_v22 = vmul.f32 %v3579_v14, %v3579_v14  ;;  %v1544_v14 = vadd.s32 3120, %v6360_v2  ;;  %vm2570_vm5 = vcmp.lt.s32.totalorder %v1543_v9, %v6363_v4 }
 0x2ee   : > { %v5614_v30 = vadd.f32 %v5613_v25, %v4590_v19  ;;  %v3580_v19 = vsel %vm2556_vm7, %v504_v10, 0.0  ;;  %v507_v25 = vld [vmem:[%s6355_s12 + $0xbd0] sm:$0xff] }
 0x2ef   : > { %v4604_v27 = vmul.f32 %v3580_v19, %v3580_v19  ;;  %v1545_v19 = vadd.s32 3128, %v6360_v2  ;;  %vm2571_vm6 = vcmp.lt.s32.totalorder %v1544_v14, %v6363_v4 }
 0x2f0   : > { %v5615_v35 = vadd.f32 %v5614_v30, %v4591_v24  ;;  %v3581_v24 = vsel %vm2557_vm8, %v505_v15, 0.0  ;;  %v508_v30 = vld [vmem:[%s6355_s12 + $0xbd8] sm:$0xff] }
 0x2f1   : > { %v4605_v32 = vmul.f32 %v3581_v24, %v3581_v24  ;;  %v1546_v24 = vadd.s32 3136, %v6360_v2  ;;  %vm2572_vm7 = vcmp.lt.s32.totalorder %v1545_v19, %v6363_v4 }
 0x2f2   : > { %v5616_v40 = vadd.f32 %v5615_v35, %v4592_v29  ;;  %v3582_v29 = vsel %vm2558_vm9, %v506_v20, 0.0  ;;  %v509_v35 = vld [vmem:[%s6355_s12 + $0xbe0] sm:$0xff] }
 0x2f3   : > { %v4606_v37 = vmul.f32 %v3582_v29, %v3582_v29  ;;  %v1547_v29 = vadd.s32 3144, %v6360_v2  ;;  %vm2573_vm8 = vcmp.lt.s32.totalorder %v1546_v24, %v6363_v4 }
 0x2f4   : > { %v5617_v45 = vadd.f32 %v5616_v40, %v4593_v34  ;;  %v3583_v34 = vsel %vm2559_vm10, %v507_v25, 0.0  ;;  %v510_v40 = vld [vmem:[%s6355_s12 + $0xbe8] sm:$0xff] }
 0x2f5   : > { %v4607_v42 = vmul.f32 %v3583_v34, %v3583_v34  ;;  %v1548_v34 = vadd.s32 3152, %v6360_v2  ;;  %vm2574_vm9 = vcmp.lt.s32.totalorder %v1547_v29, %v6363_v4 }
 0x2f6   : > { %v5618_v50 = vadd.f32 %v5617_v45, %v4594_v39  ;;  %v3584_v39 = vsel %vm2560_vm11, %v508_v30, 0.0  ;;  %v511_v45 = vld [vmem:[%s6355_s12 + $0xbf0] sm:$0xff] }
 0x2f7   : > { %v4608_v47 = vmul.f32 %v3584_v39, %v3584_v39  ;;  %v1549_v39 = vadd.s32 3160, %v6360_v2  ;;  %vm2575_vm10 = vcmp.lt.s32.totalorder %v1548_v34, %v6363_v4 }
 0x2f8   : > { %v5619_v55 = vadd.f32 %v5618_v50, %v4595_v44  ;;  %v3585_v44 = vsel %vm2561_vm12, %v509_v35, 0.0  ;;  %v512_v50 = vld [vmem:[%s6355_s12 + $0xbf8] sm:$0xff] }
 0x2f9   : > { %v4609_v52 = vmul.f32 %v3585_v44, %v3585_v44  ;;  %v1550_v44 = vadd.s32 3168, %v6360_v2  ;;  %vm2576_vm11 = vcmp.lt.s32.totalorder %v1549_v39, %v6363_v4 }
 0x2fa   : > { %v5620_v60 = vadd.f32 %v5619_v55, %v4596_v49  ;;  %v3586_v49 = vsel %vm2562_vm13, %v510_v40, 0.0  ;;  %v513_v55 = vld [vmem:[%s6355_s12 + $0xc00] sm:$0xff] }
 0x2fb   : > { %v4610_v57 = vmul.f32 %v3586_v49, %v3586_v49  ;;  %v1551_v49 = vadd.s32 3176, %v6360_v2  ;;  %vm2577_vm12 = vcmp.lt.s32.totalorder %v1550_v44, %v6363_v4 }
 0x2fc   : > { %v5621_v1 = vadd.f32 %v5620_v60, %v4597_v54  ;;  %v3587_v54 = vsel %vm2563_vm14, %v511_v45, 0.0  ;;  %v514_v60 = vld [vmem:[%s6355_s12 + $0xc08] sm:$0xff] }
 0x2fd   : > { %v4611_v62 = vmul.f32 %v3587_v54, %v3587_v54  ;;  %v1552_v54 = vadd.s32 3184, %v6360_v2  ;;  %vm2578_vm13 = vcmp.lt.s32.totalorder %v1551_v49, %v6363_v4 }
 0x2fe   : > { %v5622_v8 = vadd.f32 %v5621_v1, %v4598_v59  ;;  %v3588_v59 = vsel %vm2564_vm15, %v512_v50, 0.0  ;;  %v515_v1 = vld [vmem:[%s6355_s12 + $0xc10] sm:$0xff] }
 0x2ff   : > { %v4612_v5 = vmul.f32 %v3588_v59, %v3588_v59  ;;  %v1553_v59 = vadd.s32 3192, %v6360_v2  ;;  %vm2579_vm14 = vcmp.lt.s32.totalorder %v1552_v54, %v6363_v4 }
 0x300   : > { %v5623_v13 = vadd.f32 %v5622_v8, %v4599_v0  ;;  %v3589_v0 = vsel %vm2565_vm0, %v513_v55, 0.0  ;;  %v516_v8 = vld [vmem:[%s6355_s12 + $0xc18] sm:$0xff] }
 0x301   : > { %v4613_v10 = vmul.f32 %v3589_v0, %v3589_v0  ;;  %v1554_v0 = vadd.s32 3200, %v6360_v2  ;;  %vm2580_vm15 = vcmp.lt.s32.totalorder %v1553_v59, %v6363_v4 }
 0x302   : > { %v5624_v18 = vadd.f32 %v5623_v13, %v4600_v7  ;;  %v3590_v7 = vsel %vm2566_vm1, %v514_v60, 0.0  ;;  %v517_v13 = vld [vmem:[%s6355_s12 + $0xc20] sm:$0xff] }
 0x303   : > { %v4614_v15 = vmul.f32 %v3590_v7, %v3590_v7  ;;  %v1555_v7 = vadd.s32 3208, %v6360_v2  ;;  %vm2581_vm0 = vcmp.lt.s32.totalorder %v1554_v0, %v6363_v4 }
 0x304   : > { %v5625_v23 = vadd.f32 %v5624_v18, %v4601_v12  ;;  %v3591_v12 = vsel %vm2567_vm2, %v515_v1, 0.0  ;;  %v518_v18 = vld [vmem:[%s6355_s12 + $0xc28] sm:$0xff] }
 0x305   : > { %v4615_v20 = vmul.f32 %v3591_v12, %v3591_v12  ;;  %v1556_v12 = vadd.s32 3216, %v6360_v2  ;;  %vm2582_vm1 = vcmp.lt.s32.totalorder %v1555_v7, %v6363_v4 }
 0x306   : > { %v5626_v28 = vadd.f32 %v5625_v23, %v4602_v17  ;;  %v3592_v17 = vsel %vm2568_vm3, %v516_v8, 0.0  ;;  %v519_v23 = vld [vmem:[%s6355_s12 + $0xc30] sm:$0xff] }
 0x307   : > { %v4616_v25 = vmul.f32 %v3592_v17, %v3592_v17  ;;  %v1557_v17 = vadd.s32 3224, %v6360_v2  ;;  %vm2583_vm2 = vcmp.lt.s32.totalorder %v1556_v12, %v6363_v4 }
 0x308   : > { %v5627_v33 = vadd.f32 %v5626_v28, %v4603_v22  ;;  %v3593_v22 = vsel %vm2569_vm4, %v517_v13, 0.0  ;;  %v520_v28 = vld [vmem:[%s6355_s12 + $0xc38] sm:$0xff] }
 0x309   : > { %v4617_v30 = vmul.f32 %v3593_v22, %v3593_v22  ;;  %v1558_v22 = vadd.s32 3232, %v6360_v2  ;;  %vm2584_vm3 = vcmp.lt.s32.totalorder %v1557_v17, %v6363_v4 }
 0x30a   : > { %v5628_v38 = vadd.f32 %v5627_v33, %v4604_v27  ;;  %v3594_v27 = vsel %vm2570_vm5, %v518_v18, 0.0  ;;  %v521_v33 = vld [vmem:[%s6355_s12 + $0xc40] sm:$0xff] }
 0x30b   : > { %v4618_v35 = vmul.f32 %v3594_v27, %v3594_v27  ;;  %v1559_v27 = vadd.s32 3240, %v6360_v2  ;;  %vm2585_vm4 = vcmp.lt.s32.totalorder %v1558_v22, %v6363_v4 }
 0x30c   : > { %v5629_v43 = vadd.f32 %v5628_v38, %v4605_v32  ;;  %v3595_v32 = vsel %vm2571_vm6, %v519_v23, 0.0  ;;  %v522_v38 = vld [vmem:[%s6355_s12 + $0xc48] sm:$0xff] }
 0x30d   : > { %v4619_v40 = vmul.f32 %v3595_v32, %v3595_v32  ;;  %v1560_v32 = vadd.s32 3248, %v6360_v2  ;;  %vm2586_vm5 = vcmp.lt.s32.totalorder %v1559_v27, %v6363_v4 }
 0x30e   : > { %v5630_v48 = vadd.f32 %v5629_v43, %v4606_v37  ;;  %v3596_v37 = vsel %vm2572_vm7, %v520_v28, 0.0  ;;  %v523_v43 = vld [vmem:[%s6355_s12 + $0xc50] sm:$0xff] }
 0x30f   : > { %v4620_v45 = vmul.f32 %v3596_v37, %v3596_v37  ;;  %v1561_v37 = vadd.s32 3256, %v6360_v2  ;;  %vm2587_vm6 = vcmp.lt.s32.totalorder %v1560_v32, %v6363_v4 }
 0x310   : > { %v5631_v53 = vadd.f32 %v5630_v48, %v4607_v42  ;;  %v3597_v42 = vsel %vm2573_vm8, %v521_v33, 0.0  ;;  %v524_v48 = vld [vmem:[%s6355_s12 + $0xc58] sm:$0xff] }
 0x311   : > { %v4621_v50 = vmul.f32 %v3597_v42, %v3597_v42  ;;  %v1562_v42 = vadd.s32 3264, %v6360_v2  ;;  %vm2588_vm7 = vcmp.lt.s32.totalorder %v1561_v37, %v6363_v4 }
 0x312   : > { %v5632_v58 = vadd.f32 %v5631_v53, %v4608_v47  ;;  %v3598_v47 = vsel %vm2574_vm9, %v522_v38, 0.0  ;;  %v525_v53 = vld [vmem:[%s6355_s12 + $0xc60] sm:$0xff] }
 0x313   : > { %v4622_v55 = vmul.f32 %v3598_v47, %v3598_v47  ;;  %v1563_v47 = vadd.s32 3272, %v6360_v2  ;;  %vm2589_vm8 = vcmp.lt.s32.totalorder %v1562_v42, %v6363_v4 }
 0x314   : > { %v5633_v63 = vadd.f32 %v5632_v58, %v4609_v52  ;;  %v3599_v52 = vsel %vm2575_vm10, %v523_v43, 0.0  ;;  %v526_v58 = vld [vmem:[%s6355_s12 + $0xc68] sm:$0xff] }
 0x315   : > { %v4623_v60 = vmul.f32 %v3599_v52, %v3599_v52  ;;  %v1564_v52 = vadd.s32 3280, %v6360_v2  ;;  %vm2590_vm9 = vcmp.lt.s32.totalorder %v1563_v47, %v6363_v4 }
 0x316   : > { %v5634_v6 = vadd.f32 %v5633_v63, %v4610_v57  ;;  %v3600_v57 = vsel %vm2576_vm11, %v524_v48, 0.0  ;;  %v527_v63 = vld [vmem:[%s6355_s12 + $0xc70] sm:$0xff] }
 0x317   : > { %v4624_v1 = vmul.f32 %v3600_v57, %v3600_v57  ;;  %v1565_v57 = vadd.s32 3288, %v6360_v2  ;;  %vm2591_vm10 = vcmp.lt.s32.totalorder %v1564_v52, %v6363_v4 }
 0x318   : > { %v5635_v11 = vadd.f32 %v5634_v6, %v4611_v62  ;;  %v3601_v62 = vsel %vm2577_vm12, %v525_v53, 0.0  ;;  %v528_v6 = vld [vmem:[%s6355_s12 + $0xc78] sm:$0xff] }
 0x319   : > { %v4625_v8 = vmul.f32 %v3601_v62, %v3601_v62  ;;  %v1566_v62 = vadd.s32 3296, %v6360_v2  ;;  %vm2592_vm11 = vcmp.lt.s32.totalorder %v1565_v57, %v6363_v4 }
 0x31a   : > { %v5636_v16 = vadd.f32 %v5635_v11, %v4612_v5  ;;  %v3602_v5 = vsel %vm2578_vm13, %v526_v58, 0.0  ;;  %v529_v11 = vld [vmem:[%s6355_s12 + $0xc80] sm:$0xff] }
 0x31b   : > { %v4626_v13 = vmul.f32 %v3602_v5, %v3602_v5  ;;  %v1567_v5 = vadd.s32 3304, %v6360_v2  ;;  %vm2593_vm12 = vcmp.lt.s32.totalorder %v1566_v62, %v6363_v4 }
 0x31c   : > { %v5637_v21 = vadd.f32 %v5636_v16, %v4613_v10  ;;  %v3603_v10 = vsel %vm2579_vm14, %v527_v63, 0.0  ;;  %v530_v16 = vld [vmem:[%s6355_s12 + $0xc88] sm:$0xff] }
 0x31d   : > { %v4627_v18 = vmul.f32 %v3603_v10, %v3603_v10  ;;  %v1568_v10 = vadd.s32 3312, %v6360_v2  ;;  %vm2594_vm13 = vcmp.lt.s32.totalorder %v1567_v5, %v6363_v4 }
 0x31e   : > { %v5638_v26 = vadd.f32 %v5637_v21, %v4614_v15  ;;  %v3604_v15 = vsel %vm2580_vm15, %v528_v6, 0.0  ;;  %v531_v21 = vld [vmem:[%s6355_s12 + $0xc90] sm:$0xff] }
 0x31f   : > { %v4628_v23 = vmul.f32 %v3604_v15, %v3604_v15  ;;  %v1569_v15 = vadd.s32 3320, %v6360_v2  ;;  %vm2595_vm14 = vcmp.lt.s32.totalorder %v1568_v10, %v6363_v4 }
 0x320   : > { %v5639_v31 = vadd.f32 %v5638_v26, %v4615_v20  ;;  %v3605_v20 = vsel %vm2581_vm0, %v529_v11, 0.0  ;;  %v532_v26 = vld [vmem:[%s6355_s12 + $0xc98] sm:$0xff] }
 0x321   : > { %v4629_v28 = vmul.f32 %v3605_v20, %v3605_v20  ;;  %v1570_v20 = vadd.s32 3328, %v6360_v2  ;;  %vm2596_vm15 = vcmp.lt.s32.totalorder %v1569_v15, %v6363_v4 }
 0x322   : > { %v5640_v36 = vadd.f32 %v5639_v31, %v4616_v25  ;;  %v3606_v25 = vsel %vm2582_vm1, %v530_v16, 0.0  ;;  %v533_v31 = vld [vmem:[%s6355_s12 + $0xca0] sm:$0xff] }
 0x323   : > { %v4630_v33 = vmul.f32 %v3606_v25, %v3606_v25  ;;  %v1571_v25 = vadd.s32 3336, %v6360_v2  ;;  %vm2597_vm0 = vcmp.lt.s32.totalorder %v1570_v20, %v6363_v4 }
 0x324   : > { %v5641_v41 = vadd.f32 %v5640_v36, %v4617_v30  ;;  %v3607_v30 = vsel %vm2583_vm2, %v531_v21, 0.0  ;;  %v534_v36 = vld [vmem:[%s6355_s12 + $0xca8] sm:$0xff] }
 0x325   : > { %v4631_v38 = vmul.f32 %v3607_v30, %v3607_v30  ;;  %v1572_v30 = vadd.s32 3344, %v6360_v2  ;;  %vm2598_vm1 = vcmp.lt.s32.totalorder %v1571_v25, %v6363_v4 }
 0x326   : > { %v5642_v46 = vadd.f32 %v5641_v41, %v4618_v35  ;;  %v3608_v35 = vsel %vm2584_vm3, %v532_v26, 0.0  ;;  %v535_v41 = vld [vmem:[%s6355_s12 + $0xcb0] sm:$0xff] }
 0x327   : > { %v4632_v43 = vmul.f32 %v3608_v35, %v3608_v35  ;;  %v1573_v35 = vadd.s32 3352, %v6360_v2  ;;  %vm2599_vm2 = vcmp.lt.s32.totalorder %v1572_v30, %v6363_v4 }
 0x328   : > { %v5643_v51 = vadd.f32 %v5642_v46, %v4619_v40  ;;  %v3609_v40 = vsel %vm2585_vm4, %v533_v31, 0.0  ;;  %v536_v46 = vld [vmem:[%s6355_s12 + $0xcb8] sm:$0xff] }
 0x329   : > { %v4633_v48 = vmul.f32 %v3609_v40, %v3609_v40  ;;  %v1574_v40 = vadd.s32 3360, %v6360_v2  ;;  %vm2600_vm3 = vcmp.lt.s32.totalorder %v1573_v35, %v6363_v4 }
 0x32a   : > { %v5644_v56 = vadd.f32 %v5643_v51, %v4620_v45  ;;  %v3610_v45 = vsel %vm2586_vm5, %v534_v36, 0.0  ;;  %v537_v51 = vld [vmem:[%s6355_s12 + $0xcc0] sm:$0xff] }
 0x32b   : > { %v4634_v53 = vmul.f32 %v3610_v45, %v3610_v45  ;;  %v1575_v45 = vadd.s32 3368, %v6360_v2  ;;  %vm2601_vm4 = vcmp.lt.s32.totalorder %v1574_v40, %v6363_v4 }
 0x32c   : > { %v5645_v61 = vadd.f32 %v5644_v56, %v4621_v50  ;;  %v3611_v50 = vsel %vm2587_vm6, %v535_v41, 0.0  ;;  %v538_v56 = vld [vmem:[%s6355_s12 + $0xcc8] sm:$0xff] }
 0x32d   : > { %v4635_v58 = vmul.f32 %v3611_v50, %v3611_v50  ;;  %v1576_v50 = vadd.s32 3376, %v6360_v2  ;;  %vm2602_vm5 = vcmp.lt.s32.totalorder %v1575_v45, %v6363_v4 }
 0x32e   : > { %v5646_v3 = vadd.f32 %v5645_v61, %v4622_v55  ;;  %v3612_v55 = vsel %vm2588_vm7, %v536_v46, 0.0  ;;  %v539_v61 = vld [vmem:[%s6355_s12 + $0xcd0] sm:$0xff] }
 0x32f   : > { %v4636_v63 = vmul.f32 %v3612_v55, %v3612_v55  ;;  %v1577_v55 = vadd.s32 3384, %v6360_v2  ;;  %vm2603_vm6 = vcmp.lt.s32.totalorder %v1576_v50, %v6363_v4 }
 0x330   : > { %v5647_v9 = vadd.f32 %v5646_v3, %v4623_v60  ;;  %v3613_v60 = vsel %vm2589_vm8, %v537_v51, 0.0  ;;  %v540_v3 = vld [vmem:[%s6355_s12 + $0xcd8] sm:$0xff] }
 0x331   : > { %v4637_v6 = vmul.f32 %v3613_v60, %v3613_v60  ;;  %v1578_v60 = vadd.s32 3392, %v6360_v2  ;;  %vm2604_vm7 = vcmp.lt.s32.totalorder %v1577_v55, %v6363_v4 }
 0x332   : > { %v5648_v14 = vadd.f32 %v5647_v9, %v4624_v1  ;;  %v3614_v1 = vsel %vm2590_vm9, %v538_v56, 0.0  ;;  %v541_v9 = vld [vmem:[%s6355_s12 + $0xce0] sm:$0xff] }
 0x333   : > { %v4638_v11 = vmul.f32 %v3614_v1, %v3614_v1  ;;  %v1579_v1 = vadd.s32 3400, %v6360_v2  ;;  %vm2605_vm8 = vcmp.lt.s32.totalorder %v1578_v60, %v6363_v4 }
 0x334   : > { %v5649_v19 = vadd.f32 %v5648_v14, %v4625_v8  ;;  %v3615_v8 = vsel %vm2591_vm10, %v539_v61, 0.0  ;;  %v542_v14 = vld [vmem:[%s6355_s12 + $0xce8] sm:$0xff] }
 0x335   : > { %v4639_v16 = vmul.f32 %v3615_v8, %v3615_v8  ;;  %v1580_v8 = vadd.s32 3408, %v6360_v2  ;;  %vm2606_vm9 = vcmp.lt.s32.totalorder %v1579_v1, %v6363_v4 }
 0x336   : > { %v5650_v24 = vadd.f32 %v5649_v19, %v4626_v13  ;;  %v3616_v13 = vsel %vm2592_vm11, %v540_v3, 0.0  ;;  %v543_v19 = vld [vmem:[%s6355_s12 + $0xcf0] sm:$0xff] }
 0x337   : > { %v4640_v21 = vmul.f32 %v3616_v13, %v3616_v13  ;;  %v1581_v13 = vadd.s32 3416, %v6360_v2  ;;  %vm2607_vm10 = vcmp.lt.s32.totalorder %v1580_v8, %v6363_v4 }
 0x338   : > { %v5651_v29 = vadd.f32 %v5650_v24, %v4627_v18  ;;  %v3617_v18 = vsel %vm2593_vm12, %v541_v9, 0.0  ;;  %v544_v24 = vld [vmem:[%s6355_s12 + $0xcf8] sm:$0xff] }
 0x339   : > { %v4641_v26 = vmul.f32 %v3617_v18, %v3617_v18  ;;  %v1582_v18 = vadd.s32 3424, %v6360_v2  ;;  %vm2608_vm11 = vcmp.lt.s32.totalorder %v1581_v13, %v6363_v4 }
 0x33a   : > { %v5652_v34 = vadd.f32 %v5651_v29, %v4628_v23  ;;  %v3618_v23 = vsel %vm2594_vm13, %v542_v14, 0.0  ;;  %v545_v29 = vld [vmem:[%s6355_s12 + $0xd00] sm:$0xff] }
 0x33b   : > { %v4642_v31 = vmul.f32 %v3618_v23, %v3618_v23  ;;  %v1583_v23 = vadd.s32 3432, %v6360_v2  ;;  %vm2609_vm12 = vcmp.lt.s32.totalorder %v1582_v18, %v6363_v4 }
 0x33c   : > { %v5653_v39 = vadd.f32 %v5652_v34, %v4629_v28  ;;  %v3619_v28 = vsel %vm2595_vm14, %v543_v19, 0.0  ;;  %v546_v34 = vld [vmem:[%s6355_s12 + $0xd08] sm:$0xff] }
 0x33d   : > { %v4643_v36 = vmul.f32 %v3619_v28, %v3619_v28  ;;  %v1584_v28 = vadd.s32 3440, %v6360_v2  ;;  %vm2610_vm13 = vcmp.lt.s32.totalorder %v1583_v23, %v6363_v4 }
 0x33e   : > { %v5654_v44 = vadd.f32 %v5653_v39, %v4630_v33  ;;  %v3620_v33 = vsel %vm2596_vm15, %v544_v24, 0.0  ;;  %v547_v39 = vld [vmem:[%s6355_s12 + $0xd10] sm:$0xff] }
 0x33f   : > { %v4644_v41 = vmul.f32 %v3620_v33, %v3620_v33  ;;  %v1585_v33 = vadd.s32 3448, %v6360_v2  ;;  %vm2611_vm14 = vcmp.lt.s32.totalorder %v1584_v28, %v6363_v4 }
 0x340   : > { %v5655_v49 = vadd.f32 %v5654_v44, %v4631_v38  ;;  %v3621_v38 = vsel %vm2597_vm0, %v545_v29, 0.0  ;;  %v548_v44 = vld [vmem:[%s6355_s12 + $0xd18] sm:$0xff] }
 0x341   : > { %v4645_v46 = vmul.f32 %v3621_v38, %v3621_v38  ;;  %v1586_v38 = vadd.s32 3456, %v6360_v2  ;;  %vm2612_vm15 = vcmp.lt.s32.totalorder %v1585_v33, %v6363_v4 }
 0x342   : > { %v5656_v54 = vadd.f32 %v5655_v49, %v4632_v43  ;;  %v3622_v43 = vsel %vm2598_vm1, %v546_v34, 0.0  ;;  %v549_v49 = vld [vmem:[%s6355_s12 + $0xd20] sm:$0xff] }
 0x343   : > { %v4646_v51 = vmul.f32 %v3622_v43, %v3622_v43  ;;  %v1587_v43 = vadd.s32 3464, %v6360_v2  ;;  %vm2613_vm0 = vcmp.lt.s32.totalorder %v1586_v38, %v6363_v4 }
 0x344   : > { %v5657_v59 = vadd.f32 %v5656_v54, %v4633_v48  ;;  %v3623_v48 = vsel %vm2599_vm2, %v547_v39, 0.0  ;;  %v550_v54 = vld [vmem:[%s6355_s12 + $0xd28] sm:$0xff] }
 0x345   : > { %v4647_v56 = vmul.f32 %v3623_v48, %v3623_v48  ;;  %v1588_v48 = vadd.s32 3472, %v6360_v2  ;;  %vm2614_vm1 = vcmp.lt.s32.totalorder %v1587_v43, %v6363_v4 }
 0x346   : > { %v5658_v0 = vadd.f32 %v5657_v59, %v4634_v53  ;;  %v3624_v53 = vsel %vm2600_vm3, %v548_v44, 0.0  ;;  %v551_v59 = vld [vmem:[%s6355_s12 + $0xd30] sm:$0xff] }
 0x347   : > { %v4648_v61 = vmul.f32 %v3624_v53, %v3624_v53  ;;  %v1589_v53 = vadd.s32 3480, %v6360_v2  ;;  %vm2615_vm2 = vcmp.lt.s32.totalorder %v1588_v48, %v6363_v4 }
 0x348   : > { %v5659_v7 = vadd.f32 %v5658_v0, %v4635_v58  ;;  %v3625_v58 = vsel %vm2601_vm4, %v549_v49, 0.0  ;;  %v552_v0 = vld [vmem:[%s6355_s12 + $0xd38] sm:$0xff] }
 0x349   : > { %v4649_v3 = vmul.f32 %v3625_v58, %v3625_v58  ;;  %v1590_v58 = vadd.s32 3488, %v6360_v2  ;;  %vm2616_vm3 = vcmp.lt.s32.totalorder %v1589_v53, %v6363_v4 }
 0x34a   : > { %v5660_v12 = vadd.f32 %v5659_v7, %v4636_v63  ;;  %v3626_v63 = vsel %vm2602_vm5, %v550_v54, 0.0  ;;  %v553_v7 = vld [vmem:[%s6355_s12 + $0xd40] sm:$0xff] }
 0x34b   : > { %v4650_v9 = vmul.f32 %v3626_v63, %v3626_v63  ;;  %v1591_v63 = vadd.s32 3496, %v6360_v2  ;;  %vm2617_vm4 = vcmp.lt.s32.totalorder %v1590_v58, %v6363_v4 }
 0x34c   : > { %v5661_v17 = vadd.f32 %v5660_v12, %v4637_v6  ;;  %v3627_v6 = vsel %vm2603_vm6, %v551_v59, 0.0  ;;  %v554_v12 = vld [vmem:[%s6355_s12 + $0xd48] sm:$0xff] }
 0x34d   : > { %v4651_v14 = vmul.f32 %v3627_v6, %v3627_v6  ;;  %v1592_v6 = vadd.s32 3504, %v6360_v2  ;;  %vm2618_vm5 = vcmp.lt.s32.totalorder %v1591_v63, %v6363_v4 }
 0x34e   : > { %v5662_v22 = vadd.f32 %v5661_v17, %v4638_v11  ;;  %v3628_v11 = vsel %vm2604_vm7, %v552_v0, 0.0  ;;  %v555_v17 = vld [vmem:[%s6355_s12 + $0xd50] sm:$0xff] }
 0x34f   : > { %v4652_v19 = vmul.f32 %v3628_v11, %v3628_v11  ;;  %v1593_v11 = vadd.s32 3512, %v6360_v2  ;;  %vm2619_vm6 = vcmp.lt.s32.totalorder %v1592_v6, %v6363_v4 }
 0x350   : > { %v5663_v27 = vadd.f32 %v5662_v22, %v4639_v16  ;;  %v3629_v16 = vsel %vm2605_vm8, %v553_v7, 0.0  ;;  %v556_v22 = vld [vmem:[%s6355_s12 + $0xd58] sm:$0xff] }
 0x351   : > { %v4653_v24 = vmul.f32 %v3629_v16, %v3629_v16  ;;  %v1594_v16 = vadd.s32 3520, %v6360_v2  ;;  %vm2620_vm7 = vcmp.lt.s32.totalorder %v1593_v11, %v6363_v4 }
 0x352   : > { %v5664_v32 = vadd.f32 %v5663_v27, %v4640_v21  ;;  %v3630_v21 = vsel %vm2606_vm9, %v554_v12, 0.0  ;;  %v557_v27 = vld [vmem:[%s6355_s12 + $0xd60] sm:$0xff] }
 0x353   : > { %v4654_v29 = vmul.f32 %v3630_v21, %v3630_v21  ;;  %v1595_v21 = vadd.s32 3528, %v6360_v2  ;;  %vm2621_vm8 = vcmp.lt.s32.totalorder %v1594_v16, %v6363_v4 }
 0x354   : > { %v5665_v37 = vadd.f32 %v5664_v32, %v4641_v26  ;;  %v3631_v26 = vsel %vm2607_vm10, %v555_v17, 0.0  ;;  %v558_v32 = vld [vmem:[%s6355_s12 + $0xd68] sm:$0xff] }
 0x355   : > { %v4655_v34 = vmul.f32 %v3631_v26, %v3631_v26  ;;  %v1596_v26 = vadd.s32 3536, %v6360_v2  ;;  %vm2622_vm9 = vcmp.lt.s32.totalorder %v1595_v21, %v6363_v4 }
 0x356   : > { %v5666_v42 = vadd.f32 %v5665_v37, %v4642_v31  ;;  %v3632_v31 = vsel %vm2608_vm11, %v556_v22, 0.0  ;;  %v559_v37 = vld [vmem:[%s6355_s12 + $0xd70] sm:$0xff] }
 0x357   : > { %v4656_v39 = vmul.f32 %v3632_v31, %v3632_v31  ;;  %v1597_v31 = vadd.s32 3544, %v6360_v2  ;;  %vm2623_vm10 = vcmp.lt.s32.totalorder %v1596_v26, %v6363_v4 }
 0x358   : > { %v5667_v47 = vadd.f32 %v5666_v42, %v4643_v36  ;;  %v3633_v36 = vsel %vm2609_vm12, %v557_v27, 0.0  ;;  %v560_v42 = vld [vmem:[%s6355_s12 + $0xd78] sm:$0xff] }
 0x359   : > { %v4657_v44 = vmul.f32 %v3633_v36, %v3633_v36  ;;  %v1598_v36 = vadd.s32 3552, %v6360_v2  ;;  %vm2624_vm11 = vcmp.lt.s32.totalorder %v1597_v31, %v6363_v4 }
 0x35a   : > { %v5668_v52 = vadd.f32 %v5667_v47, %v4644_v41  ;;  %v3634_v41 = vsel %vm2610_vm13, %v558_v32, 0.0  ;;  %v561_v47 = vld [vmem:[%s6355_s12 + $0xd80] sm:$0xff] }
 0x35b   : > { %v4658_v49 = vmul.f32 %v3634_v41, %v3634_v41  ;;  %v1599_v41 = vadd.s32 3560, %v6360_v2  ;;  %vm2625_vm12 = vcmp.lt.s32.totalorder %v1598_v36, %v6363_v4 }
 0x35c   : > { %v5669_v57 = vadd.f32 %v5668_v52, %v4645_v46  ;;  %v3635_v46 = vsel %vm2611_vm14, %v559_v37, 0.0  ;;  %v562_v52 = vld [vmem:[%s6355_s12 + $0xd88] sm:$0xff] }
 0x35d   : > { %v4659_v54 = vmul.f32 %v3635_v46, %v3635_v46  ;;  %v1600_v46 = vadd.s32 3568, %v6360_v2  ;;  %vm2626_vm13 = vcmp.lt.s32.totalorder %v1599_v41, %v6363_v4 }
 0x35e   : > { %v5670_v62 = vadd.f32 %v5669_v57, %v4646_v51  ;;  %v3636_v51 = vsel %vm2612_vm15, %v560_v42, 0.0  ;;  %v563_v57 = vld [vmem:[%s6355_s12 + $0xd90] sm:$0xff] }
 0x35f   : > { %v4660_v59 = vmul.f32 %v3636_v51, %v3636_v51  ;;  %v1601_v51 = vadd.s32 3576, %v6360_v2  ;;  %vm2627_vm14 = vcmp.lt.s32.totalorder %v1600_v46, %v6363_v4 }
 0x360   : > { %v5671_v5 = vadd.f32 %v5670_v62, %v4647_v56  ;;  %v3637_v56 = vsel %vm2613_vm0, %v561_v47, 0.0  ;;  %v564_v62 = vld [vmem:[%s6355_s12 + $0xd98] sm:$0xff] }
 0x361   : > { %v4661_v0 = vmul.f32 %v3637_v56, %v3637_v56  ;;  %v1602_v56 = vadd.s32 3584, %v6360_v2  ;;  %vm2628_vm15 = vcmp.lt.s32.totalorder %v1601_v51, %v6363_v4 }
 0x362   : > { %v5672_v10 = vadd.f32 %v5671_v5, %v4648_v61  ;;  %v3638_v61 = vsel %vm2614_vm1, %v562_v52, 0.0  ;;  %v565_v5 = vld [vmem:[%s6355_s12 + $0xda0] sm:$0xff] }
 0x363   : > { %v4662_v7 = vmul.f32 %v3638_v61, %v3638_v61  ;;  %v1603_v61 = vadd.s32 3592, %v6360_v2  ;;  %vm2629_vm0 = vcmp.lt.s32.totalorder %v1602_v56, %v6363_v4 }
 0x364   : > { %v5673_v15 = vadd.f32 %v5672_v10, %v4649_v3  ;;  %v3639_v3 = vsel %vm2615_vm2, %v563_v57, 0.0  ;;  %v566_v10 = vld [vmem:[%s6355_s12 + $0xda8] sm:$0xff] }
 0x365   : > { %v4663_v12 = vmul.f32 %v3639_v3, %v3639_v3  ;;  %v1604_v3 = vadd.s32 3600, %v6360_v2  ;;  %vm2630_vm1 = vcmp.lt.s32.totalorder %v1603_v61, %v6363_v4 }
 0x366   : > { %v5674_v20 = vadd.f32 %v5673_v15, %v4650_v9  ;;  %v3640_v9 = vsel %vm2616_vm3, %v564_v62, 0.0  ;;  %v567_v15 = vld [vmem:[%s6355_s12 + $0xdb0] sm:$0xff] }
 0x367   : > { %v4664_v17 = vmul.f32 %v3640_v9, %v3640_v9  ;;  %v1605_v9 = vadd.s32 3608, %v6360_v2  ;;  %vm2631_vm2 = vcmp.lt.s32.totalorder %v1604_v3, %v6363_v4 }
 0x368   : > { %v5675_v25 = vadd.f32 %v5674_v20, %v4651_v14  ;;  %v3641_v14 = vsel %vm2617_vm4, %v565_v5, 0.0  ;;  %v568_v20 = vld [vmem:[%s6355_s12 + $0xdb8] sm:$0xff] }
 0x369   : > { %v4665_v22 = vmul.f32 %v3641_v14, %v3641_v14  ;;  %v1606_v14 = vadd.s32 3616, %v6360_v2  ;;  %vm2632_vm3 = vcmp.lt.s32.totalorder %v1605_v9, %v6363_v4 }
 0x36a   : > { %v5676_v30 = vadd.f32 %v5675_v25, %v4652_v19  ;;  %v3642_v19 = vsel %vm2618_vm5, %v566_v10, 0.0  ;;  %v569_v25 = vld [vmem:[%s6355_s12 + $0xdc0] sm:$0xff] }
 0x36b   : > { %v4666_v27 = vmul.f32 %v3642_v19, %v3642_v19  ;;  %v1607_v19 = vadd.s32 3624, %v6360_v2  ;;  %vm2633_vm4 = vcmp.lt.s32.totalorder %v1606_v14, %v6363_v4 }
 0x36c   : > { %v5677_v35 = vadd.f32 %v5676_v30, %v4653_v24  ;;  %v3643_v24 = vsel %vm2619_vm6, %v567_v15, 0.0  ;;  %v570_v30 = vld [vmem:[%s6355_s12 + $0xdc8] sm:$0xff] }
 0x36d   : > { %v4667_v32 = vmul.f32 %v3643_v24, %v3643_v24  ;;  %v1608_v24 = vadd.s32 3632, %v6360_v2  ;;  %vm2634_vm5 = vcmp.lt.s32.totalorder %v1607_v19, %v6363_v4 }
 0x36e   : > { %v5678_v40 = vadd.f32 %v5677_v35, %v4654_v29  ;;  %v3644_v29 = vsel %vm2620_vm7, %v568_v20, 0.0  ;;  %v571_v35 = vld [vmem:[%s6355_s12 + $0xdd0] sm:$0xff] }
 0x36f   : > { %v4668_v37 = vmul.f32 %v3644_v29, %v3644_v29  ;;  %v1609_v29 = vadd.s32 3640, %v6360_v2  ;;  %vm2635_vm6 = vcmp.lt.s32.totalorder %v1608_v24, %v6363_v4 }
 0x370   : > { %v5679_v45 = vadd.f32 %v5678_v40, %v4655_v34  ;;  %v3645_v34 = vsel %vm2621_vm8, %v569_v25, 0.0  ;;  %v572_v40 = vld [vmem:[%s6355_s12 + $0xdd8] sm:$0xff] }
 0x371   : > { %v4669_v42 = vmul.f32 %v3645_v34, %v3645_v34  ;;  %v1610_v34 = vadd.s32 3648, %v6360_v2  ;;  %vm2636_vm7 = vcmp.lt.s32.totalorder %v1609_v29, %v6363_v4 }
 0x372   : > { %v5680_v50 = vadd.f32 %v5679_v45, %v4656_v39  ;;  %v3646_v39 = vsel %vm2622_vm9, %v570_v30, 0.0  ;;  %v573_v45 = vld [vmem:[%s6355_s12 + $0xde0] sm:$0xff] }
 0x373   : > { %v4670_v47 = vmul.f32 %v3646_v39, %v3646_v39  ;;  %v1611_v39 = vadd.s32 3656, %v6360_v2  ;;  %vm2637_vm8 = vcmp.lt.s32.totalorder %v1610_v34, %v6363_v4 }
 0x374   : > { %v5681_v55 = vadd.f32 %v5680_v50, %v4657_v44  ;;  %v3647_v44 = vsel %vm2623_vm10, %v571_v35, 0.0  ;;  %v574_v50 = vld [vmem:[%s6355_s12 + $0xde8] sm:$0xff] }
 0x375   : > { %v4671_v52 = vmul.f32 %v3647_v44, %v3647_v44  ;;  %v1612_v44 = vadd.s32 3664, %v6360_v2  ;;  %vm2638_vm9 = vcmp.lt.s32.totalorder %v1611_v39, %v6363_v4 }
 0x376   : > { %v5682_v60 = vadd.f32 %v5681_v55, %v4658_v49  ;;  %v3648_v49 = vsel %vm2624_vm11, %v572_v40, 0.0  ;;  %v575_v55 = vld [vmem:[%s6355_s12 + $0xdf0] sm:$0xff] }
 0x377   : > { %v4672_v57 = vmul.f32 %v3648_v49, %v3648_v49  ;;  %v1613_v49 = vadd.s32 3672, %v6360_v2  ;;  %vm2639_vm10 = vcmp.lt.s32.totalorder %v1612_v44, %v6363_v4 }
 0x378   : > { %v5683_v1 = vadd.f32 %v5682_v60, %v4659_v54  ;;  %v3649_v54 = vsel %vm2625_vm12, %v573_v45, 0.0  ;;  %v576_v60 = vld [vmem:[%s6355_s12 + $0xdf8] sm:$0xff] }
 0x379   : > { %v4673_v62 = vmul.f32 %v3649_v54, %v3649_v54  ;;  %v1614_v54 = vadd.s32 3680, %v6360_v2  ;;  %vm2640_vm11 = vcmp.lt.s32.totalorder %v1613_v49, %v6363_v4 }
 0x37a   : > { %v5684_v8 = vadd.f32 %v5683_v1, %v4660_v59  ;;  %v3650_v59 = vsel %vm2626_vm13, %v574_v50, 0.0  ;;  %v577_v1 = vld [vmem:[%s6355_s12 + $0xe00] sm:$0xff] }
 0x37b   : > { %v4674_v5 = vmul.f32 %v3650_v59, %v3650_v59  ;;  %v1615_v59 = vadd.s32 3688, %v6360_v2  ;;  %vm2641_vm12 = vcmp.lt.s32.totalorder %v1614_v54, %v6363_v4 }
 0x37c   : > { %v5685_v13 = vadd.f32 %v5684_v8, %v4661_v0  ;;  %v3651_v0 = vsel %vm2627_vm14, %v575_v55, 0.0  ;;  %v578_v8 = vld [vmem:[%s6355_s12 + $0xe08] sm:$0xff] }
 0x37d   : > { %v4675_v10 = vmul.f32 %v3651_v0, %v3651_v0  ;;  %v1616_v0 = vadd.s32 3696, %v6360_v2  ;;  %vm2642_vm13 = vcmp.lt.s32.totalorder %v1615_v59, %v6363_v4 }
 0x37e   : > { %v5686_v18 = vadd.f32 %v5685_v13, %v4662_v7  ;;  %v3652_v7 = vsel %vm2628_vm15, %v576_v60, 0.0  ;;  %v579_v13 = vld [vmem:[%s6355_s12 + $0xe10] sm:$0xff] }
 0x37f   : > { %v4676_v15 = vmul.f32 %v3652_v7, %v3652_v7  ;;  %v1617_v7 = vadd.s32 3704, %v6360_v2  ;;  %vm2643_vm14 = vcmp.lt.s32.totalorder %v1616_v0, %v6363_v4 }
 0x380   : > { %v5687_v23 = vadd.f32 %v5686_v18, %v4663_v12  ;;  %v3653_v12 = vsel %vm2629_vm0, %v577_v1, 0.0  ;;  %v580_v18 = vld [vmem:[%s6355_s12 + $0xe18] sm:$0xff] }
 0x381   : > { %v4677_v20 = vmul.f32 %v3653_v12, %v3653_v12  ;;  %v1618_v12 = vadd.s32 3712, %v6360_v2  ;;  %vm2644_vm15 = vcmp.lt.s32.totalorder %v1617_v7, %v6363_v4 }
 0x382   : > { %v5688_v28 = vadd.f32 %v5687_v23, %v4664_v17  ;;  %v3654_v17 = vsel %vm2630_vm1, %v578_v8, 0.0  ;;  %v581_v23 = vld [vmem:[%s6355_s12 + $0xe20] sm:$0xff] }
 0x383   : > { %v4678_v25 = vmul.f32 %v3654_v17, %v3654_v17  ;;  %v1619_v17 = vadd.s32 3720, %v6360_v2  ;;  %vm2645_vm0 = vcmp.lt.s32.totalorder %v1618_v12, %v6363_v4 }
 0x384   : > { %v5689_v33 = vadd.f32 %v5688_v28, %v4665_v22  ;;  %v3655_v22 = vsel %vm2631_vm2, %v579_v13, 0.0  ;;  %v582_v28 = vld [vmem:[%s6355_s12 + $0xe28] sm:$0xff] }
 0x385   : > { %v4679_v30 = vmul.f32 %v3655_v22, %v3655_v22  ;;  %v1620_v22 = vadd.s32 3728, %v6360_v2  ;;  %vm2646_vm1 = vcmp.lt.s32.totalorder %v1619_v17, %v6363_v4 }
 0x386   : > { %v5690_v38 = vadd.f32 %v5689_v33, %v4666_v27  ;;  %v3656_v27 = vsel %vm2632_vm3, %v580_v18, 0.0  ;;  %v583_v33 = vld [vmem:[%s6355_s12 + $0xe30] sm:$0xff] }
 0x387   : > { %v4680_v35 = vmul.f32 %v3656_v27, %v3656_v27  ;;  %v1621_v27 = vadd.s32 3736, %v6360_v2  ;;  %vm2647_vm2 = vcmp.lt.s32.totalorder %v1620_v22, %v6363_v4 }
 0x388   : > { %v5691_v43 = vadd.f32 %v5690_v38, %v4667_v32  ;;  %v3657_v32 = vsel %vm2633_vm4, %v581_v23, 0.0  ;;  %v584_v38 = vld [vmem:[%s6355_s12 + $0xe38] sm:$0xff] }
 0x389   : > { %v4681_v40 = vmul.f32 %v3657_v32, %v3657_v32  ;;  %v1622_v32 = vadd.s32 3744, %v6360_v2  ;;  %vm2648_vm3 = vcmp.lt.s32.totalorder %v1621_v27, %v6363_v4 }
 0x38a   : > { %v5692_v48 = vadd.f32 %v5691_v43, %v4668_v37  ;;  %v3658_v37 = vsel %vm2634_vm5, %v582_v28, 0.0  ;;  %v585_v43 = vld [vmem:[%s6355_s12 + $0xe40] sm:$0xff] }
 0x38b   : > { %v4682_v45 = vmul.f32 %v3658_v37, %v3658_v37  ;;  %v1623_v37 = vadd.s32 3752, %v6360_v2  ;;  %vm2649_vm4 = vcmp.lt.s32.totalorder %v1622_v32, %v6363_v4 }
 0x38c   : > { %v5693_v53 = vadd.f32 %v5692_v48, %v4669_v42  ;;  %v3659_v42 = vsel %vm2635_vm6, %v583_v33, 0.0  ;;  %v586_v48 = vld [vmem:[%s6355_s12 + $0xe48] sm:$0xff] }
 0x38d   : > { %v4683_v50 = vmul.f32 %v3659_v42, %v3659_v42  ;;  %v1624_v42 = vadd.s32 3760, %v6360_v2  ;;  %vm2650_vm5 = vcmp.lt.s32.totalorder %v1623_v37, %v6363_v4 }
 0x38e   : > { %v5694_v58 = vadd.f32 %v5693_v53, %v4670_v47  ;;  %v3660_v47 = vsel %vm2636_vm7, %v584_v38, 0.0  ;;  %v587_v53 = vld [vmem:[%s6355_s12 + $0xe50] sm:$0xff] }
 0x38f   : > { %v4684_v55 = vmul.f32 %v3660_v47, %v3660_v47  ;;  %v1625_v47 = vadd.s32 3768, %v6360_v2  ;;  %vm2651_vm6 = vcmp.lt.s32.totalorder %v1624_v42, %v6363_v4 }
 0x390   : > { %v5695_v63 = vadd.f32 %v5694_v58, %v4671_v52  ;;  %v3661_v52 = vsel %vm2637_vm8, %v585_v43, 0.0  ;;  %v588_v58 = vld [vmem:[%s6355_s12 + $0xe58] sm:$0xff] }
 0x391   : > { %v4685_v60 = vmul.f32 %v3661_v52, %v3661_v52  ;;  %v1626_v52 = vadd.s32 3776, %v6360_v2  ;;  %vm2652_vm7 = vcmp.lt.s32.totalorder %v1625_v47, %v6363_v4 }
 0x392   : > { %v5696_v6 = vadd.f32 %v5695_v63, %v4672_v57  ;;  %v3662_v57 = vsel %vm2638_vm9, %v586_v48, 0.0  ;;  %v589_v63 = vld [vmem:[%s6355_s12 + $0xe60] sm:$0xff] }
 0x393   : > { %v4686_v1 = vmul.f32 %v3662_v57, %v3662_v57  ;;  %v1627_v57 = vadd.s32 3784, %v6360_v2  ;;  %vm2653_vm8 = vcmp.lt.s32.totalorder %v1626_v52, %v6363_v4 }
 0x394   : > { %v5697_v11 = vadd.f32 %v5696_v6, %v4673_v62  ;;  %v3663_v62 = vsel %vm2639_vm10, %v587_v53, 0.0  ;;  %v590_v6 = vld [vmem:[%s6355_s12 + $0xe68] sm:$0xff] }
 0x395   : > { %v4687_v8 = vmul.f32 %v3663_v62, %v3663_v62  ;;  %v1628_v62 = vadd.s32 3792, %v6360_v2  ;;  %vm2654_vm9 = vcmp.lt.s32.totalorder %v1627_v57, %v6363_v4 }
 0x396   : > { %v5698_v16 = vadd.f32 %v5697_v11, %v4674_v5  ;;  %v3664_v5 = vsel %vm2640_vm11, %v588_v58, 0.0  ;;  %v591_v11 = vld [vmem:[%s6355_s12 + $0xe70] sm:$0xff] }
 0x397   : > { %v4688_v13 = vmul.f32 %v3664_v5, %v3664_v5  ;;  %v1629_v5 = vadd.s32 3800, %v6360_v2  ;;  %vm2655_vm10 = vcmp.lt.s32.totalorder %v1628_v62, %v6363_v4 }
 0x398   : > { %v5699_v21 = vadd.f32 %v5698_v16, %v4675_v10  ;;  %v3665_v10 = vsel %vm2641_vm12, %v589_v63, 0.0  ;;  %v592_v16 = vld [vmem:[%s6355_s12 + $0xe78] sm:$0xff] }
 0x399   : > { %v4689_v18 = vmul.f32 %v3665_v10, %v3665_v10  ;;  %v1630_v10 = vadd.s32 3808, %v6360_v2  ;;  %vm2656_vm11 = vcmp.lt.s32.totalorder %v1629_v5, %v6363_v4 }
 0x39a   : > { %v5700_v26 = vadd.f32 %v5699_v21, %v4676_v15  ;;  %v3666_v15 = vsel %vm2642_vm13, %v590_v6, 0.0  ;;  %v593_v21 = vld [vmem:[%s6355_s12 + $0xe80] sm:$0xff] }
 0x39b   : > { %v4690_v23 = vmul.f32 %v3666_v15, %v3666_v15  ;;  %v1631_v15 = vadd.s32 3816, %v6360_v2  ;;  %vm2657_vm12 = vcmp.lt.s32.totalorder %v1630_v10, %v6363_v4 }
 0x39c   : > { %v5701_v31 = vadd.f32 %v5700_v26, %v4677_v20  ;;  %v3667_v20 = vsel %vm2643_vm14, %v591_v11, 0.0  ;;  %v594_v26 = vld [vmem:[%s6355_s12 + $0xe88] sm:$0xff] }
 0x39d   : > { %v4691_v28 = vmul.f32 %v3667_v20, %v3667_v20  ;;  %v1632_v20 = vadd.s32 3824, %v6360_v2  ;;  %vm2658_vm13 = vcmp.lt.s32.totalorder %v1631_v15, %v6363_v4 }
 0x39e   : > { %v5702_v36 = vadd.f32 %v5701_v31, %v4678_v25  ;;  %v3668_v25 = vsel %vm2644_vm15, %v592_v16, 0.0  ;;  %v595_v31 = vld [vmem:[%s6355_s12 + $0xe90] sm:$0xff] }
 0x39f   : > { %v4692_v33 = vmul.f32 %v3668_v25, %v3668_v25  ;;  %v1633_v25 = vadd.s32 3832, %v6360_v2  ;;  %vm2659_vm14 = vcmp.lt.s32.totalorder %v1632_v20, %v6363_v4 }
 0x3a0   : > { %v5703_v41 = vadd.f32 %v5702_v36, %v4679_v30  ;;  %v3669_v30 = vsel %vm2645_vm0, %v593_v21, 0.0  ;;  %v596_v36 = vld [vmem:[%s6355_s12 + $0xe98] sm:$0xff] }
 0x3a1   : > { %v4693_v38 = vmul.f32 %v3669_v30, %v3669_v30  ;;  %v1634_v30 = vadd.s32 3840, %v6360_v2  ;;  %vm2660_vm15 = vcmp.lt.s32.totalorder %v1633_v25, %v6363_v4 }
 0x3a2   : > { %v5704_v46 = vadd.f32 %v5703_v41, %v4680_v35  ;;  %v3670_v35 = vsel %vm2646_vm1, %v594_v26, 0.0  ;;  %v597_v41 = vld [vmem:[%s6355_s12 + $0xea0] sm:$0xff] }
 0x3a3   : > { %v4694_v43 = vmul.f32 %v3670_v35, %v3670_v35  ;;  %v1635_v35 = vadd.s32 3848, %v6360_v2  ;;  %vm2661_vm0 = vcmp.lt.s32.totalorder %v1634_v30, %v6363_v4 }
 0x3a4   : > { %v5705_v51 = vadd.f32 %v5704_v46, %v4681_v40  ;;  %v3671_v40 = vsel %vm2647_vm2, %v595_v31, 0.0  ;;  %v598_v46 = vld [vmem:[%s6355_s12 + $0xea8] sm:$0xff] }
 0x3a5   : > { %v4695_v48 = vmul.f32 %v3671_v40, %v3671_v40  ;;  %v1636_v40 = vadd.s32 3856, %v6360_v2  ;;  %vm2662_vm1 = vcmp.lt.s32.totalorder %v1635_v35, %v6363_v4 }
 0x3a6   : > { %v5706_v56 = vadd.f32 %v5705_v51, %v4682_v45  ;;  %v3672_v45 = vsel %vm2648_vm3, %v596_v36, 0.0  ;;  %v599_v51 = vld [vmem:[%s6355_s12 + $0xeb0] sm:$0xff] }
 0x3a7   : > { %v4696_v53 = vmul.f32 %v3672_v45, %v3672_v45  ;;  %v1637_v45 = vadd.s32 3864, %v6360_v2  ;;  %vm2663_vm2 = vcmp.lt.s32.totalorder %v1636_v40, %v6363_v4 }
 0x3a8   : > { %v5707_v61 = vadd.f32 %v5706_v56, %v4683_v50  ;;  %v3673_v50 = vsel %vm2649_vm4, %v597_v41, 0.0  ;;  %v600_v56 = vld [vmem:[%s6355_s12 + $0xeb8] sm:$0xff] }
 0x3a9   : > { %v4697_v58 = vmul.f32 %v3673_v50, %v3673_v50  ;;  %v1638_v50 = vadd.s32 3872, %v6360_v2  ;;  %vm2664_vm3 = vcmp.lt.s32.totalorder %v1637_v45, %v6363_v4 }
 0x3aa   : > { %v5708_v3 = vadd.f32 %v5707_v61, %v4684_v55  ;;  %v3674_v55 = vsel %vm2650_vm5, %v598_v46, 0.0  ;;  %v601_v61 = vld [vmem:[%s6355_s12 + $0xec0] sm:$0xff] }
 0x3ab   : > { %v4698_v63 = vmul.f32 %v3674_v55, %v3674_v55  ;;  %v1639_v55 = vadd.s32 3880, %v6360_v2  ;;  %vm2665_vm4 = vcmp.lt.s32.totalorder %v1638_v50, %v6363_v4 }
 0x3ac   : > { %v5709_v9 = vadd.f32 %v5708_v3, %v4685_v60  ;;  %v3675_v60 = vsel %vm2651_vm6, %v599_v51, 0.0  ;;  %v602_v3 = vld [vmem:[%s6355_s12 + $0xec8] sm:$0xff] }
 0x3ad   : > { %v4699_v6 = vmul.f32 %v3675_v60, %v3675_v60  ;;  %v1640_v60 = vadd.s32 3888, %v6360_v2  ;;  %vm2666_vm5 = vcmp.lt.s32.totalorder %v1639_v55, %v6363_v4 }
 0x3ae   : > { %v5710_v14 = vadd.f32 %v5709_v9, %v4686_v1  ;;  %v3676_v1 = vsel %vm2652_vm7, %v600_v56, 0.0  ;;  %v603_v9 = vld [vmem:[%s6355_s12 + $0xed0] sm:$0xff] }
 0x3af   : > { %v4700_v11 = vmul.f32 %v3676_v1, %v3676_v1  ;;  %v1641_v1 = vadd.s32 3896, %v6360_v2  ;;  %vm2667_vm6 = vcmp.lt.s32.totalorder %v1640_v60, %v6363_v4 }
 0x3b0   : > { %v5711_v19 = vadd.f32 %v5710_v14, %v4687_v8  ;;  %v3677_v8 = vsel %vm2653_vm8, %v601_v61, 0.0  ;;  %v604_v14 = vld [vmem:[%s6355_s12 + $0xed8] sm:$0xff] }
 0x3b1   : > { %v4701_v16 = vmul.f32 %v3677_v8, %v3677_v8  ;;  %v1642_v8 = vadd.s32 3904, %v6360_v2  ;;  %vm2668_vm7 = vcmp.lt.s32.totalorder %v1641_v1, %v6363_v4 }
 0x3b2   : > { %v5712_v24 = vadd.f32 %v5711_v19, %v4688_v13  ;;  %v3678_v13 = vsel %vm2654_vm9, %v602_v3, 0.0  ;;  %v605_v19 = vld [vmem:[%s6355_s12 + $0xee0] sm:$0xff] }
 0x3b3   : > { %v4702_v21 = vmul.f32 %v3678_v13, %v3678_v13  ;;  %v1643_v13 = vadd.s32 3912, %v6360_v2  ;;  %vm2669_vm8 = vcmp.lt.s32.totalorder %v1642_v8, %v6363_v4 }
 0x3b4   : > { %v5713_v29 = vadd.f32 %v5712_v24, %v4689_v18  ;;  %v3679_v18 = vsel %vm2655_vm10, %v603_v9, 0.0  ;;  %v606_v24 = vld [vmem:[%s6355_s12 + $0xee8] sm:$0xff] }
 0x3b5   : > { %v4703_v26 = vmul.f32 %v3679_v18, %v3679_v18  ;;  %v1644_v18 = vadd.s32 3920, %v6360_v2  ;;  %vm2670_vm9 = vcmp.lt.s32.totalorder %v1643_v13, %v6363_v4 }
 0x3b6   : > { %v5714_v34 = vadd.f32 %v5713_v29, %v4690_v23  ;;  %v3680_v23 = vsel %vm2656_vm11, %v604_v14, 0.0  ;;  %v607_v29 = vld [vmem:[%s6355_s12 + $0xef0] sm:$0xff] }
 0x3b7   : > { %v4704_v31 = vmul.f32 %v3680_v23, %v3680_v23  ;;  %v1645_v23 = vadd.s32 3928, %v6360_v2  ;;  %vm2671_vm10 = vcmp.lt.s32.totalorder %v1644_v18, %v6363_v4 }
 0x3b8   : > { %v5715_v39 = vadd.f32 %v5714_v34, %v4691_v28  ;;  %v3681_v28 = vsel %vm2657_vm12, %v605_v19, 0.0  ;;  %v608_v34 = vld [vmem:[%s6355_s12 + $0xef8] sm:$0xff] }
 0x3b9   : > { %v4705_v36 = vmul.f32 %v3681_v28, %v3681_v28  ;;  %v1646_v28 = vadd.s32 3936, %v6360_v2  ;;  %vm2672_vm11 = vcmp.lt.s32.totalorder %v1645_v23, %v6363_v4 }
 0x3ba   : > { %v5716_v44 = vadd.f32 %v5715_v39, %v4692_v33  ;;  %v3682_v33 = vsel %vm2658_vm13, %v606_v24, 0.0  ;;  %v609_v39 = vld [vmem:[%s6355_s12 + $0xf00] sm:$0xff] }
 0x3bb   : > { %v4706_v41 = vmul.f32 %v3682_v33, %v3682_v33  ;;  %v1647_v33 = vadd.s32 3944, %v6360_v2  ;;  %vm2673_vm12 = vcmp.lt.s32.totalorder %v1646_v28, %v6363_v4 }
 0x3bc   : > { %v5717_v49 = vadd.f32 %v5716_v44, %v4693_v38  ;;  %v3683_v38 = vsel %vm2659_vm14, %v607_v29, 0.0  ;;  %v610_v44 = vld [vmem:[%s6355_s12 + $0xf08] sm:$0xff] }
 0x3bd   : > { %v4707_v46 = vmul.f32 %v3683_v38, %v3683_v38  ;;  %v1648_v38 = vadd.s32 3952, %v6360_v2  ;;  %vm2674_vm13 = vcmp.lt.s32.totalorder %v1647_v33, %v6363_v4 }
 0x3be   : > { %v5718_v54 = vadd.f32 %v5717_v49, %v4694_v43  ;;  %v3684_v43 = vsel %vm2660_vm15, %v608_v34, 0.0  ;;  %v611_v49 = vld [vmem:[%s6355_s12 + $0xf10] sm:$0xff] }
 0x3bf   : > { %v4708_v51 = vmul.f32 %v3684_v43, %v3684_v43  ;;  %v1649_v43 = vadd.s32 3960, %v6360_v2  ;;  %vm2675_vm14 = vcmp.lt.s32.totalorder %v1648_v38, %v6363_v4 }
 0x3c0   : > { %v5719_v59 = vadd.f32 %v5718_v54, %v4695_v48  ;;  %v3685_v48 = vsel %vm2661_vm0, %v609_v39, 0.0  ;;  %v612_v54 = vld [vmem:[%s6355_s12 + $0xf18] sm:$0xff] }
 0x3c1   : > { %v4709_v56 = vmul.f32 %v3685_v48, %v3685_v48  ;;  %v1650_v48 = vadd.s32 3968, %v6360_v2  ;;  %vm2676_vm15 = vcmp.lt.s32.totalorder %v1649_v43, %v6363_v4 }
 0x3c2   : > { %v5720_v0 = vadd.f32 %v5719_v59, %v4696_v53  ;;  %v3686_v53 = vsel %vm2662_vm1, %v610_v44, 0.0  ;;  %v613_v59 = vld [vmem:[%s6355_s12 + $0xf20] sm:$0xff] }
 0x3c3   : > { %v4710_v61 = vmul.f32 %v3686_v53, %v3686_v53  ;;  %v1651_v53 = vadd.s32 3976, %v6360_v2  ;;  %vm2677_vm0 = vcmp.lt.s32.totalorder %v1650_v48, %v6363_v4 }
 0x3c4   : > { %v5721_v7 = vadd.f32 %v5720_v0, %v4697_v58  ;;  %v3687_v58 = vsel %vm2663_vm2, %v611_v49, 0.0  ;;  %v614_v0 = vld [vmem:[%s6355_s12 + $0xf28] sm:$0xff] }
 0x3c5   : > { %v4711_v3 = vmul.f32 %v3687_v58, %v3687_v58  ;;  %v1652_v58 = vadd.s32 3984, %v6360_v2  ;;  %vm2678_vm1 = vcmp.lt.s32.totalorder %v1651_v53, %v6363_v4 }
 0x3c6   : > { %v5722_v12 = vadd.f32 %v5721_v7, %v4698_v63  ;;  %v3688_v63 = vsel %vm2664_vm3, %v612_v54, 0.0  ;;  %v615_v7 = vld [vmem:[%s6355_s12 + $0xf30] sm:$0xff] }
 0x3c7   : > { %v4712_v9 = vmul.f32 %v3688_v63, %v3688_v63  ;;  %v1653_v63 = vadd.s32 3992, %v6360_v2  ;;  %vm2679_vm2 = vcmp.lt.s32.totalorder %v1652_v58, %v6363_v4 }
 0x3c8   : > { %v5723_v17 = vadd.f32 %v5722_v12, %v4699_v6  ;;  %v3689_v6 = vsel %vm2665_vm4, %v613_v59, 0.0  ;;  %v616_v12 = vld [vmem:[%s6355_s12 + $0xf38] sm:$0xff] }
 0x3c9   : > { %v4713_v14 = vmul.f32 %v3689_v6, %v3689_v6  ;;  %v1654_v6 = vadd.s32 4000, %v6360_v2  ;;  %vm2680_vm3 = vcmp.lt.s32.totalorder %v1653_v63, %v6363_v4 }
 0x3ca   : > { %v5724_v22 = vadd.f32 %v5723_v17, %v4700_v11  ;;  %v3690_v11 = vsel %vm2666_vm5, %v614_v0, 0.0  ;;  %v617_v17 = vld [vmem:[%s6355_s12 + $0xf40] sm:$0xff] }
 0x3cb   : > { %v4714_v19 = vmul.f32 %v3690_v11, %v3690_v11  ;;  %v1655_v11 = vadd.s32 4008, %v6360_v2  ;;  %vm2681_vm4 = vcmp.lt.s32.totalorder %v1654_v6, %v6363_v4 }
 0x3cc   : > { %v5725_v27 = vadd.f32 %v5724_v22, %v4701_v16  ;;  %v3691_v16 = vsel %vm2667_vm6, %v615_v7, 0.0  ;;  %v618_v22 = vld [vmem:[%s6355_s12 + $0xf48] sm:$0xff] }
 0x3cd   : > { %v4715_v24 = vmul.f32 %v3691_v16, %v3691_v16  ;;  %v1656_v16 = vadd.s32 4016, %v6360_v2  ;;  %vm2682_vm5 = vcmp.lt.s32.totalorder %v1655_v11, %v6363_v4 }
 0x3ce   : > { %v5726_v32 = vadd.f32 %v5725_v27, %v4702_v21  ;;  %v3692_v21 = vsel %vm2668_vm7, %v616_v12, 0.0  ;;  %v619_v27 = vld [vmem:[%s6355_s12 + $0xf50] sm:$0xff] }
 0x3cf   : > { %v4716_v29 = vmul.f32 %v3692_v21, %v3692_v21  ;;  %v1657_v21 = vadd.s32 4024, %v6360_v2  ;;  %vm2683_vm6 = vcmp.lt.s32.totalorder %v1656_v16, %v6363_v4 }
 0x3d0   : > { %v5727_v37 = vadd.f32 %v5726_v32, %v4703_v26  ;;  %v3693_v26 = vsel %vm2669_vm8, %v617_v17, 0.0  ;;  %v620_v32 = vld [vmem:[%s6355_s12 + $0xf58] sm:$0xff] }
 0x3d1   : > { %v4717_v34 = vmul.f32 %v3693_v26, %v3693_v26  ;;  %v1658_v26 = vadd.s32 4032, %v6360_v2  ;;  %vm2684_vm7 = vcmp.lt.s32.totalorder %v1657_v21, %v6363_v4 }
 0x3d2   : > { %v5728_v42 = vadd.f32 %v5727_v37, %v4704_v31  ;;  %v3694_v31 = vsel %vm2670_vm9, %v618_v22, 0.0  ;;  %v621_v37 = vld [vmem:[%s6355_s12 + $0xf60] sm:$0xff] }
 0x3d3   : > { %v4718_v39 = vmul.f32 %v3694_v31, %v3694_v31  ;;  %v1659_v31 = vadd.s32 4040, %v6360_v2  ;;  %vm2685_vm8 = vcmp.lt.s32.totalorder %v1658_v26, %v6363_v4 }
 0x3d4   : > { %v5729_v47 = vadd.f32 %v5728_v42, %v4705_v36  ;;  %v3695_v36 = vsel %vm2671_vm10, %v619_v27, 0.0  ;;  %v622_v42 = vld [vmem:[%s6355_s12 + $0xf68] sm:$0xff] }
 0x3d5   : > { %v4719_v44 = vmul.f32 %v3695_v36, %v3695_v36  ;;  %v1660_v36 = vadd.s32 4048, %v6360_v2  ;;  %vm2686_vm9 = vcmp.lt.s32.totalorder %v1659_v31, %v6363_v4 }
 0x3d6   : > { %v5730_v52 = vadd.f32 %v5729_v47, %v4706_v41  ;;  %v3696_v41 = vsel %vm2672_vm11, %v620_v32, 0.0  ;;  %v623_v47 = vld [vmem:[%s6355_s12 + $0xf70] sm:$0xff] }
 0x3d7   : > { %v4720_v49 = vmul.f32 %v3696_v41, %v3696_v41  ;;  %v1661_v41 = vadd.s32 4056, %v6360_v2  ;;  %vm2687_vm10 = vcmp.lt.s32.totalorder %v1660_v36, %v6363_v4 }
 0x3d8   : > { %v5731_v57 = vadd.f32 %v5730_v52, %v4707_v46  ;;  %v3697_v46 = vsel %vm2673_vm12, %v621_v37, 0.0  ;;  %v624_v52 = vld [vmem:[%s6355_s12 + $0xf78] sm:$0xff] }
 0x3d9   : > { %v4721_v54 = vmul.f32 %v3697_v46, %v3697_v46  ;;  %v1662_v46 = vadd.s32 4064, %v6360_v2  ;;  %vm2688_vm11 = vcmp.lt.s32.totalorder %v1661_v41, %v6363_v4 }
 0x3da   : > { %v5732_v62 = vadd.f32 %v5731_v57, %v4708_v51  ;;  %v3698_v51 = vsel %vm2674_vm13, %v622_v42, 0.0  ;;  %v625_v57 = vld [vmem:[%s6355_s12 + $0xf80] sm:$0xff] }
 0x3db   : > { %v4722_v59 = vmul.f32 %v3698_v51, %v3698_v51  ;;  %v1663_v51 = vadd.s32 4072, %v6360_v2  ;;  %vm2689_vm12 = vcmp.lt.s32.totalorder %v1662_v46, %v6363_v4 }
 0x3dc   : > { %v5733_v5 = vadd.f32 %v5732_v62, %v4709_v56  ;;  %v3699_v56 = vsel %vm2675_vm14, %v623_v47, 0.0  ;;  %v626_v62 = vld [vmem:[%s6355_s12 + $0xf88] sm:$0xff] }
 0x3dd   : > { %v4723_v0 = vmul.f32 %v3699_v56, %v3699_v56  ;;  %v1664_v56 = vadd.s32 4080, %v6360_v2  ;;  %vm2690_vm13 = vcmp.lt.s32.totalorder %v1663_v51, %v6363_v4 }
 0x3de   : > { %v5734_v10 = vadd.f32 %v5733_v5, %v4710_v61  ;;  %v3700_v61 = vsel %vm2676_vm15, %v624_v52, 0.0  ;;  %v627_v5 = vld [vmem:[%s6355_s12 + $0xf90] sm:$0xff] }
 0x3df   : > { %v4724_v7 = vmul.f32 %v3700_v61, %v3700_v61  ;;  %v1665_v61 = vadd.s32 4088, %v6360_v2  ;;  %vm2691_vm14 = vcmp.lt.s32.totalorder %v1664_v56, %v6363_v4 }
 0x3e0   : > { %v5735_v15 = vadd.f32 %v5734_v10, %v4711_v3  ;;  %v3701_v3 = vsel %vm2677_vm0, %v625_v57, 0.0  ;;  %v628_v10 = vld [vmem:[%s6355_s12 + $0xf98] sm:$0xff] }
 0x3e1   : > { %v4725_v12 = vmul.f32 %v3701_v3, %v3701_v3  ;;  %v1666_v3 = vadd.s32 4096, %v6360_v2  ;;  %vm2692_vm15 = vcmp.lt.s32.totalorder %v1665_v61, %v6363_v4 }
 0x3e2   : > { %v5736_v20 = vadd.f32 %v5735_v15, %v4712_v9  ;;  %v3702_v9 = vsel %vm2678_vm1, %v626_v62, 0.0  ;;  %v629_v15 = vld [vmem:[%s6355_s12 + $0xfa0] sm:$0xff] }
 0x3e3   : > { %v4726_v17 = vmul.f32 %v3702_v9, %v3702_v9  ;;  %v1667_v9 = vadd.s32 4104, %v6360_v2  ;;  %vm2693_vm0 = vcmp.lt.s32.totalorder %v1666_v3, %v6363_v4 }
 0x3e4   : > { %v5737_v25 = vadd.f32 %v5736_v20, %v4713_v14  ;;  %v3703_v14 = vsel %vm2679_vm2, %v627_v5, 0.0  ;;  %v630_v20 = vld [vmem:[%s6355_s12 + $0xfa8] sm:$0xff] }
 0x3e5   : > { %v4727_v22 = vmul.f32 %v3703_v14, %v3703_v14  ;;  %v1668_v14 = vadd.s32 4112, %v6360_v2  ;;  %vm2694_vm1 = vcmp.lt.s32.totalorder %v1667_v9, %v6363_v4 }
 0x3e6   : > { %v5738_v30 = vadd.f32 %v5737_v25, %v4714_v19  ;;  %v3704_v19 = vsel %vm2680_vm3, %v628_v10, 0.0  ;;  %v631_v25 = vld [vmem:[%s6355_s12 + $0xfb0] sm:$0xff] }
 0x3e7   : > { %v4728_v27 = vmul.f32 %v3704_v19, %v3704_v19  ;;  %v1669_v19 = vadd.s32 4120, %v6360_v2  ;;  %vm2695_vm2 = vcmp.lt.s32.totalorder %v1668_v14, %v6363_v4 }
 0x3e8   : > { %v5739_v35 = vadd.f32 %v5738_v30, %v4715_v24  ;;  %v3705_v24 = vsel %vm2681_vm4, %v629_v15, 0.0  ;;  %v632_v30 = vld [vmem:[%s6355_s12 + $0xfb8] sm:$0xff] }
 0x3e9   : > { %v4729_v32 = vmul.f32 %v3705_v24, %v3705_v24  ;;  %v1670_v24 = vadd.s32 4128, %v6360_v2  ;;  %vm2696_vm3 = vcmp.lt.s32.totalorder %v1669_v19, %v6363_v4 }
 0x3ea   : > { %v5740_v40 = vadd.f32 %v5739_v35, %v4716_v29  ;;  %v3706_v29 = vsel %vm2682_vm5, %v630_v20, 0.0  ;;  %v633_v35 = vld [vmem:[%s6355_s12 + $0xfc0] sm:$0xff] }
 0x3eb   : > { %v4730_v37 = vmul.f32 %v3706_v29, %v3706_v29  ;;  %v1671_v29 = vadd.s32 4136, %v6360_v2  ;;  %vm2697_vm4 = vcmp.lt.s32.totalorder %v1670_v24, %v6363_v4 }
 0x3ec   : > { %v5741_v45 = vadd.f32 %v5740_v40, %v4717_v34  ;;  %v3707_v34 = vsel %vm2683_vm6, %v631_v25, 0.0  ;;  %v634_v40 = vld [vmem:[%s6355_s12 + $0xfc8] sm:$0xff] }
 0x3ed   : > { %v4731_v42 = vmul.f32 %v3707_v34, %v3707_v34  ;;  %v1672_v34 = vadd.s32 4144, %v6360_v2  ;;  %vm2698_vm5 = vcmp.lt.s32.totalorder %v1671_v29, %v6363_v4 }
 0x3ee   : > { %v5742_v50 = vadd.f32 %v5741_v45, %v4718_v39  ;;  %v3708_v39 = vsel %vm2684_vm7, %v632_v30, 0.0  ;;  %v635_v45 = vld [vmem:[%s6355_s12 + $0xfd0] sm:$0xff] }
 0x3ef   : > { %v4732_v47 = vmul.f32 %v3708_v39, %v3708_v39  ;;  %v1673_v39 = vadd.s32 4152, %v6360_v2  ;;  %vm2699_vm6 = vcmp.lt.s32.totalorder %v1672_v34, %v6363_v4 }
 0x3f0   : > { %v5743_v55 = vadd.f32 %v5742_v50, %v4719_v44  ;;  %v3709_v44 = vsel %vm2685_vm8, %v633_v35, 0.0  ;;  %v636_v50 = vld [vmem:[%s6355_s12 + $0xfd8] sm:$0xff] }
 0x3f1   : > { %v4733_v52 = vmul.f32 %v3709_v44, %v3709_v44  ;;  %v1674_v44 = vadd.s32 4160, %v6360_v2  ;;  %vm2700_vm7 = vcmp.lt.s32.totalorder %v1673_v39, %v6363_v4 }
 0x3f2   : > { %v5744_v60 = vadd.f32 %v5743_v55, %v4720_v49  ;;  %v3710_v49 = vsel %vm2686_vm9, %v634_v40, 0.0  ;;  %v637_v55 = vld [vmem:[%s6355_s12 + $0xfe0] sm:$0xff] }
 0x3f3   : > { %v4734_v57 = vmul.f32 %v3710_v49, %v3710_v49  ;;  %v1675_v49 = vadd.s32 4168, %v6360_v2  ;;  %vm2701_vm8 = vcmp.lt.s32.totalorder %v1674_v44, %v6363_v4 }
 0x3f4   : > { %v5745_v1 = vadd.f32 %v5744_v60, %v4721_v54  ;;  %v3711_v54 = vsel %vm2687_vm10, %v635_v45, 0.0  ;;  %v638_v60 = vld [vmem:[%s6355_s12 + $0xfe8] sm:$0xff] }
 0x3f5   : > { %v4735_v62 = vmul.f32 %v3711_v54, %v3711_v54  ;;  %v1676_v54 = vadd.s32 4176, %v6360_v2  ;;  %vm2702_vm9 = vcmp.lt.s32.totalorder %v1675_v49, %v6363_v4 }
 0x3f6   : > { %v5746_v8 = vadd.f32 %v5745_v1, %v4722_v59  ;;  %v3712_v59 = vsel %vm2688_vm11, %v636_v50, 0.0  ;;  %v639_v1 = vld [vmem:[%s6355_s12 + $0xff0] sm:$0xff] }
 0x3f7   : > { %v4736_v5 = vmul.f32 %v3712_v59, %v3712_v59  ;;  %v1677_v59 = vadd.s32 4184, %v6360_v2  ;;  %vm2703_vm10 = vcmp.lt.s32.totalorder %v1676_v54, %v6363_v4 }
 0x3f8   : > { %v5747_v13 = vadd.f32 %v5746_v8, %v4723_v0  ;;  %v3713_v0 = vsel %vm2689_vm12, %v637_v55, 0.0  ;;  %v640_v8 = vld [vmem:[%s6355_s12 + $0xff8] sm:$0xff] }
 0x3f9   : > { %v4737_v10 = vmul.f32 %v3713_v0, %v3713_v0  ;;  %v1678_v0 = vadd.s32 4192, %v6360_v2  ;;  %vm2704_vm11 = vcmp.lt.s32.totalorder %v1677_v59, %v6363_v4 }
 0x3fa   : > { %v5748_v18 = vadd.f32 %v5747_v13, %v4724_v7  ;;  %v3714_v7 = vsel %vm2690_vm13, %v638_v60, 0.0  ;;  %v641_v13 = vld [vmem:[%s6355_s12 + $0x1000] sm:$0xff] }
 0x3fb   : > { %v4738_v15 = vmul.f32 %v3714_v7, %v3714_v7  ;;  %v1679_v7 = vadd.s32 4200, %v6360_v2  ;;  %vm2705_vm12 = vcmp.lt.s32.totalorder %v1678_v0, %v6363_v4 }
 0x3fc   : > { %v5749_v23 = vadd.f32 %v5748_v18, %v4725_v12  ;;  %v3715_v12 = vsel %vm2691_vm14, %v639_v1, 0.0  ;;  %v642_v18 = vld [vmem:[%s6355_s12 + $0x1008] sm:$0xff] }
 0x3fd   : > { %v4739_v20 = vmul.f32 %v3715_v12, %v3715_v12  ;;  %v1680_v12 = vadd.s32 4208, %v6360_v2  ;;  %vm2706_vm13 = vcmp.lt.s32.totalorder %v1679_v7, %v6363_v4 }
 0x3fe   : > { %v5750_v28 = vadd.f32 %v5749_v23, %v4726_v17  ;;  %v3716_v17 = vsel %vm2692_vm15, %v640_v8, 0.0  ;;  %v643_v23 = vld [vmem:[%s6355_s12 + $0x1010] sm:$0xff] }
 0x3ff   : > { %v4740_v25 = vmul.f32 %v3716_v17, %v3716_v17  ;;  %v1681_v17 = vadd.s32 4216, %v6360_v2  ;;  %vm2707_vm14 = vcmp.lt.s32.totalorder %v1680_v12, %v6363_v4 }
 0x400   : > { %v5751_v33 = vadd.f32 %v5750_v28, %v4727_v22  ;;  %v3717_v22 = vsel %vm2693_vm0, %v641_v13, 0.0  ;;  %v644_v28 = vld [vmem:[%s6355_s12 + $0x1018] sm:$0xff] }
 0x401   : > { %v4741_v30 = vmul.f32 %v3717_v22, %v3717_v22  ;;  %v1682_v22 = vadd.s32 4224, %v6360_v2  ;;  %vm2708_vm15 = vcmp.lt.s32.totalorder %v1681_v17, %v6363_v4 }
 0x402   : > { %v5752_v38 = vadd.f32 %v5751_v33, %v4728_v27  ;;  %v3718_v27 = vsel %vm2694_vm1, %v642_v18, 0.0  ;;  %v645_v33 = vld [vmem:[%s6355_s12 + $0x1020] sm:$0xff] }
 0x403   : > { %v4742_v35 = vmul.f32 %v3718_v27, %v3718_v27  ;;  %v1683_v27 = vadd.s32 4232, %v6360_v2  ;;  %vm2709_vm0 = vcmp.lt.s32.totalorder %v1682_v22, %v6363_v4 }
 0x404   : > { %v5753_v43 = vadd.f32 %v5752_v38, %v4729_v32  ;;  %v3719_v32 = vsel %vm2695_vm2, %v643_v23, 0.0  ;;  %v646_v38 = vld [vmem:[%s6355_s12 + $0x1028] sm:$0xff] }
 0x405   : > { %v4743_v40 = vmul.f32 %v3719_v32, %v3719_v32  ;;  %v1684_v32 = vadd.s32 4240, %v6360_v2  ;;  %vm2710_vm1 = vcmp.lt.s32.totalorder %v1683_v27, %v6363_v4 }
 0x406   : > { %v5754_v48 = vadd.f32 %v5753_v43, %v4730_v37  ;;  %v3720_v37 = vsel %vm2696_vm3, %v644_v28, 0.0  ;;  %v647_v43 = vld [vmem:[%s6355_s12 + $0x1030] sm:$0xff] }
 0x407   : > { %v4744_v45 = vmul.f32 %v3720_v37, %v3720_v37  ;;  %v1685_v37 = vadd.s32 4248, %v6360_v2  ;;  %vm2711_vm2 = vcmp.lt.s32.totalorder %v1684_v32, %v6363_v4 }
 0x408   : > { %v5755_v53 = vadd.f32 %v5754_v48, %v4731_v42  ;;  %v3721_v42 = vsel %vm2697_vm4, %v645_v33, 0.0  ;;  %v648_v48 = vld [vmem:[%s6355_s12 + $0x1038] sm:$0xff] }
 0x409   : > { %v4745_v50 = vmul.f32 %v3721_v42, %v3721_v42  ;;  %v1686_v42 = vadd.s32 4256, %v6360_v2  ;;  %vm2712_vm3 = vcmp.lt.s32.totalorder %v1685_v37, %v6363_v4 }
 0x40a   : > { %v5756_v58 = vadd.f32 %v5755_v53, %v4732_v47  ;;  %v3722_v47 = vsel %vm2698_vm5, %v646_v38, 0.0  ;;  %v649_v53 = vld [vmem:[%s6355_s12 + $0x1040] sm:$0xff] }
 0x40b   : > { %v4746_v55 = vmul.f32 %v3722_v47, %v3722_v47  ;;  %v1687_v47 = vadd.s32 4264, %v6360_v2  ;;  %vm2713_vm4 = vcmp.lt.s32.totalorder %v1686_v42, %v6363_v4 }
 0x40c   : > { %v5757_v63 = vadd.f32 %v5756_v58, %v4733_v52  ;;  %v3723_v52 = vsel %vm2699_vm6, %v647_v43, 0.0  ;;  %v650_v58 = vld [vmem:[%s6355_s12 + $0x1048] sm:$0xff] }
 0x40d   : > { %v4747_v60 = vmul.f32 %v3723_v52, %v3723_v52  ;;  %v1688_v52 = vadd.s32 4272, %v6360_v2  ;;  %vm2714_vm5 = vcmp.lt.s32.totalorder %v1687_v47, %v6363_v4 }
 0x40e   : > { %v5758_v6 = vadd.f32 %v5757_v63, %v4734_v57  ;;  %v3724_v57 = vsel %vm2700_vm7, %v648_v48, 0.0  ;;  %v651_v63 = vld [vmem:[%s6355_s12 + $0x1050] sm:$0xff] }
 0x40f   : > { %v4748_v1 = vmul.f32 %v3724_v57, %v3724_v57  ;;  %v1689_v57 = vadd.s32 4280, %v6360_v2  ;;  %vm2715_vm6 = vcmp.lt.s32.totalorder %v1688_v52, %v6363_v4 }
 0x410   : > { %v5759_v11 = vadd.f32 %v5758_v6, %v4735_v62  ;;  %v3725_v62 = vsel %vm2701_vm8, %v649_v53, 0.0  ;;  %v652_v6 = vld [vmem:[%s6355_s12 + $0x1058] sm:$0xff] }
 0x411   : > { %v4749_v8 = vmul.f32 %v3725_v62, %v3725_v62  ;;  %v1690_v62 = vadd.s32 4288, %v6360_v2  ;;  %vm2716_vm7 = vcmp.lt.s32.totalorder %v1689_v57, %v6363_v4 }
 0x412   : > { %v5760_v16 = vadd.f32 %v5759_v11, %v4736_v5  ;;  %v3726_v5 = vsel %vm2702_vm9, %v650_v58, 0.0  ;;  %v653_v11 = vld [vmem:[%s6355_s12 + $0x1060] sm:$0xff] }
 0x413   : > { %v4750_v13 = vmul.f32 %v3726_v5, %v3726_v5  ;;  %v1691_v5 = vadd.s32 4296, %v6360_v2  ;;  %vm2717_vm8 = vcmp.lt.s32.totalorder %v1690_v62, %v6363_v4 }
 0x414   : > { %v5761_v21 = vadd.f32 %v5760_v16, %v4737_v10  ;;  %v3727_v10 = vsel %vm2703_vm10, %v651_v63, 0.0  ;;  %v654_v16 = vld [vmem:[%s6355_s12 + $0x1068] sm:$0xff] }
 0x415   : > { %v4751_v18 = vmul.f32 %v3727_v10, %v3727_v10  ;;  %v1692_v10 = vadd.s32 4304, %v6360_v2  ;;  %vm2718_vm9 = vcmp.lt.s32.totalorder %v1691_v5, %v6363_v4 }
 0x416   : > { %v5762_v26 = vadd.f32 %v5761_v21, %v4738_v15  ;;  %v3728_v15 = vsel %vm2704_vm11, %v652_v6, 0.0  ;;  %v655_v21 = vld [vmem:[%s6355_s12 + $0x1070] sm:$0xff] }
 0x417   : > { %v4752_v23 = vmul.f32 %v3728_v15, %v3728_v15  ;;  %v1693_v15 = vadd.s32 4312, %v6360_v2  ;;  %vm2719_vm10 = vcmp.lt.s32.totalorder %v1692_v10, %v6363_v4 }
 0x418   : > { %v5763_v31 = vadd.f32 %v5762_v26, %v4739_v20  ;;  %v3729_v20 = vsel %vm2705_vm12, %v653_v11, 0.0  ;;  %v656_v26 = vld [vmem:[%s6355_s12 + $0x1078] sm:$0xff] }
 0x419   : > { %v4753_v28 = vmul.f32 %v3729_v20, %v3729_v20  ;;  %v1694_v20 = vadd.s32 4320, %v6360_v2  ;;  %vm2720_vm11 = vcmp.lt.s32.totalorder %v1693_v15, %v6363_v4 }
 0x41a   : > { %v5764_v36 = vadd.f32 %v5763_v31, %v4740_v25  ;;  %v3730_v25 = vsel %vm2706_vm13, %v654_v16, 0.0  ;;  %v657_v31 = vld [vmem:[%s6355_s12 + $0x1080] sm:$0xff] }
 0x41b   : > { %v4754_v33 = vmul.f32 %v3730_v25, %v3730_v25  ;;  %v1695_v25 = vadd.s32 4328, %v6360_v2  ;;  %vm2721_vm12 = vcmp.lt.s32.totalorder %v1694_v20, %v6363_v4 }
 0x41c   : > { %v5765_v41 = vadd.f32 %v5764_v36, %v4741_v30  ;;  %v3731_v30 = vsel %vm2707_vm14, %v655_v21, 0.0  ;;  %v658_v36 = vld [vmem:[%s6355_s12 + $0x1088] sm:$0xff] }
 0x41d   : > { %v4755_v38 = vmul.f32 %v3731_v30, %v3731_v30  ;;  %v1696_v30 = vadd.s32 4336, %v6360_v2  ;;  %vm2722_vm13 = vcmp.lt.s32.totalorder %v1695_v25, %v6363_v4 }
 0x41e   : > { %v5766_v46 = vadd.f32 %v5765_v41, %v4742_v35  ;;  %v3732_v35 = vsel %vm2708_vm15, %v656_v26, 0.0  ;;  %v659_v41 = vld [vmem:[%s6355_s12 + $0x1090] sm:$0xff] }
 0x41f   : > { %v4756_v43 = vmul.f32 %v3732_v35, %v3732_v35  ;;  %v1697_v35 = vadd.s32 4344, %v6360_v2  ;;  %vm2723_vm14 = vcmp.lt.s32.totalorder %v1696_v30, %v6363_v4 }
 0x420   : > { %v5767_v51 = vadd.f32 %v5766_v46, %v4743_v40  ;;  %v3733_v40 = vsel %vm2709_vm0, %v657_v31, 0.0  ;;  %v660_v46 = vld [vmem:[%s6355_s12 + $0x1098] sm:$0xff] }
 0x421   : > { %v4757_v48 = vmul.f32 %v3733_v40, %v3733_v40  ;;  %v1698_v40 = vadd.s32 4352, %v6360_v2  ;;  %vm2724_vm15 = vcmp.lt.s32.totalorder %v1697_v35, %v6363_v4 }
 0x422   : > { %v5768_v56 = vadd.f32 %v5767_v51, %v4744_v45  ;;  %v3734_v45 = vsel %vm2710_vm1, %v658_v36, 0.0  ;;  %v661_v51 = vld [vmem:[%s6355_s12 + $0x10a0] sm:$0xff] }
 0x423   : > { %v4758_v53 = vmul.f32 %v3734_v45, %v3734_v45  ;;  %v1699_v45 = vadd.s32 4360, %v6360_v2  ;;  %vm2725_vm0 = vcmp.lt.s32.totalorder %v1698_v40, %v6363_v4 }
 0x424   : > { %v5769_v61 = vadd.f32 %v5768_v56, %v4745_v50  ;;  %v3735_v50 = vsel %vm2711_vm2, %v659_v41, 0.0  ;;  %v662_v56 = vld [vmem:[%s6355_s12 + $0x10a8] sm:$0xff] }
 0x425   : > { %v4759_v58 = vmul.f32 %v3735_v50, %v3735_v50  ;;  %v1700_v50 = vadd.s32 4368, %v6360_v2  ;;  %vm2726_vm1 = vcmp.lt.s32.totalorder %v1699_v45, %v6363_v4 }
 0x426   : > { %v5770_v3 = vadd.f32 %v5769_v61, %v4746_v55  ;;  %v3736_v55 = vsel %vm2712_vm3, %v660_v46, 0.0  ;;  %v663_v61 = vld [vmem:[%s6355_s12 + $0x10b0] sm:$0xff] }
 0x427   : > { %v4760_v63 = vmul.f32 %v3736_v55, %v3736_v55  ;;  %v1701_v55 = vadd.s32 4376, %v6360_v2  ;;  %vm2727_vm2 = vcmp.lt.s32.totalorder %v1700_v50, %v6363_v4 }
 0x428   : > { %v5771_v9 = vadd.f32 %v5770_v3, %v4747_v60  ;;  %v3737_v60 = vsel %vm2713_vm4, %v661_v51, 0.0  ;;  %v664_v3 = vld [vmem:[%s6355_s12 + $0x10b8] sm:$0xff] }
 0x429   : > { %v4761_v6 = vmul.f32 %v3737_v60, %v3737_v60  ;;  %v1702_v60 = vadd.s32 4384, %v6360_v2  ;;  %vm2728_vm3 = vcmp.lt.s32.totalorder %v1701_v55, %v6363_v4 }
 0x42a   : > { %v5772_v14 = vadd.f32 %v5771_v9, %v4748_v1  ;;  %v3738_v1 = vsel %vm2714_vm5, %v662_v56, 0.0  ;;  %v665_v9 = vld [vmem:[%s6355_s12 + $0x10c0] sm:$0xff] }
 0x42b   : > { %v4762_v11 = vmul.f32 %v3738_v1, %v3738_v1  ;;  %v1703_v1 = vadd.s32 4392, %v6360_v2  ;;  %vm2729_vm4 = vcmp.lt.s32.totalorder %v1702_v60, %v6363_v4 }
 0x42c   : > { %v5773_v19 = vadd.f32 %v5772_v14, %v4749_v8  ;;  %v3739_v8 = vsel %vm2715_vm6, %v663_v61, 0.0  ;;  %v666_v14 = vld [vmem:[%s6355_s12 + $0x10c8] sm:$0xff] }
 0x42d   : > { %v4763_v16 = vmul.f32 %v3739_v8, %v3739_v8  ;;  %v1704_v8 = vadd.s32 4400, %v6360_v2  ;;  %vm2730_vm5 = vcmp.lt.s32.totalorder %v1703_v1, %v6363_v4 }
 0x42e   : > { %v5774_v24 = vadd.f32 %v5773_v19, %v4750_v13  ;;  %v3740_v13 = vsel %vm2716_vm7, %v664_v3, 0.0  ;;  %v667_v19 = vld [vmem:[%s6355_s12 + $0x10d0] sm:$0xff] }
 0x42f   : > { %v4764_v21 = vmul.f32 %v3740_v13, %v3740_v13  ;;  %v1705_v13 = vadd.s32 4408, %v6360_v2  ;;  %vm2731_vm6 = vcmp.lt.s32.totalorder %v1704_v8, %v6363_v4 }
 0x430   : > { %v5775_v29 = vadd.f32 %v5774_v24, %v4751_v18  ;;  %v3741_v18 = vsel %vm2717_vm8, %v665_v9, 0.0  ;;  %v668_v24 = vld [vmem:[%s6355_s12 + $0x10d8] sm:$0xff] }
 0x431   : > { %v4765_v26 = vmul.f32 %v3741_v18, %v3741_v18  ;;  %v1706_v18 = vadd.s32 4416, %v6360_v2  ;;  %vm2732_vm7 = vcmp.lt.s32.totalorder %v1705_v13, %v6363_v4 }
 0x432   : > { %v5776_v34 = vadd.f32 %v5775_v29, %v4752_v23  ;;  %v3742_v23 = vsel %vm2718_vm9, %v666_v14, 0.0  ;;  %v669_v29 = vld [vmem:[%s6355_s12 + $0x10e0] sm:$0xff] }
 0x433   : > { %v4766_v31 = vmul.f32 %v3742_v23, %v3742_v23  ;;  %v1707_v23 = vadd.s32 4424, %v6360_v2  ;;  %vm2733_vm8 = vcmp.lt.s32.totalorder %v1706_v18, %v6363_v4 }
 0x434   : > { %v5777_v39 = vadd.f32 %v5776_v34, %v4753_v28  ;;  %v3743_v28 = vsel %vm2719_vm10, %v667_v19, 0.0  ;;  %v670_v34 = vld [vmem:[%s6355_s12 + $0x10e8] sm:$0xff] }
 0x435   : > { %v4767_v36 = vmul.f32 %v3743_v28, %v3743_v28  ;;  %v1708_v28 = vadd.s32 4432, %v6360_v2  ;;  %vm2734_vm9 = vcmp.lt.s32.totalorder %v1707_v23, %v6363_v4 }
 0x436   : > { %v5778_v44 = vadd.f32 %v5777_v39, %v4754_v33  ;;  %v3744_v33 = vsel %vm2720_vm11, %v668_v24, 0.0  ;;  %v671_v39 = vld [vmem:[%s6355_s12 + $0x10f0] sm:$0xff] }
 0x437   : > { %v4768_v41 = vmul.f32 %v3744_v33, %v3744_v33  ;;  %v1709_v33 = vadd.s32 4440, %v6360_v2  ;;  %vm2735_vm10 = vcmp.lt.s32.totalorder %v1708_v28, %v6363_v4 }
 0x438   : > { %v5779_v49 = vadd.f32 %v5778_v44, %v4755_v38  ;;  %v3745_v38 = vsel %vm2721_vm12, %v669_v29, 0.0  ;;  %v672_v44 = vld [vmem:[%s6355_s12 + $0x10f8] sm:$0xff] }
 0x439   : > { %v4769_v46 = vmul.f32 %v3745_v38, %v3745_v38  ;;  %v1710_v38 = vadd.s32 4448, %v6360_v2  ;;  %vm2736_vm11 = vcmp.lt.s32.totalorder %v1709_v33, %v6363_v4 }
 0x43a   : > { %v5780_v54 = vadd.f32 %v5779_v49, %v4756_v43  ;;  %v3746_v43 = vsel %vm2722_vm13, %v670_v34, 0.0  ;;  %v673_v49 = vld [vmem:[%s6355_s12 + $0x1100] sm:$0xff] }
 0x43b   : > { %v4770_v51 = vmul.f32 %v3746_v43, %v3746_v43  ;;  %v1711_v43 = vadd.s32 4456, %v6360_v2  ;;  %vm2737_vm12 = vcmp.lt.s32.totalorder %v1710_v38, %v6363_v4 }
 0x43c   : > { %v5781_v59 = vadd.f32 %v5780_v54, %v4757_v48  ;;  %v3747_v48 = vsel %vm2723_vm14, %v671_v39, 0.0  ;;  %v674_v54 = vld [vmem:[%s6355_s12 + $0x1108] sm:$0xff] }
 0x43d   : > { %v4771_v56 = vmul.f32 %v3747_v48, %v3747_v48  ;;  %v1712_v48 = vadd.s32 4464, %v6360_v2  ;;  %vm2738_vm13 = vcmp.lt.s32.totalorder %v1711_v43, %v6363_v4 }
 0x43e   : > { %v5782_v0 = vadd.f32 %v5781_v59, %v4758_v53  ;;  %v3748_v53 = vsel %vm2724_vm15, %v672_v44, 0.0  ;;  %v675_v59 = vld [vmem:[%s6355_s12 + $0x1110] sm:$0xff] }
 0x43f   : > { %v4772_v61 = vmul.f32 %v3748_v53, %v3748_v53  ;;  %v1713_v53 = vadd.s32 4472, %v6360_v2  ;;  %vm2739_vm14 = vcmp.lt.s32.totalorder %v1712_v48, %v6363_v4 }
 0x440   : > { %v5783_v7 = vadd.f32 %v5782_v0, %v4759_v58  ;;  %v3749_v58 = vsel %vm2725_vm0, %v673_v49, 0.0  ;;  %v676_v0 = vld [vmem:[%s6355_s12 + $0x1118] sm:$0xff] }
 0x441   : > { %v4773_v3 = vmul.f32 %v3749_v58, %v3749_v58  ;;  %v1714_v58 = vadd.s32 4480, %v6360_v2  ;;  %vm2740_vm15 = vcmp.lt.s32.totalorder %v1713_v53, %v6363_v4 }
 0x442   : > { %v5784_v12 = vadd.f32 %v5783_v7, %v4760_v63  ;;  %v3750_v63 = vsel %vm2726_vm1, %v674_v54, 0.0  ;;  %v677_v7 = vld [vmem:[%s6355_s12 + $0x1120] sm:$0xff] }
 0x443   : > { %v4774_v9 = vmul.f32 %v3750_v63, %v3750_v63  ;;  %v1715_v63 = vadd.s32 4488, %v6360_v2  ;;  %vm2741_vm0 = vcmp.lt.s32.totalorder %v1714_v58, %v6363_v4 }
 0x444   : > { %v5785_v17 = vadd.f32 %v5784_v12, %v4761_v6  ;;  %v3751_v6 = vsel %vm2727_vm2, %v675_v59, 0.0  ;;  %v678_v12 = vld [vmem:[%s6355_s12 + $0x1128] sm:$0xff] }
 0x445   : > { %v4775_v14 = vmul.f32 %v3751_v6, %v3751_v6  ;;  %v1716_v6 = vadd.s32 4496, %v6360_v2  ;;  %vm2742_vm1 = vcmp.lt.s32.totalorder %v1715_v63, %v6363_v4 }
 0x446   : > { %v5786_v22 = vadd.f32 %v5785_v17, %v4762_v11  ;;  %v3752_v11 = vsel %vm2728_vm3, %v676_v0, 0.0  ;;  %v679_v17 = vld [vmem:[%s6355_s12 + $0x1130] sm:$0xff] }
 0x447   : > { %v4776_v19 = vmul.f32 %v3752_v11, %v3752_v11  ;;  %v1717_v11 = vadd.s32 4504, %v6360_v2  ;;  %vm2743_vm2 = vcmp.lt.s32.totalorder %v1716_v6, %v6363_v4 }
 0x448   : > { %v5787_v27 = vadd.f32 %v5786_v22, %v4763_v16  ;;  %v3753_v16 = vsel %vm2729_vm4, %v677_v7, 0.0  ;;  %v680_v22 = vld [vmem:[%s6355_s12 + $0x1138] sm:$0xff] }
 0x449   : > { %v4777_v24 = vmul.f32 %v3753_v16, %v3753_v16  ;;  %v1718_v16 = vadd.s32 4512, %v6360_v2  ;;  %vm2744_vm3 = vcmp.lt.s32.totalorder %v1717_v11, %v6363_v4 }
 0x44a   : > { %v5788_v32 = vadd.f32 %v5787_v27, %v4764_v21  ;;  %v3754_v21 = vsel %vm2730_vm5, %v678_v12, 0.0  ;;  %v681_v27 = vld [vmem:[%s6355_s12 + $0x1140] sm:$0xff] }
 0x44b   : > { %v4778_v29 = vmul.f32 %v3754_v21, %v3754_v21  ;;  %v1719_v21 = vadd.s32 4520, %v6360_v2  ;;  %vm2745_vm4 = vcmp.lt.s32.totalorder %v1718_v16, %v6363_v4 }
 0x44c   : > { %v5789_v37 = vadd.f32 %v5788_v32, %v4765_v26  ;;  %v3755_v26 = vsel %vm2731_vm6, %v679_v17, 0.0  ;;  %v682_v32 = vld [vmem:[%s6355_s12 + $0x1148] sm:$0xff] }
 0x44d   : > { %v4779_v34 = vmul.f32 %v3755_v26, %v3755_v26  ;;  %v1720_v26 = vadd.s32 4528, %v6360_v2  ;;  %vm2746_vm5 = vcmp.lt.s32.totalorder %v1719_v21, %v6363_v4 }
 0x44e   : > { %v5790_v42 = vadd.f32 %v5789_v37, %v4766_v31  ;;  %v3756_v31 = vsel %vm2732_vm7, %v680_v22, 0.0  ;;  %v683_v37 = vld [vmem:[%s6355_s12 + $0x1150] sm:$0xff] }
 0x44f   : > { %v4780_v39 = vmul.f32 %v3756_v31, %v3756_v31  ;;  %v1721_v31 = vadd.s32 4536, %v6360_v2  ;;  %vm2747_vm6 = vcmp.lt.s32.totalorder %v1720_v26, %v6363_v4 }
 0x450   : > { %v5791_v47 = vadd.f32 %v5790_v42, %v4767_v36  ;;  %v3757_v36 = vsel %vm2733_vm8, %v681_v27, 0.0  ;;  %v684_v42 = vld [vmem:[%s6355_s12 + $0x1158] sm:$0xff] }
 0x451   : > { %v4781_v44 = vmul.f32 %v3757_v36, %v3757_v36  ;;  %v1722_v36 = vadd.s32 4544, %v6360_v2  ;;  %vm2748_vm7 = vcmp.lt.s32.totalorder %v1721_v31, %v6363_v4 }
 0x452   : > { %v5792_v52 = vadd.f32 %v5791_v47, %v4768_v41  ;;  %v3758_v41 = vsel %vm2734_vm9, %v682_v32, 0.0  ;;  %v685_v47 = vld [vmem:[%s6355_s12 + $0x1160] sm:$0xff] }
 0x453   : > { %v4782_v49 = vmul.f32 %v3758_v41, %v3758_v41  ;;  %v1723_v41 = vadd.s32 4552, %v6360_v2  ;;  %vm2749_vm8 = vcmp.lt.s32.totalorder %v1722_v36, %v6363_v4 }
 0x454   : > { %v5793_v57 = vadd.f32 %v5792_v52, %v4769_v46  ;;  %v3759_v46 = vsel %vm2735_vm10, %v683_v37, 0.0  ;;  %v686_v52 = vld [vmem:[%s6355_s12 + $0x1168] sm:$0xff] }
 0x455   : > { %v4783_v54 = vmul.f32 %v3759_v46, %v3759_v46  ;;  %v1724_v46 = vadd.s32 4560, %v6360_v2  ;;  %vm2750_vm9 = vcmp.lt.s32.totalorder %v1723_v41, %v6363_v4 }
 0x456   : > { %v5794_v62 = vadd.f32 %v5793_v57, %v4770_v51  ;;  %v3760_v51 = vsel %vm2736_vm11, %v684_v42, 0.0  ;;  %v687_v57 = vld [vmem:[%s6355_s12 + $0x1170] sm:$0xff] }
 0x457   : > { %v4784_v59 = vmul.f32 %v3760_v51, %v3760_v51  ;;  %v1725_v51 = vadd.s32 4568, %v6360_v2  ;;  %vm2751_vm10 = vcmp.lt.s32.totalorder %v1724_v46, %v6363_v4 }
 0x458   : > { %v5795_v5 = vadd.f32 %v5794_v62, %v4771_v56  ;;  %v3761_v56 = vsel %vm2737_vm12, %v685_v47, 0.0  ;;  %v688_v62 = vld [vmem:[%s6355_s12 + $0x1178] sm:$0xff] }
 0x459   : > { %v4785_v0 = vmul.f32 %v3761_v56, %v3761_v56  ;;  %v1726_v56 = vadd.s32 4576, %v6360_v2  ;;  %vm2752_vm11 = vcmp.lt.s32.totalorder %v1725_v51, %v6363_v4 }
 0x45a   : > { %v5796_v10 = vadd.f32 %v5795_v5, %v4772_v61  ;;  %v3762_v61 = vsel %vm2738_vm13, %v686_v52, 0.0  ;;  %v689_v5 = vld [vmem:[%s6355_s12 + $0x1180] sm:$0xff] }
 0x45b   : > { %v4786_v7 = vmul.f32 %v3762_v61, %v3762_v61  ;;  %v1727_v61 = vadd.s32 4584, %v6360_v2  ;;  %vm2753_vm12 = vcmp.lt.s32.totalorder %v1726_v56, %v6363_v4 }
 0x45c   : > { %v5797_v15 = vadd.f32 %v5796_v10, %v4773_v3  ;;  %v3763_v3 = vsel %vm2739_vm14, %v687_v57, 0.0  ;;  %v690_v10 = vld [vmem:[%s6355_s12 + $0x1188] sm:$0xff] }
 0x45d   : > { %v4787_v12 = vmul.f32 %v3763_v3, %v3763_v3  ;;  %v1728_v3 = vadd.s32 4592, %v6360_v2  ;;  %vm2754_vm13 = vcmp.lt.s32.totalorder %v1727_v61, %v6363_v4 }
 0x45e   : > { %v5798_v20 = vadd.f32 %v5797_v15, %v4774_v9  ;;  %v3764_v9 = vsel %vm2740_vm15, %v688_v62, 0.0  ;;  %v691_v15 = vld [vmem:[%s6355_s12 + $0x1190] sm:$0xff] }
 0x45f   : > { %v4788_v17 = vmul.f32 %v3764_v9, %v3764_v9  ;;  %v1729_v9 = vadd.s32 4600, %v6360_v2  ;;  %vm2755_vm14 = vcmp.lt.s32.totalorder %v1728_v3, %v6363_v4 }
 0x460   : > { %v5799_v25 = vadd.f32 %v5798_v20, %v4775_v14  ;;  %v3765_v14 = vsel %vm2741_vm0, %v689_v5, 0.0  ;;  %v692_v20 = vld [vmem:[%s6355_s12 + $0x1198] sm:$0xff] }
 0x461   : > { %v4789_v22 = vmul.f32 %v3765_v14, %v3765_v14  ;;  %v1730_v14 = vadd.s32 4608, %v6360_v2  ;;  %vm2756_vm15 = vcmp.lt.s32.totalorder %v1729_v9, %v6363_v4 }
 0x462   : > { %v5800_v30 = vadd.f32 %v5799_v25, %v4776_v19  ;;  %v3766_v19 = vsel %vm2742_vm1, %v690_v10, 0.0  ;;  %v693_v25 = vld [vmem:[%s6355_s12 + $0x11a0] sm:$0xff] }
 0x463   : > { %v4790_v27 = vmul.f32 %v3766_v19, %v3766_v19  ;;  %v1731_v19 = vadd.s32 4616, %v6360_v2  ;;  %vm2757_vm0 = vcmp.lt.s32.totalorder %v1730_v14, %v6363_v4 }
 0x464   : > { %v5801_v35 = vadd.f32 %v5800_v30, %v4777_v24  ;;  %v3767_v24 = vsel %vm2743_vm2, %v691_v15, 0.0  ;;  %v694_v30 = vld [vmem:[%s6355_s12 + $0x11a8] sm:$0xff] }
 0x465   : > { %v4791_v32 = vmul.f32 %v3767_v24, %v3767_v24  ;;  %v1732_v24 = vadd.s32 4624, %v6360_v2  ;;  %vm2758_vm1 = vcmp.lt.s32.totalorder %v1731_v19, %v6363_v4 }
 0x466   : > { %v5802_v40 = vadd.f32 %v5801_v35, %v4778_v29  ;;  %v3768_v29 = vsel %vm2744_vm3, %v692_v20, 0.0  ;;  %v695_v35 = vld [vmem:[%s6355_s12 + $0x11b0] sm:$0xff] }
 0x467   : > { %v4792_v37 = vmul.f32 %v3768_v29, %v3768_v29  ;;  %v1733_v29 = vadd.s32 4632, %v6360_v2  ;;  %vm2759_vm2 = vcmp.lt.s32.totalorder %v1732_v24, %v6363_v4 }
 0x468   : > { %v5803_v45 = vadd.f32 %v5802_v40, %v4779_v34  ;;  %v3769_v34 = vsel %vm2745_vm4, %v693_v25, 0.0  ;;  %v696_v40 = vld [vmem:[%s6355_s12 + $0x11b8] sm:$0xff] }
 0x469   : > { %v4793_v42 = vmul.f32 %v3769_v34, %v3769_v34  ;;  %v1734_v34 = vadd.s32 4640, %v6360_v2  ;;  %vm2760_vm3 = vcmp.lt.s32.totalorder %v1733_v29, %v6363_v4 }
 0x46a   : > { %v5804_v50 = vadd.f32 %v5803_v45, %v4780_v39  ;;  %v3770_v39 = vsel %vm2746_vm5, %v694_v30, 0.0  ;;  %v697_v45 = vld [vmem:[%s6355_s12 + $0x11c0] sm:$0xff] }
 0x46b   : > { %v4794_v47 = vmul.f32 %v3770_v39, %v3770_v39  ;;  %v1735_v39 = vadd.s32 4648, %v6360_v2  ;;  %vm2761_vm4 = vcmp.lt.s32.totalorder %v1734_v34, %v6363_v4 }
 0x46c   : > { %v5805_v55 = vadd.f32 %v5804_v50, %v4781_v44  ;;  %v3771_v44 = vsel %vm2747_vm6, %v695_v35, 0.0  ;;  %v698_v50 = vld [vmem:[%s6355_s12 + $0x11c8] sm:$0xff] }
 0x46d   : > { %v4795_v52 = vmul.f32 %v3771_v44, %v3771_v44  ;;  %v1736_v44 = vadd.s32 4656, %v6360_v2  ;;  %vm2762_vm5 = vcmp.lt.s32.totalorder %v1735_v39, %v6363_v4 }
 0x46e   : > { %v5806_v60 = vadd.f32 %v5805_v55, %v4782_v49  ;;  %v3772_v49 = vsel %vm2748_vm7, %v696_v40, 0.0  ;;  %v699_v55 = vld [vmem:[%s6355_s12 + $0x11d0] sm:$0xff] }
 0x46f   : > { %v4796_v57 = vmul.f32 %v3772_v49, %v3772_v49  ;;  %v1737_v49 = vadd.s32 4664, %v6360_v2  ;;  %vm2763_vm6 = vcmp.lt.s32.totalorder %v1736_v44, %v6363_v4 }
 0x470   : > { %v5807_v1 = vadd.f32 %v5806_v60, %v4783_v54  ;;  %v3773_v54 = vsel %vm2749_vm8, %v697_v45, 0.0  ;;  %v700_v60 = vld [vmem:[%s6355_s12 + $0x11d8] sm:$0xff] }
 0x471   : > { %v4797_v62 = vmul.f32 %v3773_v54, %v3773_v54  ;;  %v1738_v54 = vadd.s32 4672, %v6360_v2  ;;  %vm2764_vm7 = vcmp.lt.s32.totalorder %v1737_v49, %v6363_v4 }
 0x472   : > { %v5808_v8 = vadd.f32 %v5807_v1, %v4784_v59  ;;  %v3774_v59 = vsel %vm2750_vm9, %v698_v50, 0.0  ;;  %v701_v1 = vld [vmem:[%s6355_s12 + $0x11e0] sm:$0xff] }
 0x473   : > { %v4798_v5 = vmul.f32 %v3774_v59, %v3774_v59  ;;  %v1739_v59 = vadd.s32 4680, %v6360_v2  ;;  %vm2765_vm8 = vcmp.lt.s32.totalorder %v1738_v54, %v6363_v4 }
 0x474   : > { %v5809_v13 = vadd.f32 %v5808_v8, %v4785_v0  ;;  %v3775_v0 = vsel %vm2751_vm10, %v699_v55, 0.0  ;;  %v702_v8 = vld [vmem:[%s6355_s12 + $0x11e8] sm:$0xff] }
 0x475   : > { %v4799_v10 = vmul.f32 %v3775_v0, %v3775_v0  ;;  %v1740_v0 = vadd.s32 4688, %v6360_v2  ;;  %vm2766_vm9 = vcmp.lt.s32.totalorder %v1739_v59, %v6363_v4 }
 0x476   : > { %v5810_v18 = vadd.f32 %v5809_v13, %v4786_v7  ;;  %v3776_v7 = vsel %vm2752_vm11, %v700_v60, 0.0  ;;  %v703_v13 = vld [vmem:[%s6355_s12 + $0x11f0] sm:$0xff] }
 0x477   : > { %v4800_v15 = vmul.f32 %v3776_v7, %v3776_v7  ;;  %v1741_v7 = vadd.s32 4696, %v6360_v2  ;;  %vm2767_vm10 = vcmp.lt.s32.totalorder %v1740_v0, %v6363_v4 }
 0x478   : > { %v5811_v23 = vadd.f32 %v5810_v18, %v4787_v12  ;;  %v3777_v12 = vsel %vm2753_vm12, %v701_v1, 0.0  ;;  %v704_v18 = vld [vmem:[%s6355_s12 + $0x11f8] sm:$0xff] }
 0x479   : > { %v4801_v20 = vmul.f32 %v3777_v12, %v3777_v12  ;;  %v1742_v12 = vadd.s32 4704, %v6360_v2  ;;  %vm2768_vm11 = vcmp.lt.s32.totalorder %v1741_v7, %v6363_v4 }
 0x47a   : > { %v5812_v28 = vadd.f32 %v5811_v23, %v4788_v17  ;;  %v3778_v17 = vsel %vm2754_vm13, %v702_v8, 0.0  ;;  %v705_v23 = vld [vmem:[%s6355_s12 + $0x1200] sm:$0xff] }
 0x47b   : > { %v4802_v25 = vmul.f32 %v3778_v17, %v3778_v17  ;;  %v1743_v17 = vadd.s32 4712, %v6360_v2  ;;  %vm2769_vm12 = vcmp.lt.s32.totalorder %v1742_v12, %v6363_v4 }
 0x47c   : > { %v5813_v33 = vadd.f32 %v5812_v28, %v4789_v22  ;;  %v3779_v22 = vsel %vm2755_vm14, %v703_v13, 0.0  ;;  %v706_v28 = vld [vmem:[%s6355_s12 + $0x1208] sm:$0xff] }
 0x47d   : > { %v4803_v30 = vmul.f32 %v3779_v22, %v3779_v22  ;;  %v1744_v22 = vadd.s32 4720, %v6360_v2  ;;  %vm2770_vm13 = vcmp.lt.s32.totalorder %v1743_v17, %v6363_v4 }
 0x47e   : > { %v5814_v38 = vadd.f32 %v5813_v33, %v4790_v27  ;;  %v3780_v27 = vsel %vm2756_vm15, %v704_v18, 0.0  ;;  %v707_v33 = vld [vmem:[%s6355_s12 + $0x1210] sm:$0xff] }
 0x47f   : > { %v4804_v35 = vmul.f32 %v3780_v27, %v3780_v27  ;;  %v1745_v27 = vadd.s32 4728, %v6360_v2  ;;  %vm2771_vm14 = vcmp.lt.s32.totalorder %v1744_v22, %v6363_v4 }
 0x480   : > { %v5815_v43 = vadd.f32 %v5814_v38, %v4791_v32  ;;  %v3781_v32 = vsel %vm2757_vm0, %v705_v23, 0.0  ;;  %v708_v38 = vld [vmem:[%s6355_s12 + $0x1218] sm:$0xff] }
 0x481   : > { %v4805_v40 = vmul.f32 %v3781_v32, %v3781_v32  ;;  %v1746_v32 = vadd.s32 4736, %v6360_v2  ;;  %vm2772_vm15 = vcmp.lt.s32.totalorder %v1745_v27, %v6363_v4 }
 0x482   : > { %v5816_v48 = vadd.f32 %v5815_v43, %v4792_v37  ;;  %v3782_v37 = vsel %vm2758_vm1, %v706_v28, 0.0  ;;  %v709_v43 = vld [vmem:[%s6355_s12 + $0x1220] sm:$0xff] }
 0x483   : > { %v4806_v45 = vmul.f32 %v3782_v37, %v3782_v37  ;;  %v1747_v37 = vadd.s32 4744, %v6360_v2  ;;  %vm2773_vm0 = vcmp.lt.s32.totalorder %v1746_v32, %v6363_v4 }
 0x484   : > { %v5817_v53 = vadd.f32 %v5816_v48, %v4793_v42  ;;  %v3783_v42 = vsel %vm2759_vm2, %v707_v33, 0.0  ;;  %v710_v48 = vld [vmem:[%s6355_s12 + $0x1228] sm:$0xff] }
 0x485   : > { %v4807_v50 = vmul.f32 %v3783_v42, %v3783_v42  ;;  %v1748_v42 = vadd.s32 4752, %v6360_v2  ;;  %vm2774_vm1 = vcmp.lt.s32.totalorder %v1747_v37, %v6363_v4 }
 0x486   : > { %v5818_v58 = vadd.f32 %v5817_v53, %v4794_v47  ;;  %v3784_v47 = vsel %vm2760_vm3, %v708_v38, 0.0  ;;  %v711_v53 = vld [vmem:[%s6355_s12 + $0x1230] sm:$0xff] }
 0x487   : > { %v4808_v55 = vmul.f32 %v3784_v47, %v3784_v47  ;;  %v1749_v47 = vadd.s32 4760, %v6360_v2  ;;  %vm2775_vm2 = vcmp.lt.s32.totalorder %v1748_v42, %v6363_v4 }
 0x488   : > { %v5819_v63 = vadd.f32 %v5818_v58, %v4795_v52  ;;  %v3785_v52 = vsel %vm2761_vm4, %v709_v43, 0.0  ;;  %v712_v58 = vld [vmem:[%s6355_s12 + $0x1238] sm:$0xff] }
 0x489   : > { %v4809_v60 = vmul.f32 %v3785_v52, %v3785_v52  ;;  %v1750_v52 = vadd.s32 4768, %v6360_v2  ;;  %vm2776_vm3 = vcmp.lt.s32.totalorder %v1749_v47, %v6363_v4 }
 0x48a   : > { %v5820_v6 = vadd.f32 %v5819_v63, %v4796_v57  ;;  %v3786_v57 = vsel %vm2762_vm5, %v710_v48, 0.0  ;;  %v713_v63 = vld [vmem:[%s6355_s12 + $0x1240] sm:$0xff] }
 0x48b   : > { %v4810_v1 = vmul.f32 %v3786_v57, %v3786_v57  ;;  %v1751_v57 = vadd.s32 4776, %v6360_v2  ;;  %vm2777_vm4 = vcmp.lt.s32.totalorder %v1750_v52, %v6363_v4 }
 0x48c   : > { %v5821_v11 = vadd.f32 %v5820_v6, %v4797_v62  ;;  %v3787_v62 = vsel %vm2763_vm6, %v711_v53, 0.0  ;;  %v714_v6 = vld [vmem:[%s6355_s12 + $0x1248] sm:$0xff] }
 0x48d   : > { %v4811_v8 = vmul.f32 %v3787_v62, %v3787_v62  ;;  %v1752_v62 = vadd.s32 4784, %v6360_v2  ;;  %vm2778_vm5 = vcmp.lt.s32.totalorder %v1751_v57, %v6363_v4 }
 0x48e   : > { %v5822_v16 = vadd.f32 %v5821_v11, %v4798_v5  ;;  %v3788_v5 = vsel %vm2764_vm7, %v712_v58, 0.0  ;;  %v715_v11 = vld [vmem:[%s6355_s12 + $0x1250] sm:$0xff] }
 0x48f   : > { %v4812_v13 = vmul.f32 %v3788_v5, %v3788_v5  ;;  %v1753_v5 = vadd.s32 4792, %v6360_v2  ;;  %vm2779_vm6 = vcmp.lt.s32.totalorder %v1752_v62, %v6363_v4 }
 0x490   : > { %v5823_v21 = vadd.f32 %v5822_v16, %v4799_v10  ;;  %v3789_v10 = vsel %vm2765_vm8, %v713_v63, 0.0  ;;  %v716_v16 = vld [vmem:[%s6355_s12 + $0x1258] sm:$0xff] }
 0x491   : > { %v4813_v18 = vmul.f32 %v3789_v10, %v3789_v10  ;;  %v1754_v10 = vadd.s32 4800, %v6360_v2  ;;  %vm2780_vm7 = vcmp.lt.s32.totalorder %v1753_v5, %v6363_v4 }
 0x492   : > { %v5824_v26 = vadd.f32 %v5823_v21, %v4800_v15  ;;  %v3790_v15 = vsel %vm2766_vm9, %v714_v6, 0.0  ;;  %v717_v21 = vld [vmem:[%s6355_s12 + $0x1260] sm:$0xff] }
 0x493   : > { %v4814_v23 = vmul.f32 %v3790_v15, %v3790_v15  ;;  %v1755_v15 = vadd.s32 4808, %v6360_v2  ;;  %vm2781_vm8 = vcmp.lt.s32.totalorder %v1754_v10, %v6363_v4 }
 0x494   : > { %v5825_v31 = vadd.f32 %v5824_v26, %v4801_v20  ;;  %v3791_v20 = vsel %vm2767_vm10, %v715_v11, 0.0  ;;  %v718_v26 = vld [vmem:[%s6355_s12 + $0x1268] sm:$0xff] }
 0x495   : > { %v4815_v28 = vmul.f32 %v3791_v20, %v3791_v20  ;;  %v1756_v20 = vadd.s32 4816, %v6360_v2  ;;  %vm2782_vm9 = vcmp.lt.s32.totalorder %v1755_v15, %v6363_v4 }
 0x496   : > { %v5826_v36 = vadd.f32 %v5825_v31, %v4802_v25  ;;  %v3792_v25 = vsel %vm2768_vm11, %v716_v16, 0.0  ;;  %v719_v31 = vld [vmem:[%s6355_s12 + $0x1270] sm:$0xff] }
 0x497   : > { %v4816_v33 = vmul.f32 %v3792_v25, %v3792_v25  ;;  %v1757_v25 = vadd.s32 4824, %v6360_v2  ;;  %vm2783_vm10 = vcmp.lt.s32.totalorder %v1756_v20, %v6363_v4 }
 0x498   : > { %v5827_v41 = vadd.f32 %v5826_v36, %v4803_v30  ;;  %v3793_v30 = vsel %vm2769_vm12, %v717_v21, 0.0  ;;  %v720_v36 = vld [vmem:[%s6355_s12 + $0x1278] sm:$0xff] }
 0x499   : > { %v4817_v38 = vmul.f32 %v3793_v30, %v3793_v30  ;;  %v1758_v30 = vadd.s32 4832, %v6360_v2  ;;  %vm2784_vm11 = vcmp.lt.s32.totalorder %v1757_v25, %v6363_v4 }
 0x49a   : > { %v5828_v46 = vadd.f32 %v5827_v41, %v4804_v35  ;;  %v3794_v35 = vsel %vm2770_vm13, %v718_v26, 0.0  ;;  %v721_v41 = vld [vmem:[%s6355_s12 + $0x1280] sm:$0xff] }
 0x49b   : > { %v4818_v43 = vmul.f32 %v3794_v35, %v3794_v35  ;;  %v1759_v35 = vadd.s32 4840, %v6360_v2  ;;  %vm2785_vm12 = vcmp.lt.s32.totalorder %v1758_v30, %v6363_v4 }
 0x49c   : > { %v5829_v51 = vadd.f32 %v5828_v46, %v4805_v40  ;;  %v3795_v40 = vsel %vm2771_vm14, %v719_v31, 0.0  ;;  %v722_v46 = vld [vmem:[%s6355_s12 + $0x1288] sm:$0xff] }
 0x49d   : > { %v4819_v48 = vmul.f32 %v3795_v40, %v3795_v40  ;;  %v1760_v40 = vadd.s32 4848, %v6360_v2  ;;  %vm2786_vm13 = vcmp.lt.s32.totalorder %v1759_v35, %v6363_v4 }
 0x49e   : > { %v5830_v56 = vadd.f32 %v5829_v51, %v4806_v45  ;;  %v3796_v45 = vsel %vm2772_vm15, %v720_v36, 0.0  ;;  %v723_v51 = vld [vmem:[%s6355_s12 + $0x1290] sm:$0xff] }
 0x49f   : > { %v4820_v53 = vmul.f32 %v3796_v45, %v3796_v45  ;;  %v1761_v45 = vadd.s32 4856, %v6360_v2  ;;  %vm2787_vm14 = vcmp.lt.s32.totalorder %v1760_v40, %v6363_v4 }
 0x4a0   : > { %v5831_v61 = vadd.f32 %v5830_v56, %v4807_v50  ;;  %v3797_v50 = vsel %vm2773_vm0, %v721_v41, 0.0  ;;  %v724_v56 = vld [vmem:[%s6355_s12 + $0x1298] sm:$0xff] }
 0x4a1   : > { %v4821_v58 = vmul.f32 %v3797_v50, %v3797_v50  ;;  %v1762_v50 = vadd.s32 4864, %v6360_v2  ;;  %vm2788_vm15 = vcmp.lt.s32.totalorder %v1761_v45, %v6363_v4 }
 0x4a2   : > { %v5832_v3 = vadd.f32 %v5831_v61, %v4808_v55  ;;  %v3798_v55 = vsel %vm2774_vm1, %v722_v46, 0.0  ;;  %v725_v61 = vld [vmem:[%s6355_s12 + $0x12a0] sm:$0xff] }
 0x4a3   : > { %v4822_v63 = vmul.f32 %v3798_v55, %v3798_v55  ;;  %v1763_v55 = vadd.s32 4872, %v6360_v2  ;;  %vm2789_vm0 = vcmp.lt.s32.totalorder %v1762_v50, %v6363_v4 }
 0x4a4   : > { %v5833_v9 = vadd.f32 %v5832_v3, %v4809_v60  ;;  %v3799_v60 = vsel %vm2775_vm2, %v723_v51, 0.0  ;;  %v726_v3 = vld [vmem:[%s6355_s12 + $0x12a8] sm:$0xff] }
 0x4a5   : > { %v4823_v6 = vmul.f32 %v3799_v60, %v3799_v60  ;;  %v1764_v60 = vadd.s32 4880, %v6360_v2  ;;  %vm2790_vm1 = vcmp.lt.s32.totalorder %v1763_v55, %v6363_v4 }
 0x4a6   : > { %v5834_v14 = vadd.f32 %v5833_v9, %v4810_v1  ;;  %v3800_v1 = vsel %vm2776_vm3, %v724_v56, 0.0  ;;  %v727_v9 = vld [vmem:[%s6355_s12 + $0x12b0] sm:$0xff] }
 0x4a7   : > { %v4824_v11 = vmul.f32 %v3800_v1, %v3800_v1  ;;  %v1765_v1 = vadd.s32 4888, %v6360_v2  ;;  %vm2791_vm2 = vcmp.lt.s32.totalorder %v1764_v60, %v6363_v4 }
 0x4a8   : > { %v5835_v19 = vadd.f32 %v5834_v14, %v4811_v8  ;;  %v3801_v8 = vsel %vm2777_vm4, %v725_v61, 0.0  ;;  %v728_v14 = vld [vmem:[%s6355_s12 + $0x12b8] sm:$0xff] }
 0x4a9   : > { %v4825_v16 = vmul.f32 %v3801_v8, %v3801_v8  ;;  %v1766_v8 = vadd.s32 4896, %v6360_v2  ;;  %vm2792_vm3 = vcmp.lt.s32.totalorder %v1765_v1, %v6363_v4 }
 0x4aa   : > { %v5836_v24 = vadd.f32 %v5835_v19, %v4812_v13  ;;  %v3802_v13 = vsel %vm2778_vm5, %v726_v3, 0.0  ;;  %v729_v19 = vld [vmem:[%s6355_s12 + $0x12c0] sm:$0xff] }
 0x4ab   : > { %v4826_v21 = vmul.f32 %v3802_v13, %v3802_v13  ;;  %v1767_v13 = vadd.s32 4904, %v6360_v2  ;;  %vm2793_vm4 = vcmp.lt.s32.totalorder %v1766_v8, %v6363_v4 }
 0x4ac   : > { %v5837_v29 = vadd.f32 %v5836_v24, %v4813_v18  ;;  %v3803_v18 = vsel %vm2779_vm6, %v727_v9, 0.0  ;;  %v730_v24 = vld [vmem:[%s6355_s12 + $0x12c8] sm:$0xff] }
 0x4ad   : > { %v4827_v26 = vmul.f32 %v3803_v18, %v3803_v18  ;;  %v1768_v18 = vadd.s32 4912, %v6360_v2  ;;  %vm2794_vm5 = vcmp.lt.s32.totalorder %v1767_v13, %v6363_v4 }
 0x4ae   : > { %v5838_v34 = vadd.f32 %v5837_v29, %v4814_v23  ;;  %v3804_v23 = vsel %vm2780_vm7, %v728_v14, 0.0  ;;  %v731_v29 = vld [vmem:[%s6355_s12 + $0x12d0] sm:$0xff] }
 0x4af   : > { %v4828_v31 = vmul.f32 %v3804_v23, %v3804_v23  ;;  %v1769_v23 = vadd.s32 4920, %v6360_v2  ;;  %vm2795_vm6 = vcmp.lt.s32.totalorder %v1768_v18, %v6363_v4 }
 0x4b0   : > { %v5839_v39 = vadd.f32 %v5838_v34, %v4815_v28  ;;  %v3805_v28 = vsel %vm2781_vm8, %v729_v19, 0.0  ;;  %v732_v34 = vld [vmem:[%s6355_s12 + $0x12d8] sm:$0xff] }
 0x4b1   : > { %v4829_v36 = vmul.f32 %v3805_v28, %v3805_v28  ;;  %v1770_v28 = vadd.s32 4928, %v6360_v2  ;;  %vm2796_vm7 = vcmp.lt.s32.totalorder %v1769_v23, %v6363_v4 }
 0x4b2   : > { %v5840_v44 = vadd.f32 %v5839_v39, %v4816_v33  ;;  %v3806_v33 = vsel %vm2782_vm9, %v730_v24, 0.0  ;;  %v733_v39 = vld [vmem:[%s6355_s12 + $0x12e0] sm:$0xff] }
 0x4b3   : > { %v4830_v41 = vmul.f32 %v3806_v33, %v3806_v33  ;;  %v1771_v33 = vadd.s32 4936, %v6360_v2  ;;  %vm2797_vm8 = vcmp.lt.s32.totalorder %v1770_v28, %v6363_v4 }
 0x4b4   : > { %v5841_v49 = vadd.f32 %v5840_v44, %v4817_v38  ;;  %v3807_v38 = vsel %vm2783_vm10, %v731_v29, 0.0  ;;  %v734_v44 = vld [vmem:[%s6355_s12 + $0x12e8] sm:$0xff] }
 0x4b5   : > { %v4831_v46 = vmul.f32 %v3807_v38, %v3807_v38  ;;  %v1772_v38 = vadd.s32 4944, %v6360_v2  ;;  %vm2798_vm9 = vcmp.lt.s32.totalorder %v1771_v33, %v6363_v4 }
 0x4b6   : > { %v5842_v54 = vadd.f32 %v5841_v49, %v4818_v43  ;;  %v3808_v43 = vsel %vm2784_vm11, %v732_v34, 0.0  ;;  %v735_v49 = vld [vmem:[%s6355_s12 + $0x12f0] sm:$0xff] }
 0x4b7   : > { %v4832_v51 = vmul.f32 %v3808_v43, %v3808_v43  ;;  %v1773_v43 = vadd.s32 4952, %v6360_v2  ;;  %vm2799_vm10 = vcmp.lt.s32.totalorder %v1772_v38, %v6363_v4 }
 0x4b8   : > { %v5843_v59 = vadd.f32 %v5842_v54, %v4819_v48  ;;  %v3809_v48 = vsel %vm2785_vm12, %v733_v39, 0.0  ;;  %v736_v54 = vld [vmem:[%s6355_s12 + $0x12f8] sm:$0xff] }
 0x4b9   : > { %v4833_v56 = vmul.f32 %v3809_v48, %v3809_v48  ;;  %v1774_v48 = vadd.s32 4960, %v6360_v2  ;;  %vm2800_vm11 = vcmp.lt.s32.totalorder %v1773_v43, %v6363_v4 }
 0x4ba   : > { %v5844_v0 = vadd.f32 %v5843_v59, %v4820_v53  ;;  %v3810_v53 = vsel %vm2786_vm13, %v734_v44, 0.0  ;;  %v737_v59 = vld [vmem:[%s6355_s12 + $0x1300] sm:$0xff] }
 0x4bb   : > { %v4834_v61 = vmul.f32 %v3810_v53, %v3810_v53  ;;  %v1775_v53 = vadd.s32 4968, %v6360_v2  ;;  %vm2801_vm12 = vcmp.lt.s32.totalorder %v1774_v48, %v6363_v4 }
 0x4bc   : > { %v5845_v7 = vadd.f32 %v5844_v0, %v4821_v58  ;;  %v3811_v58 = vsel %vm2787_vm14, %v735_v49, 0.0  ;;  %v738_v0 = vld [vmem:[%s6355_s12 + $0x1308] sm:$0xff] }
 0x4bd   : > { %v4835_v3 = vmul.f32 %v3811_v58, %v3811_v58  ;;  %v1776_v58 = vadd.s32 4976, %v6360_v2  ;;  %vm2802_vm13 = vcmp.lt.s32.totalorder %v1775_v53, %v6363_v4 }
 0x4be   : > { %v5846_v12 = vadd.f32 %v5845_v7, %v4822_v63  ;;  %v3812_v63 = vsel %vm2788_vm15, %v736_v54, 0.0  ;;  %v739_v7 = vld [vmem:[%s6355_s12 + $0x1310] sm:$0xff] }
 0x4bf   : > { %v4836_v9 = vmul.f32 %v3812_v63, %v3812_v63  ;;  %v1777_v63 = vadd.s32 4984, %v6360_v2  ;;  %vm2803_vm14 = vcmp.lt.s32.totalorder %v1776_v58, %v6363_v4 }
 0x4c0   : > { %v5847_v17 = vadd.f32 %v5846_v12, %v4823_v6  ;;  %v3813_v6 = vsel %vm2789_vm0, %v737_v59, 0.0  ;;  %v740_v12 = vld [vmem:[%s6355_s12 + $0x1318] sm:$0xff] }
 0x4c1   : > { %v4837_v14 = vmul.f32 %v3813_v6, %v3813_v6  ;;  %v1778_v6 = vadd.s32 4992, %v6360_v2  ;;  %vm2804_vm15 = vcmp.lt.s32.totalorder %v1777_v63, %v6363_v4 }
 0x4c2   : > { %v5848_v22 = vadd.f32 %v5847_v17, %v4824_v11  ;;  %v3814_v11 = vsel %vm2790_vm1, %v738_v0, 0.0  ;;  %v741_v17 = vld [vmem:[%s6355_s12 + $0x1320] sm:$0xff] }
 0x4c3   : > { %v4838_v19 = vmul.f32 %v3814_v11, %v3814_v11  ;;  %v1779_v11 = vadd.s32 5000, %v6360_v2  ;;  %vm2805_vm0 = vcmp.lt.s32.totalorder %v1778_v6, %v6363_v4 }
 0x4c4   : > { %v5849_v27 = vadd.f32 %v5848_v22, %v4825_v16  ;;  %v3815_v16 = vsel %vm2791_vm2, %v739_v7, 0.0  ;;  %v742_v22 = vld [vmem:[%s6355_s12 + $0x1328] sm:$0xff] }
 0x4c5   : > { %v4839_v24 = vmul.f32 %v3815_v16, %v3815_v16  ;;  %v1780_v16 = vadd.s32 5008, %v6360_v2  ;;  %vm2806_vm1 = vcmp.lt.s32.totalorder %v1779_v11, %v6363_v4 }
 0x4c6   : > { %v5850_v32 = vadd.f32 %v5849_v27, %v4826_v21  ;;  %v3816_v21 = vsel %vm2792_vm3, %v740_v12, 0.0  ;;  %v743_v27 = vld [vmem:[%s6355_s12 + $0x1330] sm:$0xff] }
 0x4c7   : > { %v4840_v29 = vmul.f32 %v3816_v21, %v3816_v21  ;;  %v1781_v21 = vadd.s32 5016, %v6360_v2  ;;  %vm2807_vm2 = vcmp.lt.s32.totalorder %v1780_v16, %v6363_v4 }
 0x4c8   : > { %v5851_v37 = vadd.f32 %v5850_v32, %v4827_v26  ;;  %v3817_v26 = vsel %vm2793_vm4, %v741_v17, 0.0  ;;  %v744_v32 = vld [vmem:[%s6355_s12 + $0x1338] sm:$0xff] }
 0x4c9   : > { %v4841_v34 = vmul.f32 %v3817_v26, %v3817_v26  ;;  %v1782_v26 = vadd.s32 5024, %v6360_v2  ;;  %vm2808_vm3 = vcmp.lt.s32.totalorder %v1781_v21, %v6363_v4 }
 0x4ca   : > { %v5852_v42 = vadd.f32 %v5851_v37, %v4828_v31  ;;  %v3818_v31 = vsel %vm2794_vm5, %v742_v22, 0.0  ;;  %v745_v37 = vld [vmem:[%s6355_s12 + $0x1340] sm:$0xff] }
 0x4cb   : > { %v4842_v39 = vmul.f32 %v3818_v31, %v3818_v31  ;;  %v1783_v31 = vadd.s32 5032, %v6360_v2  ;;  %vm2809_vm4 = vcmp.lt.s32.totalorder %v1782_v26, %v6363_v4 }
 0x4cc   : > { %v5853_v47 = vadd.f32 %v5852_v42, %v4829_v36  ;;  %v3819_v36 = vsel %vm2795_vm6, %v743_v27, 0.0  ;;  %v746_v42 = vld [vmem:[%s6355_s12 + $0x1348] sm:$0xff] }
 0x4cd   : > { %v4843_v44 = vmul.f32 %v3819_v36, %v3819_v36  ;;  %v1784_v36 = vadd.s32 5040, %v6360_v2  ;;  %vm2810_vm5 = vcmp.lt.s32.totalorder %v1783_v31, %v6363_v4 }
 0x4ce   : > { %v5854_v52 = vadd.f32 %v5853_v47, %v4830_v41  ;;  %v3820_v41 = vsel %vm2796_vm7, %v744_v32, 0.0  ;;  %v747_v47 = vld [vmem:[%s6355_s12 + $0x1350] sm:$0xff] }
 0x4cf   : > { %v4844_v49 = vmul.f32 %v3820_v41, %v3820_v41  ;;  %v1785_v41 = vadd.s32 5048, %v6360_v2  ;;  %vm2811_vm6 = vcmp.lt.s32.totalorder %v1784_v36, %v6363_v4 }
 0x4d0   : > { %v5855_v57 = vadd.f32 %v5854_v52, %v4831_v46  ;;  %v3821_v46 = vsel %vm2797_vm8, %v745_v37, 0.0  ;;  %v748_v52 = vld [vmem:[%s6355_s12 + $0x1358] sm:$0xff] }
 0x4d1   : > { %v4845_v54 = vmul.f32 %v3821_v46, %v3821_v46  ;;  %v1786_v46 = vadd.s32 5056, %v6360_v2  ;;  %vm2812_vm7 = vcmp.lt.s32.totalorder %v1785_v41, %v6363_v4 }
 0x4d2   : > { %v5856_v62 = vadd.f32 %v5855_v57, %v4832_v51  ;;  %v3822_v51 = vsel %vm2798_vm9, %v746_v42, 0.0  ;;  %v749_v57 = vld [vmem:[%s6355_s12 + $0x1360] sm:$0xff] }
 0x4d3   : > { %v4846_v59 = vmul.f32 %v3822_v51, %v3822_v51  ;;  %v1787_v51 = vadd.s32 5064, %v6360_v2  ;;  %vm2813_vm8 = vcmp.lt.s32.totalorder %v1786_v46, %v6363_v4 }
 0x4d4   : > { %v5857_v5 = vadd.f32 %v5856_v62, %v4833_v56  ;;  %v3823_v56 = vsel %vm2799_vm10, %v747_v47, 0.0  ;;  %v750_v62 = vld [vmem:[%s6355_s12 + $0x1368] sm:$0xff] }
 0x4d5   : > { %v4847_v0 = vmul.f32 %v3823_v56, %v3823_v56  ;;  %v1788_v56 = vadd.s32 5072, %v6360_v2  ;;  %vm2814_vm9 = vcmp.lt.s32.totalorder %v1787_v51, %v6363_v4 }
 0x4d6   : > { %v5858_v10 = vadd.f32 %v5857_v5, %v4834_v61  ;;  %v3824_v61 = vsel %vm2800_vm11, %v748_v52, 0.0  ;;  %v751_v5 = vld [vmem:[%s6355_s12 + $0x1370] sm:$0xff] }
 0x4d7   : > { %v4848_v7 = vmul.f32 %v3824_v61, %v3824_v61  ;;  %v1789_v61 = vadd.s32 5080, %v6360_v2  ;;  %vm2815_vm10 = vcmp.lt.s32.totalorder %v1788_v56, %v6363_v4 }
 0x4d8   : > { %v5859_v15 = vadd.f32 %v5858_v10, %v4835_v3  ;;  %v3825_v3 = vsel %vm2801_vm12, %v749_v57, 0.0  ;;  %v752_v10 = vld [vmem:[%s6355_s12 + $0x1378] sm:$0xff] }
 0x4d9   : > { %v4849_v12 = vmul.f32 %v3825_v3, %v3825_v3  ;;  %v1790_v3 = vadd.s32 5088, %v6360_v2  ;;  %vm2816_vm11 = vcmp.lt.s32.totalorder %v1789_v61, %v6363_v4 }
 0x4da   : > { %v5860_v20 = vadd.f32 %v5859_v15, %v4836_v9  ;;  %v3826_v9 = vsel %vm2802_vm13, %v750_v62, 0.0  ;;  %v753_v15 = vld [vmem:[%s6355_s12 + $0x1380] sm:$0xff] }
 0x4db   : > { %v4850_v17 = vmul.f32 %v3826_v9, %v3826_v9  ;;  %v1791_v9 = vadd.s32 5096, %v6360_v2  ;;  %vm2817_vm12 = vcmp.lt.s32.totalorder %v1790_v3, %v6363_v4 }
 0x4dc   : > { %v5861_v25 = vadd.f32 %v5860_v20, %v4837_v14  ;;  %v3827_v14 = vsel %vm2803_vm14, %v751_v5, 0.0  ;;  %v754_v20 = vld [vmem:[%s6355_s12 + $0x1388] sm:$0xff] }
 0x4dd   : > { %v4851_v22 = vmul.f32 %v3827_v14, %v3827_v14  ;;  %v1792_v14 = vadd.s32 5104, %v6360_v2  ;;  %vm2818_vm13 = vcmp.lt.s32.totalorder %v1791_v9, %v6363_v4 }
 0x4de   : > { %v5862_v30 = vadd.f32 %v5861_v25, %v4838_v19  ;;  %v3828_v19 = vsel %vm2804_vm15, %v752_v10, 0.0  ;;  %v755_v25 = vld [vmem:[%s6355_s12 + $0x1390] sm:$0xff] }
 0x4df   : > { %v4852_v27 = vmul.f32 %v3828_v19, %v3828_v19  ;;  %v1793_v19 = vadd.s32 5112, %v6360_v2  ;;  %vm2819_vm14 = vcmp.lt.s32.totalorder %v1792_v14, %v6363_v4 }
 0x4e0   : > { %v5863_v35 = vadd.f32 %v5862_v30, %v4839_v24  ;;  %v3829_v24 = vsel %vm2805_vm0, %v753_v15, 0.0  ;;  %v756_v30 = vld [vmem:[%s6355_s12 + $0x1398] sm:$0xff] }
 0x4e1   : > { %v4853_v32 = vmul.f32 %v3829_v24, %v3829_v24  ;;  %v1794_v24 = vadd.s32 5120, %v6360_v2  ;;  %vm2820_vm15 = vcmp.lt.s32.totalorder %v1793_v19, %v6363_v4 }
 0x4e2   : > { %v5864_v40 = vadd.f32 %v5863_v35, %v4840_v29  ;;  %v3830_v29 = vsel %vm2806_vm1, %v754_v20, 0.0  ;;  %v757_v35 = vld [vmem:[%s6355_s12 + $0x13a0] sm:$0xff] }
 0x4e3   : > { %v4854_v37 = vmul.f32 %v3830_v29, %v3830_v29  ;;  %v1795_v29 = vadd.s32 5128, %v6360_v2  ;;  %vm2821_vm0 = vcmp.lt.s32.totalorder %v1794_v24, %v6363_v4 }
 0x4e4   : > { %v5865_v45 = vadd.f32 %v5864_v40, %v4841_v34  ;;  %v3831_v34 = vsel %vm2807_vm2, %v755_v25, 0.0  ;;  %v758_v40 = vld [vmem:[%s6355_s12 + $0x13a8] sm:$0xff] }
 0x4e5   : > { %v4855_v42 = vmul.f32 %v3831_v34, %v3831_v34  ;;  %v1796_v34 = vadd.s32 5136, %v6360_v2  ;;  %vm2822_vm1 = vcmp.lt.s32.totalorder %v1795_v29, %v6363_v4 }
 0x4e6   : > { %v5866_v50 = vadd.f32 %v5865_v45, %v4842_v39  ;;  %v3832_v39 = vsel %vm2808_vm3, %v756_v30, 0.0  ;;  %v759_v45 = vld [vmem:[%s6355_s12 + $0x13b0] sm:$0xff] }
 0x4e7   : > { %v4856_v47 = vmul.f32 %v3832_v39, %v3832_v39  ;;  %v1797_v39 = vadd.s32 5144, %v6360_v2  ;;  %vm2823_vm2 = vcmp.lt.s32.totalorder %v1796_v34, %v6363_v4 }
 0x4e8   : > { %v5867_v55 = vadd.f32 %v5866_v50, %v4843_v44  ;;  %v3833_v44 = vsel %vm2809_vm4, %v757_v35, 0.0  ;;  %v760_v50 = vld [vmem:[%s6355_s12 + $0x13b8] sm:$0xff] }
 0x4e9   : > { %v4857_v52 = vmul.f32 %v3833_v44, %v3833_v44  ;;  %v1798_v44 = vadd.s32 5152, %v6360_v2  ;;  %vm2824_vm3 = vcmp.lt.s32.totalorder %v1797_v39, %v6363_v4 }
 0x4ea   : > { %v5868_v60 = vadd.f32 %v5867_v55, %v4844_v49  ;;  %v3834_v49 = vsel %vm2810_vm5, %v758_v40, 0.0  ;;  %v761_v55 = vld [vmem:[%s6355_s12 + $0x13c0] sm:$0xff] }
 0x4eb   : > { %v4858_v57 = vmul.f32 %v3834_v49, %v3834_v49  ;;  %v1799_v49 = vadd.s32 5160, %v6360_v2  ;;  %vm2825_vm4 = vcmp.lt.s32.totalorder %v1798_v44, %v6363_v4 }
 0x4ec   : > { %v5869_v1 = vadd.f32 %v5868_v60, %v4845_v54  ;;  %v3835_v54 = vsel %vm2811_vm6, %v759_v45, 0.0  ;;  %v762_v60 = vld [vmem:[%s6355_s12 + $0x13c8] sm:$0xff] }
 0x4ed   : > { %v4859_v62 = vmul.f32 %v3835_v54, %v3835_v54  ;;  %v1800_v54 = vadd.s32 5168, %v6360_v2  ;;  %vm2826_vm5 = vcmp.lt.s32.totalorder %v1799_v49, %v6363_v4 }
 0x4ee   : > { %v5870_v8 = vadd.f32 %v5869_v1, %v4846_v59  ;;  %v3836_v59 = vsel %vm2812_vm7, %v760_v50, 0.0  ;;  %v763_v1 = vld [vmem:[%s6355_s12 + $0x13d0] sm:$0xff] }
 0x4ef   : > { %v4860_v5 = vmul.f32 %v3836_v59, %v3836_v59  ;;  %v1801_v59 = vadd.s32 5176, %v6360_v2  ;;  %vm2827_vm6 = vcmp.lt.s32.totalorder %v1800_v54, %v6363_v4 }
 0x4f0   : > { %v5871_v13 = vadd.f32 %v5870_v8, %v4847_v0  ;;  %v3837_v0 = vsel %vm2813_vm8, %v761_v55, 0.0  ;;  %v764_v8 = vld [vmem:[%s6355_s12 + $0x13d8] sm:$0xff] }
 0x4f1   : > { %v4861_v10 = vmul.f32 %v3837_v0, %v3837_v0  ;;  %v1802_v0 = vadd.s32 5184, %v6360_v2  ;;  %vm2828_vm7 = vcmp.lt.s32.totalorder %v1801_v59, %v6363_v4 }
 0x4f2   : > { %v5872_v18 = vadd.f32 %v5871_v13, %v4848_v7  ;;  %v3838_v7 = vsel %vm2814_vm9, %v762_v60, 0.0  ;;  %v765_v13 = vld [vmem:[%s6355_s12 + $0x13e0] sm:$0xff] }
 0x4f3   : > { %v4862_v15 = vmul.f32 %v3838_v7, %v3838_v7  ;;  %v1803_v7 = vadd.s32 5192, %v6360_v2  ;;  %vm2829_vm8 = vcmp.lt.s32.totalorder %v1802_v0, %v6363_v4 }
 0x4f4   : > { %v5873_v23 = vadd.f32 %v5872_v18, %v4849_v12  ;;  %v3839_v12 = vsel %vm2815_vm10, %v763_v1, 0.0  ;;  %v766_v18 = vld [vmem:[%s6355_s12 + $0x13e8] sm:$0xff] }
 0x4f5   : > { %v4863_v20 = vmul.f32 %v3839_v12, %v3839_v12  ;;  %v1804_v12 = vadd.s32 5200, %v6360_v2  ;;  %vm2830_vm9 = vcmp.lt.s32.totalorder %v1803_v7, %v6363_v4 }
 0x4f6   : > { %v5874_v28 = vadd.f32 %v5873_v23, %v4850_v17  ;;  %v3840_v17 = vsel %vm2816_vm11, %v764_v8, 0.0  ;;  %v767_v23 = vld [vmem:[%s6355_s12 + $0x13f0] sm:$0xff] }
 0x4f7   : > { %v4864_v25 = vmul.f32 %v3840_v17, %v3840_v17  ;;  %v1805_v17 = vadd.s32 5208, %v6360_v2  ;;  %vm2831_vm10 = vcmp.lt.s32.totalorder %v1804_v12, %v6363_v4 }
 0x4f8   : > { %v5875_v33 = vadd.f32 %v5874_v28, %v4851_v22  ;;  %v3841_v22 = vsel %vm2817_vm12, %v765_v13, 0.0  ;;  %v768_v28 = vld [vmem:[%s6355_s12 + $0x13f8] sm:$0xff] }
 0x4f9   : > { %v4865_v30 = vmul.f32 %v3841_v22, %v3841_v22  ;;  %v1806_v22 = vadd.s32 5216, %v6360_v2  ;;  %vm2832_vm11 = vcmp.lt.s32.totalorder %v1805_v17, %v6363_v4 }
 0x4fa   : > { %v5876_v38 = vadd.f32 %v5875_v33, %v4852_v27  ;;  %v3842_v27 = vsel %vm2818_vm13, %v766_v18, 0.0  ;;  %v769_v33 = vld [vmem:[%s6355_s12 + $0x1400] sm:$0xff] }
 0x4fb   : > { %v4866_v35 = vmul.f32 %v3842_v27, %v3842_v27  ;;  %v1807_v27 = vadd.s32 5224, %v6360_v2  ;;  %vm2833_vm12 = vcmp.lt.s32.totalorder %v1806_v22, %v6363_v4 }
 0x4fc   : > { %v5877_v43 = vadd.f32 %v5876_v38, %v4853_v32  ;;  %v3843_v32 = vsel %vm2819_vm14, %v767_v23, 0.0  ;;  %v770_v38 = vld [vmem:[%s6355_s12 + $0x1408] sm:$0xff] }
 0x4fd   : > { %v4867_v40 = vmul.f32 %v3843_v32, %v3843_v32  ;;  %v1808_v32 = vadd.s32 5232, %v6360_v2  ;;  %vm2834_vm13 = vcmp.lt.s32.totalorder %v1807_v27, %v6363_v4 }
 0x4fe   : > { %v5878_v48 = vadd.f32 %v5877_v43, %v4854_v37  ;;  %v3844_v37 = vsel %vm2820_vm15, %v768_v28, 0.0  ;;  %v771_v43 = vld [vmem:[%s6355_s12 + $0x1410] sm:$0xff] }
 0x4ff   : > { %v4868_v45 = vmul.f32 %v3844_v37, %v3844_v37  ;;  %v1809_v37 = vadd.s32 5240, %v6360_v2  ;;  %vm2835_vm14 = vcmp.lt.s32.totalorder %v1808_v32, %v6363_v4 }
 0x500   : > { %v5879_v53 = vadd.f32 %v5878_v48, %v4855_v42  ;;  %v3845_v42 = vsel %vm2821_vm0, %v769_v33, 0.0  ;;  %v772_v48 = vld [vmem:[%s6355_s12 + $0x1418] sm:$0xff] }
 0x501   : > { %v4869_v50 = vmul.f32 %v3845_v42, %v3845_v42  ;;  %v1810_v42 = vadd.s32 5248, %v6360_v2  ;;  %vm2836_vm15 = vcmp.lt.s32.totalorder %v1809_v37, %v6363_v4 }
 0x502   : > { %v5880_v58 = vadd.f32 %v5879_v53, %v4856_v47  ;;  %v3846_v47 = vsel %vm2822_vm1, %v770_v38, 0.0  ;;  %v773_v53 = vld [vmem:[%s6355_s12 + $0x1420] sm:$0xff] }
 0x503   : > { %v4870_v55 = vmul.f32 %v3846_v47, %v3846_v47  ;;  %v1811_v47 = vadd.s32 5256, %v6360_v2  ;;  %vm2837_vm0 = vcmp.lt.s32.totalorder %v1810_v42, %v6363_v4 }
 0x504   : > { %v5881_v63 = vadd.f32 %v5880_v58, %v4857_v52  ;;  %v3847_v52 = vsel %vm2823_vm2, %v771_v43, 0.0  ;;  %v774_v58 = vld [vmem:[%s6355_s12 + $0x1428] sm:$0xff] }
 0x505   : > { %v4871_v60 = vmul.f32 %v3847_v52, %v3847_v52  ;;  %v1812_v52 = vadd.s32 5264, %v6360_v2  ;;  %vm2838_vm1 = vcmp.lt.s32.totalorder %v1811_v47, %v6363_v4 }
 0x506   : > { %v5882_v6 = vadd.f32 %v5881_v63, %v4858_v57  ;;  %v3848_v57 = vsel %vm2824_vm3, %v772_v48, 0.0  ;;  %v775_v63 = vld [vmem:[%s6355_s12 + $0x1430] sm:$0xff] }
 0x507   : > { %v4872_v1 = vmul.f32 %v3848_v57, %v3848_v57  ;;  %v1813_v57 = vadd.s32 5272, %v6360_v2  ;;  %vm2839_vm2 = vcmp.lt.s32.totalorder %v1812_v52, %v6363_v4 }
 0x508   : > { %v5883_v11 = vadd.f32 %v5882_v6, %v4859_v62  ;;  %v3849_v62 = vsel %vm2825_vm4, %v773_v53, 0.0  ;;  %v776_v6 = vld [vmem:[%s6355_s12 + $0x1438] sm:$0xff] }
 0x509   : > { %v4873_v8 = vmul.f32 %v3849_v62, %v3849_v62  ;;  %v1814_v62 = vadd.s32 5280, %v6360_v2  ;;  %vm2840_vm3 = vcmp.lt.s32.totalorder %v1813_v57, %v6363_v4 }
 0x50a   : > { %v5884_v16 = vadd.f32 %v5883_v11, %v4860_v5  ;;  %v3850_v5 = vsel %vm2826_vm5, %v774_v58, 0.0  ;;  %v777_v11 = vld [vmem:[%s6355_s12 + $0x1440] sm:$0xff] }
 0x50b   : > { %v4874_v13 = vmul.f32 %v3850_v5, %v3850_v5  ;;  %v1815_v5 = vadd.s32 5288, %v6360_v2  ;;  %vm2841_vm4 = vcmp.lt.s32.totalorder %v1814_v62, %v6363_v4 }
 0x50c   : > { %v5885_v21 = vadd.f32 %v5884_v16, %v4861_v10  ;;  %v3851_v10 = vsel %vm2827_vm6, %v775_v63, 0.0  ;;  %v778_v16 = vld [vmem:[%s6355_s12 + $0x1448] sm:$0xff] }
 0x50d   : > { %v4875_v18 = vmul.f32 %v3851_v10, %v3851_v10  ;;  %v1816_v10 = vadd.s32 5296, %v6360_v2  ;;  %vm2842_vm5 = vcmp.lt.s32.totalorder %v1815_v5, %v6363_v4 }
 0x50e   : > { %v5886_v26 = vadd.f32 %v5885_v21, %v4862_v15  ;;  %v3852_v15 = vsel %vm2828_vm7, %v776_v6, 0.0  ;;  %v779_v21 = vld [vmem:[%s6355_s12 + $0x1450] sm:$0xff] }
 0x50f   : > { %v4876_v23 = vmul.f32 %v3852_v15, %v3852_v15  ;;  %v1817_v15 = vadd.s32 5304, %v6360_v2  ;;  %vm2843_vm6 = vcmp.lt.s32.totalorder %v1816_v10, %v6363_v4 }
 0x510   : > { %v5887_v31 = vadd.f32 %v5886_v26, %v4863_v20  ;;  %v3853_v20 = vsel %vm2829_vm8, %v777_v11, 0.0  ;;  %v780_v26 = vld [vmem:[%s6355_s12 + $0x1458] sm:$0xff] }
 0x511   : > { %v4877_v28 = vmul.f32 %v3853_v20, %v3853_v20  ;;  %v1818_v20 = vadd.s32 5312, %v6360_v2  ;;  %vm2844_vm7 = vcmp.lt.s32.totalorder %v1817_v15, %v6363_v4 }
 0x512   : > { %v5888_v36 = vadd.f32 %v5887_v31, %v4864_v25  ;;  %v3854_v25 = vsel %vm2830_vm9, %v778_v16, 0.0  ;;  %v781_v31 = vld [vmem:[%s6355_s12 + $0x1460] sm:$0xff] }
 0x513   : > { %v4878_v33 = vmul.f32 %v3854_v25, %v3854_v25  ;;  %v1819_v25 = vadd.s32 5320, %v6360_v2  ;;  %vm2845_vm8 = vcmp.lt.s32.totalorder %v1818_v20, %v6363_v4 }
 0x514   : > { %v5889_v41 = vadd.f32 %v5888_v36, %v4865_v30  ;;  %v3855_v30 = vsel %vm2831_vm10, %v779_v21, 0.0  ;;  %v782_v36 = vld [vmem:[%s6355_s12 + $0x1468] sm:$0xff] }
 0x515   : > { %v4879_v38 = vmul.f32 %v3855_v30, %v3855_v30  ;;  %v1820_v30 = vadd.s32 5328, %v6360_v2  ;;  %vm2846_vm9 = vcmp.lt.s32.totalorder %v1819_v25, %v6363_v4 }
 0x516   : > { %v5890_v46 = vadd.f32 %v5889_v41, %v4866_v35  ;;  %v3856_v35 = vsel %vm2832_vm11, %v780_v26, 0.0  ;;  %v783_v41 = vld [vmem:[%s6355_s12 + $0x1470] sm:$0xff] }
 0x517   : > { %v4880_v43 = vmul.f32 %v3856_v35, %v3856_v35  ;;  %v1821_v35 = vadd.s32 5336, %v6360_v2  ;;  %vm2847_vm10 = vcmp.lt.s32.totalorder %v1820_v30, %v6363_v4 }
 0x518   : > { %v5891_v51 = vadd.f32 %v5890_v46, %v4867_v40  ;;  %v3857_v40 = vsel %vm2833_vm12, %v781_v31, 0.0  ;;  %v784_v46 = vld [vmem:[%s6355_s12 + $0x1478] sm:$0xff] }
 0x519   : > { %v4881_v48 = vmul.f32 %v3857_v40, %v3857_v40  ;;  %v1822_v40 = vadd.s32 5344, %v6360_v2  ;;  %vm2848_vm11 = vcmp.lt.s32.totalorder %v1821_v35, %v6363_v4 }
 0x51a   : > { %v5892_v56 = vadd.f32 %v5891_v51, %v4868_v45  ;;  %v3858_v45 = vsel %vm2834_vm13, %v782_v36, 0.0  ;;  %v785_v51 = vld [vmem:[%s6355_s12 + $0x1480] sm:$0xff] }
 0x51b   : > { %v4882_v53 = vmul.f32 %v3858_v45, %v3858_v45  ;;  %v1823_v45 = vadd.s32 5352, %v6360_v2  ;;  %vm2849_vm12 = vcmp.lt.s32.totalorder %v1822_v40, %v6363_v4 }
 0x51c   : > { %v5893_v61 = vadd.f32 %v5892_v56, %v4869_v50  ;;  %v3859_v50 = vsel %vm2835_vm14, %v783_v41, 0.0  ;;  %v786_v56 = vld [vmem:[%s6355_s12 + $0x1488] sm:$0xff] }
 0x51d   : > { %v4883_v58 = vmul.f32 %v3859_v50, %v3859_v50  ;;  %v1824_v50 = vadd.s32 5360, %v6360_v2  ;;  %vm2850_vm13 = vcmp.lt.s32.totalorder %v1823_v45, %v6363_v4 }
 0x51e   : > { %v5894_v3 = vadd.f32 %v5893_v61, %v4870_v55  ;;  %v3860_v55 = vsel %vm2836_vm15, %v784_v46, 0.0  ;;  %v787_v61 = vld [vmem:[%s6355_s12 + $0x1490] sm:$0xff] }
 0x51f   : > { %v4884_v63 = vmul.f32 %v3860_v55, %v3860_v55  ;;  %v1825_v55 = vadd.s32 5368, %v6360_v2  ;;  %vm2851_vm14 = vcmp.lt.s32.totalorder %v1824_v50, %v6363_v4 }
 0x520   : > { %v5895_v9 = vadd.f32 %v5894_v3, %v4871_v60  ;;  %v3861_v60 = vsel %vm2837_vm0, %v785_v51, 0.0  ;;  %v788_v3 = vld [vmem:[%s6355_s12 + $0x1498] sm:$0xff] }
 0x521   : > { %v4885_v6 = vmul.f32 %v3861_v60, %v3861_v60  ;;  %v1826_v60 = vadd.s32 5376, %v6360_v2  ;;  %vm2852_vm15 = vcmp.lt.s32.totalorder %v1825_v55, %v6363_v4 }
 0x522   : > { %v5896_v14 = vadd.f32 %v5895_v9, %v4872_v1  ;;  %v3862_v1 = vsel %vm2838_vm1, %v786_v56, 0.0  ;;  %v789_v9 = vld [vmem:[%s6355_s12 + $0x14a0] sm:$0xff] }
 0x523   : > { %v4886_v11 = vmul.f32 %v3862_v1, %v3862_v1  ;;  %v1827_v1 = vadd.s32 5384, %v6360_v2  ;;  %vm2853_vm0 = vcmp.lt.s32.totalorder %v1826_v60, %v6363_v4 }
 0x524   : > { %v5897_v19 = vadd.f32 %v5896_v14, %v4873_v8  ;;  %v3863_v8 = vsel %vm2839_vm2, %v787_v61, 0.0  ;;  %v790_v14 = vld [vmem:[%s6355_s12 + $0x14a8] sm:$0xff] }
 0x525   : > { %v4887_v16 = vmul.f32 %v3863_v8, %v3863_v8  ;;  %v1828_v8 = vadd.s32 5392, %v6360_v2  ;;  %vm2854_vm1 = vcmp.lt.s32.totalorder %v1827_v1, %v6363_v4 }
 0x526   : > { %v5898_v24 = vadd.f32 %v5897_v19, %v4874_v13  ;;  %v3864_v13 = vsel %vm2840_vm3, %v788_v3, 0.0  ;;  %v791_v19 = vld [vmem:[%s6355_s12 + $0x14b0] sm:$0xff] }
 0x527   : > { %v4888_v21 = vmul.f32 %v3864_v13, %v3864_v13  ;;  %v1829_v13 = vadd.s32 5400, %v6360_v2  ;;  %vm2855_vm2 = vcmp.lt.s32.totalorder %v1828_v8, %v6363_v4 }
 0x528   : > { %v5899_v29 = vadd.f32 %v5898_v24, %v4875_v18  ;;  %v3865_v18 = vsel %vm2841_vm4, %v789_v9, 0.0  ;;  %v792_v24 = vld [vmem:[%s6355_s12 + $0x14b8] sm:$0xff] }
 0x529   : > { %v4889_v26 = vmul.f32 %v3865_v18, %v3865_v18  ;;  %v1830_v18 = vadd.s32 5408, %v6360_v2  ;;  %vm2856_vm3 = vcmp.lt.s32.totalorder %v1829_v13, %v6363_v4 }
 0x52a   : > { %v5900_v34 = vadd.f32 %v5899_v29, %v4876_v23  ;;  %v3866_v23 = vsel %vm2842_vm5, %v790_v14, 0.0  ;;  %v793_v29 = vld [vmem:[%s6355_s12 + $0x14c0] sm:$0xff] }
 0x52b   : > { %v4890_v31 = vmul.f32 %v3866_v23, %v3866_v23  ;;  %v1831_v23 = vadd.s32 5416, %v6360_v2  ;;  %vm2857_vm4 = vcmp.lt.s32.totalorder %v1830_v18, %v6363_v4 }
 0x52c   : > { %v5901_v39 = vadd.f32 %v5900_v34, %v4877_v28  ;;  %v3867_v28 = vsel %vm2843_vm6, %v791_v19, 0.0  ;;  %v794_v34 = vld [vmem:[%s6355_s12 + $0x14c8] sm:$0xff] }
 0x52d   : > { %v4891_v36 = vmul.f32 %v3867_v28, %v3867_v28  ;;  %v1832_v28 = vadd.s32 5424, %v6360_v2  ;;  %vm2858_vm5 = vcmp.lt.s32.totalorder %v1831_v23, %v6363_v4 }
 0x52e   : > { %v5902_v44 = vadd.f32 %v5901_v39, %v4878_v33  ;;  %v3868_v33 = vsel %vm2844_vm7, %v792_v24, 0.0  ;;  %v795_v39 = vld [vmem:[%s6355_s12 + $0x14d0] sm:$0xff] }
 0x52f   : > { %v4892_v41 = vmul.f32 %v3868_v33, %v3868_v33  ;;  %v1833_v33 = vadd.s32 5432, %v6360_v2  ;;  %vm2859_vm6 = vcmp.lt.s32.totalorder %v1832_v28, %v6363_v4 }
 0x530   : > { %v5903_v49 = vadd.f32 %v5902_v44, %v4879_v38  ;;  %v3869_v38 = vsel %vm2845_vm8, %v793_v29, 0.0  ;;  %v796_v44 = vld [vmem:[%s6355_s12 + $0x14d8] sm:$0xff] }
 0x531   : > { %v4893_v46 = vmul.f32 %v3869_v38, %v3869_v38  ;;  %v1834_v38 = vadd.s32 5440, %v6360_v2  ;;  %vm2860_vm7 = vcmp.lt.s32.totalorder %v1833_v33, %v6363_v4 }
 0x532   : > { %v5904_v54 = vadd.f32 %v5903_v49, %v4880_v43  ;;  %v3870_v43 = vsel %vm2846_vm9, %v794_v34, 0.0  ;;  %v797_v49 = vld [vmem:[%s6355_s12 + $0x14e0] sm:$0xff] }
 0x533   : > { %v4894_v51 = vmul.f32 %v3870_v43, %v3870_v43  ;;  %v1835_v43 = vadd.s32 5448, %v6360_v2  ;;  %vm2861_vm8 = vcmp.lt.s32.totalorder %v1834_v38, %v6363_v4 }
 0x534   : > { %v5905_v59 = vadd.f32 %v5904_v54, %v4881_v48  ;;  %v3871_v48 = vsel %vm2847_vm10, %v795_v39, 0.0  ;;  %v798_v54 = vld [vmem:[%s6355_s12 + $0x14e8] sm:$0xff] }
 0x535   : > { %v4895_v56 = vmul.f32 %v3871_v48, %v3871_v48  ;;  %v1836_v48 = vadd.s32 5456, %v6360_v2  ;;  %vm2862_vm9 = vcmp.lt.s32.totalorder %v1835_v43, %v6363_v4 }
 0x536   : > { %v5906_v0 = vadd.f32 %v5905_v59, %v4882_v53  ;;  %v3872_v53 = vsel %vm2848_vm11, %v796_v44, 0.0  ;;  %v799_v59 = vld [vmem:[%s6355_s12 + $0x14f0] sm:$0xff] }
 0x537   : > { %v4896_v61 = vmul.f32 %v3872_v53, %v3872_v53  ;;  %v1837_v53 = vadd.s32 5464, %v6360_v2  ;;  %vm2863_vm10 = vcmp.lt.s32.totalorder %v1836_v48, %v6363_v4 }
 0x538   : > { %v5907_v7 = vadd.f32 %v5906_v0, %v4883_v58  ;;  %v3873_v58 = vsel %vm2849_vm12, %v797_v49, 0.0  ;;  %v800_v0 = vld [vmem:[%s6355_s12 + $0x14f8] sm:$0xff] }
 0x539   : > { %v4897_v3 = vmul.f32 %v3873_v58, %v3873_v58  ;;  %v1838_v58 = vadd.s32 5472, %v6360_v2  ;;  %vm2864_vm11 = vcmp.lt.s32.totalorder %v1837_v53, %v6363_v4 }
 0x53a   : > { %v5908_v12 = vadd.f32 %v5907_v7, %v4884_v63  ;;  %v3874_v63 = vsel %vm2850_vm13, %v798_v54, 0.0  ;;  %v801_v7 = vld [vmem:[%s6355_s12 + $0x1500] sm:$0xff] }
 0x53b   : > { %v4898_v9 = vmul.f32 %v3874_v63, %v3874_v63  ;;  %v1839_v63 = vadd.s32 5480, %v6360_v2  ;;  %vm2865_vm12 = vcmp.lt.s32.totalorder %v1838_v58, %v6363_v4 }
 0x53c   : > { %v5909_v17 = vadd.f32 %v5908_v12, %v4885_v6  ;;  %v3875_v6 = vsel %vm2851_vm14, %v799_v59, 0.0  ;;  %v802_v12 = vld [vmem:[%s6355_s12 + $0x1508] sm:$0xff] }
 0x53d   : > { %v4899_v14 = vmul.f32 %v3875_v6, %v3875_v6  ;;  %v1840_v6 = vadd.s32 5488, %v6360_v2  ;;  %vm2866_vm13 = vcmp.lt.s32.totalorder %v1839_v63, %v6363_v4 }
 0x53e   : > { %v5910_v22 = vadd.f32 %v5909_v17, %v4886_v11  ;;  %v3876_v11 = vsel %vm2852_vm15, %v800_v0, 0.0  ;;  %v803_v17 = vld [vmem:[%s6355_s12 + $0x1510] sm:$0xff] }
 0x53f   : > { %v4900_v19 = vmul.f32 %v3876_v11, %v3876_v11  ;;  %v1841_v11 = vadd.s32 5496, %v6360_v2  ;;  %vm2867_vm14 = vcmp.lt.s32.totalorder %v1840_v6, %v6363_v4 }
 0x540   : > { %v5911_v27 = vadd.f32 %v5910_v22, %v4887_v16  ;;  %v3877_v16 = vsel %vm2853_vm0, %v801_v7, 0.0  ;;  %v804_v22 = vld [vmem:[%s6355_s12 + $0x1518] sm:$0xff] }
 0x541   : > { %v4901_v24 = vmul.f32 %v3877_v16, %v3877_v16  ;;  %v1842_v16 = vadd.s32 5504, %v6360_v2  ;;  %vm2868_vm15 = vcmp.lt.s32.totalorder %v1841_v11, %v6363_v4 }
 0x542   : > { %v5912_v32 = vadd.f32 %v5911_v27, %v4888_v21  ;;  %v3878_v21 = vsel %vm2854_vm1, %v802_v12, 0.0  ;;  %v805_v27 = vld [vmem:[%s6355_s12 + $0x1520] sm:$0xff] }
 0x543   : > { %v4902_v29 = vmul.f32 %v3878_v21, %v3878_v21  ;;  %v1843_v21 = vadd.s32 5512, %v6360_v2  ;;  %vm2869_vm0 = vcmp.lt.s32.totalorder %v1842_v16, %v6363_v4 }
 0x544   : > { %v5913_v37 = vadd.f32 %v5912_v32, %v4889_v26  ;;  %v3879_v26 = vsel %vm2855_vm2, %v803_v17, 0.0  ;;  %v806_v32 = vld [vmem:[%s6355_s12 + $0x1528] sm:$0xff] }
 0x545   : > { %v4903_v34 = vmul.f32 %v3879_v26, %v3879_v26  ;;  %v1844_v26 = vadd.s32 5520, %v6360_v2  ;;  %vm2870_vm1 = vcmp.lt.s32.totalorder %v1843_v21, %v6363_v4 }
 0x546   : > { %v5914_v42 = vadd.f32 %v5913_v37, %v4890_v31  ;;  %v3880_v31 = vsel %vm2856_vm3, %v804_v22, 0.0  ;;  %v807_v37 = vld [vmem:[%s6355_s12 + $0x1530] sm:$0xff] }
 0x547   : > { %v4904_v39 = vmul.f32 %v3880_v31, %v3880_v31  ;;  %v1845_v31 = vadd.s32 5528, %v6360_v2  ;;  %vm2871_vm2 = vcmp.lt.s32.totalorder %v1844_v26, %v6363_v4 }
 0x548   : > { %v5915_v47 = vadd.f32 %v5914_v42, %v4891_v36  ;;  %v3881_v36 = vsel %vm2857_vm4, %v805_v27, 0.0  ;;  %v808_v42 = vld [vmem:[%s6355_s12 + $0x1538] sm:$0xff] }
 0x549   : > { %v4905_v44 = vmul.f32 %v3881_v36, %v3881_v36  ;;  %v1846_v36 = vadd.s32 5536, %v6360_v2  ;;  %vm2872_vm3 = vcmp.lt.s32.totalorder %v1845_v31, %v6363_v4 }
 0x54a   : > { %v5916_v52 = vadd.f32 %v5915_v47, %v4892_v41  ;;  %v3882_v41 = vsel %vm2858_vm5, %v806_v32, 0.0  ;;  %v809_v47 = vld [vmem:[%s6355_s12 + $0x1540] sm:$0xff] }
 0x54b   : > { %v4906_v49 = vmul.f32 %v3882_v41, %v3882_v41  ;;  %v1847_v41 = vadd.s32 5544, %v6360_v2  ;;  %vm2873_vm4 = vcmp.lt.s32.totalorder %v1846_v36, %v6363_v4 }
 0x54c   : > { %v5917_v57 = vadd.f32 %v5916_v52, %v4893_v46  ;;  %v3883_v46 = vsel %vm2859_vm6, %v807_v37, 0.0  ;;  %v810_v52 = vld [vmem:[%s6355_s12 + $0x1548] sm:$0xff] }
 0x54d   : > { %v4907_v54 = vmul.f32 %v3883_v46, %v3883_v46  ;;  %v1848_v46 = vadd.s32 5552, %v6360_v2  ;;  %vm2874_vm5 = vcmp.lt.s32.totalorder %v1847_v41, %v6363_v4 }
 0x54e   : > { %v5918_v62 = vadd.f32 %v5917_v57, %v4894_v51  ;;  %v3884_v51 = vsel %vm2860_vm7, %v808_v42, 0.0  ;;  %v811_v57 = vld [vmem:[%s6355_s12 + $0x1550] sm:$0xff] }
 0x54f   : > { %v4908_v59 = vmul.f32 %v3884_v51, %v3884_v51  ;;  %v1849_v51 = vadd.s32 5560, %v6360_v2  ;;  %vm2875_vm6 = vcmp.lt.s32.totalorder %v1848_v46, %v6363_v4 }
 0x550   : > { %v5919_v5 = vadd.f32 %v5918_v62, %v4895_v56  ;;  %v3885_v56 = vsel %vm2861_vm8, %v809_v47, 0.0  ;;  %v812_v62 = vld [vmem:[%s6355_s12 + $0x1558] sm:$0xff] }
 0x551   : > { %v4909_v0 = vmul.f32 %v3885_v56, %v3885_v56  ;;  %v1850_v56 = vadd.s32 5568, %v6360_v2  ;;  %vm2876_vm7 = vcmp.lt.s32.totalorder %v1849_v51, %v6363_v4 }
 0x552   : > { %v5920_v10 = vadd.f32 %v5919_v5, %v4896_v61  ;;  %v3886_v61 = vsel %vm2862_vm9, %v810_v52, 0.0  ;;  %v813_v5 = vld [vmem:[%s6355_s12 + $0x1560] sm:$0xff] }
 0x553   : > { %v4910_v7 = vmul.f32 %v3886_v61, %v3886_v61  ;;  %v1851_v61 = vadd.s32 5576, %v6360_v2  ;;  %vm2877_vm8 = vcmp.lt.s32.totalorder %v1850_v56, %v6363_v4 }
 0x554   : > { %v5921_v15 = vadd.f32 %v5920_v10, %v4897_v3  ;;  %v3887_v3 = vsel %vm2863_vm10, %v811_v57, 0.0  ;;  %v814_v10 = vld [vmem:[%s6355_s12 + $0x1568] sm:$0xff] }
 0x555   : > { %v4911_v12 = vmul.f32 %v3887_v3, %v3887_v3  ;;  %v1852_v3 = vadd.s32 5584, %v6360_v2  ;;  %vm2878_vm9 = vcmp.lt.s32.totalorder %v1851_v61, %v6363_v4 }
 0x556   : > { %v5922_v20 = vadd.f32 %v5921_v15, %v4898_v9  ;;  %v3888_v9 = vsel %vm2864_vm11, %v812_v62, 0.0  ;;  %v815_v15 = vld [vmem:[%s6355_s12 + $0x1570] sm:$0xff] }
 0x557   : > { %v4912_v17 = vmul.f32 %v3888_v9, %v3888_v9  ;;  %v1853_v9 = vadd.s32 5592, %v6360_v2  ;;  %vm2879_vm10 = vcmp.lt.s32.totalorder %v1852_v3, %v6363_v4 }
 0x558   : > { %v5923_v25 = vadd.f32 %v5922_v20, %v4899_v14  ;;  %v3889_v14 = vsel %vm2865_vm12, %v813_v5, 0.0  ;;  %v816_v20 = vld [vmem:[%s6355_s12 + $0x1578] sm:$0xff] }
 0x559   : > { %v4913_v22 = vmul.f32 %v3889_v14, %v3889_v14  ;;  %v1854_v14 = vadd.s32 5600, %v6360_v2  ;;  %vm2880_vm11 = vcmp.lt.s32.totalorder %v1853_v9, %v6363_v4 }
 0x55a   : > { %v5924_v30 = vadd.f32 %v5923_v25, %v4900_v19  ;;  %v3890_v19 = vsel %vm2866_vm13, %v814_v10, 0.0  ;;  %v817_v25 = vld [vmem:[%s6355_s12 + $0x1580] sm:$0xff] }
 0x55b   : > { %v4914_v27 = vmul.f32 %v3890_v19, %v3890_v19  ;;  %v1855_v19 = vadd.s32 5608, %v6360_v2  ;;  %vm2881_vm12 = vcmp.lt.s32.totalorder %v1854_v14, %v6363_v4 }
 0x55c   : > { %v5925_v35 = vadd.f32 %v5924_v30, %v4901_v24  ;;  %v3891_v24 = vsel %vm2867_vm14, %v815_v15, 0.0  ;;  %v818_v30 = vld [vmem:[%s6355_s12 + $0x1588] sm:$0xff] }
 0x55d   : > { %v4915_v32 = vmul.f32 %v3891_v24, %v3891_v24  ;;  %v1856_v24 = vadd.s32 5616, %v6360_v2  ;;  %vm2882_vm13 = vcmp.lt.s32.totalorder %v1855_v19, %v6363_v4 }
 0x55e   : > { %v5926_v40 = vadd.f32 %v5925_v35, %v4902_v29  ;;  %v3892_v29 = vsel %vm2868_vm15, %v816_v20, 0.0  ;;  %v819_v35 = vld [vmem:[%s6355_s12 + $0x1590] sm:$0xff] }
 0x55f   : > { %v4916_v37 = vmul.f32 %v3892_v29, %v3892_v29  ;;  %v1857_v29 = vadd.s32 5624, %v6360_v2  ;;  %vm2883_vm14 = vcmp.lt.s32.totalorder %v1856_v24, %v6363_v4 }
 0x560   : > { %v5927_v45 = vadd.f32 %v5926_v40, %v4903_v34  ;;  %v3893_v34 = vsel %vm2869_vm0, %v817_v25, 0.0  ;;  %v820_v40 = vld [vmem:[%s6355_s12 + $0x1598] sm:$0xff] }
 0x561   : > { %v4917_v42 = vmul.f32 %v3893_v34, %v3893_v34  ;;  %v1858_v34 = vadd.s32 5632, %v6360_v2  ;;  %vm2884_vm15 = vcmp.lt.s32.totalorder %v1857_v29, %v6363_v4 }
 0x562   : > { %v5928_v50 = vadd.f32 %v5927_v45, %v4904_v39  ;;  %v3894_v39 = vsel %vm2870_vm1, %v818_v30, 0.0  ;;  %v821_v45 = vld [vmem:[%s6355_s12 + $0x15a0] sm:$0xff] }
 0x563   : > { %v4918_v47 = vmul.f32 %v3894_v39, %v3894_v39  ;;  %v1859_v39 = vadd.s32 5640, %v6360_v2  ;;  %vm2885_vm0 = vcmp.lt.s32.totalorder %v1858_v34, %v6363_v4 }
 0x564   : > { %v5929_v55 = vadd.f32 %v5928_v50, %v4905_v44  ;;  %v3895_v44 = vsel %vm2871_vm2, %v819_v35, 0.0  ;;  %v822_v50 = vld [vmem:[%s6355_s12 + $0x15a8] sm:$0xff] }
 0x565   : > { %v4919_v52 = vmul.f32 %v3895_v44, %v3895_v44  ;;  %v1860_v44 = vadd.s32 5648, %v6360_v2  ;;  %vm2886_vm1 = vcmp.lt.s32.totalorder %v1859_v39, %v6363_v4 }
 0x566   : > { %v5930_v60 = vadd.f32 %v5929_v55, %v4906_v49  ;;  %v3896_v49 = vsel %vm2872_vm3, %v820_v40, 0.0  ;;  %v823_v55 = vld [vmem:[%s6355_s12 + $0x15b0] sm:$0xff] }
 0x567   : > { %v4920_v57 = vmul.f32 %v3896_v49, %v3896_v49  ;;  %v1861_v49 = vadd.s32 5656, %v6360_v2  ;;  %vm2887_vm2 = vcmp.lt.s32.totalorder %v1860_v44, %v6363_v4 }
 0x568   : > { %v5931_v1 = vadd.f32 %v5930_v60, %v4907_v54  ;;  %v3897_v54 = vsel %vm2873_vm4, %v821_v45, 0.0  ;;  %v824_v60 = vld [vmem:[%s6355_s12 + $0x15b8] sm:$0xff] }
 0x569   : > { %v4921_v62 = vmul.f32 %v3897_v54, %v3897_v54  ;;  %v1862_v54 = vadd.s32 5664, %v6360_v2  ;;  %vm2888_vm3 = vcmp.lt.s32.totalorder %v1861_v49, %v6363_v4 }
 0x56a   : > { %v5932_v8 = vadd.f32 %v5931_v1, %v4908_v59  ;;  %v3898_v59 = vsel %vm2874_vm5, %v822_v50, 0.0  ;;  %v825_v1 = vld [vmem:[%s6355_s12 + $0x15c0] sm:$0xff] }
 0x56b   : > { %v4922_v5 = vmul.f32 %v3898_v59, %v3898_v59  ;;  %v1863_v59 = vadd.s32 5672, %v6360_v2  ;;  %vm2889_vm4 = vcmp.lt.s32.totalorder %v1862_v54, %v6363_v4 }
 0x56c   : > { %v5933_v13 = vadd.f32 %v5932_v8, %v4909_v0  ;;  %v3899_v0 = vsel %vm2875_vm6, %v823_v55, 0.0  ;;  %v826_v8 = vld [vmem:[%s6355_s12 + $0x15c8] sm:$0xff] }
 0x56d   : > { %v4923_v10 = vmul.f32 %v3899_v0, %v3899_v0  ;;  %v1864_v0 = vadd.s32 5680, %v6360_v2  ;;  %vm2890_vm5 = vcmp.lt.s32.totalorder %v1863_v59, %v6363_v4 }
 0x56e   : > { %v5934_v18 = vadd.f32 %v5933_v13, %v4910_v7  ;;  %v3900_v7 = vsel %vm2876_vm7, %v824_v60, 0.0  ;;  %v827_v13 = vld [vmem:[%s6355_s12 + $0x15d0] sm:$0xff] }
 0x56f   : > { %v4924_v15 = vmul.f32 %v3900_v7, %v3900_v7  ;;  %v1865_v7 = vadd.s32 5688, %v6360_v2  ;;  %vm2891_vm6 = vcmp.lt.s32.totalorder %v1864_v0, %v6363_v4 }
 0x570   : > { %v5935_v23 = vadd.f32 %v5934_v18, %v4911_v12  ;;  %v3901_v12 = vsel %vm2877_vm8, %v825_v1, 0.0  ;;  %v828_v18 = vld [vmem:[%s6355_s12 + $0x15d8] sm:$0xff] }
 0x571   : > { %v4925_v20 = vmul.f32 %v3901_v12, %v3901_v12  ;;  %v1866_v12 = vadd.s32 5696, %v6360_v2  ;;  %vm2892_vm7 = vcmp.lt.s32.totalorder %v1865_v7, %v6363_v4 }
 0x572   : > { %v5936_v28 = vadd.f32 %v5935_v23, %v4912_v17  ;;  %v3902_v17 = vsel %vm2878_vm9, %v826_v8, 0.0  ;;  %v829_v23 = vld [vmem:[%s6355_s12 + $0x15e0] sm:$0xff] }
 0x573   : > { %v4926_v25 = vmul.f32 %v3902_v17, %v3902_v17  ;;  %v1867_v17 = vadd.s32 5704, %v6360_v2  ;;  %vm2893_vm8 = vcmp.lt.s32.totalorder %v1866_v12, %v6363_v4 }
 0x574   : > { %v5937_v33 = vadd.f32 %v5936_v28, %v4913_v22  ;;  %v3903_v22 = vsel %vm2879_vm10, %v827_v13, 0.0  ;;  %v830_v28 = vld [vmem:[%s6355_s12 + $0x15e8] sm:$0xff] }
 0x575   : > { %v4927_v30 = vmul.f32 %v3903_v22, %v3903_v22  ;;  %v1868_v22 = vadd.s32 5712, %v6360_v2  ;;  %vm2894_vm9 = vcmp.lt.s32.totalorder %v1867_v17, %v6363_v4 }
 0x576   : > { %v5938_v38 = vadd.f32 %v5937_v33, %v4914_v27  ;;  %v3904_v27 = vsel %vm2880_vm11, %v828_v18, 0.0  ;;  %v831_v33 = vld [vmem:[%s6355_s12 + $0x15f0] sm:$0xff] }
 0x577   : > { %v4928_v35 = vmul.f32 %v3904_v27, %v3904_v27  ;;  %v1869_v27 = vadd.s32 5720, %v6360_v2  ;;  %vm2895_vm10 = vcmp.lt.s32.totalorder %v1868_v22, %v6363_v4 }
 0x578   : > { %v5939_v43 = vadd.f32 %v5938_v38, %v4915_v32  ;;  %v3905_v32 = vsel %vm2881_vm12, %v829_v23, 0.0  ;;  %v832_v38 = vld [vmem:[%s6355_s12 + $0x15f8] sm:$0xff] }
 0x579   : > { %v4929_v40 = vmul.f32 %v3905_v32, %v3905_v32  ;;  %v1870_v32 = vadd.s32 5728, %v6360_v2  ;;  %vm2896_vm11 = vcmp.lt.s32.totalorder %v1869_v27, %v6363_v4 }
 0x57a   : > { %v5940_v48 = vadd.f32 %v5939_v43, %v4916_v37  ;;  %v3906_v37 = vsel %vm2882_vm13, %v830_v28, 0.0  ;;  %v833_v43 = vld [vmem:[%s6355_s12 + $0x1600] sm:$0xff] }
 0x57b   : > { %v4930_v45 = vmul.f32 %v3906_v37, %v3906_v37  ;;  %v1871_v37 = vadd.s32 5736, %v6360_v2  ;;  %vm2897_vm12 = vcmp.lt.s32.totalorder %v1870_v32, %v6363_v4 }
 0x57c   : > { %v5941_v53 = vadd.f32 %v5940_v48, %v4917_v42  ;;  %v3907_v42 = vsel %vm2883_vm14, %v831_v33, 0.0  ;;  %v834_v48 = vld [vmem:[%s6355_s12 + $0x1608] sm:$0xff] }
 0x57d   : > { %v4931_v50 = vmul.f32 %v3907_v42, %v3907_v42  ;;  %v1872_v42 = vadd.s32 5744, %v6360_v2  ;;  %vm2898_vm13 = vcmp.lt.s32.totalorder %v1871_v37, %v6363_v4 }
 0x57e   : > { %v5942_v58 = vadd.f32 %v5941_v53, %v4918_v47  ;;  %v3908_v47 = vsel %vm2884_vm15, %v832_v38, 0.0  ;;  %v835_v53 = vld [vmem:[%s6355_s12 + $0x1610] sm:$0xff] }
 0x57f   : > { %v4932_v55 = vmul.f32 %v3908_v47, %v3908_v47  ;;  %v1873_v47 = vadd.s32 5752, %v6360_v2  ;;  %vm2899_vm14 = vcmp.lt.s32.totalorder %v1872_v42, %v6363_v4 }
 0x580   : > { %v5943_v63 = vadd.f32 %v5942_v58, %v4919_v52  ;;  %v3909_v52 = vsel %vm2885_vm0, %v833_v43, 0.0  ;;  %v836_v58 = vld [vmem:[%s6355_s12 + $0x1618] sm:$0xff] }
 0x581   : > { %v4933_v60 = vmul.f32 %v3909_v52, %v3909_v52  ;;  %v1874_v52 = vadd.s32 5760, %v6360_v2  ;;  %vm2900_vm15 = vcmp.lt.s32.totalorder %v1873_v47, %v6363_v4 }
 0x582   : > { %v5944_v6 = vadd.f32 %v5943_v63, %v4920_v57  ;;  %v3910_v57 = vsel %vm2886_vm1, %v834_v48, 0.0  ;;  %v837_v63 = vld [vmem:[%s6355_s12 + $0x1620] sm:$0xff] }
 0x583   : > { %v4934_v1 = vmul.f32 %v3910_v57, %v3910_v57  ;;  %v1875_v57 = vadd.s32 5768, %v6360_v2  ;;  %vm2901_vm0 = vcmp.lt.s32.totalorder %v1874_v52, %v6363_v4 }
 0x584   : > { %v5945_v11 = vadd.f32 %v5944_v6, %v4921_v62  ;;  %v3911_v62 = vsel %vm2887_vm2, %v835_v53, 0.0  ;;  %v838_v6 = vld [vmem:[%s6355_s12 + $0x1628] sm:$0xff] }
 0x585   : > { %v4935_v8 = vmul.f32 %v3911_v62, %v3911_v62  ;;  %v1876_v62 = vadd.s32 5776, %v6360_v2  ;;  %vm2902_vm1 = vcmp.lt.s32.totalorder %v1875_v57, %v6363_v4 }
 0x586   : > { %v5946_v16 = vadd.f32 %v5945_v11, %v4922_v5  ;;  %v3912_v5 = vsel %vm2888_vm3, %v836_v58, 0.0  ;;  %v839_v11 = vld [vmem:[%s6355_s12 + $0x1630] sm:$0xff] }
 0x587   : > { %v4936_v13 = vmul.f32 %v3912_v5, %v3912_v5  ;;  %v1877_v5 = vadd.s32 5784, %v6360_v2  ;;  %vm2903_vm2 = vcmp.lt.s32.totalorder %v1876_v62, %v6363_v4 }
 0x588   : > { %v5947_v21 = vadd.f32 %v5946_v16, %v4923_v10  ;;  %v3913_v10 = vsel %vm2889_vm4, %v837_v63, 0.0  ;;  %v840_v16 = vld [vmem:[%s6355_s12 + $0x1638] sm:$0xff] }
 0x589   : > { %v4937_v18 = vmul.f32 %v3913_v10, %v3913_v10  ;;  %v1878_v10 = vadd.s32 5792, %v6360_v2  ;;  %vm2904_vm3 = vcmp.lt.s32.totalorder %v1877_v5, %v6363_v4 }
 0x58a   : > { %v5948_v26 = vadd.f32 %v5947_v21, %v4924_v15  ;;  %v3914_v15 = vsel %vm2890_vm5, %v838_v6, 0.0  ;;  %v841_v21 = vld [vmem:[%s6355_s12 + $0x1640] sm:$0xff] }
 0x58b   : > { %v4938_v23 = vmul.f32 %v3914_v15, %v3914_v15  ;;  %v1879_v15 = vadd.s32 5800, %v6360_v2  ;;  %vm2905_vm4 = vcmp.lt.s32.totalorder %v1878_v10, %v6363_v4 }
 0x58c   : > { %v5949_v31 = vadd.f32 %v5948_v26, %v4925_v20  ;;  %v3915_v20 = vsel %vm2891_vm6, %v839_v11, 0.0  ;;  %v842_v26 = vld [vmem:[%s6355_s12 + $0x1648] sm:$0xff] }
 0x58d   : > { %v4939_v28 = vmul.f32 %v3915_v20, %v3915_v20  ;;  %v1880_v20 = vadd.s32 5808, %v6360_v2  ;;  %vm2906_vm5 = vcmp.lt.s32.totalorder %v1879_v15, %v6363_v4 }
 0x58e   : > { %v5950_v36 = vadd.f32 %v5949_v31, %v4926_v25  ;;  %v3916_v25 = vsel %vm2892_vm7, %v840_v16, 0.0  ;;  %v843_v31 = vld [vmem:[%s6355_s12 + $0x1650] sm:$0xff] }
 0x58f   : > { %v4940_v33 = vmul.f32 %v3916_v25, %v3916_v25  ;;  %v1881_v25 = vadd.s32 5816, %v6360_v2  ;;  %vm2907_vm6 = vcmp.lt.s32.totalorder %v1880_v20, %v6363_v4 }
 0x590   : > { %v5951_v41 = vadd.f32 %v5950_v36, %v4927_v30  ;;  %v3917_v30 = vsel %vm2893_vm8, %v841_v21, 0.0  ;;  %v844_v36 = vld [vmem:[%s6355_s12 + $0x1658] sm:$0xff] }
 0x591   : > { %v4941_v38 = vmul.f32 %v3917_v30, %v3917_v30  ;;  %v1882_v30 = vadd.s32 5824, %v6360_v2  ;;  %vm2908_vm7 = vcmp.lt.s32.totalorder %v1881_v25, %v6363_v4 }
 0x592   : > { %v5952_v46 = vadd.f32 %v5951_v41, %v4928_v35  ;;  %v3918_v35 = vsel %vm2894_vm9, %v842_v26, 0.0  ;;  %v845_v41 = vld [vmem:[%s6355_s12 + $0x1660] sm:$0xff] }
 0x593   : > { %v4942_v43 = vmul.f32 %v3918_v35, %v3918_v35  ;;  %v1883_v35 = vadd.s32 5832, %v6360_v2  ;;  %vm2909_vm8 = vcmp.lt.s32.totalorder %v1882_v30, %v6363_v4 }
 0x594   : > { %v5953_v51 = vadd.f32 %v5952_v46, %v4929_v40  ;;  %v3919_v40 = vsel %vm2895_vm10, %v843_v31, 0.0  ;;  %v846_v46 = vld [vmem:[%s6355_s12 + $0x1668] sm:$0xff] }
 0x595   : > { %v4943_v48 = vmul.f32 %v3919_v40, %v3919_v40  ;;  %v1884_v40 = vadd.s32 5840, %v6360_v2  ;;  %vm2910_vm9 = vcmp.lt.s32.totalorder %v1883_v35, %v6363_v4 }
 0x596   : > { %v5954_v56 = vadd.f32 %v5953_v51, %v4930_v45  ;;  %v3920_v45 = vsel %vm2896_vm11, %v844_v36, 0.0  ;;  %v847_v51 = vld [vmem:[%s6355_s12 + $0x1670] sm:$0xff] }
 0x597   : > { %v4944_v53 = vmul.f32 %v3920_v45, %v3920_v45  ;;  %v1885_v45 = vadd.s32 5848, %v6360_v2  ;;  %vm2911_vm10 = vcmp.lt.s32.totalorder %v1884_v40, %v6363_v4 }
 0x598   : > { %v5955_v61 = vadd.f32 %v5954_v56, %v4931_v50  ;;  %v3921_v50 = vsel %vm2897_vm12, %v845_v41, 0.0  ;;  %v848_v56 = vld [vmem:[%s6355_s12 + $0x1678] sm:$0xff] }
 0x599   : > { %v4945_v58 = vmul.f32 %v3921_v50, %v3921_v50  ;;  %v1886_v50 = vadd.s32 5856, %v6360_v2  ;;  %vm2912_vm11 = vcmp.lt.s32.totalorder %v1885_v45, %v6363_v4 }
 0x59a   : > { %v5956_v3 = vadd.f32 %v5955_v61, %v4932_v55  ;;  %v3922_v55 = vsel %vm2898_vm13, %v846_v46, 0.0  ;;  %v849_v61 = vld [vmem:[%s6355_s12 + $0x1680] sm:$0xff] }
 0x59b   : > { %v4946_v63 = vmul.f32 %v3922_v55, %v3922_v55  ;;  %v1887_v55 = vadd.s32 5864, %v6360_v2  ;;  %vm2913_vm12 = vcmp.lt.s32.totalorder %v1886_v50, %v6363_v4 }
 0x59c   : > { %v5957_v9 = vadd.f32 %v5956_v3, %v4933_v60  ;;  %v3923_v60 = vsel %vm2899_vm14, %v847_v51, 0.0  ;;  %v850_v3 = vld [vmem:[%s6355_s12 + $0x1688] sm:$0xff] }
 0x59d   : > { %v4947_v6 = vmul.f32 %v3923_v60, %v3923_v60  ;;  %v1888_v60 = vadd.s32 5872, %v6360_v2  ;;  %vm2914_vm13 = vcmp.lt.s32.totalorder %v1887_v55, %v6363_v4 }
 0x59e   : > { %v5958_v14 = vadd.f32 %v5957_v9, %v4934_v1  ;;  %v3924_v1 = vsel %vm2900_vm15, %v848_v56, 0.0  ;;  %v851_v9 = vld [vmem:[%s6355_s12 + $0x1690] sm:$0xff] }
 0x59f   : > { %v4948_v11 = vmul.f32 %v3924_v1, %v3924_v1  ;;  %v1889_v1 = vadd.s32 5880, %v6360_v2  ;;  %vm2915_vm14 = vcmp.lt.s32.totalorder %v1888_v60, %v6363_v4 }
 0x5a0   : > { %v5959_v19 = vadd.f32 %v5958_v14, %v4935_v8  ;;  %v3925_v8 = vsel %vm2901_vm0, %v849_v61, 0.0  ;;  %v852_v14 = vld [vmem:[%s6355_s12 + $0x1698] sm:$0xff] }
 0x5a1   : > { %v4949_v16 = vmul.f32 %v3925_v8, %v3925_v8  ;;  %v1890_v8 = vadd.s32 5888, %v6360_v2  ;;  %vm2916_vm15 = vcmp.lt.s32.totalorder %v1889_v1, %v6363_v4 }
 0x5a2   : > { %v5960_v24 = vadd.f32 %v5959_v19, %v4936_v13  ;;  %v3926_v13 = vsel %vm2902_vm1, %v850_v3, 0.0  ;;  %v853_v19 = vld [vmem:[%s6355_s12 + $0x16a0] sm:$0xff] }
 0x5a3   : > { %v4950_v21 = vmul.f32 %v3926_v13, %v3926_v13  ;;  %v1891_v13 = vadd.s32 5896, %v6360_v2  ;;  %vm2917_vm0 = vcmp.lt.s32.totalorder %v1890_v8, %v6363_v4 }
 0x5a4   : > { %v5961_v29 = vadd.f32 %v5960_v24, %v4937_v18  ;;  %v3927_v18 = vsel %vm2903_vm2, %v851_v9, 0.0  ;;  %v854_v24 = vld [vmem:[%s6355_s12 + $0x16a8] sm:$0xff] }
 0x5a5   : > { %v4951_v26 = vmul.f32 %v3927_v18, %v3927_v18  ;;  %v1892_v18 = vadd.s32 5904, %v6360_v2  ;;  %vm2918_vm1 = vcmp.lt.s32.totalorder %v1891_v13, %v6363_v4 }
 0x5a6   : > { %v5962_v34 = vadd.f32 %v5961_v29, %v4938_v23  ;;  %v3928_v23 = vsel %vm2904_vm3, %v852_v14, 0.0  ;;  %v855_v29 = vld [vmem:[%s6355_s12 + $0x16b0] sm:$0xff] }
 0x5a7   : > { %v4952_v31 = vmul.f32 %v3928_v23, %v3928_v23  ;;  %v1893_v23 = vadd.s32 5912, %v6360_v2  ;;  %vm2919_vm2 = vcmp.lt.s32.totalorder %v1892_v18, %v6363_v4 }
 0x5a8   : > { %v5963_v39 = vadd.f32 %v5962_v34, %v4939_v28  ;;  %v3929_v28 = vsel %vm2905_vm4, %v853_v19, 0.0  ;;  %v856_v34 = vld [vmem:[%s6355_s12 + $0x16b8] sm:$0xff] }
 0x5a9   : > { %v4953_v36 = vmul.f32 %v3929_v28, %v3929_v28  ;;  %v1894_v28 = vadd.s32 5920, %v6360_v2  ;;  %vm2920_vm3 = vcmp.lt.s32.totalorder %v1893_v23, %v6363_v4 }
 0x5aa   : > { %v5964_v44 = vadd.f32 %v5963_v39, %v4940_v33  ;;  %v3930_v33 = vsel %vm2906_vm5, %v854_v24, 0.0  ;;  %v857_v39 = vld [vmem:[%s6355_s12 + $0x16c0] sm:$0xff] }
 0x5ab   : > { %v4954_v41 = vmul.f32 %v3930_v33, %v3930_v33  ;;  %v1895_v33 = vadd.s32 5928, %v6360_v2  ;;  %vm2921_vm4 = vcmp.lt.s32.totalorder %v1894_v28, %v6363_v4 }
 0x5ac   : > { %v5965_v49 = vadd.f32 %v5964_v44, %v4941_v38  ;;  %v3931_v38 = vsel %vm2907_vm6, %v855_v29, 0.0  ;;  %v858_v44 = vld [vmem:[%s6355_s12 + $0x16c8] sm:$0xff] }
 0x5ad   : > { %v4955_v46 = vmul.f32 %v3931_v38, %v3931_v38  ;;  %v1896_v38 = vadd.s32 5936, %v6360_v2  ;;  %vm2922_vm5 = vcmp.lt.s32.totalorder %v1895_v33, %v6363_v4 }
 0x5ae   : > { %v5966_v54 = vadd.f32 %v5965_v49, %v4942_v43  ;;  %v3932_v43 = vsel %vm2908_vm7, %v856_v34, 0.0  ;;  %v859_v49 = vld [vmem:[%s6355_s12 + $0x16d0] sm:$0xff] }
 0x5af   : > { %v4956_v51 = vmul.f32 %v3932_v43, %v3932_v43  ;;  %v1897_v43 = vadd.s32 5944, %v6360_v2  ;;  %vm2923_vm6 = vcmp.lt.s32.totalorder %v1896_v38, %v6363_v4 }
 0x5b0   : > { %v5967_v59 = vadd.f32 %v5966_v54, %v4943_v48  ;;  %v3933_v48 = vsel %vm2909_vm8, %v857_v39, 0.0  ;;  %v860_v54 = vld [vmem:[%s6355_s12 + $0x16d8] sm:$0xff] }
 0x5b1   : > { %v4957_v56 = vmul.f32 %v3933_v48, %v3933_v48  ;;  %v1898_v48 = vadd.s32 5952, %v6360_v2  ;;  %vm2924_vm7 = vcmp.lt.s32.totalorder %v1897_v43, %v6363_v4 }
 0x5b2   : > { %v5968_v0 = vadd.f32 %v5967_v59, %v4944_v53  ;;  %v3934_v53 = vsel %vm2910_vm9, %v858_v44, 0.0  ;;  %v861_v59 = vld [vmem:[%s6355_s12 + $0x16e0] sm:$0xff] }
 0x5b3   : > { %v4958_v61 = vmul.f32 %v3934_v53, %v3934_v53  ;;  %v1899_v53 = vadd.s32 5960, %v6360_v2  ;;  %vm2925_vm8 = vcmp.lt.s32.totalorder %v1898_v48, %v6363_v4 }
 0x5b4   : > { %v5969_v7 = vadd.f32 %v5968_v0, %v4945_v58  ;;  %v3935_v58 = vsel %vm2911_vm10, %v859_v49, 0.0  ;;  %v862_v0 = vld [vmem:[%s6355_s12 + $0x16e8] sm:$0xff] }
 0x5b5   : > { %v4959_v3 = vmul.f32 %v3935_v58, %v3935_v58  ;;  %v1900_v58 = vadd.s32 5968, %v6360_v2  ;;  %vm2926_vm9 = vcmp.lt.s32.totalorder %v1899_v53, %v6363_v4 }
 0x5b6   : > { %v5970_v12 = vadd.f32 %v5969_v7, %v4946_v63  ;;  %v3936_v63 = vsel %vm2912_vm11, %v860_v54, 0.0  ;;  %v863_v7 = vld [vmem:[%s6355_s12 + $0x16f0] sm:$0xff] }
 0x5b7   : > { %v4960_v9 = vmul.f32 %v3936_v63, %v3936_v63  ;;  %v1901_v63 = vadd.s32 5976, %v6360_v2  ;;  %vm2927_vm10 = vcmp.lt.s32.totalorder %v1900_v58, %v6363_v4 }
 0x5b8   : > { %v5971_v17 = vadd.f32 %v5970_v12, %v4947_v6  ;;  %v3937_v6 = vsel %vm2913_vm12, %v861_v59, 0.0  ;;  %v864_v12 = vld [vmem:[%s6355_s12 + $0x16f8] sm:$0xff] }
 0x5b9   : > { %v4961_v14 = vmul.f32 %v3937_v6, %v3937_v6  ;;  %v1902_v6 = vadd.s32 5984, %v6360_v2  ;;  %vm2928_vm11 = vcmp.lt.s32.totalorder %v1901_v63, %v6363_v4 }
 0x5ba   : > { %v5972_v22 = vadd.f32 %v5971_v17, %v4948_v11  ;;  %v3938_v11 = vsel %vm2914_vm13, %v862_v0, 0.0  ;;  %v865_v17 = vld [vmem:[%s6355_s12 + $0x1700] sm:$0xff] }
 0x5bb   : > { %v4962_v19 = vmul.f32 %v3938_v11, %v3938_v11  ;;  %v1903_v11 = vadd.s32 5992, %v6360_v2  ;;  %vm2929_vm12 = vcmp.lt.s32.totalorder %v1902_v6, %v6363_v4 }
 0x5bc   : > { %v5973_v27 = vadd.f32 %v5972_v22, %v4949_v16  ;;  %v3939_v16 = vsel %vm2915_vm14, %v863_v7, 0.0  ;;  %v866_v22 = vld [vmem:[%s6355_s12 + $0x1708] sm:$0xff] }
 0x5bd   : > { %v4963_v24 = vmul.f32 %v3939_v16, %v3939_v16  ;;  %v1904_v16 = vadd.s32 6000, %v6360_v2  ;;  %vm2930_vm13 = vcmp.lt.s32.totalorder %v1903_v11, %v6363_v4 }
 0x5be   : > { %v5974_v32 = vadd.f32 %v5973_v27, %v4950_v21  ;;  %v3940_v21 = vsel %vm2916_vm15, %v864_v12, 0.0  ;;  %v867_v27 = vld [vmem:[%s6355_s12 + $0x1710] sm:$0xff] }
 0x5bf   : > { %v4964_v29 = vmul.f32 %v3940_v21, %v3940_v21  ;;  %v1905_v21 = vadd.s32 6008, %v6360_v2  ;;  %vm2931_vm14 = vcmp.lt.s32.totalorder %v1904_v16, %v6363_v4 }
 0x5c0   : > { %v5975_v37 = vadd.f32 %v5974_v32, %v4951_v26  ;;  %v3941_v26 = vsel %vm2917_vm0, %v865_v17, 0.0  ;;  %v868_v32 = vld [vmem:[%s6355_s12 + $0x1718] sm:$0xff] }
 0x5c1   : > { %v4965_v34 = vmul.f32 %v3941_v26, %v3941_v26  ;;  %v1906_v26 = vadd.s32 6016, %v6360_v2  ;;  %vm2932_vm15 = vcmp.lt.s32.totalorder %v1905_v21, %v6363_v4 }
 0x5c2   : > { %v5976_v42 = vadd.f32 %v5975_v37, %v4952_v31  ;;  %v3942_v31 = vsel %vm2918_vm1, %v866_v22, 0.0  ;;  %v869_v37 = vld [vmem:[%s6355_s12 + $0x1720] sm:$0xff] }
 0x5c3   : > { %v4966_v39 = vmul.f32 %v3942_v31, %v3942_v31  ;;  %v1907_v31 = vadd.s32 6024, %v6360_v2  ;;  %vm2933_vm0 = vcmp.lt.s32.totalorder %v1906_v26, %v6363_v4 }
 0x5c4   : > { %v5977_v47 = vadd.f32 %v5976_v42, %v4953_v36  ;;  %v3943_v36 = vsel %vm2919_vm2, %v867_v27, 0.0  ;;  %v870_v42 = vld [vmem:[%s6355_s12 + $0x1728] sm:$0xff] }
 0x5c5   : > { %v4967_v44 = vmul.f32 %v3943_v36, %v3943_v36  ;;  %v1908_v36 = vadd.s32 6032, %v6360_v2  ;;  %vm2934_vm1 = vcmp.lt.s32.totalorder %v1907_v31, %v6363_v4 }
 0x5c6   : > { %v5978_v52 = vadd.f32 %v5977_v47, %v4954_v41  ;;  %v3944_v41 = vsel %vm2920_vm3, %v868_v32, 0.0  ;;  %v871_v47 = vld [vmem:[%s6355_s12 + $0x1730] sm:$0xff] }
 0x5c7   : > { %v4968_v49 = vmul.f32 %v3944_v41, %v3944_v41  ;;  %v1909_v41 = vadd.s32 6040, %v6360_v2  ;;  %vm2935_vm2 = vcmp.lt.s32.totalorder %v1908_v36, %v6363_v4 }
 0x5c8   : > { %v5979_v57 = vadd.f32 %v5978_v52, %v4955_v46  ;;  %v3945_v46 = vsel %vm2921_vm4, %v869_v37, 0.0  ;;  %v872_v52 = vld [vmem:[%s6355_s12 + $0x1738] sm:$0xff] }
 0x5c9   : > { %v4969_v54 = vmul.f32 %v3945_v46, %v3945_v46  ;;  %v1910_v46 = vadd.s32 6048, %v6360_v2  ;;  %vm2936_vm3 = vcmp.lt.s32.totalorder %v1909_v41, %v6363_v4 }
 0x5ca   : > { %v5980_v62 = vadd.f32 %v5979_v57, %v4956_v51  ;;  %v3946_v51 = vsel %vm2922_vm5, %v870_v42, 0.0  ;;  %v873_v57 = vld [vmem:[%s6355_s12 + $0x1740] sm:$0xff] }
 0x5cb   : > { %v4970_v59 = vmul.f32 %v3946_v51, %v3946_v51  ;;  %v1911_v51 = vadd.s32 6056, %v6360_v2  ;;  %vm2937_vm4 = vcmp.lt.s32.totalorder %v1910_v46, %v6363_v4 }
 0x5cc   : > { %v5981_v5 = vadd.f32 %v5980_v62, %v4957_v56  ;;  %v3947_v56 = vsel %vm2923_vm6, %v871_v47, 0.0  ;;  %v874_v62 = vld [vmem:[%s6355_s12 + $0x1748] sm:$0xff] }
 0x5cd   : > { %v4971_v0 = vmul.f32 %v3947_v56, %v3947_v56  ;;  %v1912_v56 = vadd.s32 6064, %v6360_v2  ;;  %vm2938_vm5 = vcmp.lt.s32.totalorder %v1911_v51, %v6363_v4 }
 0x5ce   : > { %v5982_v10 = vadd.f32 %v5981_v5, %v4958_v61  ;;  %v3948_v61 = vsel %vm2924_vm7, %v872_v52, 0.0  ;;  %v875_v5 = vld [vmem:[%s6355_s12 + $0x1750] sm:$0xff] }
 0x5cf   : > { %v4972_v7 = vmul.f32 %v3948_v61, %v3948_v61  ;;  %v1913_v61 = vadd.s32 6072, %v6360_v2  ;;  %vm2939_vm6 = vcmp.lt.s32.totalorder %v1912_v56, %v6363_v4 }
 0x5d0   : > { %v5983_v15 = vadd.f32 %v5982_v10, %v4959_v3  ;;  %v3949_v3 = vsel %vm2925_vm8, %v873_v57, 0.0  ;;  %v876_v10 = vld [vmem:[%s6355_s12 + $0x1758] sm:$0xff] }
 0x5d1   : > { %v4973_v12 = vmul.f32 %v3949_v3, %v3949_v3  ;;  %v1914_v3 = vadd.s32 6080, %v6360_v2  ;;  %vm2940_vm7 = vcmp.lt.s32.totalorder %v1913_v61, %v6363_v4 }
 0x5d2   : > { %v5984_v20 = vadd.f32 %v5983_v15, %v4960_v9  ;;  %v3950_v9 = vsel %vm2926_vm9, %v874_v62, 0.0  ;;  %v877_v15 = vld [vmem:[%s6355_s12 + $0x1760] sm:$0xff] }
 0x5d3   : > { %v4974_v17 = vmul.f32 %v3950_v9, %v3950_v9  ;;  %v1915_v9 = vadd.s32 6088, %v6360_v2  ;;  %vm2941_vm8 = vcmp.lt.s32.totalorder %v1914_v3, %v6363_v4 }
 0x5d4   : > { %v5985_v25 = vadd.f32 %v5984_v20, %v4961_v14  ;;  %v3951_v14 = vsel %vm2927_vm10, %v875_v5, 0.0  ;;  %v878_v20 = vld [vmem:[%s6355_s12 + $0x1768] sm:$0xff] }
 0x5d5   : > { %v4975_v22 = vmul.f32 %v3951_v14, %v3951_v14  ;;  %v1916_v14 = vadd.s32 6096, %v6360_v2  ;;  %vm2942_vm9 = vcmp.lt.s32.totalorder %v1915_v9, %v6363_v4 }
 0x5d6   : > { %v5986_v30 = vadd.f32 %v5985_v25, %v4962_v19  ;;  %v3952_v19 = vsel %vm2928_vm11, %v876_v10, 0.0  ;;  %v879_v25 = vld [vmem:[%s6355_s12 + $0x1770] sm:$0xff] }
 0x5d7   : > { %v4976_v27 = vmul.f32 %v3952_v19, %v3952_v19  ;;  %v1917_v19 = vadd.s32 6104, %v6360_v2  ;;  %vm2943_vm10 = vcmp.lt.s32.totalorder %v1916_v14, %v6363_v4 }
 0x5d8   : > { %v5987_v35 = vadd.f32 %v5986_v30, %v4963_v24  ;;  %v3953_v24 = vsel %vm2929_vm12, %v877_v15, 0.0  ;;  %v880_v30 = vld [vmem:[%s6355_s12 + $0x1778] sm:$0xff] }
 0x5d9   : > { %v4977_v32 = vmul.f32 %v3953_v24, %v3953_v24  ;;  %v1918_v24 = vadd.s32 6112, %v6360_v2  ;;  %vm2944_vm11 = vcmp.lt.s32.totalorder %v1917_v19, %v6363_v4 }
 0x5da   : > { %v5988_v40 = vadd.f32 %v5987_v35, %v4964_v29  ;;  %v3954_v29 = vsel %vm2930_vm13, %v878_v20, 0.0  ;;  %v881_v35 = vld [vmem:[%s6355_s12 + $0x1780] sm:$0xff] }
 0x5db   : > { %v4978_v37 = vmul.f32 %v3954_v29, %v3954_v29  ;;  %v1919_v29 = vadd.s32 6120, %v6360_v2  ;;  %vm2945_vm12 = vcmp.lt.s32.totalorder %v1918_v24, %v6363_v4 }
 0x5dc   : > { %v5989_v45 = vadd.f32 %v5988_v40, %v4965_v34  ;;  %v3955_v34 = vsel %vm2931_vm14, %v879_v25, 0.0  ;;  %v882_v40 = vld [vmem:[%s6355_s12 + $0x1788] sm:$0xff] }
 0x5dd   : > { %v4979_v42 = vmul.f32 %v3955_v34, %v3955_v34  ;;  %v1920_v34 = vadd.s32 6128, %v6360_v2  ;;  %vm2946_vm13 = vcmp.lt.s32.totalorder %v1919_v29, %v6363_v4 }
 0x5de   : > { %v5990_v50 = vadd.f32 %v5989_v45, %v4966_v39  ;;  %v3956_v39 = vsel %vm2932_vm15, %v880_v30, 0.0  ;;  %v883_v45 = vld [vmem:[%s6355_s12 + $0x1790] sm:$0xff] }
 0x5df   : > { %v4980_v47 = vmul.f32 %v3956_v39, %v3956_v39  ;;  %v1921_v39 = vadd.s32 6136, %v6360_v2  ;;  %vm2947_vm14 = vcmp.lt.s32.totalorder %v1920_v34, %v6363_v4 }
 0x5e0   : > { %v5991_v55 = vadd.f32 %v5990_v50, %v4967_v44  ;;  %v3957_v44 = vsel %vm2933_vm0, %v881_v35, 0.0  ;;  %v884_v50 = vld [vmem:[%s6355_s12 + $0x1798] sm:$0xff] }
 0x5e1   : > { %v4981_v52 = vmul.f32 %v3957_v44, %v3957_v44  ;;  %v1922_v44 = vadd.s32 6144, %v6360_v2  ;;  %vm2948_vm15 = vcmp.lt.s32.totalorder %v1921_v39, %v6363_v4 }
 0x5e2   : > { %v5992_v60 = vadd.f32 %v5991_v55, %v4968_v49  ;;  %v3958_v49 = vsel %vm2934_vm1, %v882_v40, 0.0  ;;  %v885_v55 = vld [vmem:[%s6355_s12 + $0x17a0] sm:$0xff] }
 0x5e3   : > { %v4982_v57 = vmul.f32 %v3958_v49, %v3958_v49  ;;  %v1923_v49 = vadd.s32 6152, %v6360_v2  ;;  %vm2949_vm0 = vcmp.lt.s32.totalorder %v1922_v44, %v6363_v4 }
 0x5e4   : > { %v5993_v1 = vadd.f32 %v5992_v60, %v4969_v54  ;;  %v3959_v54 = vsel %vm2935_vm2, %v883_v45, 0.0  ;;  %v886_v60 = vld [vmem:[%s6355_s12 + $0x17a8] sm:$0xff] }
 0x5e5   : > { %v4983_v62 = vmul.f32 %v3959_v54, %v3959_v54  ;;  %v1924_v54 = vadd.s32 6160, %v6360_v2  ;;  %vm2950_vm1 = vcmp.lt.s32.totalorder %v1923_v49, %v6363_v4 }
 0x5e6   : > { %v5994_v8 = vadd.f32 %v5993_v1, %v4970_v59  ;;  %v3960_v59 = vsel %vm2936_vm3, %v884_v50, 0.0  ;;  %v887_v1 = vld [vmem:[%s6355_s12 + $0x17b0] sm:$0xff] }
 0x5e7   : > { %v4984_v5 = vmul.f32 %v3960_v59, %v3960_v59  ;;  %v1925_v59 = vadd.s32 6168, %v6360_v2  ;;  %vm2951_vm2 = vcmp.lt.s32.totalorder %v1924_v54, %v6363_v4 }
 0x5e8   : > { %v5995_v13 = vadd.f32 %v5994_v8, %v4971_v0  ;;  %v3961_v0 = vsel %vm2937_vm4, %v885_v55, 0.0  ;;  %v888_v8 = vld [vmem:[%s6355_s12 + $0x17b8] sm:$0xff] }
 0x5e9   : > { %v4985_v10 = vmul.f32 %v3961_v0, %v3961_v0  ;;  %v1926_v0 = vadd.s32 6176, %v6360_v2  ;;  %vm2952_vm3 = vcmp.lt.s32.totalorder %v1925_v59, %v6363_v4 }
 0x5ea   : > { %v5996_v18 = vadd.f32 %v5995_v13, %v4972_v7  ;;  %v3962_v7 = vsel %vm2938_vm5, %v886_v60, 0.0  ;;  %v889_v13 = vld [vmem:[%s6355_s12 + $0x17c0] sm:$0xff] }
 0x5eb   : > { %v4986_v15 = vmul.f32 %v3962_v7, %v3962_v7  ;;  %v1927_v7 = vadd.s32 6184, %v6360_v2  ;;  %vm2953_vm4 = vcmp.lt.s32.totalorder %v1926_v0, %v6363_v4 }
 0x5ec   : > { %v5997_v23 = vadd.f32 %v5996_v18, %v4973_v12  ;;  %v3963_v12 = vsel %vm2939_vm6, %v887_v1, 0.0  ;;  %v890_v18 = vld [vmem:[%s6355_s12 + $0x17c8] sm:$0xff] }
 0x5ed   : > { %v4987_v20 = vmul.f32 %v3963_v12, %v3963_v12  ;;  %v1928_v12 = vadd.s32 6192, %v6360_v2  ;;  %vm2954_vm5 = vcmp.lt.s32.totalorder %v1927_v7, %v6363_v4 }
 0x5ee   : > { %v5998_v28 = vadd.f32 %v5997_v23, %v4974_v17  ;;  %v3964_v17 = vsel %vm2940_vm7, %v888_v8, 0.0  ;;  %v891_v23 = vld [vmem:[%s6355_s12 + $0x17d0] sm:$0xff] }
 0x5ef   : > { %v4988_v25 = vmul.f32 %v3964_v17, %v3964_v17  ;;  %v1929_v17 = vadd.s32 6200, %v6360_v2  ;;  %vm2955_vm6 = vcmp.lt.s32.totalorder %v1928_v12, %v6363_v4 }
 0x5f0   : > { %v5999_v33 = vadd.f32 %v5998_v28, %v4975_v22  ;;  %v3965_v22 = vsel %vm2941_vm8, %v889_v13, 0.0  ;;  %v892_v28 = vld [vmem:[%s6355_s12 + $0x17d8] sm:$0xff] }
 0x5f1   : > { %v4989_v30 = vmul.f32 %v3965_v22, %v3965_v22  ;;  %v1930_v22 = vadd.s32 6208, %v6360_v2  ;;  %vm2956_vm7 = vcmp.lt.s32.totalorder %v1929_v17, %v6363_v4 }
 0x5f2   : > { %v6000_v38 = vadd.f32 %v5999_v33, %v4976_v27  ;;  %v3966_v27 = vsel %vm2942_vm9, %v890_v18, 0.0  ;;  %v893_v33 = vld [vmem:[%s6355_s12 + $0x17e0] sm:$0xff] }
 0x5f3   : > { %v4990_v35 = vmul.f32 %v3966_v27, %v3966_v27  ;;  %v1931_v27 = vadd.s32 6216, %v6360_v2  ;;  %vm2957_vm8 = vcmp.lt.s32.totalorder %v1930_v22, %v6363_v4 }
 0x5f4   : > { %v6001_v43 = vadd.f32 %v6000_v38, %v4977_v32  ;;  %v3967_v32 = vsel %vm2943_vm10, %v891_v23, 0.0  ;;  %v894_v38 = vld [vmem:[%s6355_s12 + $0x17e8] sm:$0xff] }
 0x5f5   : > { %v4991_v40 = vmul.f32 %v3967_v32, %v3967_v32  ;;  %v1932_v32 = vadd.s32 6224, %v6360_v2  ;;  %vm2958_vm9 = vcmp.lt.s32.totalorder %v1931_v27, %v6363_v4 }
 0x5f6   : > { %v6002_v48 = vadd.f32 %v6001_v43, %v4978_v37  ;;  %v3968_v37 = vsel %vm2944_vm11, %v892_v28, 0.0  ;;  %v895_v43 = vld [vmem:[%s6355_s12 + $0x17f0] sm:$0xff] }
 0x5f7   : > { %v4992_v45 = vmul.f32 %v3968_v37, %v3968_v37  ;;  %v1933_v37 = vadd.s32 6232, %v6360_v2  ;;  %vm2959_vm10 = vcmp.lt.s32.totalorder %v1932_v32, %v6363_v4 }
 0x5f8   : > { %v6003_v53 = vadd.f32 %v6002_v48, %v4979_v42  ;;  %v3969_v42 = vsel %vm2945_vm12, %v893_v33, 0.0  ;;  %v896_v48 = vld [vmem:[%s6355_s12 + $0x17f8] sm:$0xff] }
 0x5f9   : > { %v4993_v50 = vmul.f32 %v3969_v42, %v3969_v42  ;;  %v1934_v42 = vadd.s32 6240, %v6360_v2  ;;  %vm2960_vm11 = vcmp.lt.s32.totalorder %v1933_v37, %v6363_v4 }
 0x5fa   : > { %v6004_v58 = vadd.f32 %v6003_v53, %v4980_v47  ;;  %v3970_v47 = vsel %vm2946_vm13, %v894_v38, 0.0  ;;  %v897_v53 = vld [vmem:[%s6355_s12 + $0x1800] sm:$0xff] }
 0x5fb   : > { %v4994_v55 = vmul.f32 %v3970_v47, %v3970_v47  ;;  %v1935_v47 = vadd.s32 6248, %v6360_v2  ;;  %vm2961_vm12 = vcmp.lt.s32.totalorder %v1934_v42, %v6363_v4 }
 0x5fc   : > { %v6005_v63 = vadd.f32 %v6004_v58, %v4981_v52  ;;  %v3971_v52 = vsel %vm2947_vm14, %v895_v43, 0.0  ;;  %v898_v58 = vld [vmem:[%s6355_s12 + $0x1808] sm:$0xff] }
 0x5fd   : > { %v4995_v60 = vmul.f32 %v3971_v52, %v3971_v52  ;;  %v1936_v52 = vadd.s32 6256, %v6360_v2  ;;  %vm2962_vm13 = vcmp.lt.s32.totalorder %v1935_v47, %v6363_v4 }
 0x5fe   : > { %v6006_v6 = vadd.f32 %v6005_v63, %v4982_v57  ;;  %v3972_v57 = vsel %vm2948_vm15, %v896_v48, 0.0  ;;  %v899_v63 = vld [vmem:[%s6355_s12 + $0x1810] sm:$0xff] }
 0x5ff   : > { %v4996_v1 = vmul.f32 %v3972_v57, %v3972_v57  ;;  %v1937_v57 = vadd.s32 6264, %v6360_v2  ;;  %vm2963_vm14 = vcmp.lt.s32.totalorder %v1936_v52, %v6363_v4 }
 0x600   : > { %v6007_v11 = vadd.f32 %v6006_v6, %v4983_v62  ;;  %v3973_v62 = vsel %vm2949_vm0, %v897_v53, 0.0  ;;  %v900_v6 = vld [vmem:[%s6355_s12 + $0x1818] sm:$0xff] }
 0x601   : > { %v4997_v8 = vmul.f32 %v3973_v62, %v3973_v62  ;;  %v1938_v62 = vadd.s32 6272, %v6360_v2  ;;  %vm2964_vm15 = vcmp.lt.s32.totalorder %v1937_v57, %v6363_v4 }
 0x602   : > { %v6008_v16 = vadd.f32 %v6007_v11, %v4984_v5  ;;  %v3974_v5 = vsel %vm2950_vm1, %v898_v58, 0.0  ;;  %v901_v11 = vld [vmem:[%s6355_s12 + $0x1820] sm:$0xff] }
 0x603   : > { %v4998_v13 = vmul.f32 %v3974_v5, %v3974_v5  ;;  %v1939_v5 = vadd.s32 6280, %v6360_v2  ;;  %vm2965_vm0 = vcmp.lt.s32.totalorder %v1938_v62, %v6363_v4 }
 0x604   : > { %v6009_v21 = vadd.f32 %v6008_v16, %v4985_v10  ;;  %v3975_v10 = vsel %vm2951_vm2, %v899_v63, 0.0  ;;  %v902_v16 = vld [vmem:[%s6355_s12 + $0x1828] sm:$0xff] }
 0x605   : > { %v4999_v18 = vmul.f32 %v3975_v10, %v3975_v10  ;;  %v1940_v10 = vadd.s32 6288, %v6360_v2  ;;  %vm2966_vm1 = vcmp.lt.s32.totalorder %v1939_v5, %v6363_v4 }
 0x606   : > { %v6010_v26 = vadd.f32 %v6009_v21, %v4986_v15  ;;  %v3976_v15 = vsel %vm2952_vm3, %v900_v6, 0.0  ;;  %v903_v21 = vld [vmem:[%s6355_s12 + $0x1830] sm:$0xff] }
 0x607   : > { %v5000_v23 = vmul.f32 %v3976_v15, %v3976_v15  ;;  %v1941_v15 = vadd.s32 6296, %v6360_v2  ;;  %vm2967_vm2 = vcmp.lt.s32.totalorder %v1940_v10, %v6363_v4 }
 0x608   : > { %v6011_v31 = vadd.f32 %v6010_v26, %v4987_v20  ;;  %v3977_v20 = vsel %vm2953_vm4, %v901_v11, 0.0  ;;  %v904_v26 = vld [vmem:[%s6355_s12 + $0x1838] sm:$0xff] }
 0x609   : > { %v5001_v28 = vmul.f32 %v3977_v20, %v3977_v20  ;;  %v1942_v20 = vadd.s32 6304, %v6360_v2  ;;  %vm2968_vm3 = vcmp.lt.s32.totalorder %v1941_v15, %v6363_v4 }
 0x60a   : > { %v6012_v36 = vadd.f32 %v6011_v31, %v4988_v25  ;;  %v3978_v25 = vsel %vm2954_vm5, %v902_v16, 0.0  ;;  %v905_v31 = vld [vmem:[%s6355_s12 + $0x1840] sm:$0xff] }
 0x60b   : > { %v5002_v33 = vmul.f32 %v3978_v25, %v3978_v25  ;;  %v1943_v25 = vadd.s32 6312, %v6360_v2  ;;  %vm2969_vm4 = vcmp.lt.s32.totalorder %v1942_v20, %v6363_v4 }
 0x60c   : > { %v6013_v41 = vadd.f32 %v6012_v36, %v4989_v30  ;;  %v3979_v30 = vsel %vm2955_vm6, %v903_v21, 0.0  ;;  %v906_v36 = vld [vmem:[%s6355_s12 + $0x1848] sm:$0xff] }
 0x60d   : > { %v5003_v38 = vmul.f32 %v3979_v30, %v3979_v30  ;;  %v1944_v30 = vadd.s32 6320, %v6360_v2  ;;  %vm2970_vm5 = vcmp.lt.s32.totalorder %v1943_v25, %v6363_v4 }
 0x60e   : > { %v6014_v46 = vadd.f32 %v6013_v41, %v4990_v35  ;;  %v3980_v35 = vsel %vm2956_vm7, %v904_v26, 0.0  ;;  %v907_v41 = vld [vmem:[%s6355_s12 + $0x1850] sm:$0xff] }
 0x60f   : > { %v5004_v43 = vmul.f32 %v3980_v35, %v3980_v35  ;;  %v1945_v35 = vadd.s32 6328, %v6360_v2  ;;  %vm2971_vm6 = vcmp.lt.s32.totalorder %v1944_v30, %v6363_v4 }
 0x610   : > { %v6015_v51 = vadd.f32 %v6014_v46, %v4991_v40  ;;  %v3981_v40 = vsel %vm2957_vm8, %v905_v31, 0.0  ;;  %v908_v46 = vld [vmem:[%s6355_s12 + $0x1858] sm:$0xff] }
 0x611   : > { %v5005_v48 = vmul.f32 %v3981_v40, %v3981_v40  ;;  %v1946_v40 = vadd.s32 6336, %v6360_v2  ;;  %vm2972_vm7 = vcmp.lt.s32.totalorder %v1945_v35, %v6363_v4 }
 0x612   : > { %v6016_v56 = vadd.f32 %v6015_v51, %v4992_v45  ;;  %v3982_v45 = vsel %vm2958_vm9, %v906_v36, 0.0  ;;  %v909_v51 = vld [vmem:[%s6355_s12 + $0x1860] sm:$0xff] }
 0x613   : > { %v5006_v53 = vmul.f32 %v3982_v45, %v3982_v45  ;;  %v1947_v45 = vadd.s32 6344, %v6360_v2  ;;  %vm2973_vm8 = vcmp.lt.s32.totalorder %v1946_v40, %v6363_v4 }
 0x614   : > { %v6017_v61 = vadd.f32 %v6016_v56, %v4993_v50  ;;  %v3983_v50 = vsel %vm2959_vm10, %v907_v41, 0.0  ;;  %v910_v56 = vld [vmem:[%s6355_s12 + $0x1868] sm:$0xff] }
 0x615   : > { %v5007_v58 = vmul.f32 %v3983_v50, %v3983_v50  ;;  %v1948_v50 = vadd.s32 6352, %v6360_v2  ;;  %vm2974_vm9 = vcmp.lt.s32.totalorder %v1947_v45, %v6363_v4 }
 0x616   : > { %v6018_v3 = vadd.f32 %v6017_v61, %v4994_v55  ;;  %v3984_v55 = vsel %vm2960_vm11, %v908_v46, 0.0  ;;  %v911_v61 = vld [vmem:[%s6355_s12 + $0x1870] sm:$0xff] }
 0x617   : > { %v5008_v63 = vmul.f32 %v3984_v55, %v3984_v55  ;;  %v1949_v55 = vadd.s32 6360, %v6360_v2  ;;  %vm2975_vm10 = vcmp.lt.s32.totalorder %v1948_v50, %v6363_v4 }
 0x618   : > { %v6019_v9 = vadd.f32 %v6018_v3, %v4995_v60  ;;  %v3985_v60 = vsel %vm2961_vm12, %v909_v51, 0.0  ;;  %v912_v3 = vld [vmem:[%s6355_s12 + $0x1878] sm:$0xff] }
 0x619   : > { %v5009_v6 = vmul.f32 %v3985_v60, %v3985_v60  ;;  %v1950_v60 = vadd.s32 6368, %v6360_v2  ;;  %vm2976_vm11 = vcmp.lt.s32.totalorder %v1949_v55, %v6363_v4 }
 0x61a   : > { %v6020_v14 = vadd.f32 %v6019_v9, %v4996_v1  ;;  %v3986_v1 = vsel %vm2962_vm13, %v910_v56, 0.0  ;;  %v913_v9 = vld [vmem:[%s6355_s12 + $0x1880] sm:$0xff] }
 0x61b   : > { %v5010_v11 = vmul.f32 %v3986_v1, %v3986_v1  ;;  %v1951_v1 = vadd.s32 6376, %v6360_v2  ;;  %vm2977_vm12 = vcmp.lt.s32.totalorder %v1950_v60, %v6363_v4 }
 0x61c   : > { %v6021_v19 = vadd.f32 %v6020_v14, %v4997_v8  ;;  %v3987_v8 = vsel %vm2963_vm14, %v911_v61, 0.0  ;;  %v914_v14 = vld [vmem:[%s6355_s12 + $0x1888] sm:$0xff] }
 0x61d   : > { %v5011_v16 = vmul.f32 %v3987_v8, %v3987_v8  ;;  %v1952_v8 = vadd.s32 6384, %v6360_v2  ;;  %vm2978_vm13 = vcmp.lt.s32.totalorder %v1951_v1, %v6363_v4 }
 0x61e   : > { %v6022_v24 = vadd.f32 %v6021_v19, %v4998_v13  ;;  %v3988_v13 = vsel %vm2964_vm15, %v912_v3, 0.0  ;;  %v915_v19 = vld [vmem:[%s6355_s12 + $0x1890] sm:$0xff] }
 0x61f   : > { %v5012_v21 = vmul.f32 %v3988_v13, %v3988_v13  ;;  %v1953_v13 = vadd.s32 6392, %v6360_v2  ;;  %vm2979_vm14 = vcmp.lt.s32.totalorder %v1952_v8, %v6363_v4 }
 0x620   : > { %v6023_v29 = vadd.f32 %v6022_v24, %v4999_v18  ;;  %v3989_v18 = vsel %vm2965_vm0, %v913_v9, 0.0  ;;  %v916_v24 = vld [vmem:[%s6355_s12 + $0x1898] sm:$0xff] }
 0x621   : > { %v5013_v26 = vmul.f32 %v3989_v18, %v3989_v18  ;;  %v1954_v18 = vadd.s32 6400, %v6360_v2  ;;  %vm2980_vm15 = vcmp.lt.s32.totalorder %v1953_v13, %v6363_v4 }
 0x622   : > { %v6024_v34 = vadd.f32 %v6023_v29, %v5000_v23  ;;  %v3990_v23 = vsel %vm2966_vm1, %v914_v14, 0.0  ;;  %v917_v29 = vld [vmem:[%s6355_s12 + $0x18a0] sm:$0xff] }
 0x623   : > { %v5014_v31 = vmul.f32 %v3990_v23, %v3990_v23  ;;  %v1955_v23 = vadd.s32 6408, %v6360_v2  ;;  %vm2981_vm0 = vcmp.lt.s32.totalorder %v1954_v18, %v6363_v4 }
 0x624   : > { %v6025_v39 = vadd.f32 %v6024_v34, %v5001_v28  ;;  %v3991_v28 = vsel %vm2967_vm2, %v915_v19, 0.0  ;;  %v918_v34 = vld [vmem:[%s6355_s12 + $0x18a8] sm:$0xff] }
 0x625   : > { %v5015_v36 = vmul.f32 %v3991_v28, %v3991_v28  ;;  %v1956_v28 = vadd.s32 6416, %v6360_v2  ;;  %vm2982_vm1 = vcmp.lt.s32.totalorder %v1955_v23, %v6363_v4 }
 0x626   : > { %v6026_v44 = vadd.f32 %v6025_v39, %v5002_v33  ;;  %v3992_v33 = vsel %vm2968_vm3, %v916_v24, 0.0  ;;  %v919_v39 = vld [vmem:[%s6355_s12 + $0x18b0] sm:$0xff] }
 0x627   : > { %v5016_v41 = vmul.f32 %v3992_v33, %v3992_v33  ;;  %v1957_v33 = vadd.s32 6424, %v6360_v2  ;;  %vm2983_vm2 = vcmp.lt.s32.totalorder %v1956_v28, %v6363_v4 }
 0x628   : > { %v6027_v49 = vadd.f32 %v6026_v44, %v5003_v38  ;;  %v3993_v38 = vsel %vm2969_vm4, %v917_v29, 0.0  ;;  %v920_v44 = vld [vmem:[%s6355_s12 + $0x18b8] sm:$0xff] }
 0x629   : > { %v5017_v46 = vmul.f32 %v3993_v38, %v3993_v38  ;;  %v1958_v38 = vadd.s32 6432, %v6360_v2  ;;  %vm2984_vm3 = vcmp.lt.s32.totalorder %v1957_v33, %v6363_v4 }
 0x62a   : > { %v6028_v54 = vadd.f32 %v6027_v49, %v5004_v43  ;;  %v3994_v43 = vsel %vm2970_vm5, %v918_v34, 0.0  ;;  %v921_v49 = vld [vmem:[%s6355_s12 + $0x18c0] sm:$0xff] }
 0x62b   : > { %v5018_v51 = vmul.f32 %v3994_v43, %v3994_v43  ;;  %v1959_v43 = vadd.s32 6440, %v6360_v2  ;;  %vm2985_vm4 = vcmp.lt.s32.totalorder %v1958_v38, %v6363_v4 }
 0x62c   : > { %v6029_v59 = vadd.f32 %v6028_v54, %v5005_v48  ;;  %v3995_v48 = vsel %vm2971_vm6, %v919_v39, 0.0  ;;  %v922_v54 = vld [vmem:[%s6355_s12 + $0x18c8] sm:$0xff] }
 0x62d   : > { %v5019_v56 = vmul.f32 %v3995_v48, %v3995_v48  ;;  %v1960_v48 = vadd.s32 6448, %v6360_v2  ;;  %vm2986_vm5 = vcmp.lt.s32.totalorder %v1959_v43, %v6363_v4 }
 0x62e   : > { %v6030_v0 = vadd.f32 %v6029_v59, %v5006_v53  ;;  %v3996_v53 = vsel %vm2972_vm7, %v920_v44, 0.0  ;;  %v923_v59 = vld [vmem:[%s6355_s12 + $0x18d0] sm:$0xff] }
 0x62f   : > { %v5020_v61 = vmul.f32 %v3996_v53, %v3996_v53  ;;  %v1961_v53 = vadd.s32 6456, %v6360_v2  ;;  %vm2987_vm6 = vcmp.lt.s32.totalorder %v1960_v48, %v6363_v4 }
 0x630   : > { %v6031_v7 = vadd.f32 %v6030_v0, %v5007_v58  ;;  %v3997_v58 = vsel %vm2973_vm8, %v921_v49, 0.0  ;;  %v924_v0 = vld [vmem:[%s6355_s12 + $0x18d8] sm:$0xff] }
 0x631   : > { %v5021_v3 = vmul.f32 %v3997_v58, %v3997_v58  ;;  %v1962_v58 = vadd.s32 6464, %v6360_v2  ;;  %vm2988_vm7 = vcmp.lt.s32.totalorder %v1961_v53, %v6363_v4 }
 0x632   : > { %v6032_v12 = vadd.f32 %v6031_v7, %v5008_v63  ;;  %v3998_v63 = vsel %vm2974_vm9, %v922_v54, 0.0  ;;  %v925_v7 = vld [vmem:[%s6355_s12 + $0x18e0] sm:$0xff] }
 0x633   : > { %v5022_v9 = vmul.f32 %v3998_v63, %v3998_v63  ;;  %v1963_v63 = vadd.s32 6472, %v6360_v2  ;;  %vm2989_vm8 = vcmp.lt.s32.totalorder %v1962_v58, %v6363_v4 }
 0x634   : > { %v6033_v17 = vadd.f32 %v6032_v12, %v5009_v6  ;;  %v3999_v6 = vsel %vm2975_vm10, %v923_v59, 0.0  ;;  %v926_v12 = vld [vmem:[%s6355_s12 + $0x18e8] sm:$0xff] }
 0x635   : > { %v5023_v14 = vmul.f32 %v3999_v6, %v3999_v6  ;;  %v1964_v6 = vadd.s32 6480, %v6360_v2  ;;  %vm2990_vm9 = vcmp.lt.s32.totalorder %v1963_v63, %v6363_v4 }
 0x636   : > { %v6034_v22 = vadd.f32 %v6033_v17, %v5010_v11  ;;  %v4000_v11 = vsel %vm2976_vm11, %v924_v0, 0.0  ;;  %v927_v17 = vld [vmem:[%s6355_s12 + $0x18f0] sm:$0xff] }
 0x637   : > { %v5024_v19 = vmul.f32 %v4000_v11, %v4000_v11  ;;  %v1965_v11 = vadd.s32 6488, %v6360_v2  ;;  %vm2991_vm10 = vcmp.lt.s32.totalorder %v1964_v6, %v6363_v4 }
 0x638   : > { %v6035_v27 = vadd.f32 %v6034_v22, %v5011_v16  ;;  %v4001_v16 = vsel %vm2977_vm12, %v925_v7, 0.0  ;;  %v928_v22 = vld [vmem:[%s6355_s12 + $0x18f8] sm:$0xff] }
 0x639   : > { %v5025_v24 = vmul.f32 %v4001_v16, %v4001_v16  ;;  %v1966_v16 = vadd.s32 6496, %v6360_v2  ;;  %vm2992_vm11 = vcmp.lt.s32.totalorder %v1965_v11, %v6363_v4 }
 0x63a   : > { %v6036_v32 = vadd.f32 %v6035_v27, %v5012_v21  ;;  %v4002_v21 = vsel %vm2978_vm13, %v926_v12, 0.0  ;;  %v929_v27 = vld [vmem:[%s6355_s12 + $0x1900] sm:$0xff] }
 0x63b   : > { %v5026_v29 = vmul.f32 %v4002_v21, %v4002_v21  ;;  %v1967_v21 = vadd.s32 6504, %v6360_v2  ;;  %vm2993_vm12 = vcmp.lt.s32.totalorder %v1966_v16, %v6363_v4 }
 0x63c   : > { %v6037_v37 = vadd.f32 %v6036_v32, %v5013_v26  ;;  %v4003_v26 = vsel %vm2979_vm14, %v927_v17, 0.0  ;;  %v930_v32 = vld [vmem:[%s6355_s12 + $0x1908] sm:$0xff] }
 0x63d   : > { %v5027_v34 = vmul.f32 %v4003_v26, %v4003_v26  ;;  %v1968_v26 = vadd.s32 6512, %v6360_v2  ;;  %vm2994_vm13 = vcmp.lt.s32.totalorder %v1967_v21, %v6363_v4 }
 0x63e   : > { %v6038_v42 = vadd.f32 %v6037_v37, %v5014_v31  ;;  %v4004_v31 = vsel %vm2980_vm15, %v928_v22, 0.0  ;;  %v931_v37 = vld [vmem:[%s6355_s12 + $0x1910] sm:$0xff] }
 0x63f   : > { %v5028_v39 = vmul.f32 %v4004_v31, %v4004_v31  ;;  %v1969_v31 = vadd.s32 6520, %v6360_v2  ;;  %vm2995_vm14 = vcmp.lt.s32.totalorder %v1968_v26, %v6363_v4 }
 0x640   : > { %v6039_v47 = vadd.f32 %v6038_v42, %v5015_v36  ;;  %v4005_v36 = vsel %vm2981_vm0, %v929_v27, 0.0  ;;  %v932_v42 = vld [vmem:[%s6355_s12 + $0x1918] sm:$0xff] }
 0x641   : > { %v5029_v44 = vmul.f32 %v4005_v36, %v4005_v36  ;;  %v1970_v36 = vadd.s32 6528, %v6360_v2  ;;  %vm2996_vm15 = vcmp.lt.s32.totalorder %v1969_v31, %v6363_v4 }
 0x642   : > { %v6040_v52 = vadd.f32 %v6039_v47, %v5016_v41  ;;  %v4006_v41 = vsel %vm2982_vm1, %v930_v32, 0.0  ;;  %v933_v47 = vld [vmem:[%s6355_s12 + $0x1920] sm:$0xff] }
 0x643   : > { %v5030_v49 = vmul.f32 %v4006_v41, %v4006_v41  ;;  %v1971_v41 = vadd.s32 6536, %v6360_v2  ;;  %vm2997_vm0 = vcmp.lt.s32.totalorder %v1970_v36, %v6363_v4 }
 0x644   : > { %v6041_v57 = vadd.f32 %v6040_v52, %v5017_v46  ;;  %v4007_v46 = vsel %vm2983_vm2, %v931_v37, 0.0  ;;  %v934_v52 = vld [vmem:[%s6355_s12 + $0x1928] sm:$0xff] }
 0x645   : > { %v5031_v54 = vmul.f32 %v4007_v46, %v4007_v46  ;;  %v1972_v46 = vadd.s32 6544, %v6360_v2  ;;  %vm2998_vm1 = vcmp.lt.s32.totalorder %v1971_v41, %v6363_v4 }
 0x646   : > { %v6042_v62 = vadd.f32 %v6041_v57, %v5018_v51  ;;  %v4008_v51 = vsel %vm2984_vm3, %v932_v42, 0.0  ;;  %v935_v57 = vld [vmem:[%s6355_s12 + $0x1930] sm:$0xff] }
 0x647   : > { %v5032_v59 = vmul.f32 %v4008_v51, %v4008_v51  ;;  %v1973_v51 = vadd.s32 6552, %v6360_v2  ;;  %vm2999_vm2 = vcmp.lt.s32.totalorder %v1972_v46, %v6363_v4 }
 0x648   : > { %v6043_v5 = vadd.f32 %v6042_v62, %v5019_v56  ;;  %v4009_v56 = vsel %vm2985_vm4, %v933_v47, 0.0  ;;  %v936_v62 = vld [vmem:[%s6355_s12 + $0x1938] sm:$0xff] }
 0x649   : > { %v5033_v0 = vmul.f32 %v4009_v56, %v4009_v56  ;;  %v1974_v56 = vadd.s32 6560, %v6360_v2  ;;  %vm3000_vm3 = vcmp.lt.s32.totalorder %v1973_v51, %v6363_v4 }
 0x64a   : > { %v6044_v10 = vadd.f32 %v6043_v5, %v5020_v61  ;;  %v4010_v61 = vsel %vm2986_vm5, %v934_v52, 0.0  ;;  %v937_v5 = vld [vmem:[%s6355_s12 + $0x1940] sm:$0xff] }
 0x64b   : > { %v5034_v7 = vmul.f32 %v4010_v61, %v4010_v61  ;;  %v1975_v61 = vadd.s32 6568, %v6360_v2  ;;  %vm3001_vm4 = vcmp.lt.s32.totalorder %v1974_v56, %v6363_v4 }
 0x64c   : > { %v6045_v15 = vadd.f32 %v6044_v10, %v5021_v3  ;;  %v4011_v3 = vsel %vm2987_vm6, %v935_v57, 0.0  ;;  %v938_v10 = vld [vmem:[%s6355_s12 + $0x1948] sm:$0xff] }
 0x64d   : > { %v5035_v12 = vmul.f32 %v4011_v3, %v4011_v3  ;;  %v1976_v3 = vadd.s32 6576, %v6360_v2  ;;  %vm3002_vm5 = vcmp.lt.s32.totalorder %v1975_v61, %v6363_v4 }
 0x64e   : > { %v6046_v20 = vadd.f32 %v6045_v15, %v5022_v9  ;;  %v4012_v9 = vsel %vm2988_vm7, %v936_v62, 0.0  ;;  %v939_v15 = vld [vmem:[%s6355_s12 + $0x1950] sm:$0xff] }
 0x64f   : > { %v5036_v17 = vmul.f32 %v4012_v9, %v4012_v9  ;;  %v1977_v9 = vadd.s32 6584, %v6360_v2  ;;  %vm3003_vm6 = vcmp.lt.s32.totalorder %v1976_v3, %v6363_v4 }
 0x650   : > { %v6047_v25 = vadd.f32 %v6046_v20, %v5023_v14  ;;  %v4013_v14 = vsel %vm2989_vm8, %v937_v5, 0.0  ;;  %v940_v20 = vld [vmem:[%s6355_s12 + $0x1958] sm:$0xff] }
 0x651   : > { %v5037_v22 = vmul.f32 %v4013_v14, %v4013_v14  ;;  %v1978_v14 = vadd.s32 6592, %v6360_v2  ;;  %vm3004_vm7 = vcmp.lt.s32.totalorder %v1977_v9, %v6363_v4 }
 0x652   : > { %v6048_v30 = vadd.f32 %v6047_v25, %v5024_v19  ;;  %v4014_v19 = vsel %vm2990_vm9, %v938_v10, 0.0  ;;  %v941_v25 = vld [vmem:[%s6355_s12 + $0x1960] sm:$0xff] }
 0x653   : > { %v5038_v27 = vmul.f32 %v4014_v19, %v4014_v19  ;;  %v1979_v19 = vadd.s32 6600, %v6360_v2  ;;  %vm3005_vm8 = vcmp.lt.s32.totalorder %v1978_v14, %v6363_v4 }
 0x654   : > { %v6049_v35 = vadd.f32 %v6048_v30, %v5025_v24  ;;  %v4015_v24 = vsel %vm2991_vm10, %v939_v15, 0.0  ;;  %v942_v30 = vld [vmem:[%s6355_s12 + $0x1968] sm:$0xff] }
 0x655   : > { %v5039_v32 = vmul.f32 %v4015_v24, %v4015_v24  ;;  %v1980_v24 = vadd.s32 6608, %v6360_v2  ;;  %vm3006_vm9 = vcmp.lt.s32.totalorder %v1979_v19, %v6363_v4 }
 0x656   : > { %v6050_v40 = vadd.f32 %v6049_v35, %v5026_v29  ;;  %v4016_v29 = vsel %vm2992_vm11, %v940_v20, 0.0  ;;  %v943_v35 = vld [vmem:[%s6355_s12 + $0x1970] sm:$0xff] }
 0x657   : > { %v5040_v37 = vmul.f32 %v4016_v29, %v4016_v29  ;;  %v1981_v29 = vadd.s32 6616, %v6360_v2  ;;  %vm3007_vm10 = vcmp.lt.s32.totalorder %v1980_v24, %v6363_v4 }
 0x658   : > { %v6051_v45 = vadd.f32 %v6050_v40, %v5027_v34  ;;  %v4017_v34 = vsel %vm2993_vm12, %v941_v25, 0.0  ;;  %v944_v40 = vld [vmem:[%s6355_s12 + $0x1978] sm:$0xff] }
 0x659   : > { %v5041_v42 = vmul.f32 %v4017_v34, %v4017_v34  ;;  %v1982_v34 = vadd.s32 6624, %v6360_v2  ;;  %vm3008_vm11 = vcmp.lt.s32.totalorder %v1981_v29, %v6363_v4 }
 0x65a   : > { %v6052_v50 = vadd.f32 %v6051_v45, %v5028_v39  ;;  %v4018_v39 = vsel %vm2994_vm13, %v942_v30, 0.0  ;;  %v945_v45 = vld [vmem:[%s6355_s12 + $0x1980] sm:$0xff] }
 0x65b   : > { %v5042_v47 = vmul.f32 %v4018_v39, %v4018_v39  ;;  %v1983_v39 = vadd.s32 6632, %v6360_v2  ;;  %vm3009_vm12 = vcmp.lt.s32.totalorder %v1982_v34, %v6363_v4 }
 0x65c   : > { %v6053_v55 = vadd.f32 %v6052_v50, %v5029_v44  ;;  %v4019_v44 = vsel %vm2995_vm14, %v943_v35, 0.0  ;;  %v946_v50 = vld [vmem:[%s6355_s12 + $0x1988] sm:$0xff] }
 0x65d   : > { %v5043_v52 = vmul.f32 %v4019_v44, %v4019_v44  ;;  %v1984_v44 = vadd.s32 6640, %v6360_v2  ;;  %vm3010_vm13 = vcmp.lt.s32.totalorder %v1983_v39, %v6363_v4 }
 0x65e   : > { %v6054_v60 = vadd.f32 %v6053_v55, %v5030_v49  ;;  %v4020_v49 = vsel %vm2996_vm15, %v944_v40, 0.0  ;;  %v947_v55 = vld [vmem:[%s6355_s12 + $0x1990] sm:$0xff] }
 0x65f   : > { %v5044_v57 = vmul.f32 %v4020_v49, %v4020_v49  ;;  %v1985_v49 = vadd.s32 6648, %v6360_v2  ;;  %vm3011_vm14 = vcmp.lt.s32.totalorder %v1984_v44, %v6363_v4 }
 0x660   : > { %v6055_v1 = vadd.f32 %v6054_v60, %v5031_v54  ;;  %v4021_v54 = vsel %vm2997_vm0, %v945_v45, 0.0  ;;  %v948_v60 = vld [vmem:[%s6355_s12 + $0x1998] sm:$0xff] }
 0x661   : > { %v5045_v62 = vmul.f32 %v4021_v54, %v4021_v54  ;;  %v1986_v54 = vadd.s32 6656, %v6360_v2  ;;  %vm3012_vm15 = vcmp.lt.s32.totalorder %v1985_v49, %v6363_v4 }
 0x662   : > { %v6056_v8 = vadd.f32 %v6055_v1, %v5032_v59  ;;  %v4022_v59 = vsel %vm2998_vm1, %v946_v50, 0.0  ;;  %v949_v1 = vld [vmem:[%s6355_s12 + $0x19a0] sm:$0xff] }
 0x663   : > { %v5046_v5 = vmul.f32 %v4022_v59, %v4022_v59  ;;  %v1987_v59 = vadd.s32 6664, %v6360_v2  ;;  %vm3013_vm0 = vcmp.lt.s32.totalorder %v1986_v54, %v6363_v4 }
 0x664   : > { %v6057_v13 = vadd.f32 %v6056_v8, %v5033_v0  ;;  %v4023_v0 = vsel %vm2999_vm2, %v947_v55, 0.0  ;;  %v950_v8 = vld [vmem:[%s6355_s12 + $0x19a8] sm:$0xff] }
 0x665   : > { %v5047_v10 = vmul.f32 %v4023_v0, %v4023_v0  ;;  %v1988_v0 = vadd.s32 6672, %v6360_v2  ;;  %vm3014_vm1 = vcmp.lt.s32.totalorder %v1987_v59, %v6363_v4 }
 0x666   : > { %v6058_v18 = vadd.f32 %v6057_v13, %v5034_v7  ;;  %v4024_v7 = vsel %vm3000_vm3, %v948_v60, 0.0  ;;  %v951_v13 = vld [vmem:[%s6355_s12 + $0x19b0] sm:$0xff] }
 0x667   : > { %v5048_v15 = vmul.f32 %v4024_v7, %v4024_v7  ;;  %v1989_v7 = vadd.s32 6680, %v6360_v2  ;;  %vm3015_vm2 = vcmp.lt.s32.totalorder %v1988_v0, %v6363_v4 }
 0x668   : > { %v6059_v23 = vadd.f32 %v6058_v18, %v5035_v12  ;;  %v4025_v12 = vsel %vm3001_vm4, %v949_v1, 0.0  ;;  %v952_v18 = vld [vmem:[%s6355_s12 + $0x19b8] sm:$0xff] }
 0x669   : > { %v5049_v20 = vmul.f32 %v4025_v12, %v4025_v12  ;;  %v1990_v12 = vadd.s32 6688, %v6360_v2  ;;  %vm3016_vm3 = vcmp.lt.s32.totalorder %v1989_v7, %v6363_v4 }
 0x66a   : > { %v6060_v28 = vadd.f32 %v6059_v23, %v5036_v17  ;;  %v4026_v17 = vsel %vm3002_vm5, %v950_v8, 0.0  ;;  %v953_v23 = vld [vmem:[%s6355_s12 + $0x19c0] sm:$0xff] }
 0x66b   : > { %v5050_v25 = vmul.f32 %v4026_v17, %v4026_v17  ;;  %v1991_v17 = vadd.s32 6696, %v6360_v2  ;;  %vm3017_vm4 = vcmp.lt.s32.totalorder %v1990_v12, %v6363_v4 }
 0x66c   : > { %v6061_v33 = vadd.f32 %v6060_v28, %v5037_v22  ;;  %v4027_v22 = vsel %vm3003_vm6, %v951_v13, 0.0  ;;  %v954_v28 = vld [vmem:[%s6355_s12 + $0x19c8] sm:$0xff] }
 0x66d   : > { %v5051_v30 = vmul.f32 %v4027_v22, %v4027_v22  ;;  %v1992_v22 = vadd.s32 6704, %v6360_v2  ;;  %vm3018_vm5 = vcmp.lt.s32.totalorder %v1991_v17, %v6363_v4 }
 0x66e   : > { %v6062_v38 = vadd.f32 %v6061_v33, %v5038_v27  ;;  %v4028_v27 = vsel %vm3004_vm7, %v952_v18, 0.0  ;;  %v955_v33 = vld [vmem:[%s6355_s12 + $0x19d0] sm:$0xff] }
 0x66f   : > { %v5052_v35 = vmul.f32 %v4028_v27, %v4028_v27  ;;  %v1993_v27 = vadd.s32 6712, %v6360_v2  ;;  %vm3019_vm6 = vcmp.lt.s32.totalorder %v1992_v22, %v6363_v4 }
 0x670   : > { %v6063_v43 = vadd.f32 %v6062_v38, %v5039_v32  ;;  %v4029_v32 = vsel %vm3005_vm8, %v953_v23, 0.0  ;;  %v956_v38 = vld [vmem:[%s6355_s12 + $0x19d8] sm:$0xff] }
 0x671   : > { %v5053_v40 = vmul.f32 %v4029_v32, %v4029_v32  ;;  %v1994_v32 = vadd.s32 6720, %v6360_v2  ;;  %vm3020_vm7 = vcmp.lt.s32.totalorder %v1993_v27, %v6363_v4 }
 0x672   : > { %v6064_v48 = vadd.f32 %v6063_v43, %v5040_v37  ;;  %v4030_v37 = vsel %vm3006_vm9, %v954_v28, 0.0  ;;  %v957_v43 = vld [vmem:[%s6355_s12 + $0x19e0] sm:$0xff] }
 0x673   : > { %v5054_v45 = vmul.f32 %v4030_v37, %v4030_v37  ;;  %v1995_v37 = vadd.s32 6728, %v6360_v2  ;;  %vm3021_vm8 = vcmp.lt.s32.totalorder %v1994_v32, %v6363_v4 }
 0x674   : > { %v6065_v53 = vadd.f32 %v6064_v48, %v5041_v42  ;;  %v4031_v42 = vsel %vm3007_vm10, %v955_v33, 0.0  ;;  %v958_v48 = vld [vmem:[%s6355_s12 + $0x19e8] sm:$0xff] }
 0x675   : > { %v5055_v50 = vmul.f32 %v4031_v42, %v4031_v42  ;;  %v1996_v42 = vadd.s32 6736, %v6360_v2  ;;  %vm3022_vm9 = vcmp.lt.s32.totalorder %v1995_v37, %v6363_v4 }
 0x676   : > { %v6066_v58 = vadd.f32 %v6065_v53, %v5042_v47  ;;  %v4032_v47 = vsel %vm3008_vm11, %v956_v38, 0.0  ;;  %v959_v53 = vld [vmem:[%s6355_s12 + $0x19f0] sm:$0xff] }
 0x677   : > { %v5056_v55 = vmul.f32 %v4032_v47, %v4032_v47  ;;  %v1997_v47 = vadd.s32 6744, %v6360_v2  ;;  %vm3023_vm10 = vcmp.lt.s32.totalorder %v1996_v42, %v6363_v4 }
 0x678   : > { %v6067_v63 = vadd.f32 %v6066_v58, %v5043_v52  ;;  %v4033_v52 = vsel %vm3009_vm12, %v957_v43, 0.0  ;;  %v960_v58 = vld [vmem:[%s6355_s12 + $0x19f8] sm:$0xff] }
 0x679   : > { %v5057_v60 = vmul.f32 %v4033_v52, %v4033_v52  ;;  %v1998_v52 = vadd.s32 6752, %v6360_v2  ;;  %vm3024_vm11 = vcmp.lt.s32.totalorder %v1997_v47, %v6363_v4 }
 0x67a   : > { %v6068_v6 = vadd.f32 %v6067_v63, %v5044_v57  ;;  %v4034_v57 = vsel %vm3010_vm13, %v958_v48, 0.0  ;;  %v961_v63 = vld [vmem:[%s6355_s12 + $0x1a00] sm:$0xff] }
 0x67b   : > { %v5058_v1 = vmul.f32 %v4034_v57, %v4034_v57  ;;  %v1999_v57 = vadd.s32 6760, %v6360_v2  ;;  %vm3025_vm12 = vcmp.lt.s32.totalorder %v1998_v52, %v6363_v4 }
 0x67c   : > { %v6069_v11 = vadd.f32 %v6068_v6, %v5045_v62  ;;  %v4035_v62 = vsel %vm3011_vm14, %v959_v53, 0.0  ;;  %v962_v6 = vld [vmem:[%s6355_s12 + $0x1a08] sm:$0xff] }
 0x67d   : > { %v5059_v8 = vmul.f32 %v4035_v62, %v4035_v62  ;;  %v2000_v62 = vadd.s32 6768, %v6360_v2  ;;  %vm3026_vm13 = vcmp.lt.s32.totalorder %v1999_v57, %v6363_v4 }
 0x67e   : > { %v6070_v16 = vadd.f32 %v6069_v11, %v5046_v5  ;;  %v4036_v5 = vsel %vm3012_vm15, %v960_v58, 0.0  ;;  %v963_v11 = vld [vmem:[%s6355_s12 + $0x1a10] sm:$0xff] }
 0x67f   : > { %v5060_v13 = vmul.f32 %v4036_v5, %v4036_v5  ;;  %v2001_v5 = vadd.s32 6776, %v6360_v2  ;;  %vm3027_vm14 = vcmp.lt.s32.totalorder %v2000_v62, %v6363_v4 }
 0x680   : > { %v6071_v21 = vadd.f32 %v6070_v16, %v5047_v10  ;;  %v4037_v10 = vsel %vm3013_vm0, %v961_v63, 0.0  ;;  %v964_v16 = vld [vmem:[%s6355_s12 + $0x1a18] sm:$0xff] }
 0x681   : > { %v5061_v18 = vmul.f32 %v4037_v10, %v4037_v10  ;;  %v2002_v10 = vadd.s32 6784, %v6360_v2  ;;  %vm3028_vm15 = vcmp.lt.s32.totalorder %v2001_v5, %v6363_v4 }
 0x682   : > { %v6072_v26 = vadd.f32 %v6071_v21, %v5048_v15  ;;  %v4038_v15 = vsel %vm3014_vm1, %v962_v6, 0.0  ;;  %v965_v21 = vld [vmem:[%s6355_s12 + $0x1a20] sm:$0xff] }
 0x683   : > { %v5062_v23 = vmul.f32 %v4038_v15, %v4038_v15  ;;  %v2003_v15 = vadd.s32 6792, %v6360_v2  ;;  %vm3029_vm0 = vcmp.lt.s32.totalorder %v2002_v10, %v6363_v4 }
 0x684   : > { %v6073_v31 = vadd.f32 %v6072_v26, %v5049_v20  ;;  %v4039_v20 = vsel %vm3015_vm2, %v963_v11, 0.0  ;;  %v966_v26 = vld [vmem:[%s6355_s12 + $0x1a28] sm:$0xff] }
 0x685   : > { %v5063_v28 = vmul.f32 %v4039_v20, %v4039_v20  ;;  %v2004_v20 = vadd.s32 6800, %v6360_v2  ;;  %vm3030_vm1 = vcmp.lt.s32.totalorder %v2003_v15, %v6363_v4 }
 0x686   : > { %v6074_v36 = vadd.f32 %v6073_v31, %v5050_v25  ;;  %v4040_v25 = vsel %vm3016_vm3, %v964_v16, 0.0  ;;  %v967_v31 = vld [vmem:[%s6355_s12 + $0x1a30] sm:$0xff] }
 0x687   : > { %v5064_v33 = vmul.f32 %v4040_v25, %v4040_v25  ;;  %v2005_v25 = vadd.s32 6808, %v6360_v2  ;;  %vm3031_vm2 = vcmp.lt.s32.totalorder %v2004_v20, %v6363_v4 }
 0x688   : > { %v6075_v41 = vadd.f32 %v6074_v36, %v5051_v30  ;;  %v4041_v30 = vsel %vm3017_vm4, %v965_v21, 0.0  ;;  %v968_v36 = vld [vmem:[%s6355_s12 + $0x1a38] sm:$0xff] }
 0x689   : > { %v5065_v38 = vmul.f32 %v4041_v30, %v4041_v30  ;;  %v2006_v30 = vadd.s32 6816, %v6360_v2  ;;  %vm3032_vm3 = vcmp.lt.s32.totalorder %v2005_v25, %v6363_v4 }
 0x68a   : > { %v6076_v46 = vadd.f32 %v6075_v41, %v5052_v35  ;;  %v4042_v35 = vsel %vm3018_vm5, %v966_v26, 0.0  ;;  %v969_v41 = vld [vmem:[%s6355_s12 + $0x1a40] sm:$0xff] }
 0x68b   : > { %v5066_v43 = vmul.f32 %v4042_v35, %v4042_v35  ;;  %v2007_v35 = vadd.s32 6824, %v6360_v2  ;;  %vm3033_vm4 = vcmp.lt.s32.totalorder %v2006_v30, %v6363_v4 }
 0x68c   : > { %v6077_v51 = vadd.f32 %v6076_v46, %v5053_v40  ;;  %v4043_v40 = vsel %vm3019_vm6, %v967_v31, 0.0  ;;  %v970_v46 = vld [vmem:[%s6355_s12 + $0x1a48] sm:$0xff] }
 0x68d   : > { %v5067_v48 = vmul.f32 %v4043_v40, %v4043_v40  ;;  %v2008_v40 = vadd.s32 6832, %v6360_v2  ;;  %vm3034_vm5 = vcmp.lt.s32.totalorder %v2007_v35, %v6363_v4 }
 0x68e   : > { %v6078_v56 = vadd.f32 %v6077_v51, %v5054_v45  ;;  %v4044_v45 = vsel %vm3020_vm7, %v968_v36, 0.0  ;;  %v971_v51 = vld [vmem:[%s6355_s12 + $0x1a50] sm:$0xff] }
 0x68f   : > { %v5068_v53 = vmul.f32 %v4044_v45, %v4044_v45  ;;  %v2009_v45 = vadd.s32 6840, %v6360_v2  ;;  %vm3035_vm6 = vcmp.lt.s32.totalorder %v2008_v40, %v6363_v4 }
 0x690   : > { %v6079_v61 = vadd.f32 %v6078_v56, %v5055_v50  ;;  %v4045_v50 = vsel %vm3021_vm8, %v969_v41, 0.0  ;;  %v972_v56 = vld [vmem:[%s6355_s12 + $0x1a58] sm:$0xff] }
 0x691   : > { %v5069_v58 = vmul.f32 %v4045_v50, %v4045_v50  ;;  %v2010_v50 = vadd.s32 6848, %v6360_v2  ;;  %vm3036_vm7 = vcmp.lt.s32.totalorder %v2009_v45, %v6363_v4 }
 0x692   : > { %v6080_v3 = vadd.f32 %v6079_v61, %v5056_v55  ;;  %v4046_v55 = vsel %vm3022_vm9, %v970_v46, 0.0  ;;  %v973_v61 = vld [vmem:[%s6355_s12 + $0x1a60] sm:$0xff] }
 0x693   : > { %v5070_v63 = vmul.f32 %v4046_v55, %v4046_v55  ;;  %v2011_v55 = vadd.s32 6856, %v6360_v2  ;;  %vm3037_vm8 = vcmp.lt.s32.totalorder %v2010_v50, %v6363_v4 }
 0x694   : > { %v6081_v9 = vadd.f32 %v6080_v3, %v5057_v60  ;;  %v4047_v60 = vsel %vm3023_vm10, %v971_v51, 0.0  ;;  %v974_v3 = vld [vmem:[%s6355_s12 + $0x1a68] sm:$0xff] }
 0x695   : > { %v5071_v6 = vmul.f32 %v4047_v60, %v4047_v60  ;;  %v2012_v60 = vadd.s32 6864, %v6360_v2  ;;  %vm3038_vm9 = vcmp.lt.s32.totalorder %v2011_v55, %v6363_v4 }
 0x696   : > { %v6082_v14 = vadd.f32 %v6081_v9, %v5058_v1  ;;  %v4048_v1 = vsel %vm3024_vm11, %v972_v56, 0.0  ;;  %v975_v9 = vld [vmem:[%s6355_s12 + $0x1a70] sm:$0xff] }
 0x697   : > { %v5072_v11 = vmul.f32 %v4048_v1, %v4048_v1  ;;  %v2013_v1 = vadd.s32 6872, %v6360_v2  ;;  %vm3039_vm10 = vcmp.lt.s32.totalorder %v2012_v60, %v6363_v4 }
 0x698   : > { %v6083_v19 = vadd.f32 %v6082_v14, %v5059_v8  ;;  %v4049_v8 = vsel %vm3025_vm12, %v973_v61, 0.0  ;;  %v976_v14 = vld [vmem:[%s6355_s12 + $0x1a78] sm:$0xff] }
 0x699   : > { %v5073_v16 = vmul.f32 %v4049_v8, %v4049_v8  ;;  %v2014_v8 = vadd.s32 6880, %v6360_v2  ;;  %vm3040_vm11 = vcmp.lt.s32.totalorder %v2013_v1, %v6363_v4 }
 0x69a   : > { %v6084_v24 = vadd.f32 %v6083_v19, %v5060_v13  ;;  %v4050_v13 = vsel %vm3026_vm13, %v974_v3, 0.0  ;;  %v977_v19 = vld [vmem:[%s6355_s12 + $0x1a80] sm:$0xff] }
 0x69b   : > { %v5074_v21 = vmul.f32 %v4050_v13, %v4050_v13  ;;  %v2015_v13 = vadd.s32 6888, %v6360_v2  ;;  %vm3041_vm12 = vcmp.lt.s32.totalorder %v2014_v8, %v6363_v4 }
 0x69c   : > { %v6085_v29 = vadd.f32 %v6084_v24, %v5061_v18  ;;  %v4051_v18 = vsel %vm3027_vm14, %v975_v9, 0.0  ;;  %v978_v24 = vld [vmem:[%s6355_s12 + $0x1a88] sm:$0xff] }
 0x69d   : > { %v5075_v26 = vmul.f32 %v4051_v18, %v4051_v18  ;;  %v2016_v18 = vadd.s32 6896, %v6360_v2  ;;  %vm3042_vm13 = vcmp.lt.s32.totalorder %v2015_v13, %v6363_v4 }
 0x69e   : > { %v6086_v34 = vadd.f32 %v6085_v29, %v5062_v23  ;;  %v4052_v23 = vsel %vm3028_vm15, %v976_v14, 0.0  ;;  %v979_v29 = vld [vmem:[%s6355_s12 + $0x1a90] sm:$0xff] }
 0x69f   : > { %v5076_v31 = vmul.f32 %v4052_v23, %v4052_v23  ;;  %v2017_v23 = vadd.s32 6904, %v6360_v2  ;;  %vm3043_vm14 = vcmp.lt.s32.totalorder %v2016_v18, %v6363_v4 }
 0x6a0   : > { %v6087_v39 = vadd.f32 %v6086_v34, %v5063_v28  ;;  %v4053_v28 = vsel %vm3029_vm0, %v977_v19, 0.0  ;;  %v980_v34 = vld [vmem:[%s6355_s12 + $0x1a98] sm:$0xff] }
 0x6a1   : > { %v5077_v36 = vmul.f32 %v4053_v28, %v4053_v28  ;;  %v2018_v28 = vadd.s32 6912, %v6360_v2  ;;  %vm3044_vm15 = vcmp.lt.s32.totalorder %v2017_v23, %v6363_v4 }
 0x6a2   : > { %v6088_v44 = vadd.f32 %v6087_v39, %v5064_v33  ;;  %v4054_v33 = vsel %vm3030_vm1, %v978_v24, 0.0  ;;  %v981_v39 = vld [vmem:[%s6355_s12 + $0x1aa0] sm:$0xff] }
 0x6a3   : > { %v5078_v41 = vmul.f32 %v4054_v33, %v4054_v33  ;;  %v2019_v33 = vadd.s32 6920, %v6360_v2  ;;  %vm3045_vm0 = vcmp.lt.s32.totalorder %v2018_v28, %v6363_v4 }
 0x6a4   : > { %v6089_v49 = vadd.f32 %v6088_v44, %v5065_v38  ;;  %v4055_v38 = vsel %vm3031_vm2, %v979_v29, 0.0  ;;  %v982_v44 = vld [vmem:[%s6355_s12 + $0x1aa8] sm:$0xff] }
 0x6a5   : > { %v5079_v46 = vmul.f32 %v4055_v38, %v4055_v38  ;;  %v2020_v38 = vadd.s32 6928, %v6360_v2  ;;  %vm3046_vm1 = vcmp.lt.s32.totalorder %v2019_v33, %v6363_v4 }
 0x6a6   : > { %v6090_v54 = vadd.f32 %v6089_v49, %v5066_v43  ;;  %v4056_v43 = vsel %vm3032_vm3, %v980_v34, 0.0  ;;  %v983_v49 = vld [vmem:[%s6355_s12 + $0x1ab0] sm:$0xff] }
 0x6a7   : > { %v5080_v51 = vmul.f32 %v4056_v43, %v4056_v43  ;;  %v2021_v43 = vadd.s32 6936, %v6360_v2  ;;  %vm3047_vm2 = vcmp.lt.s32.totalorder %v2020_v38, %v6363_v4 }
 0x6a8   : > { %v6091_v59 = vadd.f32 %v6090_v54, %v5067_v48  ;;  %v4057_v48 = vsel %vm3033_vm4, %v981_v39, 0.0  ;;  %v984_v54 = vld [vmem:[%s6355_s12 + $0x1ab8] sm:$0xff] }
 0x6a9   : > { %v5081_v56 = vmul.f32 %v4057_v48, %v4057_v48  ;;  %v2022_v48 = vadd.s32 6944, %v6360_v2  ;;  %vm3048_vm3 = vcmp.lt.s32.totalorder %v2021_v43, %v6363_v4 }
 0x6aa   : > { %v6092_v0 = vadd.f32 %v6091_v59, %v5068_v53  ;;  %v4058_v53 = vsel %vm3034_vm5, %v982_v44, 0.0  ;;  %v985_v59 = vld [vmem:[%s6355_s12 + $0x1ac0] sm:$0xff] }
 0x6ab   : > { %v5082_v61 = vmul.f32 %v4058_v53, %v4058_v53  ;;  %v2023_v53 = vadd.s32 6952, %v6360_v2  ;;  %vm3049_vm4 = vcmp.lt.s32.totalorder %v2022_v48, %v6363_v4 }
 0x6ac   : > { %v6093_v7 = vadd.f32 %v6092_v0, %v5069_v58  ;;  %v4059_v58 = vsel %vm3035_vm6, %v983_v49, 0.0  ;;  %v986_v0 = vld [vmem:[%s6355_s12 + $0x1ac8] sm:$0xff] }
 0x6ad   : > { %v5083_v3 = vmul.f32 %v4059_v58, %v4059_v58  ;;  %v2024_v58 = vadd.s32 6960, %v6360_v2  ;;  %vm3050_vm5 = vcmp.lt.s32.totalorder %v2023_v53, %v6363_v4 }
 0x6ae   : > { %v6094_v12 = vadd.f32 %v6093_v7, %v5070_v63  ;;  %v4060_v63 = vsel %vm3036_vm7, %v984_v54, 0.0  ;;  %v987_v7 = vld [vmem:[%s6355_s12 + $0x1ad0] sm:$0xff] }
 0x6af   : > { %v5084_v9 = vmul.f32 %v4060_v63, %v4060_v63  ;;  %v2025_v63 = vadd.s32 6968, %v6360_v2  ;;  %vm3051_vm6 = vcmp.lt.s32.totalorder %v2024_v58, %v6363_v4 }
 0x6b0   : > { %v6095_v17 = vadd.f32 %v6094_v12, %v5071_v6  ;;  %v4061_v6 = vsel %vm3037_vm8, %v985_v59, 0.0  ;;  %v988_v12 = vld [vmem:[%s6355_s12 + $0x1ad8] sm:$0xff] }
 0x6b1   : > { %v5085_v14 = vmul.f32 %v4061_v6, %v4061_v6  ;;  %v2026_v6 = vadd.s32 6976, %v6360_v2  ;;  %vm3052_vm7 = vcmp.lt.s32.totalorder %v2025_v63, %v6363_v4 }
 0x6b2   : > { %v6096_v22 = vadd.f32 %v6095_v17, %v5072_v11  ;;  %v4062_v11 = vsel %vm3038_vm9, %v986_v0, 0.0  ;;  %v989_v17 = vld [vmem:[%s6355_s12 + $0x1ae0] sm:$0xff] }
 0x6b3   : > { %v5086_v19 = vmul.f32 %v4062_v11, %v4062_v11  ;;  %v2027_v11 = vadd.s32 6984, %v6360_v2  ;;  %vm3053_vm8 = vcmp.lt.s32.totalorder %v2026_v6, %v6363_v4 }
 0x6b4   : > { %v6097_v27 = vadd.f32 %v6096_v22, %v5073_v16  ;;  %v4063_v16 = vsel %vm3039_vm10, %v987_v7, 0.0  ;;  %v990_v22 = vld [vmem:[%s6355_s12 + $0x1ae8] sm:$0xff] }
 0x6b5   : > { %v5087_v24 = vmul.f32 %v4063_v16, %v4063_v16  ;;  %v2028_v16 = vadd.s32 6992, %v6360_v2  ;;  %vm3054_vm9 = vcmp.lt.s32.totalorder %v2027_v11, %v6363_v4 }
 0x6b6   : > { %v6098_v32 = vadd.f32 %v6097_v27, %v5074_v21  ;;  %v4064_v21 = vsel %vm3040_vm11, %v988_v12, 0.0  ;;  %v991_v27 = vld [vmem:[%s6355_s12 + $0x1af0] sm:$0xff] }
 0x6b7   : > { %v5088_v29 = vmul.f32 %v4064_v21, %v4064_v21  ;;  %v2029_v21 = vadd.s32 7000, %v6360_v2  ;;  %vm3055_vm10 = vcmp.lt.s32.totalorder %v2028_v16, %v6363_v4 }
 0x6b8   : > { %v6099_v37 = vadd.f32 %v6098_v32, %v5075_v26  ;;  %v4065_v26 = vsel %vm3041_vm12, %v989_v17, 0.0  ;;  %v992_v32 = vld [vmem:[%s6355_s12 + $0x1af8] sm:$0xff] }
 0x6b9   : > { %v5089_v34 = vmul.f32 %v4065_v26, %v4065_v26  ;;  %v2030_v26 = vadd.s32 7008, %v6360_v2  ;;  %vm3056_vm11 = vcmp.lt.s32.totalorder %v2029_v21, %v6363_v4 }
 0x6ba   : > { %v6100_v42 = vadd.f32 %v6099_v37, %v5076_v31  ;;  %v4066_v31 = vsel %vm3042_vm13, %v990_v22, 0.0  ;;  %v993_v37 = vld [vmem:[%s6355_s12 + $0x1b00] sm:$0xff] }
 0x6bb   : > { %v5090_v39 = vmul.f32 %v4066_v31, %v4066_v31  ;;  %v2031_v31 = vadd.s32 7016, %v6360_v2  ;;  %vm3057_vm12 = vcmp.lt.s32.totalorder %v2030_v26, %v6363_v4 }
 0x6bc   : > { %v6101_v47 = vadd.f32 %v6100_v42, %v5077_v36  ;;  %v4067_v36 = vsel %vm3043_vm14, %v991_v27, 0.0  ;;  %v994_v42 = vld [vmem:[%s6355_s12 + $0x1b08] sm:$0xff] }
 0x6bd   : > { %v5091_v44 = vmul.f32 %v4067_v36, %v4067_v36  ;;  %v2032_v36 = vadd.s32 7024, %v6360_v2  ;;  %vm3058_vm13 = vcmp.lt.s32.totalorder %v2031_v31, %v6363_v4 }
 0x6be   : > { %v6102_v52 = vadd.f32 %v6101_v47, %v5078_v41  ;;  %v4068_v41 = vsel %vm3044_vm15, %v992_v32, 0.0  ;;  %v995_v47 = vld [vmem:[%s6355_s12 + $0x1b10] sm:$0xff] }
 0x6bf   : > { %v5092_v49 = vmul.f32 %v4068_v41, %v4068_v41  ;;  %v2033_v41 = vadd.s32 7032, %v6360_v2  ;;  %vm3059_vm14 = vcmp.lt.s32.totalorder %v2032_v36, %v6363_v4 }
 0x6c0   : > { %v6103_v57 = vadd.f32 %v6102_v52, %v5079_v46  ;;  %v4069_v46 = vsel %vm3045_vm0, %v993_v37, 0.0  ;;  %v996_v52 = vld [vmem:[%s6355_s12 + $0x1b18] sm:$0xff] }
 0x6c1   : > { %v5093_v54 = vmul.f32 %v4069_v46, %v4069_v46  ;;  %v2034_v46 = vadd.s32 7040, %v6360_v2  ;;  %vm3060_vm15 = vcmp.lt.s32.totalorder %v2033_v41, %v6363_v4 }
 0x6c2   : > { %v6104_v62 = vadd.f32 %v6103_v57, %v5080_v51  ;;  %v4070_v51 = vsel %vm3046_vm1, %v994_v42, 0.0  ;;  %v997_v57 = vld [vmem:[%s6355_s12 + $0x1b20] sm:$0xff] }
 0x6c3   : > { %v5094_v59 = vmul.f32 %v4070_v51, %v4070_v51  ;;  %v2035_v51 = vadd.s32 7048, %v6360_v2  ;;  %vm3061_vm0 = vcmp.lt.s32.totalorder %v2034_v46, %v6363_v4 }
 0x6c4   : > { %v6105_v5 = vadd.f32 %v6104_v62, %v5081_v56  ;;  %v4071_v56 = vsel %vm3047_vm2, %v995_v47, 0.0  ;;  %v998_v62 = vld [vmem:[%s6355_s12 + $0x1b28] sm:$0xff] }
 0x6c5   : > { %v5095_v0 = vmul.f32 %v4071_v56, %v4071_v56  ;;  %v2036_v56 = vadd.s32 7056, %v6360_v2  ;;  %vm3062_vm1 = vcmp.lt.s32.totalorder %v2035_v51, %v6363_v4 }
 0x6c6   : > { %v6106_v10 = vadd.f32 %v6105_v5, %v5082_v61  ;;  %v4072_v61 = vsel %vm3048_vm3, %v996_v52, 0.0  ;;  %v999_v5 = vld [vmem:[%s6355_s12 + $0x1b30] sm:$0xff] }
 0x6c7   : > { %v5096_v7 = vmul.f32 %v4072_v61, %v4072_v61  ;;  %v2037_v61 = vadd.s32 7064, %v6360_v2  ;;  %vm3063_vm2 = vcmp.lt.s32.totalorder %v2036_v56, %v6363_v4 }
 0x6c8   : > { %v6107_v15 = vadd.f32 %v6106_v10, %v5083_v3  ;;  %v4073_v3 = vsel %vm3049_vm4, %v997_v57, 0.0  ;;  %v1000_v10 = vld [vmem:[%s6355_s12 + $0x1b38] sm:$0xff] }
 0x6c9   : > { %v5097_v12 = vmul.f32 %v4073_v3, %v4073_v3  ;;  %v2038_v3 = vadd.s32 7072, %v6360_v2  ;;  %vm3064_vm3 = vcmp.lt.s32.totalorder %v2037_v61, %v6363_v4 }
 0x6ca   : > { %v6108_v20 = vadd.f32 %v6107_v15, %v5084_v9  ;;  %v4074_v9 = vsel %vm3050_vm5, %v998_v62, 0.0  ;;  %v1001_v15 = vld [vmem:[%s6355_s12 + $0x1b40] sm:$0xff] }
 0x6cb   : > { %v5098_v17 = vmul.f32 %v4074_v9, %v4074_v9  ;;  %v2039_v9 = vadd.s32 7080, %v6360_v2  ;;  %vm3065_vm4 = vcmp.lt.s32.totalorder %v2038_v3, %v6363_v4 }
 0x6cc   : > { %v6109_v25 = vadd.f32 %v6108_v20, %v5085_v14  ;;  %v4075_v14 = vsel %vm3051_vm6, %v999_v5, 0.0  ;;  %v1002_v20 = vld [vmem:[%s6355_s12 + $0x1b48] sm:$0xff] }
 0x6cd   : > { %v5099_v22 = vmul.f32 %v4075_v14, %v4075_v14  ;;  %v2040_v14 = vadd.s32 7088, %v6360_v2  ;;  %vm3066_vm5 = vcmp.lt.s32.totalorder %v2039_v9, %v6363_v4 }
 0x6ce   : > { %v6110_v30 = vadd.f32 %v6109_v25, %v5086_v19  ;;  %v4076_v19 = vsel %vm3052_vm7, %v1000_v10, 0.0  ;;  %v1003_v25 = vld [vmem:[%s6355_s12 + $0x1b50] sm:$0xff] }
 0x6cf   : > { %v5100_v27 = vmul.f32 %v4076_v19, %v4076_v19  ;;  %v2041_v19 = vadd.s32 7096, %v6360_v2  ;;  %vm3067_vm6 = vcmp.lt.s32.totalorder %v2040_v14, %v6363_v4 }
 0x6d0   : > { %v6111_v35 = vadd.f32 %v6110_v30, %v5087_v24  ;;  %v4077_v24 = vsel %vm3053_vm8, %v1001_v15, 0.0  ;;  %v1004_v30 = vld [vmem:[%s6355_s12 + $0x1b58] sm:$0xff] }
 0x6d1   : > { %v5101_v32 = vmul.f32 %v4077_v24, %v4077_v24  ;;  %v2042_v24 = vadd.s32 7104, %v6360_v2  ;;  %vm3068_vm7 = vcmp.lt.s32.totalorder %v2041_v19, %v6363_v4 }
 0x6d2   : > { %v6112_v40 = vadd.f32 %v6111_v35, %v5088_v29  ;;  %v4078_v29 = vsel %vm3054_vm9, %v1002_v20, 0.0  ;;  %v1005_v35 = vld [vmem:[%s6355_s12 + $0x1b60] sm:$0xff] }
 0x6d3   : > { %v5102_v37 = vmul.f32 %v4078_v29, %v4078_v29  ;;  %v2043_v29 = vadd.s32 7112, %v6360_v2  ;;  %vm3069_vm8 = vcmp.lt.s32.totalorder %v2042_v24, %v6363_v4 }
 0x6d4   : > { %v6113_v45 = vadd.f32 %v6112_v40, %v5089_v34  ;;  %v4079_v34 = vsel %vm3055_vm10, %v1003_v25, 0.0  ;;  %v1006_v40 = vld [vmem:[%s6355_s12 + $0x1b68] sm:$0xff] }
 0x6d5   : > { %v5103_v42 = vmul.f32 %v4079_v34, %v4079_v34  ;;  %v2044_v34 = vadd.s32 7120, %v6360_v2  ;;  %vm3070_vm9 = vcmp.lt.s32.totalorder %v2043_v29, %v6363_v4 }
 0x6d6   : > { %v6114_v50 = vadd.f32 %v6113_v45, %v5090_v39  ;;  %v4080_v39 = vsel %vm3056_vm11, %v1004_v30, 0.0  ;;  %v1007_v45 = vld [vmem:[%s6355_s12 + $0x1b70] sm:$0xff] }
 0x6d7   : > { %v5104_v47 = vmul.f32 %v4080_v39, %v4080_v39  ;;  %v2045_v39 = vadd.s32 7128, %v6360_v2  ;;  %vm3071_vm10 = vcmp.lt.s32.totalorder %v2044_v34, %v6363_v4 }
 0x6d8   : > { %v6115_v55 = vadd.f32 %v6114_v50, %v5091_v44  ;;  %v4081_v44 = vsel %vm3057_vm12, %v1005_v35, 0.0  ;;  %v1008_v50 = vld [vmem:[%s6355_s12 + $0x1b78] sm:$0xff] }
 0x6d9   : > { %v5105_v52 = vmul.f32 %v4081_v44, %v4081_v44  ;;  %v2046_v44 = vadd.s32 7136, %v6360_v2  ;;  %vm3072_vm11 = vcmp.lt.s32.totalorder %v2045_v39, %v6363_v4 }
 0x6da   : > { %v6116_v60 = vadd.f32 %v6115_v55, %v5092_v49  ;;  %v4082_v49 = vsel %vm3058_vm13, %v1006_v40, 0.0  ;;  %v1009_v55 = vld [vmem:[%s6355_s12 + $0x1b80] sm:$0xff] }
 0x6db   : > { %v5106_v57 = vmul.f32 %v4082_v49, %v4082_v49  ;;  %v2047_v49 = vadd.s32 7144, %v6360_v2  ;;  %vm3073_vm12 = vcmp.lt.s32.totalorder %v2046_v44, %v6363_v4 }
 0x6dc   : > { %v6117_v1 = vadd.f32 %v6116_v60, %v5093_v54  ;;  %v4083_v54 = vsel %vm3059_vm14, %v1007_v45, 0.0  ;;  %v1010_v60 = vld [vmem:[%s6355_s12 + $0x1b88] sm:$0xff] }
 0x6dd   : > { %v5107_v62 = vmul.f32 %v4083_v54, %v4083_v54  ;;  %v2048_v54 = vadd.s32 7152, %v6360_v2  ;;  %vm3074_vm13 = vcmp.lt.s32.totalorder %v2047_v49, %v6363_v4 }
 0x6de   : > { %v6118_v8 = vadd.f32 %v6117_v1, %v5094_v59  ;;  %v4084_v59 = vsel %vm3060_vm15, %v1008_v50, 0.0  ;;  %v1011_v1 = vld [vmem:[%s6355_s12 + $0x1b90] sm:$0xff] }
 0x6df   : > { %v5108_v5 = vmul.f32 %v4084_v59, %v4084_v59  ;;  %v2049_v59 = vadd.s32 7160, %v6360_v2  ;;  %vm3075_vm14 = vcmp.lt.s32.totalorder %v2048_v54, %v6363_v4 }
 0x6e0   : > { %v6119_v13 = vadd.f32 %v6118_v8, %v5095_v0  ;;  %v4085_v0 = vsel %vm3061_vm0, %v1009_v55, 0.0  ;;  %v1012_v8 = vld [vmem:[%s6355_s12 + $0x1b98] sm:$0xff] }
 0x6e1   : > { %v5109_v10 = vmul.f32 %v4085_v0, %v4085_v0  ;;  %v2050_v0 = vadd.s32 7168, %v6360_v2  ;;  %vm3076_vm15 = vcmp.lt.s32.totalorder %v2049_v59, %v6363_v4 }
 0x6e2   : > { %v6120_v18 = vadd.f32 %v6119_v13, %v5096_v7  ;;  %v4086_v7 = vsel %vm3062_vm1, %v1010_v60, 0.0  ;;  %v1013_v13 = vld [vmem:[%s6355_s12 + $0x1ba0] sm:$0xff] }
 0x6e3   : > { %v5110_v15 = vmul.f32 %v4086_v7, %v4086_v7  ;;  %v2051_v7 = vadd.s32 7176, %v6360_v2  ;;  %vm3077_vm0 = vcmp.lt.s32.totalorder %v2050_v0, %v6363_v4 }
 0x6e4   : > { %v6121_v23 = vadd.f32 %v6120_v18, %v5097_v12  ;;  %v4087_v12 = vsel %vm3063_vm2, %v1011_v1, 0.0  ;;  %v1014_v18 = vld [vmem:[%s6355_s12 + $0x1ba8] sm:$0xff] }
 0x6e5   : > { %v5111_v20 = vmul.f32 %v4087_v12, %v4087_v12  ;;  %v2052_v12 = vadd.s32 7184, %v6360_v2  ;;  %vm3078_vm1 = vcmp.lt.s32.totalorder %v2051_v7, %v6363_v4 }
 0x6e6   : > { %v6122_v28 = vadd.f32 %v6121_v23, %v5098_v17  ;;  %v4088_v17 = vsel %vm3064_vm3, %v1012_v8, 0.0  ;;  %v1015_v23 = vld [vmem:[%s6355_s12 + $0x1bb0] sm:$0xff] }
 0x6e7   : > { %v5112_v25 = vmul.f32 %v4088_v17, %v4088_v17  ;;  %v2053_v17 = vadd.s32 7192, %v6360_v2  ;;  %vm3079_vm2 = vcmp.lt.s32.totalorder %v2052_v12, %v6363_v4 }
 0x6e8   : > { %v6123_v33 = vadd.f32 %v6122_v28, %v5099_v22  ;;  %v4089_v22 = vsel %vm3065_vm4, %v1013_v13, 0.0  ;;  %v1016_v28 = vld [vmem:[%s6355_s12 + $0x1bb8] sm:$0xff] }
 0x6e9   : > { %v5113_v30 = vmul.f32 %v4089_v22, %v4089_v22  ;;  %v2054_v22 = vadd.s32 7200, %v6360_v2  ;;  %vm3080_vm3 = vcmp.lt.s32.totalorder %v2053_v17, %v6363_v4 }
 0x6ea   : > { %v6124_v38 = vadd.f32 %v6123_v33, %v5100_v27  ;;  %v4090_v27 = vsel %vm3066_vm5, %v1014_v18, 0.0  ;;  %v1017_v33 = vld [vmem:[%s6355_s12 + $0x1bc0] sm:$0xff] }
 0x6eb   : > { %v5114_v35 = vmul.f32 %v4090_v27, %v4090_v27  ;;  %v2055_v27 = vadd.s32 7208, %v6360_v2  ;;  %vm3081_vm4 = vcmp.lt.s32.totalorder %v2054_v22, %v6363_v4 }
 0x6ec   : > { %v6125_v43 = vadd.f32 %v6124_v38, %v5101_v32  ;;  %v4091_v32 = vsel %vm3067_vm6, %v1015_v23, 0.0  ;;  %v1018_v38 = vld [vmem:[%s6355_s12 + $0x1bc8] sm:$0xff] }
 0x6ed   : > { %v5115_v40 = vmul.f32 %v4091_v32, %v4091_v32  ;;  %v2056_v32 = vadd.s32 7216, %v6360_v2  ;;  %vm3082_vm5 = vcmp.lt.s32.totalorder %v2055_v27, %v6363_v4 }
 0x6ee   : > { %v6126_v48 = vadd.f32 %v6125_v43, %v5102_v37  ;;  %v4092_v37 = vsel %vm3068_vm7, %v1016_v28, 0.0  ;;  %v1019_v43 = vld [vmem:[%s6355_s12 + $0x1bd0] sm:$0xff] }
 0x6ef   : > { %v5116_v45 = vmul.f32 %v4092_v37, %v4092_v37  ;;  %v2057_v37 = vadd.s32 7224, %v6360_v2  ;;  %vm3083_vm6 = vcmp.lt.s32.totalorder %v2056_v32, %v6363_v4 }
 0x6f0   : > { %v6127_v53 = vadd.f32 %v6126_v48, %v5103_v42  ;;  %v4093_v42 = vsel %vm3069_vm8, %v1017_v33, 0.0  ;;  %v1020_v48 = vld [vmem:[%s6355_s12 + $0x1bd8] sm:$0xff] }
 0x6f1   : > { %v5117_v50 = vmul.f32 %v4093_v42, %v4093_v42  ;;  %v2058_v42 = vadd.s32 7232, %v6360_v2  ;;  %vm3084_vm7 = vcmp.lt.s32.totalorder %v2057_v37, %v6363_v4 }
 0x6f2   : > { %v6128_v58 = vadd.f32 %v6127_v53, %v5104_v47  ;;  %v4094_v47 = vsel %vm3070_vm9, %v1018_v38, 0.0  ;;  %v1021_v53 = vld [vmem:[%s6355_s12 + $0x1be0] sm:$0xff] }
 0x6f3   : > { %v5118_v55 = vmul.f32 %v4094_v47, %v4094_v47  ;;  %v2059_v47 = vadd.s32 7240, %v6360_v2  ;;  %vm3085_vm8 = vcmp.lt.s32.totalorder %v2058_v42, %v6363_v4 }
 0x6f4   : > { %v6129_v63 = vadd.f32 %v6128_v58, %v5105_v52  ;;  %v4095_v52 = vsel %vm3071_vm10, %v1019_v43, 0.0  ;;  %v1022_v58 = vld [vmem:[%s6355_s12 + $0x1be8] sm:$0xff] }
 0x6f5   : > { %v5119_v60 = vmul.f32 %v4095_v52, %v4095_v52  ;;  %v2060_v52 = vadd.s32 7248, %v6360_v2  ;;  %vm3086_vm9 = vcmp.lt.s32.totalorder %v2059_v47, %v6363_v4 }
 0x6f6   : > { %v6130_v6 = vadd.f32 %v6129_v63, %v5106_v57  ;;  %v4096_v57 = vsel %vm3072_vm11, %v1020_v48, 0.0  ;;  %v1023_v63 = vld [vmem:[%s6355_s12 + $0x1bf0] sm:$0xff] }
 0x6f7   : > { %v5120_v1 = vmul.f32 %v4096_v57, %v4096_v57  ;;  %v2061_v57 = vadd.s32 7256, %v6360_v2  ;;  %vm3087_vm10 = vcmp.lt.s32.totalorder %v2060_v52, %v6363_v4 }
 0x6f8   : > { %v6131_v11 = vadd.f32 %v6130_v6, %v5107_v62  ;;  %v4097_v62 = vsel %vm3073_vm12, %v1021_v53, 0.0  ;;  %v1024_v6 = vld [vmem:[%s6355_s12 + $0x1bf8] sm:$0xff] }
 0x6f9   : > { %v5121_v8 = vmul.f32 %v4097_v62, %v4097_v62  ;;  %v2062_v62 = vadd.s32 7264, %v6360_v2  ;;  %vm3088_vm11 = vcmp.lt.s32.totalorder %v2061_v57, %v6363_v4 }
 0x6fa   : > { %v6132_v16 = vadd.f32 %v6131_v11, %v5108_v5  ;;  %v4098_v5 = vsel %vm3074_vm13, %v1022_v58, 0.0  ;;  %v1025_v11 = vld [vmem:[%s6355_s12 + $0x1c00] sm:$0xff] }
 0x6fb   : > { %v5122_v13 = vmul.f32 %v4098_v5, %v4098_v5  ;;  %v2063_v5 = vadd.s32 7272, %v6360_v2  ;;  %vm3089_vm12 = vcmp.lt.s32.totalorder %v2062_v62, %v6363_v4 }
 0x6fc   : > { %v6133_v21 = vadd.f32 %v6132_v16, %v5109_v10  ;;  %v4099_v10 = vsel %vm3075_vm14, %v1023_v63, 0.0  ;;  %v1026_v16 = vld [vmem:[%s6355_s12 + $0x1c08] sm:$0xff] }
 0x6fd   : > { %v5123_v18 = vmul.f32 %v4099_v10, %v4099_v10  ;;  %v2064_v10 = vadd.s32 7280, %v6360_v2  ;;  %vm3090_vm13 = vcmp.lt.s32.totalorder %v2063_v5, %v6363_v4 }
 0x6fe   : > { %v6134_v26 = vadd.f32 %v6133_v21, %v5110_v15  ;;  %v4100_v15 = vsel %vm3076_vm15, %v1024_v6, 0.0  ;;  %v1027_v21 = vld [vmem:[%s6355_s12 + $0x1c10] sm:$0xff] }
 0x6ff   : > { %v5124_v23 = vmul.f32 %v4100_v15, %v4100_v15  ;;  %v2065_v15 = vadd.s32 7288, %v6360_v2  ;;  %vm3091_vm14 = vcmp.lt.s32.totalorder %v2064_v10, %v6363_v4 }
 0x700   : > { %v6135_v31 = vadd.f32 %v6134_v26, %v5111_v20  ;;  %v4101_v20 = vsel %vm3077_vm0, %v1025_v11, 0.0  ;;  %v1028_v26 = vld [vmem:[%s6355_s12 + $0x1c18] sm:$0xff] }
 0x701   : > { %v5125_v28 = vmul.f32 %v4101_v20, %v4101_v20  ;;  %v2066_v20 = vadd.s32 7296, %v6360_v2  ;;  %vm3092_vm15 = vcmp.lt.s32.totalorder %v2065_v15, %v6363_v4 }
 0x702   : > { %v6136_v36 = vadd.f32 %v6135_v31, %v5112_v25  ;;  %v4102_v25 = vsel %vm3078_vm1, %v1026_v16, 0.0  ;;  %v1029_v31 = vld [vmem:[%s6355_s12 + $0x1c20] sm:$0xff] }
 0x703   : > { %v5126_v33 = vmul.f32 %v4102_v25, %v4102_v25  ;;  %v2067_v25 = vadd.s32 7304, %v6360_v2  ;;  %vm3093_vm0 = vcmp.lt.s32.totalorder %v2066_v20, %v6363_v4 }
 0x704   : > { %v6137_v41 = vadd.f32 %v6136_v36, %v5113_v30  ;;  %v4103_v30 = vsel %vm3079_vm2, %v1027_v21, 0.0  ;;  %v1030_v36 = vld [vmem:[%s6355_s12 + $0x1c28] sm:$0xff] }
 0x705   : > { %v5127_v38 = vmul.f32 %v4103_v30, %v4103_v30  ;;  %v2068_v30 = vadd.s32 7312, %v6360_v2  ;;  %vm3094_vm1 = vcmp.lt.s32.totalorder %v2067_v25, %v6363_v4 }
 0x706   : > { %v6138_v46 = vadd.f32 %v6137_v41, %v5114_v35  ;;  %v4104_v35 = vsel %vm3080_vm3, %v1028_v26, 0.0  ;;  %v1031_v41 = vld [vmem:[%s6355_s12 + $0x1c30] sm:$0xff] }
 0x707   : > { %v5128_v43 = vmul.f32 %v4104_v35, %v4104_v35  ;;  %v2069_v35 = vadd.s32 7320, %v6360_v2  ;;  %vm3095_vm2 = vcmp.lt.s32.totalorder %v2068_v30, %v6363_v4 }
 0x708   : > { %v6139_v51 = vadd.f32 %v6138_v46, %v5115_v40  ;;  %v4105_v40 = vsel %vm3081_vm4, %v1029_v31, 0.0  ;;  %v1032_v46 = vld [vmem:[%s6355_s12 + $0x1c38] sm:$0xff] }
 0x709   : > { %v5129_v48 = vmul.f32 %v4105_v40, %v4105_v40  ;;  %v2070_v40 = vadd.s32 7328, %v6360_v2  ;;  %vm3096_vm3 = vcmp.lt.s32.totalorder %v2069_v35, %v6363_v4 }
 0x70a   : > { %v6140_v56 = vadd.f32 %v6139_v51, %v5116_v45  ;;  %v4106_v45 = vsel %vm3082_vm5, %v1030_v36, 0.0  ;;  %v1033_v51 = vld [vmem:[%s6355_s12 + $0x1c40] sm:$0xff] }
 0x70b   : > { %v5130_v53 = vmul.f32 %v4106_v45, %v4106_v45  ;;  %v2071_v45 = vadd.s32 7336, %v6360_v2  ;;  %vm3097_vm4 = vcmp.lt.s32.totalorder %v2070_v40, %v6363_v4 }
 0x70c   : > { %v6141_v61 = vadd.f32 %v6140_v56, %v5117_v50  ;;  %v4107_v50 = vsel %vm3083_vm6, %v1031_v41, 0.0  ;;  %v1034_v56 = vld [vmem:[%s6355_s12 + $0x1c48] sm:$0xff] }
 0x70d   : > { %v5131_v58 = vmul.f32 %v4107_v50, %v4107_v50  ;;  %v2072_v50 = vadd.s32 7344, %v6360_v2  ;;  %vm3098_vm5 = vcmp.lt.s32.totalorder %v2071_v45, %v6363_v4 }
 0x70e   : > { %v6142_v3 = vadd.f32 %v6141_v61, %v5118_v55  ;;  %v4108_v55 = vsel %vm3084_vm7, %v1032_v46, 0.0  ;;  %v1035_v61 = vld [vmem:[%s6355_s12 + $0x1c50] sm:$0xff] }
 0x70f   : > { %v5132_v63 = vmul.f32 %v4108_v55, %v4108_v55  ;;  %v2073_v55 = vadd.s32 7352, %v6360_v2  ;;  %vm3099_vm6 = vcmp.lt.s32.totalorder %v2072_v50, %v6363_v4 }
 0x710   : > { %v6143_v9 = vadd.f32 %v6142_v3, %v5119_v60  ;;  %v4109_v60 = vsel %vm3085_vm8, %v1033_v51, 0.0  ;;  %v1036_v3 = vld [vmem:[%s6355_s12 + $0x1c58] sm:$0xff] }
 0x711   : > { %v5133_v6 = vmul.f32 %v4109_v60, %v4109_v60  ;;  %v2074_v60 = vadd.s32 7360, %v6360_v2  ;;  %vm3100_vm7 = vcmp.lt.s32.totalorder %v2073_v55, %v6363_v4 }
 0x712   : > { %v6144_v14 = vadd.f32 %v6143_v9, %v5120_v1  ;;  %v4110_v1 = vsel %vm3086_vm9, %v1034_v56, 0.0  ;;  %v1037_v9 = vld [vmem:[%s6355_s12 + $0x1c60] sm:$0xff] }
 0x713   : > { %v5134_v11 = vmul.f32 %v4110_v1, %v4110_v1  ;;  %v2075_v1 = vadd.s32 7368, %v6360_v2  ;;  %vm3101_vm8 = vcmp.lt.s32.totalorder %v2074_v60, %v6363_v4 }
 0x714   : > { %v6145_v19 = vadd.f32 %v6144_v14, %v5121_v8  ;;  %v4111_v8 = vsel %vm3087_vm10, %v1035_v61, 0.0  ;;  %v1038_v14 = vld [vmem:[%s6355_s12 + $0x1c68] sm:$0xff] }
 0x715   : > { %v5135_v16 = vmul.f32 %v4111_v8, %v4111_v8  ;;  %v2076_v8 = vadd.s32 7376, %v6360_v2  ;;  %vm3102_vm9 = vcmp.lt.s32.totalorder %v2075_v1, %v6363_v4 }
 0x716   : > { %v6146_v24 = vadd.f32 %v6145_v19, %v5122_v13  ;;  %v4112_v13 = vsel %vm3088_vm11, %v1036_v3, 0.0  ;;  %v1039_v19 = vld [vmem:[%s6355_s12 + $0x1c70] sm:$0xff] }
 0x717   : > { %v5136_v21 = vmul.f32 %v4112_v13, %v4112_v13  ;;  %v2077_v13 = vadd.s32 7384, %v6360_v2  ;;  %vm3103_vm10 = vcmp.lt.s32.totalorder %v2076_v8, %v6363_v4 }
 0x718   : > { %v6147_v29 = vadd.f32 %v6146_v24, %v5123_v18  ;;  %v4113_v18 = vsel %vm3089_vm12, %v1037_v9, 0.0  ;;  %v1040_v24 = vld [vmem:[%s6355_s12 + $0x1c78] sm:$0xff] }
 0x719   : > { %v5137_v26 = vmul.f32 %v4113_v18, %v4113_v18  ;;  %v2078_v18 = vadd.s32 7392, %v6360_v2  ;;  %vm3104_vm11 = vcmp.lt.s32.totalorder %v2077_v13, %v6363_v4 }
 0x71a   : > { %v6148_v34 = vadd.f32 %v6147_v29, %v5124_v23  ;;  %v4114_v23 = vsel %vm3090_vm13, %v1038_v14, 0.0  ;;  %v1041_v29 = vld [vmem:[%s6355_s12 + $0x1c80] sm:$0xff] }
 0x71b   : > { %v5138_v31 = vmul.f32 %v4114_v23, %v4114_v23  ;;  %v2079_v23 = vadd.s32 7400, %v6360_v2  ;;  %vm3105_vm12 = vcmp.lt.s32.totalorder %v2078_v18, %v6363_v4 }
 0x71c   : > { %v6149_v39 = vadd.f32 %v6148_v34, %v5125_v28  ;;  %v4115_v28 = vsel %vm3091_vm14, %v1039_v19, 0.0  ;;  %v1042_v34 = vld [vmem:[%s6355_s12 + $0x1c88] sm:$0xff] }
 0x71d   : > { %v5139_v36 = vmul.f32 %v4115_v28, %v4115_v28  ;;  %v2080_v28 = vadd.s32 7408, %v6360_v2  ;;  %vm3106_vm13 = vcmp.lt.s32.totalorder %v2079_v23, %v6363_v4 }
 0x71e   : > { %v6150_v44 = vadd.f32 %v6149_v39, %v5126_v33  ;;  %v4116_v33 = vsel %vm3092_vm15, %v1040_v24, 0.0  ;;  %v1043_v39 = vld [vmem:[%s6355_s12 + $0x1c90] sm:$0xff] }
 0x71f   : > { %v5140_v41 = vmul.f32 %v4116_v33, %v4116_v33  ;;  %v2081_v33 = vadd.s32 7416, %v6360_v2  ;;  %vm3107_vm14 = vcmp.lt.s32.totalorder %v2080_v28, %v6363_v4 }
 0x720   : > { %v6151_v49 = vadd.f32 %v6150_v44, %v5127_v38  ;;  %v4117_v38 = vsel %vm3093_vm0, %v1041_v29, 0.0  ;;  %v1044_v44 = vld [vmem:[%s6355_s12 + $0x1c98] sm:$0xff] }
 0x721   : > { %v5141_v46 = vmul.f32 %v4117_v38, %v4117_v38  ;;  %v2082_v38 = vadd.s32 7424, %v6360_v2  ;;  %vm3108_vm15 = vcmp.lt.s32.totalorder %v2081_v33, %v6363_v4 }
 0x722   : > { %v6152_v54 = vadd.f32 %v6151_v49, %v5128_v43  ;;  %v4118_v43 = vsel %vm3094_vm1, %v1042_v34, 0.0  ;;  %v1045_v49 = vld [vmem:[%s6355_s12 + $0x1ca0] sm:$0xff] }
 0x723   : > { %v5142_v51 = vmul.f32 %v4118_v43, %v4118_v43  ;;  %v2083_v43 = vadd.s32 7432, %v6360_v2  ;;  %vm3109_vm0 = vcmp.lt.s32.totalorder %v2082_v38, %v6363_v4 }
 0x724   : > { %v6153_v59 = vadd.f32 %v6152_v54, %v5129_v48  ;;  %v4119_v48 = vsel %vm3095_vm2, %v1043_v39, 0.0  ;;  %v1046_v54 = vld [vmem:[%s6355_s12 + $0x1ca8] sm:$0xff] }
 0x725   : > { %v5143_v56 = vmul.f32 %v4119_v48, %v4119_v48  ;;  %v2084_v48 = vadd.s32 7440, %v6360_v2  ;;  %vm3110_vm1 = vcmp.lt.s32.totalorder %v2083_v43, %v6363_v4 }
 0x726   : > { %v6154_v0 = vadd.f32 %v6153_v59, %v5130_v53  ;;  %v4120_v53 = vsel %vm3096_vm3, %v1044_v44, 0.0  ;;  %v1047_v59 = vld [vmem:[%s6355_s12 + $0x1cb0] sm:$0xff] }
 0x727   : > { %v5144_v61 = vmul.f32 %v4120_v53, %v4120_v53  ;;  %v2085_v53 = vadd.s32 7448, %v6360_v2  ;;  %vm3111_vm2 = vcmp.lt.s32.totalorder %v2084_v48, %v6363_v4 }
 0x728   : > { %v6155_v7 = vadd.f32 %v6154_v0, %v5131_v58  ;;  %v4121_v58 = vsel %vm3097_vm4, %v1045_v49, 0.0  ;;  %v1048_v0 = vld [vmem:[%s6355_s12 + $0x1cb8] sm:$0xff] }
 0x729   : > { %v5145_v3 = vmul.f32 %v4121_v58, %v4121_v58  ;;  %v2086_v58 = vadd.s32 7456, %v6360_v2  ;;  %vm3112_vm3 = vcmp.lt.s32.totalorder %v2085_v53, %v6363_v4 }
 0x72a   : > { %v6156_v12 = vadd.f32 %v6155_v7, %v5132_v63  ;;  %v4122_v63 = vsel %vm3098_vm5, %v1046_v54, 0.0  ;;  %v1049_v7 = vld [vmem:[%s6355_s12 + $0x1cc0] sm:$0xff] }
 0x72b   : > { %v5146_v9 = vmul.f32 %v4122_v63, %v4122_v63  ;;  %v2087_v63 = vadd.s32 7464, %v6360_v2  ;;  %vm3113_vm4 = vcmp.lt.s32.totalorder %v2086_v58, %v6363_v4 }
 0x72c   : > { %v6157_v17 = vadd.f32 %v6156_v12, %v5133_v6  ;;  %v4123_v6 = vsel %vm3099_vm6, %v1047_v59, 0.0  ;;  %v1050_v12 = vld [vmem:[%s6355_s12 + $0x1cc8] sm:$0xff] }
 0x72d   : > { %v5147_v14 = vmul.f32 %v4123_v6, %v4123_v6  ;;  %v2088_v6 = vadd.s32 7472, %v6360_v2  ;;  %vm3114_vm5 = vcmp.lt.s32.totalorder %v2087_v63, %v6363_v4 }
 0x72e   : > { %v6158_v22 = vadd.f32 %v6157_v17, %v5134_v11  ;;  %v4124_v11 = vsel %vm3100_vm7, %v1048_v0, 0.0  ;;  %v1051_v17 = vld [vmem:[%s6355_s12 + $0x1cd0] sm:$0xff] }
 0x72f   : > { %v5148_v19 = vmul.f32 %v4124_v11, %v4124_v11  ;;  %v2089_v11 = vadd.s32 7480, %v6360_v2  ;;  %vm3115_vm6 = vcmp.lt.s32.totalorder %v2088_v6, %v6363_v4 }
 0x730   : > { %v6159_v27 = vadd.f32 %v6158_v22, %v5135_v16  ;;  %v4125_v16 = vsel %vm3101_vm8, %v1049_v7, 0.0  ;;  %v1052_v22 = vld [vmem:[%s6355_s12 + $0x1cd8] sm:$0xff] }
 0x731   : > { %v5149_v24 = vmul.f32 %v4125_v16, %v4125_v16  ;;  %v2090_v16 = vadd.s32 7488, %v6360_v2  ;;  %vm3116_vm7 = vcmp.lt.s32.totalorder %v2089_v11, %v6363_v4 }
 0x732   : > { %v6160_v32 = vadd.f32 %v6159_v27, %v5136_v21  ;;  %v4126_v21 = vsel %vm3102_vm9, %v1050_v12, 0.0  ;;  %v1053_v27 = vld [vmem:[%s6355_s12 + $0x1ce0] sm:$0xff] }
 0x733   : > { %v5150_v29 = vmul.f32 %v4126_v21, %v4126_v21  ;;  %v2091_v21 = vadd.s32 7496, %v6360_v2  ;;  %vm3117_vm8 = vcmp.lt.s32.totalorder %v2090_v16, %v6363_v4 }
 0x734   : > { %v6161_v37 = vadd.f32 %v6160_v32, %v5137_v26  ;;  %v4127_v26 = vsel %vm3103_vm10, %v1051_v17, 0.0  ;;  %v1054_v32 = vld [vmem:[%s6355_s12 + $0x1ce8] sm:$0xff] }
 0x735   : > { %v5151_v34 = vmul.f32 %v4127_v26, %v4127_v26  ;;  %v2092_v26 = vadd.s32 7504, %v6360_v2  ;;  %vm3118_vm9 = vcmp.lt.s32.totalorder %v2091_v21, %v6363_v4 }
 0x736   : > { %v6162_v42 = vadd.f32 %v6161_v37, %v5138_v31  ;;  %v4128_v31 = vsel %vm3104_vm11, %v1052_v22, 0.0  ;;  %v1055_v37 = vld [vmem:[%s6355_s12 + $0x1cf0] sm:$0xff] }
 0x737   : > { %v5152_v39 = vmul.f32 %v4128_v31, %v4128_v31  ;;  %v2093_v31 = vadd.s32 7512, %v6360_v2  ;;  %vm3119_vm10 = vcmp.lt.s32.totalorder %v2092_v26, %v6363_v4 }
 0x738   : > { %v6163_v47 = vadd.f32 %v6162_v42, %v5139_v36  ;;  %v4129_v36 = vsel %vm3105_vm12, %v1053_v27, 0.0  ;;  %v1056_v42 = vld [vmem:[%s6355_s12 + $0x1cf8] sm:$0xff] }
 0x739   : > { %v5153_v44 = vmul.f32 %v4129_v36, %v4129_v36  ;;  %v2094_v36 = vadd.s32 7520, %v6360_v2  ;;  %vm3120_vm11 = vcmp.lt.s32.totalorder %v2093_v31, %v6363_v4 }
 0x73a   : > { %v6164_v52 = vadd.f32 %v6163_v47, %v5140_v41  ;;  %v4130_v41 = vsel %vm3106_vm13, %v1054_v32, 0.0  ;;  %v1057_v47 = vld [vmem:[%s6355_s12 + $0x1d00] sm:$0xff] }
 0x73b   : > { %v5154_v49 = vmul.f32 %v4130_v41, %v4130_v41  ;;  %v2095_v41 = vadd.s32 7528, %v6360_v2  ;;  %vm3121_vm12 = vcmp.lt.s32.totalorder %v2094_v36, %v6363_v4 }
 0x73c   : > { %v6165_v57 = vadd.f32 %v6164_v52, %v5141_v46  ;;  %v4131_v46 = vsel %vm3107_vm14, %v1055_v37, 0.0  ;;  %v1058_v52 = vld [vmem:[%s6355_s12 + $0x1d08] sm:$0xff] }
 0x73d   : > { %v5155_v54 = vmul.f32 %v4131_v46, %v4131_v46  ;;  %v2096_v46 = vadd.s32 7536, %v6360_v2  ;;  %vm3122_vm13 = vcmp.lt.s32.totalorder %v2095_v41, %v6363_v4 }
 0x73e   : > { %v6166_v62 = vadd.f32 %v6165_v57, %v5142_v51  ;;  %v4132_v51 = vsel %vm3108_vm15, %v1056_v42, 0.0  ;;  %v1059_v57 = vld [vmem:[%s6355_s12 + $0x1d10] sm:$0xff] }
 0x73f   : > { %v5156_v59 = vmul.f32 %v4132_v51, %v4132_v51  ;;  %v2097_v51 = vadd.s32 7544, %v6360_v2  ;;  %vm3123_vm14 = vcmp.lt.s32.totalorder %v2096_v46, %v6363_v4 }
 0x740   : > { %v6167_v5 = vadd.f32 %v6166_v62, %v5143_v56  ;;  %v4133_v56 = vsel %vm3109_vm0, %v1057_v47, 0.0  ;;  %v1060_v62 = vld [vmem:[%s6355_s12 + $0x1d18] sm:$0xff] }
 0x741   : > { %v5157_v0 = vmul.f32 %v4133_v56, %v4133_v56  ;;  %v2098_v56 = vadd.s32 7552, %v6360_v2  ;;  %vm3124_vm15 = vcmp.lt.s32.totalorder %v2097_v51, %v6363_v4 }
 0x742   : > { %v6168_v10 = vadd.f32 %v6167_v5, %v5144_v61  ;;  %v4134_v61 = vsel %vm3110_vm1, %v1058_v52, 0.0  ;;  %v1061_v5 = vld [vmem:[%s6355_s12 + $0x1d20] sm:$0xff] }
 0x743   : > { %v5158_v7 = vmul.f32 %v4134_v61, %v4134_v61  ;;  %v2099_v61 = vadd.s32 7560, %v6360_v2  ;;  %vm3125_vm0 = vcmp.lt.s32.totalorder %v2098_v56, %v6363_v4 }
 0x744   : > { %v6169_v15 = vadd.f32 %v6168_v10, %v5145_v3  ;;  %v4135_v3 = vsel %vm3111_vm2, %v1059_v57, 0.0  ;;  %v1062_v10 = vld [vmem:[%s6355_s12 + $0x1d28] sm:$0xff] }
 0x745   : > { %v5159_v12 = vmul.f32 %v4135_v3, %v4135_v3  ;;  %v2100_v3 = vadd.s32 7568, %v6360_v2  ;;  %vm3126_vm1 = vcmp.lt.s32.totalorder %v2099_v61, %v6363_v4 }
 0x746   : > { %v6170_v20 = vadd.f32 %v6169_v15, %v5146_v9  ;;  %v4136_v9 = vsel %vm3112_vm3, %v1060_v62, 0.0  ;;  %v1063_v15 = vld [vmem:[%s6355_s12 + $0x1d30] sm:$0xff] }
 0x747   : > { %v5160_v17 = vmul.f32 %v4136_v9, %v4136_v9  ;;  %v2101_v9 = vadd.s32 7576, %v6360_v2  ;;  %vm3127_vm2 = vcmp.lt.s32.totalorder %v2100_v3, %v6363_v4 }
 0x748   : > { %v6171_v25 = vadd.f32 %v6170_v20, %v5147_v14  ;;  %v4137_v14 = vsel %vm3113_vm4, %v1061_v5, 0.0  ;;  %v1064_v20 = vld [vmem:[%s6355_s12 + $0x1d38] sm:$0xff] }
 0x749   : > { %v5161_v22 = vmul.f32 %v4137_v14, %v4137_v14  ;;  %v2102_v14 = vadd.s32 7584, %v6360_v2  ;;  %vm3128_vm3 = vcmp.lt.s32.totalorder %v2101_v9, %v6363_v4 }
 0x74a   : > { %v6172_v30 = vadd.f32 %v6171_v25, %v5148_v19  ;;  %v4138_v19 = vsel %vm3114_vm5, %v1062_v10, 0.0  ;;  %v1065_v25 = vld [vmem:[%s6355_s12 + $0x1d40] sm:$0xff] }
 0x74b   : > { %v5162_v27 = vmul.f32 %v4138_v19, %v4138_v19  ;;  %v2103_v19 = vadd.s32 7592, %v6360_v2  ;;  %vm3129_vm4 = vcmp.lt.s32.totalorder %v2102_v14, %v6363_v4 }
 0x74c   : > { %v6173_v35 = vadd.f32 %v6172_v30, %v5149_v24  ;;  %v4139_v24 = vsel %vm3115_vm6, %v1063_v15, 0.0  ;;  %v1066_v30 = vld [vmem:[%s6355_s12 + $0x1d48] sm:$0xff] }
 0x74d   : > { %v5163_v32 = vmul.f32 %v4139_v24, %v4139_v24  ;;  %v2104_v24 = vadd.s32 7600, %v6360_v2  ;;  %vm3130_vm5 = vcmp.lt.s32.totalorder %v2103_v19, %v6363_v4 }
 0x74e   : > { %v6174_v40 = vadd.f32 %v6173_v35, %v5150_v29  ;;  %v4140_v29 = vsel %vm3116_vm7, %v1064_v20, 0.0  ;;  %v1067_v35 = vld [vmem:[%s6355_s12 + $0x1d50] sm:$0xff] }
 0x74f   : > { %v5164_v37 = vmul.f32 %v4140_v29, %v4140_v29  ;;  %v2105_v29 = vadd.s32 7608, %v6360_v2  ;;  %vm3131_vm6 = vcmp.lt.s32.totalorder %v2104_v24, %v6363_v4 }
 0x750   : > { %v6175_v45 = vadd.f32 %v6174_v40, %v5151_v34  ;;  %v4141_v34 = vsel %vm3117_vm8, %v1065_v25, 0.0  ;;  %v1068_v40 = vld [vmem:[%s6355_s12 + $0x1d58] sm:$0xff] }
 0x751   : > { %v5165_v42 = vmul.f32 %v4141_v34, %v4141_v34  ;;  %v2106_v34 = vadd.s32 7616, %v6360_v2  ;;  %vm3132_vm7 = vcmp.lt.s32.totalorder %v2105_v29, %v6363_v4 }
 0x752   : > { %v6176_v50 = vadd.f32 %v6175_v45, %v5152_v39  ;;  %v4142_v39 = vsel %vm3118_vm9, %v1066_v30, 0.0  ;;  %v1069_v45 = vld [vmem:[%s6355_s12 + $0x1d60] sm:$0xff] }
 0x753   : > { %v5166_v47 = vmul.f32 %v4142_v39, %v4142_v39  ;;  %v2107_v39 = vadd.s32 7624, %v6360_v2  ;;  %vm3133_vm8 = vcmp.lt.s32.totalorder %v2106_v34, %v6363_v4 }
 0x754   : > { %v6177_v55 = vadd.f32 %v6176_v50, %v5153_v44  ;;  %v4143_v44 = vsel %vm3119_vm10, %v1067_v35, 0.0  ;;  %v1070_v50 = vld [vmem:[%s6355_s12 + $0x1d68] sm:$0xff] }
 0x755   : > { %v5167_v52 = vmul.f32 %v4143_v44, %v4143_v44  ;;  %v2108_v44 = vadd.s32 7632, %v6360_v2  ;;  %vm3134_vm9 = vcmp.lt.s32.totalorder %v2107_v39, %v6363_v4 }
 0x756   : > { %v6178_v60 = vadd.f32 %v6177_v55, %v5154_v49  ;;  %v4144_v49 = vsel %vm3120_vm11, %v1068_v40, 0.0  ;;  %v1071_v55 = vld [vmem:[%s6355_s12 + $0x1d70] sm:$0xff] }
 0x757   : > { %v5168_v57 = vmul.f32 %v4144_v49, %v4144_v49  ;;  %v2109_v49 = vadd.s32 7640, %v6360_v2  ;;  %vm3135_vm10 = vcmp.lt.s32.totalorder %v2108_v44, %v6363_v4 }
 0x758   : > { %v6179_v1 = vadd.f32 %v6178_v60, %v5155_v54  ;;  %v4145_v54 = vsel %vm3121_vm12, %v1069_v45, 0.0  ;;  %v1072_v60 = vld [vmem:[%s6355_s12 + $0x1d78] sm:$0xff] }
 0x759   : > { %v5169_v62 = vmul.f32 %v4145_v54, %v4145_v54  ;;  %v2110_v54 = vadd.s32 7648, %v6360_v2  ;;  %vm3136_vm11 = vcmp.lt.s32.totalorder %v2109_v49, %v6363_v4 }
 0x75a   : > { %v6180_v8 = vadd.f32 %v6179_v1, %v5156_v59  ;;  %v4146_v59 = vsel %vm3122_vm13, %v1070_v50, 0.0  ;;  %v1073_v1 = vld [vmem:[%s6355_s12 + $0x1d80] sm:$0xff] }
 0x75b   : > { %v5170_v5 = vmul.f32 %v4146_v59, %v4146_v59  ;;  %v2111_v59 = vadd.s32 7656, %v6360_v2  ;;  %vm3137_vm12 = vcmp.lt.s32.totalorder %v2110_v54, %v6363_v4 }
 0x75c   : > { %v6181_v13 = vadd.f32 %v6180_v8, %v5157_v0  ;;  %v4147_v0 = vsel %vm3123_vm14, %v1071_v55, 0.0  ;;  %v1074_v8 = vld [vmem:[%s6355_s12 + $0x1d88] sm:$0xff] }
 0x75d   : > { %v5171_v10 = vmul.f32 %v4147_v0, %v4147_v0  ;;  %v2112_v0 = vadd.s32 7664, %v6360_v2  ;;  %vm3138_vm13 = vcmp.lt.s32.totalorder %v2111_v59, %v6363_v4 }
 0x75e   : > { %v6182_v18 = vadd.f32 %v6181_v13, %v5158_v7  ;;  %v4148_v7 = vsel %vm3124_vm15, %v1072_v60, 0.0  ;;  %v1075_v13 = vld [vmem:[%s6355_s12 + $0x1d90] sm:$0xff] }
 0x75f   : > { %v5172_v15 = vmul.f32 %v4148_v7, %v4148_v7  ;;  %v2113_v7 = vadd.s32 7672, %v6360_v2  ;;  %vm3139_vm14 = vcmp.lt.s32.totalorder %v2112_v0, %v6363_v4 }
 0x760   : > { %v6183_v23 = vadd.f32 %v6182_v18, %v5159_v12  ;;  %v4149_v12 = vsel %vm3125_vm0, %v1073_v1, 0.0  ;;  %v1076_v18 = vld [vmem:[%s6355_s12 + $0x1d98] sm:$0xff] }
 0x761   : > { %v5173_v20 = vmul.f32 %v4149_v12, %v4149_v12  ;;  %v2114_v12 = vadd.s32 7680, %v6360_v2  ;;  %vm3140_vm15 = vcmp.lt.s32.totalorder %v2113_v7, %v6363_v4 }
 0x762   : > { %v6184_v28 = vadd.f32 %v6183_v23, %v5160_v17  ;;  %v4150_v17 = vsel %vm3126_vm1, %v1074_v8, 0.0  ;;  %v1077_v23 = vld [vmem:[%s6355_s12 + $0x1da0] sm:$0xff] }
 0x763   : > { %v5174_v25 = vmul.f32 %v4150_v17, %v4150_v17  ;;  %v2115_v17 = vadd.s32 7688, %v6360_v2  ;;  %vm3141_vm0 = vcmp.lt.s32.totalorder %v2114_v12, %v6363_v4 }
 0x764   : > { %v6185_v33 = vadd.f32 %v6184_v28, %v5161_v22  ;;  %v4151_v22 = vsel %vm3127_vm2, %v1075_v13, 0.0  ;;  %v1078_v28 = vld [vmem:[%s6355_s12 + $0x1da8] sm:$0xff] }
 0x765   : > { %v5175_v30 = vmul.f32 %v4151_v22, %v4151_v22  ;;  %v2116_v22 = vadd.s32 7696, %v6360_v2  ;;  %vm3142_vm1 = vcmp.lt.s32.totalorder %v2115_v17, %v6363_v4 }
 0x766   : > { %v6186_v38 = vadd.f32 %v6185_v33, %v5162_v27  ;;  %v4152_v27 = vsel %vm3128_vm3, %v1076_v18, 0.0  ;;  %v1079_v33 = vld [vmem:[%s6355_s12 + $0x1db0] sm:$0xff] }
 0x767   : > { %v5176_v35 = vmul.f32 %v4152_v27, %v4152_v27  ;;  %v2117_v27 = vadd.s32 7704, %v6360_v2  ;;  %vm3143_vm2 = vcmp.lt.s32.totalorder %v2116_v22, %v6363_v4 }
 0x768   : > { %v6187_v43 = vadd.f32 %v6186_v38, %v5163_v32  ;;  %v4153_v32 = vsel %vm3129_vm4, %v1077_v23, 0.0  ;;  %v1080_v38 = vld [vmem:[%s6355_s12 + $0x1db8] sm:$0xff] }
 0x769   : > { %v5177_v40 = vmul.f32 %v4153_v32, %v4153_v32  ;;  %v2118_v32 = vadd.s32 7712, %v6360_v2  ;;  %vm3144_vm3 = vcmp.lt.s32.totalorder %v2117_v27, %v6363_v4 }
 0x76a   : > { %v6188_v48 = vadd.f32 %v6187_v43, %v5164_v37  ;;  %v4154_v37 = vsel %vm3130_vm5, %v1078_v28, 0.0  ;;  %v1081_v43 = vld [vmem:[%s6355_s12 + $0x1dc0] sm:$0xff] }
 0x76b   : > { %v5178_v45 = vmul.f32 %v4154_v37, %v4154_v37  ;;  %v2119_v37 = vadd.s32 7720, %v6360_v2  ;;  %vm3145_vm4 = vcmp.lt.s32.totalorder %v2118_v32, %v6363_v4 }
 0x76c   : > { %v6189_v53 = vadd.f32 %v6188_v48, %v5165_v42  ;;  %v4155_v42 = vsel %vm3131_vm6, %v1079_v33, 0.0  ;;  %v1082_v48 = vld [vmem:[%s6355_s12 + $0x1dc8] sm:$0xff] }
 0x76d   : > { %v5179_v50 = vmul.f32 %v4155_v42, %v4155_v42  ;;  %v2120_v42 = vadd.s32 7728, %v6360_v2  ;;  %vm3146_vm5 = vcmp.lt.s32.totalorder %v2119_v37, %v6363_v4 }
 0x76e   : > { %v6190_v58 = vadd.f32 %v6189_v53, %v5166_v47  ;;  %v4156_v47 = vsel %vm3132_vm7, %v1080_v38, 0.0  ;;  %v1083_v53 = vld [vmem:[%s6355_s12 + $0x1dd0] sm:$0xff] }
 0x76f   : > { %v5180_v55 = vmul.f32 %v4156_v47, %v4156_v47  ;;  %v2121_v47 = vadd.s32 7736, %v6360_v2  ;;  %vm3147_vm6 = vcmp.lt.s32.totalorder %v2120_v42, %v6363_v4 }
 0x770   : > { %v6191_v63 = vadd.f32 %v6190_v58, %v5167_v52  ;;  %v4157_v52 = vsel %vm3133_vm8, %v1081_v43, 0.0  ;;  %v1084_v58 = vld [vmem:[%s6355_s12 + $0x1dd8] sm:$0xff] }
 0x771   : > { %v5181_v60 = vmul.f32 %v4157_v52, %v4157_v52  ;;  %v2122_v52 = vadd.s32 7744, %v6360_v2  ;;  %vm3148_vm7 = vcmp.lt.s32.totalorder %v2121_v47, %v6363_v4 }
 0x772   : > { %v6192_v6 = vadd.f32 %v6191_v63, %v5168_v57  ;;  %v4158_v57 = vsel %vm3134_vm9, %v1082_v48, 0.0  ;;  %v1085_v63 = vld [vmem:[%s6355_s12 + $0x1de0] sm:$0xff] }
 0x773   : > { %v5182_v1 = vmul.f32 %v4158_v57, %v4158_v57  ;;  %v2123_v57 = vadd.s32 7752, %v6360_v2  ;;  %vm3149_vm8 = vcmp.lt.s32.totalorder %v2122_v52, %v6363_v4 }
 0x774   : > { %v6193_v11 = vadd.f32 %v6192_v6, %v5169_v62  ;;  %v4159_v62 = vsel %vm3135_vm10, %v1083_v53, 0.0  ;;  %v1086_v6 = vld [vmem:[%s6355_s12 + $0x1de8] sm:$0xff] }
 0x775   : > { %v5183_v8 = vmul.f32 %v4159_v62, %v4159_v62  ;;  %v2124_v62 = vadd.s32 7760, %v6360_v2  ;;  %vm3150_vm9 = vcmp.lt.s32.totalorder %v2123_v57, %v6363_v4 }
 0x776   : > { %v6194_v16 = vadd.f32 %v6193_v11, %v5170_v5  ;;  %v4160_v5 = vsel %vm3136_vm11, %v1084_v58, 0.0  ;;  %v1087_v11 = vld [vmem:[%s6355_s12 + $0x1df0] sm:$0xff] }
 0x777   : > { %v5184_v13 = vmul.f32 %v4160_v5, %v4160_v5  ;;  %v2125_v5 = vadd.s32 7768, %v6360_v2  ;;  %vm3151_vm10 = vcmp.lt.s32.totalorder %v2124_v62, %v6363_v4 }
 0x778   : > { %v6195_v21 = vadd.f32 %v6194_v16, %v5171_v10  ;;  %v4161_v10 = vsel %vm3137_vm12, %v1085_v63, 0.0  ;;  %v1088_v16 = vld [vmem:[%s6355_s12 + $0x1df8] sm:$0xff] }
 0x779   : > { %v5185_v18 = vmul.f32 %v4161_v10, %v4161_v10  ;;  %v2126_v10 = vadd.s32 7776, %v6360_v2  ;;  %vm3152_vm11 = vcmp.lt.s32.totalorder %v2125_v5, %v6363_v4 }
 0x77a   : > { %v6196_v26 = vadd.f32 %v6195_v21, %v5172_v15  ;;  %v4162_v15 = vsel %vm3138_vm13, %v1086_v6, 0.0  ;;  %v1089_v21 = vld [vmem:[%s6355_s12 + $0x1e00] sm:$0xff] }
 0x77b   : > { %v5186_v23 = vmul.f32 %v4162_v15, %v4162_v15  ;;  %v2127_v15 = vadd.s32 7784, %v6360_v2  ;;  %vm3153_vm12 = vcmp.lt.s32.totalorder %v2126_v10, %v6363_v4 }
 0x77c   : > { %v6197_v31 = vadd.f32 %v6196_v26, %v5173_v20  ;;  %v4163_v20 = vsel %vm3139_vm14, %v1087_v11, 0.0  ;;  %v1090_v26 = vld [vmem:[%s6355_s12 + $0x1e08] sm:$0xff] }
 0x77d   : > { %v5187_v28 = vmul.f32 %v4163_v20, %v4163_v20  ;;  %v2128_v20 = vadd.s32 7792, %v6360_v2  ;;  %vm3154_vm13 = vcmp.lt.s32.totalorder %v2127_v15, %v6363_v4 }
 0x77e   : > { %v6198_v36 = vadd.f32 %v6197_v31, %v5174_v25  ;;  %v4164_v25 = vsel %vm3140_vm15, %v1088_v16, 0.0  ;;  %v1091_v31 = vld [vmem:[%s6355_s12 + $0x1e10] sm:$0xff] }
 0x77f   : > { %v5188_v33 = vmul.f32 %v4164_v25, %v4164_v25  ;;  %v2129_v25 = vadd.s32 7800, %v6360_v2  ;;  %vm3155_vm14 = vcmp.lt.s32.totalorder %v2128_v20, %v6363_v4 }
 0x780   : > { %v6199_v41 = vadd.f32 %v6198_v36, %v5175_v30  ;;  %v4165_v30 = vsel %vm3141_vm0, %v1089_v21, 0.0  ;;  %v1092_v36 = vld [vmem:[%s6355_s12 + $0x1e18] sm:$0xff] }
 0x781   : > { %v5189_v38 = vmul.f32 %v4165_v30, %v4165_v30  ;;  %v2130_v30 = vadd.s32 7808, %v6360_v2  ;;  %vm3156_vm15 = vcmp.lt.s32.totalorder %v2129_v25, %v6363_v4 }
 0x782   : > { %v6200_v46 = vadd.f32 %v6199_v41, %v5176_v35  ;;  %v4166_v35 = vsel %vm3142_vm1, %v1090_v26, 0.0  ;;  %v1093_v41 = vld [vmem:[%s6355_s12 + $0x1e20] sm:$0xff] }
 0x783   : > { %v5190_v43 = vmul.f32 %v4166_v35, %v4166_v35  ;;  %v2131_v35 = vadd.s32 7816, %v6360_v2  ;;  %vm3157_vm0 = vcmp.lt.s32.totalorder %v2130_v30, %v6363_v4 }
 0x784   : > { %v6201_v51 = vadd.f32 %v6200_v46, %v5177_v40  ;;  %v4167_v40 = vsel %vm3143_vm2, %v1091_v31, 0.0  ;;  %v1094_v46 = vld [vmem:[%s6355_s12 + $0x1e28] sm:$0xff] }
 0x785   : > { %v5191_v48 = vmul.f32 %v4167_v40, %v4167_v40  ;;  %v2132_v40 = vadd.s32 7824, %v6360_v2  ;;  %vm3158_vm1 = vcmp.lt.s32.totalorder %v2131_v35, %v6363_v4 }
 0x786   : > { %v6202_v56 = vadd.f32 %v6201_v51, %v5178_v45  ;;  %v4168_v45 = vsel %vm3144_vm3, %v1092_v36, 0.0  ;;  %v1095_v51 = vld [vmem:[%s6355_s12 + $0x1e30] sm:$0xff] }
 0x787   : > { %v5192_v53 = vmul.f32 %v4168_v45, %v4168_v45  ;;  %v2133_v45 = vadd.s32 7832, %v6360_v2  ;;  %vm3159_vm2 = vcmp.lt.s32.totalorder %v2132_v40, %v6363_v4 }
 0x788   : > { %v6203_v61 = vadd.f32 %v6202_v56, %v5179_v50  ;;  %v4169_v50 = vsel %vm3145_vm4, %v1093_v41, 0.0  ;;  %v1096_v56 = vld [vmem:[%s6355_s12 + $0x1e38] sm:$0xff] }
 0x789   : > { %v5193_v58 = vmul.f32 %v4169_v50, %v4169_v50  ;;  %v2134_v50 = vadd.s32 7840, %v6360_v2  ;;  %vm3160_vm3 = vcmp.lt.s32.totalorder %v2133_v45, %v6363_v4 }
 0x78a   : > { %v6204_v3 = vadd.f32 %v6203_v61, %v5180_v55  ;;  %v4170_v55 = vsel %vm3146_vm5, %v1094_v46, 0.0  ;;  %v1097_v61 = vld [vmem:[%s6355_s12 + $0x1e40] sm:$0xff] }
 0x78b   : > { %v5194_v63 = vmul.f32 %v4170_v55, %v4170_v55  ;;  %v2135_v55 = vadd.s32 7848, %v6360_v2  ;;  %vm3161_vm4 = vcmp.lt.s32.totalorder %v2134_v50, %v6363_v4 }
 0x78c   : > { %v6205_v9 = vadd.f32 %v6204_v3, %v5181_v60  ;;  %v4171_v60 = vsel %vm3147_vm6, %v1095_v51, 0.0  ;;  %v1098_v3 = vld [vmem:[%s6355_s12 + $0x1e48] sm:$0xff] }
 0x78d   : > { %v5195_v6 = vmul.f32 %v4171_v60, %v4171_v60  ;;  %v2136_v60 = vadd.s32 7856, %v6360_v2  ;;  %vm3162_vm5 = vcmp.lt.s32.totalorder %v2135_v55, %v6363_v4 }
 0x78e   : > { %v6206_v14 = vadd.f32 %v6205_v9, %v5182_v1  ;;  %v4172_v1 = vsel %vm3148_vm7, %v1096_v56, 0.0  ;;  %v1099_v9 = vld [vmem:[%s6355_s12 + $0x1e50] sm:$0xff] }
 0x78f   : > { %v5196_v11 = vmul.f32 %v4172_v1, %v4172_v1  ;;  %v2137_v1 = vadd.s32 7864, %v6360_v2  ;;  %vm3163_vm6 = vcmp.lt.s32.totalorder %v2136_v60, %v6363_v4 }
 0x790   : > { %v6207_v19 = vadd.f32 %v6206_v14, %v5183_v8  ;;  %v4173_v8 = vsel %vm3149_vm8, %v1097_v61, 0.0  ;;  %v1100_v14 = vld [vmem:[%s6355_s12 + $0x1e58] sm:$0xff] }
 0x791   : > { %v5197_v16 = vmul.f32 %v4173_v8, %v4173_v8  ;;  %v2138_v8 = vadd.s32 7872, %v6360_v2  ;;  %vm3164_vm7 = vcmp.lt.s32.totalorder %v2137_v1, %v6363_v4 }
 0x792   : > { %v6208_v24 = vadd.f32 %v6207_v19, %v5184_v13  ;;  %v4174_v13 = vsel %vm3150_vm9, %v1098_v3, 0.0  ;;  %v1101_v19 = vld [vmem:[%s6355_s12 + $0x1e60] sm:$0xff] }
 0x793   : > { %v5198_v21 = vmul.f32 %v4174_v13, %v4174_v13  ;;  %v2139_v13 = vadd.s32 7880, %v6360_v2  ;;  %vm3165_vm8 = vcmp.lt.s32.totalorder %v2138_v8, %v6363_v4 }
 0x794   : > { %v6209_v29 = vadd.f32 %v6208_v24, %v5185_v18  ;;  %v4175_v18 = vsel %vm3151_vm10, %v1099_v9, 0.0  ;;  %v1102_v24 = vld [vmem:[%s6355_s12 + $0x1e68] sm:$0xff] }
 0x795   : > { %v5199_v26 = vmul.f32 %v4175_v18, %v4175_v18  ;;  %v2140_v18 = vadd.s32 7888, %v6360_v2  ;;  %vm3166_vm9 = vcmp.lt.s32.totalorder %v2139_v13, %v6363_v4 }
 0x796   : > { %v6210_v34 = vadd.f32 %v6209_v29, %v5186_v23  ;;  %v4176_v23 = vsel %vm3152_vm11, %v1100_v14, 0.0  ;;  %v1103_v29 = vld [vmem:[%s6355_s12 + $0x1e70] sm:$0xff] }
 0x797   : > { %v5200_v31 = vmul.f32 %v4176_v23, %v4176_v23  ;;  %v2141_v23 = vadd.s32 7896, %v6360_v2  ;;  %vm3167_vm10 = vcmp.lt.s32.totalorder %v2140_v18, %v6363_v4 }
 0x798   : > { %v6211_v39 = vadd.f32 %v6210_v34, %v5187_v28  ;;  %v4177_v28 = vsel %vm3153_vm12, %v1101_v19, 0.0  ;;  %v1104_v34 = vld [vmem:[%s6355_s12 + $0x1e78] sm:$0xff] }
 0x799   : > { %v5201_v36 = vmul.f32 %v4177_v28, %v4177_v28  ;;  %v2142_v28 = vadd.s32 7904, %v6360_v2  ;;  %vm3168_vm11 = vcmp.lt.s32.totalorder %v2141_v23, %v6363_v4 }
 0x79a   : > { %v6212_v44 = vadd.f32 %v6211_v39, %v5188_v33  ;;  %v4178_v33 = vsel %vm3154_vm13, %v1102_v24, 0.0  ;;  %v1105_v39 = vld [vmem:[%s6355_s12 + $0x1e80] sm:$0xff] }
 0x79b   : > { %v5202_v41 = vmul.f32 %v4178_v33, %v4178_v33  ;;  %v2143_v33 = vadd.s32 7912, %v6360_v2  ;;  %vm3169_vm12 = vcmp.lt.s32.totalorder %v2142_v28, %v6363_v4 }
 0x79c   : > { %v6213_v49 = vadd.f32 %v6212_v44, %v5189_v38  ;;  %v4179_v38 = vsel %vm3155_vm14, %v1103_v29, 0.0  ;;  %v1106_v44 = vld [vmem:[%s6355_s12 + $0x1e88] sm:$0xff] }
 0x79d   : > { %v5203_v46 = vmul.f32 %v4179_v38, %v4179_v38  ;;  %v2144_v38 = vadd.s32 7920, %v6360_v2  ;;  %vm3170_vm13 = vcmp.lt.s32.totalorder %v2143_v33, %v6363_v4 }
 0x79e   : > { %v6214_v54 = vadd.f32 %v6213_v49, %v5190_v43  ;;  %v4180_v43 = vsel %vm3156_vm15, %v1104_v34, 0.0  ;;  %v1107_v49 = vld [vmem:[%s6355_s12 + $0x1e90] sm:$0xff] }
 0x79f   : > { %v5204_v51 = vmul.f32 %v4180_v43, %v4180_v43  ;;  %v2145_v43 = vadd.s32 7928, %v6360_v2  ;;  %vm3171_vm14 = vcmp.lt.s32.totalorder %v2144_v38, %v6363_v4 }
 0x7a0   : > { %v6215_v59 = vadd.f32 %v6214_v54, %v5191_v48  ;;  %v4181_v48 = vsel %vm3157_vm0, %v1105_v39, 0.0  ;;  %v1108_v54 = vld [vmem:[%s6355_s12 + $0x1e98] sm:$0xff] }
 0x7a1   : > { %v5205_v56 = vmul.f32 %v4181_v48, %v4181_v48  ;;  %v2146_v48 = vadd.s32 7936, %v6360_v2  ;;  %vm3172_vm15 = vcmp.lt.s32.totalorder %v2145_v43, %v6363_v4 }
 0x7a2   : > { %v6216_v0 = vadd.f32 %v6215_v59, %v5192_v53  ;;  %v4182_v53 = vsel %vm3158_vm1, %v1106_v44, 0.0  ;;  %v1109_v59 = vld [vmem:[%s6355_s12 + $0x1ea0] sm:$0xff] }
 0x7a3   : > { %v5206_v61 = vmul.f32 %v4182_v53, %v4182_v53  ;;  %v2147_v53 = vadd.s32 7944, %v6360_v2  ;;  %vm3173_vm0 = vcmp.lt.s32.totalorder %v2146_v48, %v6363_v4 }
 0x7a4   : > { %v6217_v7 = vadd.f32 %v6216_v0, %v5193_v58  ;;  %v4183_v58 = vsel %vm3159_vm2, %v1107_v49, 0.0  ;;  %v1110_v0 = vld [vmem:[%s6355_s12 + $0x1ea8] sm:$0xff] }
 0x7a5   : > { %v5207_v3 = vmul.f32 %v4183_v58, %v4183_v58  ;;  %v2148_v58 = vadd.s32 7952, %v6360_v2  ;;  %vm3174_vm1 = vcmp.lt.s32.totalorder %v2147_v53, %v6363_v4 }
 0x7a6   : > { %v6218_v12 = vadd.f32 %v6217_v7, %v5194_v63  ;;  %v4184_v63 = vsel %vm3160_vm3, %v1108_v54, 0.0  ;;  %v1111_v7 = vld [vmem:[%s6355_s12 + $0x1eb0] sm:$0xff] }
 0x7a7   : > { %v5208_v9 = vmul.f32 %v4184_v63, %v4184_v63  ;;  %v2149_v63 = vadd.s32 7960, %v6360_v2  ;;  %vm3175_vm2 = vcmp.lt.s32.totalorder %v2148_v58, %v6363_v4 }
 0x7a8   : > { %v6219_v17 = vadd.f32 %v6218_v12, %v5195_v6  ;;  %v4185_v6 = vsel %vm3161_vm4, %v1109_v59, 0.0  ;;  %v1112_v12 = vld [vmem:[%s6355_s12 + $0x1eb8] sm:$0xff] }
 0x7a9   : > { %v5209_v14 = vmul.f32 %v4185_v6, %v4185_v6  ;;  %v2150_v6 = vadd.s32 7968, %v6360_v2  ;;  %vm3176_vm3 = vcmp.lt.s32.totalorder %v2149_v63, %v6363_v4 }
 0x7aa   : > { %v6220_v22 = vadd.f32 %v6219_v17, %v5196_v11  ;;  %v4186_v11 = vsel %vm3162_vm5, %v1110_v0, 0.0  ;;  %v1113_v17 = vld [vmem:[%s6355_s12 + $0x1ec0] sm:$0xff] }
 0x7ab   : > { %v5210_v19 = vmul.f32 %v4186_v11, %v4186_v11  ;;  %v2151_v11 = vadd.s32 7976, %v6360_v2  ;;  %vm3177_vm4 = vcmp.lt.s32.totalorder %v2150_v6, %v6363_v4 }
 0x7ac   : > { %v6221_v27 = vadd.f32 %v6220_v22, %v5197_v16  ;;  %v4187_v16 = vsel %vm3163_vm6, %v1111_v7, 0.0  ;;  %v1114_v22 = vld [vmem:[%s6355_s12 + $0x1ec8] sm:$0xff] }
 0x7ad   : > { %v5211_v24 = vmul.f32 %v4187_v16, %v4187_v16  ;;  %v2152_v16 = vadd.s32 7984, %v6360_v2  ;;  %vm3178_vm5 = vcmp.lt.s32.totalorder %v2151_v11, %v6363_v4 }
 0x7ae   : > { %v6222_v32 = vadd.f32 %v6221_v27, %v5198_v21  ;;  %v4188_v21 = vsel %vm3164_vm7, %v1112_v12, 0.0  ;;  %v1115_v27 = vld [vmem:[%s6355_s12 + $0x1ed0] sm:$0xff] }
 0x7af   : > { %v5212_v29 = vmul.f32 %v4188_v21, %v4188_v21  ;;  %v2153_v21 = vadd.s32 7992, %v6360_v2  ;;  %vm3179_vm6 = vcmp.lt.s32.totalorder %v2152_v16, %v6363_v4 }
 0x7b0   : > { %v6223_v37 = vadd.f32 %v6222_v32, %v5199_v26  ;;  %v4189_v26 = vsel %vm3165_vm8, %v1113_v17, 0.0  ;;  %v1116_v32 = vld [vmem:[%s6355_s12 + $0x1ed8] sm:$0xff] }
 0x7b1   : > { %v5213_v34 = vmul.f32 %v4189_v26, %v4189_v26  ;;  %v2154_v26 = vadd.s32 8000, %v6360_v2  ;;  %vm3180_vm7 = vcmp.lt.s32.totalorder %v2153_v21, %v6363_v4 }
 0x7b2   : > { %v6224_v42 = vadd.f32 %v6223_v37, %v5200_v31  ;;  %v4190_v31 = vsel %vm3166_vm9, %v1114_v22, 0.0  ;;  %v1117_v37 = vld [vmem:[%s6355_s12 + $0x1ee0] sm:$0xff] }
 0x7b3   : > { %v5214_v39 = vmul.f32 %v4190_v31, %v4190_v31  ;;  %v2155_v31 = vadd.s32 8008, %v6360_v2  ;;  %vm3181_vm8 = vcmp.lt.s32.totalorder %v2154_v26, %v6363_v4 }
 0x7b4   : > { %v6225_v47 = vadd.f32 %v6224_v42, %v5201_v36  ;;  %v4191_v36 = vsel %vm3167_vm10, %v1115_v27, 0.0  ;;  %v1118_v42 = vld [vmem:[%s6355_s12 + $0x1ee8] sm:$0xff] }
 0x7b5   : > { %v5215_v44 = vmul.f32 %v4191_v36, %v4191_v36  ;;  %v2156_v36 = vadd.s32 8016, %v6360_v2  ;;  %vm3182_vm9 = vcmp.lt.s32.totalorder %v2155_v31, %v6363_v4 }
 0x7b6   : > { %v6226_v52 = vadd.f32 %v6225_v47, %v5202_v41  ;;  %v4192_v41 = vsel %vm3168_vm11, %v1116_v32, 0.0  ;;  %v1119_v47 = vld [vmem:[%s6355_s12 + $0x1ef0] sm:$0xff] }
 0x7b7   : > { %v5216_v49 = vmul.f32 %v4192_v41, %v4192_v41  ;;  %v2157_v41 = vadd.s32 8024, %v6360_v2  ;;  %vm3183_vm10 = vcmp.lt.s32.totalorder %v2156_v36, %v6363_v4 }
 0x7b8   : > { %v6227_v57 = vadd.f32 %v6226_v52, %v5203_v46  ;;  %v4193_v46 = vsel %vm3169_vm12, %v1117_v37, 0.0  ;;  %v1120_v52 = vld [vmem:[%s6355_s12 + $0x1ef8] sm:$0xff] }
 0x7b9   : > { %v5217_v54 = vmul.f32 %v4193_v46, %v4193_v46  ;;  %v2158_v46 = vadd.s32 8032, %v6360_v2  ;;  %vm3184_vm11 = vcmp.lt.s32.totalorder %v2157_v41, %v6363_v4 }
 0x7ba   : > { %v6228_v62 = vadd.f32 %v6227_v57, %v5204_v51  ;;  %v4194_v51 = vsel %vm3170_vm13, %v1118_v42, 0.0  ;;  %v1121_v57 = vld [vmem:[%s6355_s12 + $0x1f00] sm:$0xff] }
 0x7bb   : > { %v5218_v59 = vmul.f32 %v4194_v51, %v4194_v51  ;;  %v2159_v51 = vadd.s32 8040, %v6360_v2  ;;  %vm3185_vm12 = vcmp.lt.s32.totalorder %v2158_v46, %v6363_v4 }
 0x7bc   : > { %v6229_v5 = vadd.f32 %v6228_v62, %v5205_v56  ;;  %v4195_v56 = vsel %vm3171_vm14, %v1119_v47, 0.0  ;;  %v1122_v62 = vld [vmem:[%s6355_s12 + $0x1f08] sm:$0xff] }
 0x7bd   : > { %v5219_v0 = vmul.f32 %v4195_v56, %v4195_v56  ;;  %v2160_v56 = vadd.s32 8048, %v6360_v2  ;;  %vm3186_vm13 = vcmp.lt.s32.totalorder %v2159_v51, %v6363_v4 }
 0x7be   : > { %v6230_v10 = vadd.f32 %v6229_v5, %v5206_v61  ;;  %v4196_v61 = vsel %vm3172_vm15, %v1120_v52, 0.0  ;;  %v1123_v5 = vld [vmem:[%s6355_s12 + $0x1f10] sm:$0xff] }
 0x7bf   : > { %v5220_v7 = vmul.f32 %v4196_v61, %v4196_v61  ;;  %v2161_v61 = vadd.s32 8056, %v6360_v2  ;;  %vm3187_vm14 = vcmp.lt.s32.totalorder %v2160_v56, %v6363_v4 }
 0x7c0   : > { %v6231_v15 = vadd.f32 %v6230_v10, %v5207_v3  ;;  %v4197_v3 = vsel %vm3173_vm0, %v1121_v57, 0.0  ;;  %v1124_v10 = vld [vmem:[%s6355_s12 + $0x1f18] sm:$0xff] }
 0x7c1   : > { %v5221_v12 = vmul.f32 %v4197_v3, %v4197_v3  ;;  %v2162_v3 = vadd.s32 8064, %v6360_v2  ;;  %vm3188_vm15 = vcmp.lt.s32.totalorder %v2161_v61, %v6363_v4 }
 0x7c2   : > { %v6232_v20 = vadd.f32 %v6231_v15, %v5208_v9  ;;  %v4198_v9 = vsel %vm3174_vm1, %v1122_v62, 0.0  ;;  %v1125_v15 = vld [vmem:[%s6355_s12 + $0x1f20] sm:$0xff] }
 0x7c3   : > { %v5222_v17 = vmul.f32 %v4198_v9, %v4198_v9  ;;  %v2163_v9 = vadd.s32 8072, %v6360_v2  ;;  %vm3189_vm0 = vcmp.lt.s32.totalorder %v2162_v3, %v6363_v4 }
 0x7c4   : > { %v6233_v25 = vadd.f32 %v6232_v20, %v5209_v14  ;;  %v4199_v14 = vsel %vm3175_vm2, %v1123_v5, 0.0  ;;  %v1126_v20 = vld [vmem:[%s6355_s12 + $0x1f28] sm:$0xff] }
 0x7c5   : > { %v5223_v22 = vmul.f32 %v4199_v14, %v4199_v14  ;;  %v2164_v14 = vadd.s32 8080, %v6360_v2  ;;  %vm3190_vm1 = vcmp.lt.s32.totalorder %v2163_v9, %v6363_v4 }
 0x7c6   : > { %v6234_v30 = vadd.f32 %v6233_v25, %v5210_v19  ;;  %v4200_v19 = vsel %vm3176_vm3, %v1124_v10, 0.0  ;;  %v1127_v25 = vld [vmem:[%s6355_s12 + $0x1f30] sm:$0xff] }
 0x7c7   : > { %v5224_v27 = vmul.f32 %v4200_v19, %v4200_v19  ;;  %v2165_v19 = vadd.s32 8088, %v6360_v2  ;;  %vm3191_vm2 = vcmp.lt.s32.totalorder %v2164_v14, %v6363_v4 }
 0x7c8   : > { %v6235_v35 = vadd.f32 %v6234_v30, %v5211_v24  ;;  %v4201_v24 = vsel %vm3177_vm4, %v1125_v15, 0.0  ;;  %v1128_v30 = vld [vmem:[%s6355_s12 + $0x1f38] sm:$0xff] }
 0x7c9   : > { %v5225_v32 = vmul.f32 %v4201_v24, %v4201_v24  ;;  %v2166_v24 = vadd.s32 8096, %v6360_v2  ;;  %vm3192_vm3 = vcmp.lt.s32.totalorder %v2165_v19, %v6363_v4 }
 0x7ca   : > { %v6236_v40 = vadd.f32 %v6235_v35, %v5212_v29  ;;  %v4202_v29 = vsel %vm3178_vm5, %v1126_v20, 0.0  ;;  %v1129_v35 = vld [vmem:[%s6355_s12 + $0x1f40] sm:$0xff] }
 0x7cb   : > { %v5226_v37 = vmul.f32 %v4202_v29, %v4202_v29  ;;  %v2167_v29 = vadd.s32 8104, %v6360_v2  ;;  %vm3193_vm4 = vcmp.lt.s32.totalorder %v2166_v24, %v6363_v4 }
 0x7cc   : > { %v6237_v45 = vadd.f32 %v6236_v40, %v5213_v34  ;;  %v4203_v34 = vsel %vm3179_vm6, %v1127_v25, 0.0  ;;  %v1130_v40 = vld [vmem:[%s6355_s12 + $0x1f48] sm:$0xff] }
 0x7cd   : > { %v5227_v42 = vmul.f32 %v4203_v34, %v4203_v34  ;;  %v2168_v34 = vadd.s32 8112, %v6360_v2  ;;  %vm3194_vm5 = vcmp.lt.s32.totalorder %v2167_v29, %v6363_v4 }
 0x7ce   : > { %v6238_v50 = vadd.f32 %v6237_v45, %v5214_v39  ;;  %v4204_v39 = vsel %vm3180_vm7, %v1128_v30, 0.0  ;;  %v1131_v45 = vld [vmem:[%s6355_s12 + $0x1f50] sm:$0xff] }
 0x7cf   : > { %v5228_v47 = vmul.f32 %v4204_v39, %v4204_v39  ;;  %v2169_v39 = vadd.s32 8120, %v6360_v2  ;;  %vm3195_vm6 = vcmp.lt.s32.totalorder %v2168_v34, %v6363_v4 }
 0x7d0   : > { %v6239_v55 = vadd.f32 %v6238_v50, %v5215_v44  ;;  %v4205_v44 = vsel %vm3181_vm8, %v1129_v35, 0.0  ;;  %v1132_v50 = vld [vmem:[%s6355_s12 + $0x1f58] sm:$0xff] }
 0x7d1   : > { %v5229_v52 = vmul.f32 %v4205_v44, %v4205_v44  ;;  %v2170_v44 = vadd.s32 8128, %v6360_v2  ;;  %vm3196_vm7 = vcmp.lt.s32.totalorder %v2169_v39, %v6363_v4 }
 0x7d2   : > { %v6240_v60 = vadd.f32 %v6239_v55, %v5216_v49  ;;  %v4206_v49 = vsel %vm3182_vm9, %v1130_v40, 0.0  ;;  %v1133_v55 = vld [vmem:[%s6355_s12 + $0x1f60] sm:$0xff] }
 0x7d3   : > { %v5230_v57 = vmul.f32 %v4206_v49, %v4206_v49  ;;  %v2171_v49 = vadd.s32 8136, %v6360_v2  ;;  %vm3197_vm8 = vcmp.lt.s32.totalorder %v2170_v44, %v6363_v4 }
 0x7d4   : > { %v6241_v1 = vadd.f32 %v6240_v60, %v5217_v54  ;;  %v4207_v54 = vsel %vm3183_vm10, %v1131_v45, 0.0  ;;  %v1134_v60 = vld [vmem:[%s6355_s12 + $0x1f68] sm:$0xff] }
 0x7d5   : > { %v5231_v62 = vmul.f32 %v4207_v54, %v4207_v54  ;;  %v2172_v54 = vadd.s32 8144, %v6360_v2  ;;  %vm3198_vm9 = vcmp.lt.s32.totalorder %v2171_v49, %v6363_v4 }
 0x7d6   : > { %v6242_v8 = vadd.f32 %v6241_v1, %v5218_v59  ;;  %v4208_v59 = vsel %vm3184_vm11, %v1132_v50, 0.0  ;;  %v1135_v1 = vld [vmem:[%s6355_s12 + $0x1f70] sm:$0xff] }
 0x7d7   : > { %v5232_v5 = vmul.f32 %v4208_v59, %v4208_v59  ;;  %v2173_v59 = vadd.s32 8152, %v6360_v2  ;;  %vm3199_vm10 = vcmp.lt.s32.totalorder %v2172_v54, %v6363_v4 }
 0x7d8   : > { %v6243_v13 = vadd.f32 %v6242_v8, %v5219_v0  ;;  %v4209_v0 = vsel %vm3185_vm12, %v1133_v55, 0.0  ;;  %v1136_v8 = vld [vmem:[%s6355_s12 + $0x1f78] sm:$0xff] }
 0x7d9   : > { %v5233_v10 = vmul.f32 %v4209_v0, %v4209_v0  ;;  %v2174_v0 = vadd.s32 8160, %v6360_v2  ;;  %vm3200_vm11 = vcmp.lt.s32.totalorder %v2173_v59, %v6363_v4 }
 0x7da   : > { %v6244_v18 = vadd.f32 %v6243_v13, %v5220_v7  ;;  %v4210_v7 = vsel %vm3186_vm13, %v1134_v60, 0.0  ;;  %v1137_v13 = vld [vmem:[%s6355_s12 + $0x1f80] sm:$0xff] }
 0x7db   : > { %v5234_v15 = vmul.f32 %v4210_v7, %v4210_v7  ;;  %v2175_v7 = vadd.s32 8168, %v6360_v2  ;;  %vm3201_vm12 = vcmp.lt.s32.totalorder %v2174_v0, %v6363_v4 }
 0x7dc   : > { %v6245_v23 = vadd.f32 %v6244_v18, %v5221_v12  ;;  %v4211_v12 = vsel %vm3187_vm14, %v1135_v1, 0.0  ;;  %v1138_v18 = vld [vmem:[%s6355_s12 + $0x1f88] sm:$0xff] }
 0x7dd   : > { %v5235_v20 = vmul.f32 %v4211_v12, %v4211_v12  ;;  %v2176_v12 = vadd.s32 8176, %v6360_v2  ;;  %vm3202_vm13 = vcmp.lt.s32.totalorder %v2175_v7, %v6363_v4 }
 0x7de   : > { %v6246_v28 = vadd.f32 %v6245_v23, %v5222_v17  ;;  %v4212_v17 = vsel %vm3188_vm15, %v1136_v8, 0.0  ;;  %v1139_v23 = vld [vmem:[%s6355_s12 + $0x1f90] sm:$0xff] }
 0x7df   : > { %v5236_v25 = vmul.f32 %v4212_v17, %v4212_v17  ;;  %v2177_v17 = vadd.s32 8184, %v6360_v2  ;;  %vm3203_vm14 = vcmp.lt.s32.totalorder %v2176_v12, %v6363_v4 }
 0x7e0   : > { %v6247_v33 = vadd.f32 %v6246_v28, %v5223_v22  ;;  %v4213_v22 = vsel %vm3189_vm0, %v1137_v13, 0.0  ;;  %v1140_v28 = vld [vmem:[%s6355_s12 + $0x1f98] sm:$0xff] }
 0x7e1   : > { %v5237_v30 = vmul.f32 %v4213_v22, %v4213_v22  ;;  %vm3204_vm15 = vcmp.lt.s32.totalorder %v2177_v17, %v6363_v4 }
 0x7e2   : > { %v6248_v38 = vadd.f32 %v6247_v33, %v5224_v27  ;;  %v4214_v27 = vsel %vm3190_vm1, %v1138_v18, 0.0  ;;  %v1141_v33 = vld [vmem:[%s6355_s12 + $0x1fa0] sm:$0xff] }
 0x7e3   : > { %v5238_v35 = vmul.f32 %v4214_v27, %v4214_v27 }
 0x7e4   : > { %v6249_v43 = vadd.f32 %v6248_v38, %v5225_v32  ;;  %v4215_v32 = vsel %vm3191_vm2, %v1139_v23, 0.0  ;;  %v1142_v38 = vld [vmem:[%s6355_s12 + $0x1fa8] sm:$0xff] }
 0x7e5   : > { %v5239_v40 = vmul.f32 %v4215_v32, %v4215_v32 }
 0x7e6   : > { %v6250_v48 = vadd.f32 %v6249_v43, %v5226_v37  ;;  %v4216_v37 = vsel %vm3192_vm3, %v1140_v28, 0.0  ;;  %v1143_v43 = vld [vmem:[%s6355_s12 + $0x1fb0] sm:$0xff] }
 0x7e7   : > { %v5240_v45 = vmul.f32 %v4216_v37, %v4216_v37 }
 0x7e8   : > { %v6251_v53 = vadd.f32 %v6250_v48, %v5227_v42  ;;  %v4217_v42 = vsel %vm3193_vm4, %v1141_v33, 0.0  ;;  %v1144_v48 = vld [vmem:[%s6355_s12 + $0x1fb8] sm:$0xff] }
 0x7e9   : > { %v5241_v50 = vmul.f32 %v4217_v42, %v4217_v42 }
 0x7ea   : > { %v6252_v58 = vadd.f32 %v6251_v53, %v5228_v47  ;;  %v4218_v47 = vsel %vm3194_vm5, %v1142_v38, 0.0  ;;  %v1145_v53 = vld [vmem:[%s6355_s12 + $0x1fc0] sm:$0xff] }
 0x7eb   : > { %v5242_v55 = vmul.f32 %v4218_v47, %v4218_v47 }
 0x7ec   : > { %v6253_v63 = vadd.f32 %v6252_v58, %v5229_v52  ;;  %v4219_v52 = vsel %vm3195_vm6, %v1143_v43, 0.0  ;;  %v1146_v58 = vld [vmem:[%s6355_s12 + $0x1fc8] sm:$0xff] }
 0x7ed   : > { %v5243_v60 = vmul.f32 %v4219_v52, %v4219_v52 }
 0x7ee   : > { %v6254_v6 = vadd.f32 %v6253_v63, %v5230_v57  ;;  %v4220_v57 = vsel %vm3196_vm7, %v1144_v48, 0.0  ;;  %v1147_v63 = vld [vmem:[%s6355_s12 + $0x1fd0] sm:$0xff] }
 0x7ef   : > { %v5244_v1 = vmul.f32 %v4220_v57, %v4220_v57 }
 0x7f0   : > { %v6255_v11 = vadd.f32 %v6254_v6, %v5231_v62  ;;  %v4221_v62 = vsel %vm3197_vm8, %v1145_v53, 0.0  ;;  %v1148_v6 = vld [vmem:[%s6355_s12 + $0x1fd8] sm:$0xff] }
 0x7f1   : > { %v5245_v8 = vmul.f32 %v4221_v62, %v4221_v62 }
 0x7f2   : > { %v6256_v16 = vadd.f32 %v6255_v11, %v5232_v5  ;;  %v4222_v5 = vsel %vm3198_vm9, %v1146_v58, 0.0  ;;  %v1149_v11 = vld [vmem:[%s6355_s12 + $0x1fe0] sm:$0xff] }
 0x7f3   : > { %v5246_v13 = vmul.f32 %v4222_v5, %v4222_v5 }
 0x7f4   : > { %v6257_v21 = vadd.f32 %v6256_v16, %v5233_v10  ;;  %v4223_v10 = vsel %vm3199_vm10, %v1147_v63, 0.0  ;;  %v1150_v16 = vld [vmem:[%s6355_s12 + $0x1fe8] sm:$0xff] }
 0x7f5   : > { %v5247_v18 = vmul.f32 %v4223_v10, %v4223_v10  ;;  %v4226_v24 = vsel %vm3202_vm13, %v1150_v16, 0.0 }
 0x7f6   : > { %v6258_v26 = vadd.f32 %v6257_v21, %v5234_v15  ;;  %v4224_v15 = vsel %vm3200_vm11, %v1148_v6, 0.0  ;;  %v1151_v21 = vld [vmem:[%s6355_s12 + $0x1ff0] sm:$0xff]  ;;  %v5250_v29 = vmul.f32 %v4226_v24, %v4226_v24 }
 0x7f7   : > { %v5248_v22 = vmul.f32 %v4224_v15, %v4224_v15  ;;  %v4227_v28 = vsel %vm3203_vm14, %v1151_v21, 0.0 }
 0x7f8   : > { %v6259_v31 = vadd.f32 %v6258_v26, %v5235_v20  ;;  %v4225_v20 = vsel %vm3201_vm12, %v1149_v11, 0.0 }
 0x7f9   : > { %v5249_v26 = vmul.f32 %v4225_v20, %v4225_v20 }
 0x7fa   : > { %v6260_v36 = vadd.f32 %v6259_v31, %v5236_v25  ;;  %v1152_v25 = vld [vmem:[%s6355_s12 + $0x1ff8] sm:$0xff]  ;;  %v5251_v31 = vmul.f32 %v4227_v28, %v4227_v28 }
 0x7fb   : > { %v4228_v2 = vsel %vm3204_vm15, %v1152_v25, 0.0 }
 0x7fc   : > { %v6261_v41 = vadd.f32 %v6260_v36, %v5237_v30  ;;  %v5252_v33 = vmul.f32 %v4228_v2, %v4228_v2  ;;  %v5253_v36 = vld [vmem:[%s9446_s1] sm:$0xff] }
 0x7fe   : > { %v6262_v46 = vadd.f32 %v6261_v41, %v5238_v35 }
 0x800   : > { %v6263_v51 = vadd.f32 %v6262_v46, %v5239_v40 }
 0x802   : > { %v6264_v56 = vadd.f32 %v6263_v51, %v5240_v45 }
 0x804   : > { %v6265_v61 = vadd.f32 %v6264_v56, %v5241_v50 }
 0x806   : > { %v6266_v3 = vadd.f32 %v6265_v61, %v5242_v55 }
 0x808   : > { %v6267_v9 = vadd.f32 %v6266_v3, %v5243_v60 }
 0x80a   : > { %v6268_v14 = vadd.f32 %v6267_v9, %v5244_v1 }
 0x80c   : > { %v6269_v19 = vadd.f32 %v6268_v14, %v5245_v8 }
 0x80e   : > { %v6270_v23 = vadd.f32 %v6269_v19, %v5246_v13 }
 0x810   : > { %v6271_v27 = vadd.f32 %v6270_v23, %v5247_v18 }
 0x812   : > { %v6272_v30 = vadd.f32 %v6271_v27, %v5248_v22 }
 0x814   : > { %v6273_v32 = vadd.f32 %v6272_v30, %v5249_v26 }
 0x816   : > { %v6274_v34 = vadd.f32 %v6273_v32, %v5250_v29 }
 0x818   : > { %v6275_v35 = vadd.f32 %v6274_v34, %v5251_v31 }
 0x81a   : > { %v6276_v37 = vadd.f32 %v6275_v35, %v5252_v33 }
 0x81c   : > { %v6277_v38 = vadd.f32 %v6276_v37, %v5253_v36 }
 0x81e   : > { %6278 = vst [vmem:[%s9446_s1] sm:$0xff] %v6277_v38 }
 0x81f PF: > { %s11_s6 = sadd.s32 1, %s6331_s6  }
 0x820   : > { %p8_p6 = scmp.ge.s32.totalorder %s11_s6, 4  }
 0x822   :  { %10 = sbr.rel (!%p8_p6) target bundleno = 1 (0x1), region = 54 }

</bundles_post_ra>
